<compile_context>
chip_gen: v7x
topology: tpu7x:2x2x1
jax: 0.10.0
libtpu: 0.0.40
codegen_flags: <defaults>
</compile_context>

<pallas_src>
import numpy as np

import jax
import jax.numpy as jnp
from jax import lax
from jax.experimental import pallas as pl
from jax.experimental.pallas import tpu as pltpu

N_QUBITS = 4
DIM = 1 << N_QUBITS          # 16
SQRT_HALF = float(1.0 / np.sqrt(2.0))


# ----------------------------------------------------------------------------
# Host-side (numpy) quantum-circuit constants -- pure parameter setup glue.
# ----------------------------------------------------------------------------
def _bit(i, w):
    return (i >> (N_QUBITS - 1 - w)) & 1


def _op_on_wire(g2, w):
    mats = [np.eye(2, dtype=np.complex128) for _ in range(N_QUBITS)]
    mats[w] = np.asarray(g2, dtype=np.complex128)
    U = mats[0]
    for m in mats[1:]:
        U = np.kron(U, m)
    return U


def _cnot(c, t):
    U = np.zeros((DIM, DIM), dtype=np.complex128)
    for i in range(DIM):
        j = i ^ (1 << (N_QUBITS - 1 - t)) if _bit(i, c) else i
        U[j, i] = 1.0
    return U


def _rx(th):
    c, s = np.cos(th / 2.0), np.sin(th / 2.0)
    return np.array([[c, -1j * s], [-1j * s, c]])


def _ry(th):
    c, s = np.cos(th / 2.0), np.sin(th / 2.0)
    return np.array([[c, -s], [s, c]])


def _rz(th):
    return np.array([[np.exp(-1j * th / 2.0), 0.0], [0.0, np.exp(1j * th / 2.0)]])


_HAD = np.array([[1.0, 1.0], [1.0, -1.0]]) * SQRT_HALF


def _cnot_block():
    # ansatz CNOT pattern: for i in (1,2): for j: CNOT(j, (j+i) % n)
    U = np.eye(DIM, dtype=np.complex128)
    for i in (1, 2):
        for j in range(N_QUBITS):
            U = _cnot(j, (j + i) % N_QUBITS) @ U
    return U


_CCOMB = _cnot_block()


def ansatz_unitary(weights):
    """weights: (n_qlayers, 3, n_qubits) -> 16x16 complex unitary of the full ansatz."""
    weights = np.asarray(weights, np.float64)
    A = np.eye(DIM, dtype=np.complex128)
    for l in range(weights.shape[0]):
        A = _CCOMB @ A
        for w in range(N_QUBITS):
            A = _op_on_wire(_rx(weights[l, 0, w]), w) @ A
            A = _op_on_wire(_ry(weights[l, 1, w]), w) @ A
            A = _op_on_wire(_rz(weights[l, 2, w]), w) @ A
    return A


def circuit_constants():
    mask0 = np.zeros((N_QUBITS, DIM), np.float32)   # 1.0 where bit_w(i) == 0
    zsign = np.zeros((DIM, N_QUBITS), np.float32)   # PauliZ eigenvalue per basis state
    for w in range(N_QUBITS):
        for i in range(DIM):
            b = _bit(i, w)
            mask0[w, i] = 1.0 - b
            zsign[i, w] = 1.0 - 2.0 * b
    return mask0, zsign


def prepare_params(w_in, b_in, w_out, b_out, vqc_weights):
    """Fold every data-independent piece into dense matrices (host side).

    w_in:  (4, C)  torch Linear weight (concat order [h, x])
    w_out: (H, 4)  torch Linear weight
    vqc_weights: (4, L, 3, 4) per-gate ansatz params (forget, input, update, output)
    """
    w_in = np.asarray(w_in, np.float64)
    b_in = np.asarray(b_in, np.float64)
    w_out = np.asarray(w_out, np.float64)
    b_out = np.asarray(b_out, np.float64)
    vqc = np.asarray(vqc_weights, np.float64)
    H = w_out.shape[0]

    winh = w_in.T[:H, :]                       # (H, 4)
    winx = w_in.T[H:, :]                       # (F, 4)
    b_in2 = b_in.reshape(1, N_QUBITS)          # (1, 4)

    mask0, zsign = circuit_constants()

    # Per-gate ansatz unitaries, transposed for the row-vector convention
    # (psi_row @ A^T == (A @ psi)^T), concatenated lane-wise across the 4 gates.
    a_T = [ansatz_unitary(vqc[g]).T for g in range(4)]
    are = np.concatenate([A.real for A in a_T], axis=1)     # (16, 64)
    aim = np.concatenate([A.imag for A in a_T], axis=1)     # (16, 64)
    wr = np.concatenate([are, aim], axis=1)                 # (16, 128)
    wi = np.concatenate([-aim, are], axis=1)                # (16, 128)
    # Merged single-dot form: [re | im] (B,32) @ [[wr],[wi]] (32,128) = [GRE|GIM]
    wm = np.concatenate([wr, wi], axis=0)                   # (32, 128)

    # PauliZ expvals + clayer_out folded: prob_g @ (zsign @ w_out^T) + b_out,
    # block-diagonalized over the 4 LSTM gates -> one (64, 4H) matmul.
    # (4H == 128 here; if H grows, pad 4H to a multiple of 128 host-side.)
    M = zsign.astype(np.float64) @ w_out.T                  # (16, H)
    mbd = np.zeros((4 * DIM, 4 * H))
    for g in range(4):
        mbd[g * DIM:(g + 1) * DIM, g * H:(g + 1) * H] = M
    bvec = np.tile(b_out.reshape(1, H), (1, 4))             # (1, 4H)

    to32 = lambda a: jnp.asarray(a, jnp.float32)
    to16 = lambda a: jnp.asarray(a, jnp.bfloat16)            # MXU-only operands
    return (to32(winh), to32(winx), to32(b_in2), to16(wm),
            to16(mbd), to32(bvec), to32(mask0))


# ----------------------------------------------------------------------------
# Pallas kernel
# ----------------------------------------------------------------------------
def _dot(a, b):
    # lane-dense bf16 MXU dots, f32 accumulation (DEFAULT precision)
    return jnp.dot(a, b, preferred_element_type=jnp.float32)


def _dot_hi(a, b):
    # exact f32 dot (recurrent path / one-shot setup); negligible total cost
    return jnp.dot(a, b, preferred_element_type=jnp.float32,
                   precision=lax.Precision.HIGHEST)


def _sigmoid(z):
    # EUP tanh instead of VPU divide chain; exact identity
    return 0.5 * (jnp.tanh(0.5 * z) + 1.0)


def qlstm_kernel(x2d_ref, winh_ref, winx_ref, bin_ref, wm_ref,
                 mbd_ref, bvec_ref, mask0_ref,
                 hseq_ref, h_out_ref, c_out_ref):
    B, H = h_out_ref.shape
    T = hseq_ref.shape[1] // H

    # ---- hoist all constant loads / broadcasts out of the time loop ----
    winh = winh_ref[...]                   # (H, 4)  f32
    b_in = bin_ref[...]                    # (1, 4)  f32
    wm = wm_ref[...]                       # (32, 128) bf16  (merged ansatz)
    mbd = mbd_ref[...]                     # (64, 4H) bf16   (PauliZ + clayer_out)
    bvec_b = jnp.broadcast_to(bvec_ref[...], (B, 4 * H))     # (B, 4H) f32
    mask0 = mask0_ref[...]                 # (4, 16) f32
    mask1 = 1.0 - mask0
    m0 = [jnp.broadcast_to(mask0[w:w + 1, :], (B, DIM)) for w in range(N_QUBITS)]
    m1 = [jnp.broadcast_to(mask1[w:w + 1, :], (B, DIM)) for w in range(N_QUBITS)]

    # ---- hoisted input projection (x-half of clayer_in), one dot total ----
    # x2d is (T*B, F), time-major; xw rows t*B:(t+1)*B are time step t.
    xw = _dot_hi(x2d_ref[...], winx_ref[...]) + b_in          # (T*B, 4)

    h_t = jnp.zeros((B, H), jnp.float32)
    c_t = jnp.zeros((B, H), jnp.float32)
    h_steps = []

    # Full static unroll of the recurrence (T is small & static).
    for t in range(T):
        # clayer_in: only the recurrent half stays on the per-step path.
        # HIGHEST kept here (tiny (B,H)@(H,4) dot) to protect the 8-step
        # error accumulation; the x-half + bias are precomputed in xw.
        y = _dot_hi(h_t, winh) + xw[t * B:(t + 1) * B, :]      # (B, 4)

        # per-qubit state after AngleEmbedding RX(y): v = [cos(y/2), -i sin(y/2)]
        cv = jnp.cos(0.5 * y)                                  # (B, 4)
        sv = jnp.sin(0.5 * y)

        # first-sample quirk: a_w = arctan(y[0, w]); half-angle cos/sin via
        # the rsqrt identity, vectorized over the 4 wires
        u = y[0:1, :]                                          # (1, 4)
        rinv = lax.rsqrt(1.0 + u * u)                          # cos(a)
        ch = jnp.sqrt(0.5 * (1.0 + rinv))                      # cos(a/2)
        sh = jnp.where(u >= 0.0, 1.0, -1.0) * jnp.sqrt(
            jnp.maximum(0.5 * (1.0 - rinv), 0.0))              # sin(a/2)

        # fused per-wire gate G = RZ(a) @ RY(a) @ H applied to v:
        #   G00 = (ch - i sh) P,  G01 = (ch - i sh) Q,
        #   G10 = (ch + i sh) Q,  G11 = -(ch + i sh) P,   P,Q = (ch -/+ sh)/sqrt2
        P = (ch - sh) * SQRT_HALF                              # (1, 4)
        Q = (ch + sh) * SQRT_HALF
        u0re = (ch * P) * cv - (sh * Q) * sv                   # (B, 4)
        u0im = -(sh * P) * cv - (ch * Q) * sv
        u1re = (ch * Q) * cv - (sh * P) * sv
        u1im = (sh * Q) * cv + (ch * P) * sv

        # product state psi[b,i] = prod_w u_{w, bit_w(i)}[b]; balanced tree
        # (depth-2 complex multiplies instead of a length-3 chain)
        fre = [u0re[:, w:w + 1] * m0[w] + u1re[:, w:w + 1] * m1[w]
               for w in range(N_QUBITS)]
        fim = [u0im[:, w:w + 1] * m0[w] + u1im[:, w:w + 1] * m1[w]
               for w in range(N_QUBITS)]
        p01re = fre[0] * fre[1] - fim[0] * fim[1]
        p01im = fre[0] * fim[1] + fim[0] * fre[1]
        p23re = fre[2] * fre[3] - fim[2] * fim[3]
        p23im = fre[2] * fim[3] + fim[2] * fre[3]
        re = p01re * p23re - p01im * p23im                     # (B, 16)
        im = p01re * p23im + p01im * p23re

        # all 4 gate ansatz unitaries in ONE lane-dense MXU pass:
        # (B,32) bf16 @ (32,128) bf16 -> [GRE | GIM] (B,128) f32
        reim = jnp.concatenate([re, im], axis=1).astype(jnp.bfloat16)
        gg = _dot(reim, wm)
        gre = gg[:, :4 * DIM]
        gim = gg[:, 4 * DIM:]
        prob = gre * gre + gim * gim                           # (B, 64) f32

        # PauliZ expvals + clayer_out for all gates at once (128-lane output)
        z = _dot(prob.astype(jnp.bfloat16), mbd) + bvec_b      # (B, 4H)

        f_t = _sigmoid(z[:, 0:H])
        i_t = _sigmoid(z[:, H:2 * H])
        g_t = jnp.tanh(z[:, 2 * H:3 * H])
        o_t = _sigmoid(z[:, 3 * H:4 * H])

        c_t = f_t * c_t + i_t * g_t
        h_t = o_t * jnp.tanh(c_t)
        h_steps.append(h_t)                                    # buffer in regs

    # single lane-dense (B, T*H) store (unmasked); wrapper reshapes to (B,T,H)
    hseq_ref[...] = jnp.concatenate(h_steps, axis=1)
    h_out_ref[...] = h_t                                       # written once
    c_out_ref[...] = c_t


@jax.jit
def qlstm_pallas(x, winh, winx, b_in, wm, mbd, bvec, mask0):
    B, T, F = x.shape
    H = winh.shape[0]

    # layout plumbing only: time-major (T*B, F) slab so the x-projection is
    # one dot before the recurrence and per-step rows are contiguous.
    x2d = jnp.transpose(x.astype(jnp.float32), (1, 0, 2)).reshape(T * B, F)

    def full(shape):
        return pl.BlockSpec(shape, lambda i: (0,) * len(shape))

    out_shape = (
        jax.ShapeDtypeStruct((B, T * H), jnp.float32),     # hidden_seq (lane-dense)
        jax.ShapeDtypeStruct((B, H), jnp.float32),         # h_T
        jax.ShapeDtypeStruct((B, H), jnp.float32),         # c_T
    )
    hseq2d, h_last, c_last = pl.pallas_call(
        qlstm_kernel,
        out_shape=out_shape,
        grid=(1,),                                         # single invocation
        in_specs=[
            full((T * B, F)),
            full((H, N_QUBITS)),
            full((F, N_QUBITS)),
            full((1, N_QUBITS)),
            full((2 * DIM, 8 * DIM)),
            full((4 * DIM, 4 * H)),
            full((1, 4 * H)),
            full((N_QUBITS, DIM)),
        ],
        out_specs=(full((B, T * H)), full((B, H)), full((B, H))),
        compiler_params=pltpu.CompilerParams(
            dimension_semantics=("arbitrary",)),
    )(x2d, winh, winx, b_in, wm, mbd, bvec, mask0)
    hseq = hseq2d.reshape(B, T, H)                         # batch-first output
    return hseq, (h_last, c_last)


# ----------------------------------------------------------------------------
# Pure numpy reference (mirrors the PyTorch/PennyLane forward, float64)
# ----------------------------------------------------------------------------
def qlstm_reference(x, w_in, b_in, w_out, b_out, vqc_weights):
    x = np.asarray(x, np.float64)
    B, T, _ = x.shape
    H = w_out.shape[0]
    w_in = np.asarray(w_in, np.float64)
    b_in = np.asarray(b_in, np.float64)
    w_out = np.asarray(w_out, np.float64)
    b_out = np.asarray(b_out, np.float64)
    a_mats = [ansatz_unitary(np.asarray(vqc_weights[g], np.float64)) for g in range(4)]
    _, zsign = circuit_constants()
    zsign = zsign.astype(np.float64)

    def vqc(y, A):
        a = np.arctan(y[0])                     # angles from the FIRST sample
        out = np.zeros((B, N_QUBITS))
        for b in range(B):
            psi = np.zeros(DIM, complex)
            psi[0] = 1.0
            for w in range(N_QUBITS):
                psi = _op_on_wire(_rx(y[b, w]), w) @ psi
            for w in range(N_QUBITS):
                psi = _op_on_wire(_HAD, w) @ psi
                psi = _op_on_wire(_ry(a[w]), w) @ psi
                psi = _op_on_wire(_rz(a[w]), w) @ psi
            psi = A @ psi
            out[b] = (np.abs(psi) ** 2) @ zsign
        return out

    def sig(v):
        return 1.0 / (1.0 + np.exp(-v))

    h = np.zeros((B, H))
    c = np.zeros((B, H))
    hseq = []
    for t in range(T):
        x_t = x[:, t, :]
        v = np.concatenate([h, x_t], axis=1)
        y = v @ w_in.T + b_in
        z = [vqc(y, a_mats[g]) @ w_out.T + b_out for g in range(4)]
        f, i, g, o = sig(z[0]), sig(z[1]), np.tanh(z[2]), sig(z[3])
        c = f * c + i * g
        h = o * np.tanh(c)
        hseq.append(h.copy())
    return np.stack(hseq, axis=1), h, c


# ----------------------------------------------------------------------------
if __name__ == "__main__":
    B, T, F, H, L = 2, 8, 4, 32, 1          # batch, seq, features, hidden, n_qlayers
    C = H + F                               # concat_size (order: [h, x])

    key = jax.random.PRNGKey(0)
    ks = jax.random.split(key, 6)
    x = jax.random.normal(ks[0], (B, T, F), jnp.float32)
    w_in = jax.random.normal(ks[1], (N_QUBITS, C), jnp.float32) * 0.3    # torch Linear (out,in)
    b_in = jax.random.normal(ks[2], (N_QUBITS,), jnp.float32) * 0.1
    w_out = jax.random.normal(ks[3], (H, N_QUBITS), jnp.float32) * 0.3
    b_out = jax.random.normal(ks[4], (H,), jnp.float32) * 0.1
    vqc_w = jax.random.uniform(ks[5], (4, L, 3, N_QUBITS), jnp.float32,
                               minval=0.0, maxval=2.0 * np.pi)

    params = prepare_params(np.asarray(w_in), np.asarray(b_in),
                            np.asarray(w_out), np.asarray(b_out),
                            np.asarray(vqc_w))

    hseq, (h_last, c_last) = qlstm_pallas(x, *params)
    jax.block_until_ready((hseq, h_last, c_last))

    ref_hseq, ref_h, ref_c = qlstm_reference(
        np.asarray(x), np.asarray(w_in), np.asarray(b_in), np.asarray(w_out),
        np.asarray(b_out), np.asarray(vqc_w))

    np.testing.assert_allclose(np.asarray(hseq), ref_hseq, rtol=2e-2, atol=2e-2)
    np.testing.assert_allclose(np.asarray(h_last), ref_h, rtol=2e-2, atol=2e-2)
    np.testing.assert_allclose(np.asarray(c_last), ref_c, rtol=2e-2, atol=2e-2)

    print("KERNEL_OK")
</pallas_src>

<mosaic_0001>
module attributes {stable_mosaic.version = 11 : i64} {
  func.func @qlstm_kernel(%arg0: i32, %arg1: memref<16x4xf32, #tpu.memory_space<vmem>>, %arg2: memref<32x4xf32, #tpu.memory_space<vmem>>, %arg3: memref<4x4xf32, #tpu.memory_space<vmem>>, %arg4: memref<1x4xf32, #tpu.memory_space<vmem>>, %arg5: memref<32x128xbf16, #tpu.memory_space<vmem>>, %arg6: memref<64x128xbf16, #tpu.memory_space<vmem>>, %arg7: memref<1x128xf32, #tpu.memory_space<vmem>>, %arg8: memref<4x16xf32, #tpu.memory_space<vmem>>, %arg9: memref<2x256xf32, #tpu.memory_space<vmem>>, %arg10: memref<2x32xf32, #tpu.memory_space<vmem>>, %arg11: memref<2x32xf32, #tpu.memory_space<vmem>>) attributes {dimension_semantics = [#tpu.dimension_semantics<arbitrary>], iteration_bounds = array<i64: 1>, scalar_prefetch = 0 : i64, scratch_operands = 0 : i64, tpu.core_type = #tpu.core_type<tc>, window_params = [{pipeline_mode = #tpu.pipeline_mode<synchronous>, transform_indices = @transform_0, window_bounds = array<i64: 16, 4>}, {pipeline_mode = #tpu.pipeline_mode<synchronous>, transform_indices = @transform_1, window_bounds = array<i64: 32, 4>}, {pipeline_mode = #tpu.pipeline_mode<synchronous>, transform_indices = @transform_2, window_bounds = array<i64: 4, 4>}, {pipeline_mode = #tpu.pipeline_mode<synchronous>, transform_indices = @transform_3, window_bounds = array<i64: 1, 4>}, {pipeline_mode = #tpu.pipeline_mode<synchronous>, transform_indices = @transform_4, window_bounds = array<i64: 32, 128>}, {pipeline_mode = #tpu.pipeline_mode<synchronous>, transform_indices = @transform_5, window_bounds = array<i64: 64, 128>}, {pipeline_mode = #tpu.pipeline_mode<synchronous>, transform_indices = @transform_6, window_bounds = array<i64: 1, 128>}, {pipeline_mode = #tpu.pipeline_mode<synchronous>, transform_indices = @transform_7, window_bounds = array<i64: 4, 16>}, {pipeline_mode = #tpu.pipeline_mode<synchronous>, transform_indices = @transform_8, window_bounds = array<i64: 2, 256>}, {pipeline_mode = #tpu.pipeline_mode<synchronous>, transform_indices = @transform_9, window_bounds = array<i64: 2, 32>}, {pipeline_mode = #tpu.pipeline_mode<synchronous>, transform_indices = @transform_10, window_bounds = array<i64: 2, 32>}]} {
    %c0 = arith.constant 0 : index
    %c0_0 = arith.constant 0 : index
    %0 = vector.load %arg2[%c0, %c0_0] : memref<32x4xf32, #tpu.memory_space<vmem>>, vector<32x4xf32>
    %c0_1 = arith.constant 0 : index
    %c0_2 = arith.constant 0 : index
    %1 = vector.load %arg4[%c0_1, %c0_2] : memref<1x4xf32, #tpu.memory_space<vmem>>, vector<1x4xf32>
    %c0_3 = arith.constant 0 : index
    %c0_4 = arith.constant 0 : index
    %2 = vector.load %arg5[%c0_3, %c0_4] : memref<32x128xbf16, #tpu.memory_space<vmem>>, vector<32x128xbf16>
    %c0_5 = arith.constant 0 : index
    %c0_6 = arith.constant 0 : index
    %3 = vector.load %arg6[%c0_5, %c0_6] : memref<64x128xbf16, #tpu.memory_space<vmem>>, vector<64x128xbf16>
    %c0_7 = arith.constant 0 : index
    %c0_8 = arith.constant 0 : index
    %4 = vector.load %arg7[%c0_7, %c0_8] : memref<1x128xf32, #tpu.memory_space<vmem>>, vector<1x128xf32>
    %5 = vector.shape_cast %4 : vector<1x128xf32> to vector<1x128xf32>
    %6 = vector.broadcast %5 : vector<1x128xf32> to vector<2x128xf32>
    %c0_9 = arith.constant 0 : index
    %c0_10 = arith.constant 0 : index
    %7 = vector.load %arg8[%c0_9, %c0_10] : memref<4x16xf32, #tpu.memory_space<vmem>>, vector<4x16xf32>
    %cst = arith.constant 1.000000e+00 : f32
    %8 = vector.broadcast %cst : f32 to vector<4x16xf32>
    %9 = arith.subf %8, %7 : vector<4x16xf32>
    %10 = vector.extract_strided_slice %7 {offsets = [0, 0], sizes = [1, 16], strides = [1, 1]} : vector<4x16xf32> to vector<1x16xf32>
    %11 = vector.shape_cast %10 : vector<1x16xf32> to vector<1x16xf32>
    %12 = vector.broadcast %11 : vector<1x16xf32> to vector<2x16xf32>
    %13 = vector.extract_strided_slice %7 {offsets = [1, 0], sizes = [1, 16], strides = [1, 1]} : vector<4x16xf32> to vector<1x16xf32>
    %14 = vector.shape_cast %13 : vector<1x16xf32> to vector<1x16xf32>
    %15 = vector.broadcast %14 : vector<1x16xf32> to vector<2x16xf32>
    %16 = vector.extract_strided_slice %7 {offsets = [2, 0], sizes = [1, 16], strides = [1, 1]} : vector<4x16xf32> to vector<1x16xf32>
    %17 = vector.shape_cast %16 : vector<1x16xf32> to vector<1x16xf32>
    %18 = vector.broadcast %17 : vector<1x16xf32> to vector<2x16xf32>
    %19 = vector.extract_strided_slice %7 {offsets = [3, 0], sizes = [1, 16], strides = [1, 1]} : vector<4x16xf32> to vector<1x16xf32>
    %20 = vector.shape_cast %19 : vector<1x16xf32> to vector<1x16xf32>
    %21 = vector.broadcast %20 : vector<1x16xf32> to vector<2x16xf32>
    %22 = vector.extract_strided_slice %9 {offsets = [0, 0], sizes = [1, 16], strides = [1, 1]} : vector<4x16xf32> to vector<1x16xf32>
    %23 = vector.shape_cast %22 : vector<1x16xf32> to vector<1x16xf32>
    %24 = vector.broadcast %23 : vector<1x16xf32> to vector<2x16xf32>
    %25 = vector.extract_strided_slice %9 {offsets = [1, 0], sizes = [1, 16], strides = [1, 1]} : vector<4x16xf32> to vector<1x16xf32>
    %26 = vector.shape_cast %25 : vector<1x16xf32> to vector<1x16xf32>
    %27 = vector.broadcast %26 : vector<1x16xf32> to vector<2x16xf32>
    %28 = vector.extract_strided_slice %9 {offsets = [2, 0], sizes = [1, 16], strides = [1, 1]} : vector<4x16xf32> to vector<1x16xf32>
    %29 = vector.shape_cast %28 : vector<1x16xf32> to vector<1x16xf32>
    %30 = vector.broadcast %29 : vector<1x16xf32> to vector<2x16xf32>
    %31 = vector.extract_strided_slice %9 {offsets = [3, 0], sizes = [1, 16], strides = [1, 1]} : vector<4x16xf32> to vector<1x16xf32>
    %32 = vector.shape_cast %31 : vector<1x16xf32> to vector<1x16xf32>
    %33 = vector.broadcast %32 : vector<1x16xf32> to vector<2x16xf32>
    %c0_11 = arith.constant 0 : index
    %c0_12 = arith.constant 0 : index
    %34 = vector.load %arg1[%c0_11, %c0_12] : memref<16x4xf32, #tpu.memory_space<vmem>>, vector<16x4xf32>
    %c0_13 = arith.constant 0 : index
    %c0_14 = arith.constant 0 : index
    %35 = vector.load %arg3[%c0_13, %c0_14] : memref<4x4xf32, #tpu.memory_space<vmem>>, vector<4x4xf32>
    %cst_15 = arith.constant dense<0.000000e+00> : vector<16x4xf32>
    %36 = tpu.matmul %34, %35, %cst_15 {dimension_numbers = #tpu.dot_dimension_numbers<[1], [0], [0], [1], [0, 0, 1, 1], [], []>, precision = #tpu.contract_precision<fp32>} : vector<16x4xf32>, vector<4x4xf32>, vector<16x4xf32> -> vector<16x4xf32>
    %37 = vector.broadcast %1 : vector<1x4xf32> to vector<16x4xf32>
    %38 = arith.addf %36, %37 : vector<16x4xf32>
    %cst_16 = arith.constant 0.000000e+00 : f32
    %39 = vector.broadcast %cst_16 : f32 to vector<2x32xf32>
    %cst_17 = arith.constant 0.000000e+00 : f32
    %40 = vector.broadcast %cst_17 : f32 to vector<2x32xf32>
    %cst_18 = arith.constant dense<0.000000e+00> : vector<2x4xf32>
    %41 = tpu.matmul %39, %0, %cst_18 {dimension_numbers = #tpu.dot_dimension_numbers<[1], [0], [0], [1], [0, 0, 1, 1], [], []>, precision = #tpu.contract_precision<fp32>} : vector<2x32xf32>, vector<32x4xf32>, vector<2x4xf32> -> vector<2x4xf32>
    %42 = vector.extract_strided_slice %38 {offsets = [0, 0], sizes = [2, 4], strides = [1, 1]} : vector<16x4xf32> to vector<2x4xf32>
    %43 = arith.addf %41, %42 : vector<2x4xf32>
    %cst_19 = arith.constant 5.000000e-01 : f32
    %44 = vector.broadcast %cst_19 : f32 to vector<2x4xf32>
    %45 = arith.mulf %44, %43 : vector<2x4xf32>
    %46 = math.cos %45 : vector<2x4xf32>
    %cst_20 = arith.constant 5.000000e-01 : f32
    %47 = vector.broadcast %cst_20 : f32 to vector<2x4xf32>
    %48 = arith.mulf %47, %43 : vector<2x4xf32>
    %49 = math.sin %48 : vector<2x4xf32>
    %50 = vector.extract_strided_slice %43 {offsets = [0, 0], sizes = [1, 4], strides = [1, 1]} : vector<2x4xf32> to vector<1x4xf32>
    %51 = arith.mulf %50, %50 : vector<1x4xf32>
    %cst_21 = arith.constant 1.000000e+00 : f32
    %52 = vector.broadcast %cst_21 : f32 to vector<1x4xf32>
    %53 = arith.addf %52, %51 : vector<1x4xf32>
    %54 = math.rsqrt %53 : vector<1x4xf32>
    %cst_22 = arith.constant 1.000000e+00 : f32
    %55 = vector.broadcast %cst_22 : f32 to vector<1x4xf32>
    %56 = arith.addf %55, %54 : vector<1x4xf32>
    %cst_23 = arith.constant 5.000000e-01 : f32
    %57 = vector.broadcast %cst_23 : f32 to vector<1x4xf32>
    %58 = arith.mulf %57, %56 : vector<1x4xf32>
    %59 = math.sqrt %58 : vector<1x4xf32>
    %cst_24 = arith.constant 0.000000e+00 : f32
    %60 = vector.broadcast %cst_24 : f32 to vector<1x4xf32>
    %61 = arith.cmpf oge, %50, %60 : vector<1x4xf32>
    %cst_25 = arith.constant 1.000000e+00 : f32
    %cst_26 = arith.constant -1.000000e+00 : f32
    %62 = vector.broadcast %cst_25 : f32 to vector<1x4xf32>
    %63 = vector.broadcast %cst_26 : f32 to vector<1x4xf32>
    %64 = arith.select %61, %62, %63 : vector<1x4xi1>, vector<1x4xf32>
    %cst_27 = arith.constant 1.000000e+00 : f32
    %65 = vector.broadcast %cst_27 : f32 to vector<1x4xf32>
    %66 = arith.subf %65, %54 : vector<1x4xf32>
    %cst_28 = arith.constant 5.000000e-01 : f32
    %67 = vector.broadcast %cst_28 : f32 to vector<1x4xf32>
    %68 = arith.mulf %67, %66 : vector<1x4xf32>
    %cst_29 = arith.constant 0.000000e+00 : f32
    %69 = vector.broadcast %cst_29 : f32 to vector<1x4xf32>
    %70 = arith.maximumf %68, %69 : vector<1x4xf32>
    %71 = math.sqrt %70 : vector<1x4xf32>
    %72 = arith.mulf %64, %71 : vector<1x4xf32>
    %73 = arith.subf %59, %72 : vector<1x4xf32>
    %cst_30 = arith.constant 0.707106769 : f32
    %74 = vector.broadcast %cst_30 : f32 to vector<1x4xf32>
    %75 = arith.mulf %73, %74 : vector<1x4xf32>
    %76 = arith.addf %59, %72 : vector<1x4xf32>
    %cst_31 = arith.constant 0.707106769 : f32
    %77 = vector.broadcast %cst_31 : f32 to vector<1x4xf32>
    %78 = arith.mulf %76, %77 : vector<1x4xf32>
    %79 = arith.mulf %59, %75 : vector<1x4xf32>
    %80 = vector.broadcast %79 : vector<1x4xf32> to vector<2x4xf32>
    %81 = arith.mulf %80, %46 : vector<2x4xf32>
    %82 = arith.mulf %72, %78 : vector<1x4xf32>
    %83 = vector.broadcast %82 : vector<1x4xf32> to vector<2x4xf32>
    %84 = arith.mulf %83, %49 : vector<2x4xf32>
    %85 = arith.subf %81, %84 : vector<2x4xf32>
    %86 = arith.mulf %72, %75 : vector<1x4xf32>
    %cst_32 = arith.constant 0.000000e+00 : f32
    %87 = vector.broadcast %cst_32 : f32 to vector<1x4xf32>
    %88 = arith.subf %87, %86 : vector<1x4xf32>
    %89 = vector.broadcast %88 : vector<1x4xf32> to vector<2x4xf32>
    %90 = arith.mulf %89, %46 : vector<2x4xf32>
    %91 = arith.mulf %59, %78 : vector<1x4xf32>
    %92 = vector.broadcast %91 : vector<1x4xf32> to vector<2x4xf32>
    %93 = arith.mulf %92, %49 : vector<2x4xf32>
    %94 = arith.subf %90, %93 : vector<2x4xf32>
    %95 = arith.mulf %59, %78 : vector<1x4xf32>
    %96 = vector.broadcast %95 : vector<1x4xf32> to vector<2x4xf32>
    %97 = arith.mulf %96, %46 : vector<2x4xf32>
    %98 = arith.mulf %72, %75 : vector<1x4xf32>
    %99 = vector.broadcast %98 : vector<1x4xf32> to vector<2x4xf32>
    %100 = arith.mulf %99, %49 : vector<2x4xf32>
    %101 = arith.subf %97, %100 : vector<2x4xf32>
    %102 = arith.mulf %72, %78 : vector<1x4xf32>
    %103 = vector.broadcast %102 : vector<1x4xf32> to vector<2x4xf32>
    %104 = arith.mulf %103, %46 : vector<2x4xf32>
    %105 = arith.mulf %59, %75 : vector<1x4xf32>
    %106 = vector.broadcast %105 : vector<1x4xf32> to vector<2x4xf32>
    %107 = arith.mulf %106, %49 : vector<2x4xf32>
    %108 = arith.addf %104, %107 : vector<2x4xf32>
    %109 = vector.extract_strided_slice %85 {offsets = [0, 0], sizes = [2, 1], strides = [1, 1]} : vector<2x4xf32> to vector<2x1xf32>
    %110 = vector.broadcast %109 : vector<2x1xf32> to vector<2x16xf32>
    %111 = arith.mulf %110, %12 : vector<2x16xf32>
    %112 = vector.extract_strided_slice %101 {offsets = [0, 0], sizes = [2, 1], strides = [1, 1]} : vector<2x4xf32> to vector<2x1xf32>
    %113 = vector.broadcast %112 : vector<2x1xf32> to vector<2x16xf32>
    %114 = arith.mulf %113, %24 : vector<2x16xf32>
    %115 = arith.addf %111, %114 : vector<2x16xf32>
    %116 = vector.extract_strided_slice %85 {offsets = [0, 1], sizes = [2, 1], strides = [1, 1]} : vector<2x4xf32> to vector<2x1xf32>
    %117 = vector.broadcast %116 : vector<2x1xf32> to vector<2x16xf32>
    %118 = arith.mulf %117, %15 : vector<2x16xf32>
    %119 = vector.extract_strided_slice %101 {offsets = [0, 1], sizes = [2, 1], strides = [1, 1]} : vector<2x4xf32> to vector<2x1xf32>
    %120 = vector.broadcast %119 : vector<2x1xf32> to vector<2x16xf32>
    %121 = arith.mulf %120, %27 : vector<2x16xf32>
    %122 = arith.addf %118, %121 : vector<2x16xf32>
    %123 = vector.extract_strided_slice %85 {offsets = [0, 2], sizes = [2, 1], strides = [1, 1]} : vector<2x4xf32> to vector<2x1xf32>
    %124 = vector.broadcast %123 : vector<2x1xf32> to vector<2x16xf32>
    %125 = arith.mulf %124, %18 : vector<2x16xf32>
    %126 = vector.extract_strided_slice %101 {offsets = [0, 2], sizes = [2, 1], strides = [1, 1]} : vector<2x4xf32> to vector<2x1xf32>
    %127 = vector.broadcast %126 : vector<2x1xf32> to vector<2x16xf32>
    %128 = arith.mulf %127, %30 : vector<2x16xf32>
    %129 = arith.addf %125, %128 : vector<2x16xf32>
    %130 = vector.extract_strided_slice %85 {offsets = [0, 3], sizes = [2, 1], strides = [1, 1]} : vector<2x4xf32> to vector<2x1xf32>
    %131 = vector.broadcast %130 : vector<2x1xf32> to vector<2x16xf32>
    %132 = arith.mulf %131, %21 : vector<2x16xf32>
    %133 = vector.extract_strided_slice %101 {offsets = [0, 3], sizes = [2, 1], strides = [1, 1]} : vector<2x4xf32> to vector<2x1xf32>
    %134 = vector.broadcast %133 : vector<2x1xf32> to vector<2x16xf32>
    %135 = arith.mulf %134, %33 : vector<2x16xf32>
    %136 = arith.addf %132, %135 : vector<2x16xf32>
    %137 = vector.extract_strided_slice %94 {offsets = [0, 0], sizes = [2, 1], strides = [1, 1]} : vector<2x4xf32> to vector<2x1xf32>
    %138 = vector.broadcast %137 : vector<2x1xf32> to vector<2x16xf32>
    %139 = arith.mulf %138, %12 : vector<2x16xf32>
    %140 = vector.extract_strided_slice %108 {offsets = [0, 0], sizes = [2, 1], strides = [1, 1]} : vector<2x4xf32> to vector<2x1xf32>
    %141 = vector.broadcast %140 : vector<2x1xf32> to vector<2x16xf32>
    %142 = arith.mulf %141, %24 : vector<2x16xf32>
    %143 = arith.addf %139, %142 : vector<2x16xf32>
    %144 = vector.extract_strided_slice %94 {offsets = [0, 1], sizes = [2, 1], strides = [1, 1]} : vector<2x4xf32> to vector<2x1xf32>
    %145 = vector.broadcast %144 : vector<2x1xf32> to vector<2x16xf32>
    %146 = arith.mulf %145, %15 : vector<2x16xf32>
    %147 = vector.extract_strided_slice %108 {offsets = [0, 1], sizes = [2, 1], strides = [1, 1]} : vector<2x4xf32> to vector<2x1xf32>
    %148 = vector.broadcast %147 : vector<2x1xf32> to vector<2x16xf32>
    %149 = arith.mulf %148, %27 : vector<2x16xf32>
    %150 = arith.addf %146, %149 : vector<2x16xf32>
    %151 = vector.extract_strided_slice %94 {offsets = [0, 2], sizes = [2, 1], strides = [1, 1]} : vector<2x4xf32> to vector<2x1xf32>
    %152 = vector.broadcast %151 : vector<2x1xf32> to vector<2x16xf32>
    %153 = arith.mulf %152, %18 : vector<2x16xf32>
    %154 = vector.extract_strided_slice %108 {offsets = [0, 2], sizes = [2, 1], strides = [1, 1]} : vector<2x4xf32> to vector<2x1xf32>
    %155 = vector.broadcast %154 : vector<2x1xf32> to vector<2x16xf32>
    %156 = arith.mulf %155, %30 : vector<2x16xf32>
    %157 = arith.addf %153, %156 : vector<2x16xf32>
    %158 = vector.extract_strided_slice %94 {offsets = [0, 3], sizes = [2, 1], strides = [1, 1]} : vector<2x4xf32> to vector<2x1xf32>
    %159 = vector.broadcast %158 : vector<2x1xf32> to vector<2x16xf32>
    %160 = arith.mulf %159, %21 : vector<2x16xf32>
    %161 = vector.extract_strided_slice %108 {offsets = [0, 3], sizes = [2, 1], strides = [1, 1]} : vector<2x4xf32> to vector<2x1xf32>
    %162 = vector.broadcast %161 : vector<2x1xf32> to vector<2x16xf32>
    %163 = arith.mulf %162, %33 : vector<2x16xf32>
    %164 = arith.addf %160, %163 : vector<2x16xf32>
    %165 = arith.mulf %115, %122 : vector<2x16xf32>
    %166 = arith.mulf %143, %150 : vector<2x16xf32>
    %167 = arith.subf %165, %166 : vector<2x16xf32>
    %168 = arith.mulf %115, %150 : vector<2x16xf32>
    %169 = arith.mulf %143, %122 : vector<2x16xf32>
    %170 = arith.addf %168, %169 : vector<2x16xf32>
    %171 = arith.mulf %129, %136 : vector<2x16xf32>
    %172 = arith.mulf %157, %164 : vector<2x16xf32>
    %173 = arith.subf %171, %172 : vector<2x16xf32>
    %174 = arith.mulf %129, %164 : vector<2x16xf32>
    %175 = arith.mulf %157, %136 : vector<2x16xf32>
    %176 = arith.addf %174, %175 : vector<2x16xf32>
    %177 = arith.mulf %167, %173 : vector<2x16xf32>
    %178 = arith.mulf %170, %176 : vector<2x16xf32>
    %179 = arith.subf %177, %178 : vector<2x16xf32>
    %180 = arith.mulf %167, %176 : vector<2x16xf32>
    %181 = arith.mulf %170, %173 : vector<2x16xf32>
    %182 = arith.addf %180, %181 : vector<2x16xf32>
    %183 = tpu.concatenate %179, %182 in 1 : vector<2x16xf32>, vector<2x16xf32> -> vector<2x32xf32>
    %184 = arith.truncf %183 : vector<2x32xf32> to vector<2x32xbf16>
    %cst_33 = arith.constant dense<0.000000e+00> : vector<2x128xf32>
    %185 = tpu.matmul %184, %2, %cst_33 {dimension_numbers = #tpu.dot_dimension_numbers<[1], [0], [0], [1], [0, 0, 1, 1], [], []>} : vector<2x32xbf16>, vector<32x128xbf16>, vector<2x128xf32> -> vector<2x128xf32>
    %186 = vector.extract_strided_slice %185 {offsets = [0, 0], sizes = [2, 64], strides = [1, 1]} : vector<2x128xf32> to vector<2x64xf32>
    %187 = vector.extract_strided_slice %185 {offsets = [0, 64], sizes = [2, 64], strides = [1, 1]} : vector<2x128xf32> to vector<2x64xf32>
    %188 = arith.mulf %186, %186 : vector<2x64xf32>
    %189 = arith.mulf %187, %187 : vector<2x64xf32>
    %190 = arith.addf %188, %189 : vector<2x64xf32>
    %191 = arith.truncf %190 : vector<2x64xf32> to vector<2x64xbf16>
    %cst_34 = arith.constant dense<0.000000e+00> : vector<2x128xf32>
    %192 = tpu.matmul %191, %3, %cst_34 {dimension_numbers = #tpu.dot_dimension_numbers<[1], [0], [0], [1], [0, 0, 1, 1], [], []>} : vector<2x64xbf16>, vector<64x128xbf16>, vector<2x128xf32> -> vector<2x128xf32>
    %193 = arith.addf %192, %6 : vector<2x128xf32>
    %194 = vector.extract_strided_slice %193 {offsets = [0, 0], sizes = [2, 32], strides = [1, 1]} : vector<2x128xf32> to vector<2x32xf32>
    %cst_35 = arith.constant 5.000000e-01 : f32
    %195 = vector.broadcast %cst_35 : f32 to vector<2x32xf32>
    %196 = arith.mulf %195, %194 : vector<2x32xf32>
    %197 = math.tanh %196 : vector<2x32xf32>
    %cst_36 = arith.constant 1.000000e+00 : f32
    %198 = vector.broadcast %cst_36 : f32 to vector<2x32xf32>
    %199 = arith.addf %197, %198 : vector<2x32xf32>
    %cst_37 = arith.constant 5.000000e-01 : f32
    %200 = vector.broadcast %cst_37 : f32 to vector<2x32xf32>
    %201 = arith.mulf %200, %199 : vector<2x32xf32>
    %202 = vector.extract_strided_slice %193 {offsets = [0, 32], sizes = [2, 32], strides = [1, 1]} : vector<2x128xf32> to vector<2x32xf32>
    %cst_38 = arith.constant 5.000000e-01 : f32
    %203 = vector.broadcast %cst_38 : f32 to vector<2x32xf32>
    %204 = arith.mulf %203, %202 : vector<2x32xf32>
    %205 = math.tanh %204 : vector<2x32xf32>
    %cst_39 = arith.constant 1.000000e+00 : f32
    %206 = vector.broadcast %cst_39 : f32 to vector<2x32xf32>
    %207 = arith.addf %205, %206 : vector<2x32xf32>
    %cst_40 = arith.constant 5.000000e-01 : f32
    %208 = vector.broadcast %cst_40 : f32 to vector<2x32xf32>
    %209 = arith.mulf %208, %207 : vector<2x32xf32>
    %210 = vector.extract_strided_slice %193 {offsets = [0, 64], sizes = [2, 32], strides = [1, 1]} : vector<2x128xf32> to vector<2x32xf32>
    %211 = math.tanh %210 : vector<2x32xf32>
    %212 = vector.extract_strided_slice %193 {offsets = [0, 96], sizes = [2, 32], strides = [1, 1]} : vector<2x128xf32> to vector<2x32xf32>
    %cst_41 = arith.constant 5.000000e-01 : f32
    %213 = vector.broadcast %cst_41 : f32 to vector<2x32xf32>
    %214 = arith.mulf %213, %212 : vector<2x32xf32>
    %215 = math.tanh %214 : vector<2x32xf32>
    %cst_42 = arith.constant 1.000000e+00 : f32
    %216 = vector.broadcast %cst_42 : f32 to vector<2x32xf32>
    %217 = arith.addf %215, %216 : vector<2x32xf32>
    %cst_43 = arith.constant 5.000000e-01 : f32
    %218 = vector.broadcast %cst_43 : f32 to vector<2x32xf32>
    %219 = arith.mulf %218, %217 : vector<2x32xf32>
    %220 = arith.mulf %201, %40 : vector<2x32xf32>
    %221 = arith.mulf %209, %211 : vector<2x32xf32>
    %222 = arith.addf %220, %221 : vector<2x32xf32>
    %223 = math.tanh %222 : vector<2x32xf32>
    %224 = arith.mulf %219, %223 : vector<2x32xf32>
    %cst_44 = arith.constant dense<0.000000e+00> : vector<2x4xf32>
    %225 = tpu.matmul %224, %0, %cst_44 {dimension_numbers = #tpu.dot_dimension_numbers<[1], [0], [0], [1], [0, 0, 1, 1], [], []>, precision = #tpu.contract_precision<fp32>} : vector<2x32xf32>, vector<32x4xf32>, vector<2x4xf32> -> vector<2x4xf32>
    %226 = vector.extract_strided_slice %38 {offsets = [2, 0], sizes = [2, 4], strides = [1, 1]} : vector<16x4xf32> to vector<2x4xf32>
    %227 = arith.addf %225, %226 : vector<2x4xf32>
    %cst_45 = arith.constant 5.000000e-01 : f32
    %228 = vector.broadcast %cst_45 : f32 to vector<2x4xf32>
    %229 = arith.mulf %228, %227 : vector<2x4xf32>
    %230 = math.cos %229 : vector<2x4xf32>
    %cst_46 = arith.constant 5.000000e-01 : f32
    %231 = vector.broadcast %cst_46 : f32 to vector<2x4xf32>
    %232 = arith.mulf %231, %227 : vector<2x4xf32>
    %233 = math.sin %232 : vector<2x4xf32>
    %234 = vector.extract_strided_slice %227 {offsets = [0, 0], sizes = [1, 4], strides = [1, 1]} : vector<2x4xf32> to vector<1x4xf32>
    %235 = arith.mulf %234, %234 : vector<1x4xf32>
    %cst_47 = arith.constant 1.000000e+00 : f32
    %236 = vector.broadcast %cst_47 : f32 to vector<1x4xf32>
    %237 = arith.addf %236, %235 : vector<1x4xf32>
    %238 = math.rsqrt %237 : vector<1x4xf32>
    %cst_48 = arith.constant 1.000000e+00 : f32
    %239 = vector.broadcast %cst_48 : f32 to vector<1x4xf32>
    %240 = arith.addf %239, %238 : vector<1x4xf32>
    %cst_49 = arith.constant 5.000000e-01 : f32
    %241 = vector.broadcast %cst_49 : f32 to vector<1x4xf32>
    %242 = arith.mulf %241, %240 : vector<1x4xf32>
    %243 = math.sqrt %242 : vector<1x4xf32>
    %cst_50 = arith.constant 0.000000e+00 : f32
    %244 = vector.broadcast %cst_50 : f32 to vector<1x4xf32>
    %245 = arith.cmpf oge, %234, %244 : vector<1x4xf32>
    %cst_51 = arith.constant 1.000000e+00 : f32
    %cst_52 = arith.constant -1.000000e+00 : f32
    %246 = vector.broadcast %cst_51 : f32 to vector<1x4xf32>
    %247 = vector.broadcast %cst_52 : f32 to vector<1x4xf32>
    %248 = arith.select %245, %246, %247 : vector<1x4xi1>, vector<1x4xf32>
    %cst_53 = arith.constant 1.000000e+00 : f32
    %249 = vector.broadcast %cst_53 : f32 to vector<1x4xf32>
    %250 = arith.subf %249, %238 : vector<1x4xf32>
    %cst_54 = arith.constant 5.000000e-01 : f32
    %251 = vector.broadcast %cst_54 : f32 to vector<1x4xf32>
    %252 = arith.mulf %251, %250 : vector<1x4xf32>
    %cst_55 = arith.constant 0.000000e+00 : f32
    %253 = vector.broadcast %cst_55 : f32 to vector<1x4xf32>
    %254 = arith.maximumf %252, %253 : vector<1x4xf32>
    %255 = math.sqrt %254 : vector<1x4xf32>
    %256 = arith.mulf %248, %255 : vector<1x4xf32>
    %257 = arith.subf %243, %256 : vector<1x4xf32>
    %cst_56 = arith.constant 0.707106769 : f32
    %258 = vector.broadcast %cst_56 : f32 to vector<1x4xf32>
    %259 = arith.mulf %257, %258 : vector<1x4xf32>
    %260 = arith.addf %243, %256 : vector<1x4xf32>
    %cst_57 = arith.constant 0.707106769 : f32
    %261 = vector.broadcast %cst_57 : f32 to vector<1x4xf32>
    %262 = arith.mulf %260, %261 : vector<1x4xf32>
    %263 = arith.mulf %243, %259 : vector<1x4xf32>
    %264 = vector.broadcast %263 : vector<1x4xf32> to vector<2x4xf32>
    %265 = arith.mulf %264, %230 : vector<2x4xf32>
    %266 = arith.mulf %256, %262 : vector<1x4xf32>
    %267 = vector.broadcast %266 : vector<1x4xf32> to vector<2x4xf32>
    %268 = arith.mulf %267, %233 : vector<2x4xf32>
    %269 = arith.subf %265, %268 : vector<2x4xf32>
    %270 = arith.mulf %256, %259 : vector<1x4xf32>
    %cst_58 = arith.constant 0.000000e+00 : f32
    %271 = vector.broadcast %cst_58 : f32 to vector<1x4xf32>
    %272 = arith.subf %271, %270 : vector<1x4xf32>
    %273 = vector.broadcast %272 : vector<1x4xf32> to vector<2x4xf32>
    %274 = arith.mulf %273, %230 : vector<2x4xf32>
    %275 = arith.mulf %243, %262 : vector<1x4xf32>
    %276 = vector.broadcast %275 : vector<1x4xf32> to vector<2x4xf32>
    %277 = arith.mulf %276, %233 : vector<2x4xf32>
    %278 = arith.subf %274, %277 : vector<2x4xf32>
    %279 = arith.mulf %243, %262 : vector<1x4xf32>
    %280 = vector.broadcast %279 : vector<1x4xf32> to vector<2x4xf32>
    %281 = arith.mulf %280, %230 : vector<2x4xf32>
    %282 = arith.mulf %256, %259 : vector<1x4xf32>
    %283 = vector.broadcast %282 : vector<1x4xf32> to vector<2x4xf32>
    %284 = arith.mulf %283, %233 : vector<2x4xf32>
    %285 = arith.subf %281, %284 : vector<2x4xf32>
    %286 = arith.mulf %256, %262 : vector<1x4xf32>
    %287 = vector.broadcast %286 : vector<1x4xf32> to vector<2x4xf32>
    %288 = arith.mulf %287, %230 : vector<2x4xf32>
    %289 = arith.mulf %243, %259 : vector<1x4xf32>
    %290 = vector.broadcast %289 : vector<1x4xf32> to vector<2x4xf32>
    %291 = arith.mulf %290, %233 : vector<2x4xf32>
    %292 = arith.addf %288, %291 : vector<2x4xf32>
    %293 = vector.extract_strided_slice %269 {offsets = [0, 0], sizes = [2, 1], strides = [1, 1]} : vector<2x4xf32> to vector<2x1xf32>
    %294 = vector.broadcast %293 : vector<2x1xf32> to vector<2x16xf32>
    %295 = arith.mulf %294, %12 : vector<2x16xf32>
    %296 = vector.extract_strided_slice %285 {offsets = [0, 0], sizes = [2, 1], strides = [1, 1]} : vector<2x4xf32> to vector<2x1xf32>
    %297 = vector.broadcast %296 : vector<2x1xf32> to vector<2x16xf32>
    %298 = arith.mulf %297, %24 : vector<2x16xf32>
    %299 = arith.addf %295, %298 : vector<2x16xf32>
    %300 = vector.extract_strided_slice %269 {offsets = [0, 1], sizes = [2, 1], strides = [1, 1]} : vector<2x4xf32> to vector<2x1xf32>
    %301 = vector.broadcast %300 : vector<2x1xf32> to vector<2x16xf32>
    %302 = arith.mulf %301, %15 : vector<2x16xf32>
    %303 = vector.extract_strided_slice %285 {offsets = [0, 1], sizes = [2, 1], strides = [1, 1]} : vector<2x4xf32> to vector<2x1xf32>
    %304 = vector.broadcast %303 : vector<2x1xf32> to vector<2x16xf32>
    %305 = arith.mulf %304, %27 : vector<2x16xf32>
    %306 = arith.addf %302, %305 : vector<2x16xf32>
    %307 = vector.extract_strided_slice %269 {offsets = [0, 2], sizes = [2, 1], strides = [1, 1]} : vector<2x4xf32> to vector<2x1xf32>
    %308 = vector.broadcast %307 : vector<2x1xf32> to vector<2x16xf32>
    %309 = arith.mulf %308, %18 : vector<2x16xf32>
    %310 = vector.extract_strided_slice %285 {offsets = [0, 2], sizes = [2, 1], strides = [1, 1]} : vector<2x4xf32> to vector<2x1xf32>
    %311 = vector.broadcast %310 : vector<2x1xf32> to vector<2x16xf32>
    %312 = arith.mulf %311, %30 : vector<2x16xf32>
    %313 = arith.addf %309, %312 : vector<2x16xf32>
    %314 = vector.extract_strided_slice %269 {offsets = [0, 3], sizes = [2, 1], strides = [1, 1]} : vector<2x4xf32> to vector<2x1xf32>
    %315 = vector.broadcast %314 : vector<2x1xf32> to vector<2x16xf32>
    %316 = arith.mulf %315, %21 : vector<2x16xf32>
    %317 = vector.extract_strided_slice %285 {offsets = [0, 3], sizes = [2, 1], strides = [1, 1]} : vector<2x4xf32> to vector<2x1xf32>
    %318 = vector.broadcast %317 : vector<2x1xf32> to vector<2x16xf32>
    %319 = arith.mulf %318, %33 : vector<2x16xf32>
    %320 = arith.addf %316, %319 : vector<2x16xf32>
    %321 = vector.extract_strided_slice %278 {offsets = [0, 0], sizes = [2, 1], strides = [1, 1]} : vector<2x4xf32> to vector<2x1xf32>
    %322 = vector.broadcast %321 : vector<2x1xf32> to vector<2x16xf32>
    %323 = arith.mulf %322, %12 : vector<2x16xf32>
    %324 = vector.extract_strided_slice %292 {offsets = [0, 0], sizes = [2, 1], strides = [1, 1]} : vector<2x4xf32> to vector<2x1xf32>
    %325 = vector.broadcast %324 : vector<2x1xf32> to vector<2x16xf32>
    %326 = arith.mulf %325, %24 : vector<2x16xf32>
    %327 = arith.addf %323, %326 : vector<2x16xf32>
    %328 = vector.extract_strided_slice %278 {offsets = [0, 1], sizes = [2, 1], strides = [1, 1]} : vector<2x4xf32> to vector<2x1xf32>
    %329 = vector.broadcast %328 : vector<2x1xf32> to vector<2x16xf32>
    %330 = arith.mulf %329, %15 : vector<2x16xf32>
    %331 = vector.extract_strided_slice %292 {offsets = [0, 1], sizes = [2, 1], strides = [1, 1]} : vector<2x4xf32> to vector<2x1xf32>
    %332 = vector.broadcast %331 : vector<2x1xf32> to vector<2x16xf32>
    %333 = arith.mulf %332, %27 : vector<2x16xf32>
    %334 = arith.addf %330, %333 : vector<2x16xf32>
    %335 = vector.extract_strided_slice %278 {offsets = [0, 2], sizes = [2, 1], strides = [1, 1]} : vector<2x4xf32> to vector<2x1xf32>
    %336 = vector.broadcast %335 : vector<2x1xf32> to vector<2x16xf32>
    %337 = arith.mulf %336, %18 : vector<2x16xf32>
    %338 = vector.extract_strided_slice %292 {offsets = [0, 2], sizes = [2, 1], strides = [1, 1]} : vector<2x4xf32> to vector<2x1xf32>
    %339 = vector.broadcast %338 : vector<2x1xf32> to vector<2x16xf32>
    %340 = arith.mulf %339, %30 : vector<2x16xf32>
    %341 = arith.addf %337, %340 : vector<2x16xf32>
    %342 = vector.extract_strided_slice %278 {offsets = [0, 3], sizes = [2, 1], strides = [1, 1]} : vector<2x4xf32> to vector<2x1xf32>
    %343 = vector.broadcast %342 : vector<2x1xf32> to vector<2x16xf32>
    %344 = arith.mulf %343, %21 : vector<2x16xf32>
    %345 = vector.extract_strided_slice %292 {offsets = [0, 3], sizes = [2, 1], strides = [1, 1]} : vector<2x4xf32> to vector<2x1xf32>
    %346 = vector.broadcast %345 : vector<2x1xf32> to vector<2x16xf32>
    %347 = arith.mulf %346, %33 : vector<2x16xf32>
    %348 = arith.addf %344, %347 : vector<2x16xf32>
    %349 = arith.mulf %299, %306 : vector<2x16xf32>
    %350 = arith.mulf %327, %334 : vector<2x16xf32>
    %351 = arith.subf %349, %350 : vector<2x16xf32>
    %352 = arith.mulf %299, %334 : vector<2x16xf32>
    %353 = arith.mulf %327, %306 : vector<2x16xf32>
    %354 = arith.addf %352, %353 : vector<2x16xf32>
    %355 = arith.mulf %313, %320 : vector<2x16xf32>
    %356 = arith.mulf %341, %348 : vector<2x16xf32>
    %357 = arith.subf %355, %356 : vector<2x16xf32>
    %358 = arith.mulf %313, %348 : vector<2x16xf32>
    %359 = arith.mulf %341, %320 : vector<2x16xf32>
    %360 = arith.addf %358, %359 : vector<2x16xf32>
    %361 = arith.mulf %351, %357 : vector<2x16xf32>
    %362 = arith.mulf %354, %360 : vector<2x16xf32>
    %363 = arith.subf %361, %362 : vector<2x16xf32>
    %364 = arith.mulf %351, %360 : vector<2x16xf32>
    %365 = arith.mulf %354, %357 : vector<2x16xf32>
    %366 = arith.addf %364, %365 : vector<2x16xf32>
    %367 = tpu.concatenate %363, %366 in 1 : vector<2x16xf32>, vector<2x16xf32> -> vector<2x32xf32>
    %368 = arith.truncf %367 : vector<2x32xf32> to vector<2x32xbf16>
    %cst_59 = arith.constant dense<0.000000e+00> : vector<2x128xf32>
    %369 = tpu.matmul %368, %2, %cst_59 {dimension_numbers = #tpu.dot_dimension_numbers<[1], [0], [0], [1], [0, 0, 1, 1], [], []>} : vector<2x32xbf16>, vector<32x128xbf16>, vector<2x128xf32> -> vector<2x128xf32>
    %370 = vector.extract_strided_slice %369 {offsets = [0, 0], sizes = [2, 64], strides = [1, 1]} : vector<2x128xf32> to vector<2x64xf32>
    %371 = vector.extract_strided_slice %369 {offsets = [0, 64], sizes = [2, 64], strides = [1, 1]} : vector<2x128xf32> to vector<2x64xf32>
    %372 = arith.mulf %370, %370 : vector<2x64xf32>
    %373 = arith.mulf %371, %371 : vector<2x64xf32>
    %374 = arith.addf %372, %373 : vector<2x64xf32>
    %375 = arith.truncf %374 : vector<2x64xf32> to vector<2x64xbf16>
    %cst_60 = arith.constant dense<0.000000e+00> : vector<2x128xf32>
    %376 = tpu.matmul %375, %3, %cst_60 {dimension_numbers = #tpu.dot_dimension_numbers<[1], [0], [0], [1], [0, 0, 1, 1], [], []>} : vector<2x64xbf16>, vector<64x128xbf16>, vector<2x128xf32> -> vector<2x128xf32>
    %377 = arith.addf %376, %6 : vector<2x128xf32>
    %378 = vector.extract_strided_slice %377 {offsets = [0, 0], sizes = [2, 32], strides = [1, 1]} : vector<2x128xf32> to vector<2x32xf32>
    %cst_61 = arith.constant 5.000000e-01 : f32
    %379 = vector.broadcast %cst_61 : f32 to vector<2x32xf32>
    %380 = arith.mulf %379, %378 : vector<2x32xf32>
    %381 = math.tanh %380 : vector<2x32xf32>
    %cst_62 = arith.constant 1.000000e+00 : f32
    %382 = vector.broadcast %cst_62 : f32 to vector<2x32xf32>
    %383 = arith.addf %381, %382 : vector<2x32xf32>
    %cst_63 = arith.constant 5.000000e-01 : f32
    %384 = vector.broadcast %cst_63 : f32 to vector<2x32xf32>
    %385 = arith.mulf %384, %383 : vector<2x32xf32>
    %386 = vector.extract_strided_slice %377 {offsets = [0, 32], sizes = [2, 32], strides = [1, 1]} : vector<2x128xf32> to vector<2x32xf32>
    %cst_64 = arith.constant 5.000000e-01 : f32
    %387 = vector.broadcast %cst_64 : f32 to vector<2x32xf32>
    %388 = arith.mulf %387, %386 : vector<2x32xf32>
    %389 = math.tanh %388 : vector<2x32xf32>
    %cst_65 = arith.constant 1.000000e+00 : f32
    %390 = vector.broadcast %cst_65 : f32 to vector<2x32xf32>
    %391 = arith.addf %389, %390 : vector<2x32xf32>
    %cst_66 = arith.constant 5.000000e-01 : f32
    %392 = vector.broadcast %cst_66 : f32 to vector<2x32xf32>
    %393 = arith.mulf %392, %391 : vector<2x32xf32>
    %394 = vector.extract_strided_slice %377 {offsets = [0, 64], sizes = [2, 32], strides = [1, 1]} : vector<2x128xf32> to vector<2x32xf32>
    %395 = math.tanh %394 : vector<2x32xf32>
    %396 = vector.extract_strided_slice %377 {offsets = [0, 96], sizes = [2, 32], strides = [1, 1]} : vector<2x128xf32> to vector<2x32xf32>
    %cst_67 = arith.constant 5.000000e-01 : f32
    %397 = vector.broadcast %cst_67 : f32 to vector<2x32xf32>
    %398 = arith.mulf %397, %396 : vector<2x32xf32>
    %399 = math.tanh %398 : vector<2x32xf32>
    %cst_68 = arith.constant 1.000000e+00 : f32
    %400 = vector.broadcast %cst_68 : f32 to vector<2x32xf32>
    %401 = arith.addf %399, %400 : vector<2x32xf32>
    %cst_69 = arith.constant 5.000000e-01 : f32
    %402 = vector.broadcast %cst_69 : f32 to vector<2x32xf32>
    %403 = arith.mulf %402, %401 : vector<2x32xf32>
    %404 = arith.mulf %385, %222 : vector<2x32xf32>
    %405 = arith.mulf %393, %395 : vector<2x32xf32>
    %406 = arith.addf %404, %405 : vector<2x32xf32>
    %407 = math.tanh %406 : vector<2x32xf32>
    %408 = arith.mulf %403, %407 : vector<2x32xf32>
    %cst_70 = arith.constant dense<0.000000e+00> : vector<2x4xf32>
    %409 = tpu.matmul %408, %0, %cst_70 {dimension_numbers = #tpu.dot_dimension_numbers<[1], [0], [0], [1], [0, 0, 1, 1], [], []>, precision = #tpu.contract_precision<fp32>} : vector<2x32xf32>, vector<32x4xf32>, vector<2x4xf32> -> vector<2x4xf32>
    %410 = vector.extract_strided_slice %38 {offsets = [4, 0], sizes = [2, 4], strides = [1, 1]} : vector<16x4xf32> to vector<2x4xf32>
    %411 = arith.addf %409, %410 : vector<2x4xf32>
    %cst_71 = arith.constant 5.000000e-01 : f32
    %412 = vector.broadcast %cst_71 : f32 to vector<2x4xf32>
    %413 = arith.mulf %412, %411 : vector<2x4xf32>
    %414 = math.cos %413 : vector<2x4xf32>
    %cst_72 = arith.constant 5.000000e-01 : f32
    %415 = vector.broadcast %cst_72 : f32 to vector<2x4xf32>
    %416 = arith.mulf %415, %411 : vector<2x4xf32>
    %417 = math.sin %416 : vector<2x4xf32>
    %418 = vector.extract_strided_slice %411 {offsets = [0, 0], sizes = [1, 4], strides = [1, 1]} : vector<2x4xf32> to vector<1x4xf32>
    %419 = arith.mulf %418, %418 : vector<1x4xf32>
    %cst_73 = arith.constant 1.000000e+00 : f32
    %420 = vector.broadcast %cst_73 : f32 to vector<1x4xf32>
    %421 = arith.addf %420, %419 : vector<1x4xf32>
    %422 = math.rsqrt %421 : vector<1x4xf32>
    %cst_74 = arith.constant 1.000000e+00 : f32
    %423 = vector.broadcast %cst_74 : f32 to vector<1x4xf32>
    %424 = arith.addf %423, %422 : vector<1x4xf32>
    %cst_75 = arith.constant 5.000000e-01 : f32
    %425 = vector.broadcast %cst_75 : f32 to vector<1x4xf32>
    %426 = arith.mulf %425, %424 : vector<1x4xf32>
    %427 = math.sqrt %426 : vector<1x4xf32>
    %cst_76 = arith.constant 0.000000e+00 : f32
    %428 = vector.broadcast %cst_76 : f32 to vector<1x4xf32>
    %429 = arith.cmpf oge, %418, %428 : vector<1x4xf32>
    %cst_77 = arith.constant 1.000000e+00 : f32
    %cst_78 = arith.constant -1.000000e+00 : f32
    %430 = vector.broadcast %cst_77 : f32 to vector<1x4xf32>
    %431 = vector.broadcast %cst_78 : f32 to vector<1x4xf32>
    %432 = arith.select %429, %430, %431 : vector<1x4xi1>, vector<1x4xf32>
    %cst_79 = arith.constant 1.000000e+00 : f32
    %433 = vector.broadcast %cst_79 : f32 to vector<1x4xf32>
    %434 = arith.subf %433, %422 : vector<1x4xf32>
    %cst_80 = arith.constant 5.000000e-01 : f32
    %435 = vector.broadcast %cst_80 : f32 to vector<1x4xf32>
    %436 = arith.mulf %435, %434 : vector<1x4xf32>
    %cst_81 = arith.constant 0.000000e+00 : f32
    %437 = vector.broadcast %cst_81 : f32 to vector<1x4xf32>
    %438 = arith.maximumf %436, %437 : vector<1x4xf32>
    %439 = math.sqrt %438 : vector<1x4xf32>
    %440 = arith.mulf %432, %439 : vector<1x4xf32>
    %441 = arith.subf %427, %440 : vector<1x4xf32>
    %cst_82 = arith.constant 0.707106769 : f32
    %442 = vector.broadcast %cst_82 : f32 to vector<1x4xf32>
    %443 = arith.mulf %441, %442 : vector<1x4xf32>
    %444 = arith.addf %427, %440 : vector<1x4xf32>
    %cst_83 = arith.constant 0.707106769 : f32
    %445 = vector.broadcast %cst_83 : f32 to vector<1x4xf32>
    %446 = arith.mulf %444, %445 : vector<1x4xf32>
    %447 = arith.mulf %427, %443 : vector<1x4xf32>
    %448 = vector.broadcast %447 : vector<1x4xf32> to vector<2x4xf32>
    %449 = arith.mulf %448, %414 : vector<2x4xf32>
    %450 = arith.mulf %440, %446 : vector<1x4xf32>
    %451 = vector.broadcast %450 : vector<1x4xf32> to vector<2x4xf32>
    %452 = arith.mulf %451, %417 : vector<2x4xf32>
    %453 = arith.subf %449, %452 : vector<2x4xf32>
    %454 = arith.mulf %440, %443 : vector<1x4xf32>
    %cst_84 = arith.constant 0.000000e+00 : f32
    %455 = vector.broadcast %cst_84 : f32 to vector<1x4xf32>
    %456 = arith.subf %455, %454 : vector<1x4xf32>
    %457 = vector.broadcast %456 : vector<1x4xf32> to vector<2x4xf32>
    %458 = arith.mulf %457, %414 : vector<2x4xf32>
    %459 = arith.mulf %427, %446 : vector<1x4xf32>
    %460 = vector.broadcast %459 : vector<1x4xf32> to vector<2x4xf32>
    %461 = arith.mulf %460, %417 : vector<2x4xf32>
    %462 = arith.subf %458, %461 : vector<2x4xf32>
    %463 = arith.mulf %427, %446 : vector<1x4xf32>
    %464 = vector.broadcast %463 : vector<1x4xf32> to vector<2x4xf32>
    %465 = arith.mulf %464, %414 : vector<2x4xf32>
    %466 = arith.mulf %440, %443 : vector<1x4xf32>
    %467 = vector.broadcast %466 : vector<1x4xf32> to vector<2x4xf32>
    %468 = arith.mulf %467, %417 : vector<2x4xf32>
    %469 = arith.subf %465, %468 : vector<2x4xf32>
    %470 = arith.mulf %440, %446 : vector<1x4xf32>
    %471 = vector.broadcast %470 : vector<1x4xf32> to vector<2x4xf32>
    %472 = arith.mulf %471, %414 : vector<2x4xf32>
    %473 = arith.mulf %427, %443 : vector<1x4xf32>
    %474 = vector.broadcast %473 : vector<1x4xf32> to vector<2x4xf32>
    %475 = arith.mulf %474, %417 : vector<2x4xf32>
    %476 = arith.addf %472, %475 : vector<2x4xf32>
    %477 = vector.extract_strided_slice %453 {offsets = [0, 0], sizes = [2, 1], strides = [1, 1]} : vector<2x4xf32> to vector<2x1xf32>
    %478 = vector.broadcast %477 : vector<2x1xf32> to vector<2x16xf32>
    %479 = arith.mulf %478, %12 : vector<2x16xf32>
    %480 = vector.extract_strided_slice %469 {offsets = [0, 0], sizes = [2, 1], strides = [1, 1]} : vector<2x4xf32> to vector<2x1xf32>
    %481 = vector.broadcast %480 : vector<2x1xf32> to vector<2x16xf32>
    %482 = arith.mulf %481, %24 : vector<2x16xf32>
    %483 = arith.addf %479, %482 : vector<2x16xf32>
    %484 = vector.extract_strided_slice %453 {offsets = [0, 1], sizes = [2, 1], strides = [1, 1]} : vector<2x4xf32> to vector<2x1xf32>
    %485 = vector.broadcast %484 : vector<2x1xf32> to vector<2x16xf32>
    %486 = arith.mulf %485, %15 : vector<2x16xf32>
    %487 = vector.extract_strided_slice %469 {offsets = [0, 1], sizes = [2, 1], strides = [1, 1]} : vector<2x4xf32> to vector<2x1xf32>
    %488 = vector.broadcast %487 : vector<2x1xf32> to vector<2x16xf32>
    %489 = arith.mulf %488, %27 : vector<2x16xf32>
    %490 = arith.addf %486, %489 : vector<2x16xf32>
    %491 = vector.extract_strided_slice %453 {offsets = [0, 2], sizes = [2, 1], strides = [1, 1]} : vector<2x4xf32> to vector<2x1xf32>
    %492 = vector.broadcast %491 : vector<2x1xf32> to vector<2x16xf32>
    %493 = arith.mulf %492, %18 : vector<2x16xf32>
    %494 = vector.extract_strided_slice %469 {offsets = [0, 2], sizes = [2, 1], strides = [1, 1]} : vector<2x4xf32> to vector<2x1xf32>
    %495 = vector.broadcast %494 : vector<2x1xf32> to vector<2x16xf32>
    %496 = arith.mulf %495, %30 : vector<2x16xf32>
    %497 = arith.addf %493, %496 : vector<2x16xf32>
    %498 = vector.extract_strided_slice %453 {offsets = [0, 3], sizes = [2, 1], strides = [1, 1]} : vector<2x4xf32> to vector<2x1xf32>
    %499 = vector.broadcast %498 : vector<2x1xf32> to vector<2x16xf32>
    %500 = arith.mulf %499, %21 : vector<2x16xf32>
    %501 = vector.extract_strided_slice %469 {offsets = [0, 3], sizes = [2, 1], strides = [1, 1]} : vector<2x4xf32> to vector<2x1xf32>
    %502 = vector.broadcast %501 : vector<2x1xf32> to vector<2x16xf32>
    %503 = arith.mulf %502, %33 : vector<2x16xf32>
    %504 = arith.addf %500, %503 : vector<2x16xf32>
    %505 = vector.extract_strided_slice %462 {offsets = [0, 0], sizes = [2, 1], strides = [1, 1]} : vector<2x4xf32> to vector<2x1xf32>
    %506 = vector.broadcast %505 : vector<2x1xf32> to vector<2x16xf32>
    %507 = arith.mulf %506, %12 : vector<2x16xf32>
    %508 = vector.extract_strided_slice %476 {offsets = [0, 0], sizes = [2, 1], strides = [1, 1]} : vector<2x4xf32> to vector<2x1xf32>
    %509 = vector.broadcast %508 : vector<2x1xf32> to vector<2x16xf32>
    %510 = arith.mulf %509, %24 : vector<2x16xf32>
    %511 = arith.addf %507, %510 : vector<2x16xf32>
    %512 = vector.extract_strided_slice %462 {offsets = [0, 1], sizes = [2, 1], strides = [1, 1]} : vector<2x4xf32> to vector<2x1xf32>
    %513 = vector.broadcast %512 : vector<2x1xf32> to vector<2x16xf32>
    %514 = arith.mulf %513, %15 : vector<2x16xf32>
    %515 = vector.extract_strided_slice %476 {offsets = [0, 1], sizes = [2, 1], strides = [1, 1]} : vector<2x4xf32> to vector<2x1xf32>
    %516 = vector.broadcast %515 : vector<2x1xf32> to vector<2x16xf32>
    %517 = arith.mulf %516, %27 : vector<2x16xf32>
    %518 = arith.addf %514, %517 : vector<2x16xf32>
    %519 = vector.extract_strided_slice %462 {offsets = [0, 2], sizes = [2, 1], strides = [1, 1]} : vector<2x4xf32> to vector<2x1xf32>
    %520 = vector.broadcast %519 : vector<2x1xf32> to vector<2x16xf32>
    %521 = arith.mulf %520, %18 : vector<2x16xf32>
    %522 = vector.extract_strided_slice %476 {offsets = [0, 2], sizes = [2, 1], strides = [1, 1]} : vector<2x4xf32> to vector<2x1xf32>
    %523 = vector.broadcast %522 : vector<2x1xf32> to vector<2x16xf32>
    %524 = arith.mulf %523, %30 : vector<2x16xf32>
    %525 = arith.addf %521, %524 : vector<2x16xf32>
    %526 = vector.extract_strided_slice %462 {offsets = [0, 3], sizes = [2, 1], strides = [1, 1]} : vector<2x4xf32> to vector<2x1xf32>
    %527 = vector.broadcast %526 : vector<2x1xf32> to vector<2x16xf32>
    %528 = arith.mulf %527, %21 : vector<2x16xf32>
    %529 = vector.extract_strided_slice %476 {offsets = [0, 3], sizes = [2, 1], strides = [1, 1]} : vector<2x4xf32> to vector<2x1xf32>
    %530 = vector.broadcast %529 : vector<2x1xf32> to vector<2x16xf32>
    %531 = arith.mulf %530, %33 : vector<2x16xf32>
    %532 = arith.addf %528, %531 : vector<2x16xf32>
    %533 = arith.mulf %483, %490 : vector<2x16xf32>
    %534 = arith.mulf %511, %518 : vector<2x16xf32>
    %535 = arith.subf %533, %534 : vector<2x16xf32>
    %536 = arith.mulf %483, %518 : vector<2x16xf32>
    %537 = arith.mulf %511, %490 : vector<2x16xf32>
    %538 = arith.addf %536, %537 : vector<2x16xf32>
    %539 = arith.mulf %497, %504 : vector<2x16xf32>
    %540 = arith.mulf %525, %532 : vector<2x16xf32>
    %541 = arith.subf %539, %540 : vector<2x16xf32>
    %542 = arith.mulf %497, %532 : vector<2x16xf32>
    %543 = arith.mulf %525, %504 : vector<2x16xf32>
    %544 = arith.addf %542, %543 : vector<2x16xf32>
    %545 = arith.mulf %535, %541 : vector<2x16xf32>
    %546 = arith.mulf %538, %544 : vector<2x16xf32>
    %547 = arith.subf %545, %546 : vector<2x16xf32>
    %548 = arith.mulf %535, %544 : vector<2x16xf32>
    %549 = arith.mulf %538, %541 : vector<2x16xf32>
    %550 = arith.addf %548, %549 : vector<2x16xf32>
    %551 = tpu.concatenate %547, %550 in 1 : vector<2x16xf32>, vector<2x16xf32> -> vector<2x32xf32>
    %552 = arith.truncf %551 : vector<2x32xf32> to vector<2x32xbf16>
    %cst_85 = arith.constant dense<0.000000e+00> : vector<2x128xf32>
    %553 = tpu.matmul %552, %2, %cst_85 {dimension_numbers = #tpu.dot_dimension_numbers<[1], [0], [0], [1], [0, 0, 1, 1], [], []>} : vector<2x32xbf16>, vector<32x128xbf16>, vector<2x128xf32> -> vector<2x128xf32>
    %554 = vector.extract_strided_slice %553 {offsets = [0, 0], sizes = [2, 64], strides = [1, 1]} : vector<2x128xf32> to vector<2x64xf32>
    %555 = vector.extract_strided_slice %553 {offsets = [0, 64], sizes = [2, 64], strides = [1, 1]} : vector<2x128xf32> to vector<2x64xf32>
    %556 = arith.mulf %554, %554 : vector<2x64xf32>
    %557 = arith.mulf %555, %555 : vector<2x64xf32>
    %558 = arith.addf %556, %557 : vector<2x64xf32>
    %559 = arith.truncf %558 : vector<2x64xf32> to vector<2x64xbf16>
    %cst_86 = arith.constant dense<0.000000e+00> : vector<2x128xf32>
    %560 = tpu.matmul %559, %3, %cst_86 {dimension_numbers = #tpu.dot_dimension_numbers<[1], [0], [0], [1], [0, 0, 1, 1], [], []>} : vector<2x64xbf16>, vector<64x128xbf16>, vector<2x128xf32> -> vector<2x128xf32>
    %561 = arith.addf %560, %6 : vector<2x128xf32>
    %562 = vector.extract_strided_slice %561 {offsets = [0, 0], sizes = [2, 32], strides = [1, 1]} : vector<2x128xf32> to vector<2x32xf32>
    %cst_87 = arith.constant 5.000000e-01 : f32
    %563 = vector.broadcast %cst_87 : f32 to vector<2x32xf32>
    %564 = arith.mulf %563, %562 : vector<2x32xf32>
    %565 = math.tanh %564 : vector<2x32xf32>
    %cst_88 = arith.constant 1.000000e+00 : f32
    %566 = vector.broadcast %cst_88 : f32 to vector<2x32xf32>
    %567 = arith.addf %565, %566 : vector<2x32xf32>
    %cst_89 = arith.constant 5.000000e-01 : f32
    %568 = vector.broadcast %cst_89 : f32 to vector<2x32xf32>
    %569 = arith.mulf %568, %567 : vector<2x32xf32>
    %570 = vector.extract_strided_slice %561 {offsets = [0, 32], sizes = [2, 32], strides = [1, 1]} : vector<2x128xf32> to vector<2x32xf32>
    %cst_90 = arith.constant 5.000000e-01 : f32
    %571 = vector.broadcast %cst_90 : f32 to vector<2x32xf32>
    %572 = arith.mulf %571, %570 : vector<2x32xf32>
    %573 = math.tanh %572 : vector<2x32xf32>
    %cst_91 = arith.constant 1.000000e+00 : f32
    %574 = vector.broadcast %cst_91 : f32 to vector<2x32xf32>
    %575 = arith.addf %573, %574 : vector<2x32xf32>
    %cst_92 = arith.constant 5.000000e-01 : f32
    %576 = vector.broadcast %cst_92 : f32 to vector<2x32xf32>
    %577 = arith.mulf %576, %575 : vector<2x32xf32>
    %578 = vector.extract_strided_slice %561 {offsets = [0, 64], sizes = [2, 32], strides = [1, 1]} : vector<2x128xf32> to vector<2x32xf32>
    %579 = math.tanh %578 : vector<2x32xf32>
    %580 = vector.extract_strided_slice %561 {offsets = [0, 96], sizes = [2, 32], strides = [1, 1]} : vector<2x128xf32> to vector<2x32xf32>
    %cst_93 = arith.constant 5.000000e-01 : f32
    %581 = vector.broadcast %cst_93 : f32 to vector<2x32xf32>
    %582 = arith.mulf %581, %580 : vector<2x32xf32>
    %583 = math.tanh %582 : vector<2x32xf32>
    %cst_94 = arith.constant 1.000000e+00 : f32
    %584 = vector.broadcast %cst_94 : f32 to vector<2x32xf32>
    %585 = arith.addf %583, %584 : vector<2x32xf32>
    %cst_95 = arith.constant 5.000000e-01 : f32
    %586 = vector.broadcast %cst_95 : f32 to vector<2x32xf32>
    %587 = arith.mulf %586, %585 : vector<2x32xf32>
    %588 = arith.mulf %569, %406 : vector<2x32xf32>
    %589 = arith.mulf %577, %579 : vector<2x32xf32>
    %590 = arith.addf %588, %589 : vector<2x32xf32>
    %591 = math.tanh %590 : vector<2x32xf32>
    %592 = arith.mulf %587, %591 : vector<2x32xf32>
    %cst_96 = arith.constant dense<0.000000e+00> : vector<2x4xf32>
    %593 = tpu.matmul %592, %0, %cst_96 {dimension_numbers = #tpu.dot_dimension_numbers<[1], [0], [0], [1], [0, 0, 1, 1], [], []>, precision = #tpu.contract_precision<fp32>} : vector<2x32xf32>, vector<32x4xf32>, vector<2x4xf32> -> vector<2x4xf32>
    %594 = vector.extract_strided_slice %38 {offsets = [6, 0], sizes = [2, 4], strides = [1, 1]} : vector<16x4xf32> to vector<2x4xf32>
    %595 = arith.addf %593, %594 : vector<2x4xf32>
    %cst_97 = arith.constant 5.000000e-01 : f32
    %596 = vector.broadcast %cst_97 : f32 to vector<2x4xf32>
    %597 = arith.mulf %596, %595 : vector<2x4xf32>
    %598 = math.cos %597 : vector<2x4xf32>
    %cst_98 = arith.constant 5.000000e-01 : f32
    %599 = vector.broadcast %cst_98 : f32 to vector<2x4xf32>
    %600 = arith.mulf %599, %595 : vector<2x4xf32>
    %601 = math.sin %600 : vector<2x4xf32>
    %602 = vector.extract_strided_slice %595 {offsets = [0, 0], sizes = [1, 4], strides = [1, 1]} : vector<2x4xf32> to vector<1x4xf32>
    %603 = arith.mulf %602, %602 : vector<1x4xf32>
    %cst_99 = arith.constant 1.000000e+00 : f32
    %604 = vector.broadcast %cst_99 : f32 to vector<1x4xf32>
    %605 = arith.addf %604, %603 : vector<1x4xf32>
    %606 = math.rsqrt %605 : vector<1x4xf32>
    %cst_100 = arith.constant 1.000000e+00 : f32
    %607 = vector.broadcast %cst_100 : f32 to vector<1x4xf32>
    %608 = arith.addf %607, %606 : vector<1x4xf32>
    %cst_101 = arith.constant 5.000000e-01 : f32
    %609 = vector.broadcast %cst_101 : f32 to vector<1x4xf32>
    %610 = arith.mulf %609, %608 : vector<1x4xf32>
    %611 = math.sqrt %610 : vector<1x4xf32>
    %cst_102 = arith.constant 0.000000e+00 : f32
    %612 = vector.broadcast %cst_102 : f32 to vector<1x4xf32>
    %613 = arith.cmpf oge, %602, %612 : vector<1x4xf32>
    %cst_103 = arith.constant 1.000000e+00 : f32
    %cst_104 = arith.constant -1.000000e+00 : f32
    %614 = vector.broadcast %cst_103 : f32 to vector<1x4xf32>
    %615 = vector.broadcast %cst_104 : f32 to vector<1x4xf32>
    %616 = arith.select %613, %614, %615 : vector<1x4xi1>, vector<1x4xf32>
    %cst_105 = arith.constant 1.000000e+00 : f32
    %617 = vector.broadcast %cst_105 : f32 to vector<1x4xf32>
    %618 = arith.subf %617, %606 : vector<1x4xf32>
    %cst_106 = arith.constant 5.000000e-01 : f32
    %619 = vector.broadcast %cst_106 : f32 to vector<1x4xf32>
    %620 = arith.mulf %619, %618 : vector<1x4xf32>
    %cst_107 = arith.constant 0.000000e+00 : f32
    %621 = vector.broadcast %cst_107 : f32 to vector<1x4xf32>
    %622 = arith.maximumf %620, %621 : vector<1x4xf32>
    %623 = math.sqrt %622 : vector<1x4xf32>
    %624 = arith.mulf %616, %623 : vector<1x4xf32>
    %625 = arith.subf %611, %624 : vector<1x4xf32>
    %cst_108 = arith.constant 0.707106769 : f32
    %626 = vector.broadcast %cst_108 : f32 to vector<1x4xf32>
    %627 = arith.mulf %625, %626 : vector<1x4xf32>
    %628 = arith.addf %611, %624 : vector<1x4xf32>
    %cst_109 = arith.constant 0.707106769 : f32
    %629 = vector.broadcast %cst_109 : f32 to vector<1x4xf32>
    %630 = arith.mulf %628, %629 : vector<1x4xf32>
    %631 = arith.mulf %611, %627 : vector<1x4xf32>
    %632 = vector.broadcast %631 : vector<1x4xf32> to vector<2x4xf32>
    %633 = arith.mulf %632, %598 : vector<2x4xf32>
    %634 = arith.mulf %624, %630 : vector<1x4xf32>
    %635 = vector.broadcast %634 : vector<1x4xf32> to vector<2x4xf32>
    %636 = arith.mulf %635, %601 : vector<2x4xf32>
    %637 = arith.subf %633, %636 : vector<2x4xf32>
    %638 = arith.mulf %624, %627 : vector<1x4xf32>
    %cst_110 = arith.constant 0.000000e+00 : f32
    %639 = vector.broadcast %cst_110 : f32 to vector<1x4xf32>
    %640 = arith.subf %639, %638 : vector<1x4xf32>
    %641 = vector.broadcast %640 : vector<1x4xf32> to vector<2x4xf32>
    %642 = arith.mulf %641, %598 : vector<2x4xf32>
    %643 = arith.mulf %611, %630 : vector<1x4xf32>
    %644 = vector.broadcast %643 : vector<1x4xf32> to vector<2x4xf32>
    %645 = arith.mulf %644, %601 : vector<2x4xf32>
    %646 = arith.subf %642, %645 : vector<2x4xf32>
    %647 = arith.mulf %611, %630 : vector<1x4xf32>
    %648 = vector.broadcast %647 : vector<1x4xf32> to vector<2x4xf32>
    %649 = arith.mulf %648, %598 : vector<2x4xf32>
    %650 = arith.mulf %624, %627 : vector<1x4xf32>
    %651 = vector.broadcast %650 : vector<1x4xf32> to vector<2x4xf32>
    %652 = arith.mulf %651, %601 : vector<2x4xf32>
    %653 = arith.subf %649, %652 : vector<2x4xf32>
    %654 = arith.mulf %624, %630 : vector<1x4xf32>
    %655 = vector.broadcast %654 : vector<1x4xf32> to vector<2x4xf32>
    %656 = arith.mulf %655, %598 : vector<2x4xf32>
    %657 = arith.mulf %611, %627 : vector<1x4xf32>
    %658 = vector.broadcast %657 : vector<1x4xf32> to vector<2x4xf32>
    %659 = arith.mulf %658, %601 : vector<2x4xf32>
    %660 = arith.addf %656, %659 : vector<2x4xf32>
    %661 = vector.extract_strided_slice %637 {offsets = [0, 0], sizes = [2, 1], strides = [1, 1]} : vector<2x4xf32> to vector<2x1xf32>
    %662 = vector.broadcast %661 : vector<2x1xf32> to vector<2x16xf32>
    %663 = arith.mulf %662, %12 : vector<2x16xf32>
    %664 = vector.extract_strided_slice %653 {offsets = [0, 0], sizes = [2, 1], strides = [1, 1]} : vector<2x4xf32> to vector<2x1xf32>
    %665 = vector.broadcast %664 : vector<2x1xf32> to vector<2x16xf32>
    %666 = arith.mulf %665, %24 : vector<2x16xf32>
    %667 = arith.addf %663, %666 : vector<2x16xf32>
    %668 = vector.extract_strided_slice %637 {offsets = [0, 1], sizes = [2, 1], strides = [1, 1]} : vector<2x4xf32> to vector<2x1xf32>
    %669 = vector.broadcast %668 : vector<2x1xf32> to vector<2x16xf32>
    %670 = arith.mulf %669, %15 : vector<2x16xf32>
    %671 = vector.extract_strided_slice %653 {offsets = [0, 1], sizes = [2, 1], strides = [1, 1]} : vector<2x4xf32> to vector<2x1xf32>
    %672 = vector.broadcast %671 : vector<2x1xf32> to vector<2x16xf32>
    %673 = arith.mulf %672, %27 : vector<2x16xf32>
    %674 = arith.addf %670, %673 : vector<2x16xf32>
    %675 = vector.extract_strided_slice %637 {offsets = [0, 2], sizes = [2, 1], strides = [1, 1]} : vector<2x4xf32> to vector<2x1xf32>
    %676 = vector.broadcast %675 : vector<2x1xf32> to vector<2x16xf32>
    %677 = arith.mulf %676, %18 : vector<2x16xf32>
    %678 = vector.extract_strided_slice %653 {offsets = [0, 2], sizes = [2, 1], strides = [1, 1]} : vector<2x4xf32> to vector<2x1xf32>
    %679 = vector.broadcast %678 : vector<2x1xf32> to vector<2x16xf32>
    %680 = arith.mulf %679, %30 : vector<2x16xf32>
    %681 = arith.addf %677, %680 : vector<2x16xf32>
    %682 = vector.extract_strided_slice %637 {offsets = [0, 3], sizes = [2, 1], strides = [1, 1]} : vector<2x4xf32> to vector<2x1xf32>
    %683 = vector.broadcast %682 : vector<2x1xf32> to vector<2x16xf32>
    %684 = arith.mulf %683, %21 : vector<2x16xf32>
    %685 = vector.extract_strided_slice %653 {offsets = [0, 3], sizes = [2, 1], strides = [1, 1]} : vector<2x4xf32> to vector<2x1xf32>
    %686 = vector.broadcast %685 : vector<2x1xf32> to vector<2x16xf32>
    %687 = arith.mulf %686, %33 : vector<2x16xf32>
    %688 = arith.addf %684, %687 : vector<2x16xf32>
    %689 = vector.extract_strided_slice %646 {offsets = [0, 0], sizes = [2, 1], strides = [1, 1]} : vector<2x4xf32> to vector<2x1xf32>
    %690 = vector.broadcast %689 : vector<2x1xf32> to vector<2x16xf32>
    %691 = arith.mulf %690, %12 : vector<2x16xf32>
    %692 = vector.extract_strided_slice %660 {offsets = [0, 0], sizes = [2, 1], strides = [1, 1]} : vector<2x4xf32> to vector<2x1xf32>
    %693 = vector.broadcast %692 : vector<2x1xf32> to vector<2x16xf32>
    %694 = arith.mulf %693, %24 : vector<2x16xf32>
    %695 = arith.addf %691, %694 : vector<2x16xf32>
    %696 = vector.extract_strided_slice %646 {offsets = [0, 1], sizes = [2, 1], strides = [1, 1]} : vector<2x4xf32> to vector<2x1xf32>
    %697 = vector.broadcast %696 : vector<2x1xf32> to vector<2x16xf32>
    %698 = arith.mulf %697, %15 : vector<2x16xf32>
    %699 = vector.extract_strided_slice %660 {offsets = [0, 1], sizes = [2, 1], strides = [1, 1]} : vector<2x4xf32> to vector<2x1xf32>
    %700 = vector.broadcast %699 : vector<2x1xf32> to vector<2x16xf32>
    %701 = arith.mulf %700, %27 : vector<2x16xf32>
    %702 = arith.addf %698, %701 : vector<2x16xf32>
    %703 = vector.extract_strided_slice %646 {offsets = [0, 2], sizes = [2, 1], strides = [1, 1]} : vector<2x4xf32> to vector<2x1xf32>
    %704 = vector.broadcast %703 : vector<2x1xf32> to vector<2x16xf32>
    %705 = arith.mulf %704, %18 : vector<2x16xf32>
    %706 = vector.extract_strided_slice %660 {offsets = [0, 2], sizes = [2, 1], strides = [1, 1]} : vector<2x4xf32> to vector<2x1xf32>
    %707 = vector.broadcast %706 : vector<2x1xf32> to vector<2x16xf32>
    %708 = arith.mulf %707, %30 : vector<2x16xf32>
    %709 = arith.addf %705, %708 : vector<2x16xf32>
    %710 = vector.extract_strided_slice %646 {offsets = [0, 3], sizes = [2, 1], strides = [1, 1]} : vector<2x4xf32> to vector<2x1xf32>
    %711 = vector.broadcast %710 : vector<2x1xf32> to vector<2x16xf32>
    %712 = arith.mulf %711, %21 : vector<2x16xf32>
    %713 = vector.extract_strided_slice %660 {offsets = [0, 3], sizes = [2, 1], strides = [1, 1]} : vector<2x4xf32> to vector<2x1xf32>
    %714 = vector.broadcast %713 : vector<2x1xf32> to vector<2x16xf32>
    %715 = arith.mulf %714, %33 : vector<2x16xf32>
    %716 = arith.addf %712, %715 : vector<2x16xf32>
    %717 = arith.mulf %667, %674 : vector<2x16xf32>
    %718 = arith.mulf %695, %702 : vector<2x16xf32>
    %719 = arith.subf %717, %718 : vector<2x16xf32>
    %720 = arith.mulf %667, %702 : vector<2x16xf32>
    %721 = arith.mulf %695, %674 : vector<2x16xf32>
    %722 = arith.addf %720, %721 : vector<2x16xf32>
    %723 = arith.mulf %681, %688 : vector<2x16xf32>
    %724 = arith.mulf %709, %716 : vector<2x16xf32>
    %725 = arith.subf %723, %724 : vector<2x16xf32>
    %726 = arith.mulf %681, %716 : vector<2x16xf32>
    %727 = arith.mulf %709, %688 : vector<2x16xf32>
    %728 = arith.addf %726, %727 : vector<2x16xf32>
    %729 = arith.mulf %719, %725 : vector<2x16xf32>
    %730 = arith.mulf %722, %728 : vector<2x16xf32>
    %731 = arith.subf %729, %730 : vector<2x16xf32>
    %732 = arith.mulf %719, %728 : vector<2x16xf32>
    %733 = arith.mulf %722, %725 : vector<2x16xf32>
    %734 = arith.addf %732, %733 : vector<2x16xf32>
    %735 = tpu.concatenate %731, %734 in 1 : vector<2x16xf32>, vector<2x16xf32> -> vector<2x32xf32>
    %736 = arith.truncf %735 : vector<2x32xf32> to vector<2x32xbf16>
    %cst_111 = arith.constant dense<0.000000e+00> : vector<2x128xf32>
    %737 = tpu.matmul %736, %2, %cst_111 {dimension_numbers = #tpu.dot_dimension_numbers<[1], [0], [0], [1], [0, 0, 1, 1], [], []>} : vector<2x32xbf16>, vector<32x128xbf16>, vector<2x128xf32> -> vector<2x128xf32>
    %738 = vector.extract_strided_slice %737 {offsets = [0, 0], sizes = [2, 64], strides = [1, 1]} : vector<2x128xf32> to vector<2x64xf32>
    %739 = vector.extract_strided_slice %737 {offsets = [0, 64], sizes = [2, 64], strides = [1, 1]} : vector<2x128xf32> to vector<2x64xf32>
    %740 = arith.mulf %738, %738 : vector<2x64xf32>
    %741 = arith.mulf %739, %739 : vector<2x64xf32>
    %742 = arith.addf %740, %741 : vector<2x64xf32>
    %743 = arith.truncf %742 : vector<2x64xf32> to vector<2x64xbf16>
    %cst_112 = arith.constant dense<0.000000e+00> : vector<2x128xf32>
    %744 = tpu.matmul %743, %3, %cst_112 {dimension_numbers = #tpu.dot_dimension_numbers<[1], [0], [0], [1], [0, 0, 1, 1], [], []>} : vector<2x64xbf16>, vector<64x128xbf16>, vector<2x128xf32> -> vector<2x128xf32>
    %745 = arith.addf %744, %6 : vector<2x128xf32>
    %746 = vector.extract_strided_slice %745 {offsets = [0, 0], sizes = [2, 32], strides = [1, 1]} : vector<2x128xf32> to vector<2x32xf32>
    %cst_113 = arith.constant 5.000000e-01 : f32
    %747 = vector.broadcast %cst_113 : f32 to vector<2x32xf32>
    %748 = arith.mulf %747, %746 : vector<2x32xf32>
    %749 = math.tanh %748 : vector<2x32xf32>
    %cst_114 = arith.constant 1.000000e+00 : f32
    %750 = vector.broadcast %cst_114 : f32 to vector<2x32xf32>
    %751 = arith.addf %749, %750 : vector<2x32xf32>
    %cst_115 = arith.constant 5.000000e-01 : f32
    %752 = vector.broadcast %cst_115 : f32 to vector<2x32xf32>
    %753 = arith.mulf %752, %751 : vector<2x32xf32>
    %754 = vector.extract_strided_slice %745 {offsets = [0, 32], sizes = [2, 32], strides = [1, 1]} : vector<2x128xf32> to vector<2x32xf32>
    %cst_116 = arith.constant 5.000000e-01 : f32
    %755 = vector.broadcast %cst_116 : f32 to vector<2x32xf32>
    %756 = arith.mulf %755, %754 : vector<2x32xf32>
    %757 = math.tanh %756 : vector<2x32xf32>
    %cst_117 = arith.constant 1.000000e+00 : f32
    %758 = vector.broadcast %cst_117 : f32 to vector<2x32xf32>
    %759 = arith.addf %757, %758 : vector<2x32xf32>
    %cst_118 = arith.constant 5.000000e-01 : f32
    %760 = vector.broadcast %cst_118 : f32 to vector<2x32xf32>
    %761 = arith.mulf %760, %759 : vector<2x32xf32>
    %762 = vector.extract_strided_slice %745 {offsets = [0, 64], sizes = [2, 32], strides = [1, 1]} : vector<2x128xf32> to vector<2x32xf32>
    %763 = math.tanh %762 : vector<2x32xf32>
    %764 = vector.extract_strided_slice %745 {offsets = [0, 96], sizes = [2, 32], strides = [1, 1]} : vector<2x128xf32> to vector<2x32xf32>
    %cst_119 = arith.constant 5.000000e-01 : f32
    %765 = vector.broadcast %cst_119 : f32 to vector<2x32xf32>
    %766 = arith.mulf %765, %764 : vector<2x32xf32>
    %767 = math.tanh %766 : vector<2x32xf32>
    %cst_120 = arith.constant 1.000000e+00 : f32
    %768 = vector.broadcast %cst_120 : f32 to vector<2x32xf32>
    %769 = arith.addf %767, %768 : vector<2x32xf32>
    %cst_121 = arith.constant 5.000000e-01 : f32
    %770 = vector.broadcast %cst_121 : f32 to vector<2x32xf32>
    %771 = arith.mulf %770, %769 : vector<2x32xf32>
    %772 = arith.mulf %753, %590 : vector<2x32xf32>
    %773 = arith.mulf %761, %763 : vector<2x32xf32>
    %774 = arith.addf %772, %773 : vector<2x32xf32>
    %775 = math.tanh %774 : vector<2x32xf32>
    %776 = arith.mulf %771, %775 : vector<2x32xf32>
    %cst_122 = arith.constant dense<0.000000e+00> : vector<2x4xf32>
    %777 = tpu.matmul %776, %0, %cst_122 {dimension_numbers = #tpu.dot_dimension_numbers<[1], [0], [0], [1], [0, 0, 1, 1], [], []>, precision = #tpu.contract_precision<fp32>} : vector<2x32xf32>, vector<32x4xf32>, vector<2x4xf32> -> vector<2x4xf32>
    %778 = vector.extract_strided_slice %38 {offsets = [8, 0], sizes = [2, 4], strides = [1, 1]} : vector<16x4xf32> to vector<2x4xf32>
    %779 = arith.addf %777, %778 : vector<2x4xf32>
    %cst_123 = arith.constant 5.000000e-01 : f32
    %780 = vector.broadcast %cst_123 : f32 to vector<2x4xf32>
    %781 = arith.mulf %780, %779 : vector<2x4xf32>
    %782 = math.cos %781 : vector<2x4xf32>
    %cst_124 = arith.constant 5.000000e-01 : f32
    %783 = vector.broadcast %cst_124 : f32 to vector<2x4xf32>
    %784 = arith.mulf %783, %779 : vector<2x4xf32>
    %785 = math.sin %784 : vector<2x4xf32>
    %786 = vector.extract_strided_slice %779 {offsets = [0, 0], sizes = [1, 4], strides = [1, 1]} : vector<2x4xf32> to vector<1x4xf32>
    %787 = arith.mulf %786, %786 : vector<1x4xf32>
    %cst_125 = arith.constant 1.000000e+00 : f32
    %788 = vector.broadcast %cst_125 : f32 to vector<1x4xf32>
    %789 = arith.addf %788, %787 : vector<1x4xf32>
    %790 = math.rsqrt %789 : vector<1x4xf32>
    %cst_126 = arith.constant 1.000000e+00 : f32
    %791 = vector.broadcast %cst_126 : f32 to vector<1x4xf32>
    %792 = arith.addf %791, %790 : vector<1x4xf32>
    %cst_127 = arith.constant 5.000000e-01 : f32
    %793 = vector.broadcast %cst_127 : f32 to vector<1x4xf32>
    %794 = arith.mulf %793, %792 : vector<1x4xf32>
    %795 = math.sqrt %794 : vector<1x4xf32>
    %cst_128 = arith.constant 0.000000e+00 : f32
    %796 = vector.broadcast %cst_128 : f32 to vector<1x4xf32>
    %797 = arith.cmpf oge, %786, %796 : vector<1x4xf32>
    %cst_129 = arith.constant 1.000000e+00 : f32
    %cst_130 = arith.constant -1.000000e+00 : f32
    %798 = vector.broadcast %cst_129 : f32 to vector<1x4xf32>
    %799 = vector.broadcast %cst_130 : f32 to vector<1x4xf32>
    %800 = arith.select %797, %798, %799 : vector<1x4xi1>, vector<1x4xf32>
    %cst_131 = arith.constant 1.000000e+00 : f32
    %801 = vector.broadcast %cst_131 : f32 to vector<1x4xf32>
    %802 = arith.subf %801, %790 : vector<1x4xf32>
    %cst_132 = arith.constant 5.000000e-01 : f32
    %803 = vector.broadcast %cst_132 : f32 to vector<1x4xf32>
    %804 = arith.mulf %803, %802 : vector<1x4xf32>
    %cst_133 = arith.constant 0.000000e+00 : f32
    %805 = vector.broadcast %cst_133 : f32 to vector<1x4xf32>
    %806 = arith.maximumf %804, %805 : vector<1x4xf32>
    %807 = math.sqrt %806 : vector<1x4xf32>
    %808 = arith.mulf %800, %807 : vector<1x4xf32>
    %809 = arith.subf %795, %808 : vector<1x4xf32>
    %cst_134 = arith.constant 0.707106769 : f32
    %810 = vector.broadcast %cst_134 : f32 to vector<1x4xf32>
    %811 = arith.mulf %809, %810 : vector<1x4xf32>
    %812 = arith.addf %795, %808 : vector<1x4xf32>
    %cst_135 = arith.constant 0.707106769 : f32
    %813 = vector.broadcast %cst_135 : f32 to vector<1x4xf32>
    %814 = arith.mulf %812, %813 : vector<1x4xf32>
    %815 = arith.mulf %795, %811 : vector<1x4xf32>
    %816 = vector.broadcast %815 : vector<1x4xf32> to vector<2x4xf32>
    %817 = arith.mulf %816, %782 : vector<2x4xf32>
    %818 = arith.mulf %808, %814 : vector<1x4xf32>
    %819 = vector.broadcast %818 : vector<1x4xf32> to vector<2x4xf32>
    %820 = arith.mulf %819, %785 : vector<2x4xf32>
    %821 = arith.subf %817, %820 : vector<2x4xf32>
    %822 = arith.mulf %808, %811 : vector<1x4xf32>
    %cst_136 = arith.constant 0.000000e+00 : f32
    %823 = vector.broadcast %cst_136 : f32 to vector<1x4xf32>
    %824 = arith.subf %823, %822 : vector<1x4xf32>
    %825 = vector.broadcast %824 : vector<1x4xf32> to vector<2x4xf32>
    %826 = arith.mulf %825, %782 : vector<2x4xf32>
    %827 = arith.mulf %795, %814 : vector<1x4xf32>
    %828 = vector.broadcast %827 : vector<1x4xf32> to vector<2x4xf32>
    %829 = arith.mulf %828, %785 : vector<2x4xf32>
    %830 = arith.subf %826, %829 : vector<2x4xf32>
    %831 = arith.mulf %795, %814 : vector<1x4xf32>
    %832 = vector.broadcast %831 : vector<1x4xf32> to vector<2x4xf32>
    %833 = arith.mulf %832, %782 : vector<2x4xf32>
    %834 = arith.mulf %808, %811 : vector<1x4xf32>
    %835 = vector.broadcast %834 : vector<1x4xf32> to vector<2x4xf32>
    %836 = arith.mulf %835, %785 : vector<2x4xf32>
    %837 = arith.subf %833, %836 : vector<2x4xf32>
    %838 = arith.mulf %808, %814 : vector<1x4xf32>
    %839 = vector.broadcast %838 : vector<1x4xf32> to vector<2x4xf32>
    %840 = arith.mulf %839, %782 : vector<2x4xf32>
    %841 = arith.mulf %795, %811 : vector<1x4xf32>
    %842 = vector.broadcast %841 : vector<1x4xf32> to vector<2x4xf32>
    %843 = arith.mulf %842, %785 : vector<2x4xf32>
    %844 = arith.addf %840, %843 : vector<2x4xf32>
    %845 = vector.extract_strided_slice %821 {offsets = [0, 0], sizes = [2, 1], strides = [1, 1]} : vector<2x4xf32> to vector<2x1xf32>
    %846 = vector.broadcast %845 : vector<2x1xf32> to vector<2x16xf32>
    %847 = arith.mulf %846, %12 : vector<2x16xf32>
    %848 = vector.extract_strided_slice %837 {offsets = [0, 0], sizes = [2, 1], strides = [1, 1]} : vector<2x4xf32> to vector<2x1xf32>
    %849 = vector.broadcast %848 : vector<2x1xf32> to vector<2x16xf32>
    %850 = arith.mulf %849, %24 : vector<2x16xf32>
    %851 = arith.addf %847, %850 : vector<2x16xf32>
    %852 = vector.extract_strided_slice %821 {offsets = [0, 1], sizes = [2, 1], strides = [1, 1]} : vector<2x4xf32> to vector<2x1xf32>
    %853 = vector.broadcast %852 : vector<2x1xf32> to vector<2x16xf32>
    %854 = arith.mulf %853, %15 : vector<2x16xf32>
    %855 = vector.extract_strided_slice %837 {offsets = [0, 1], sizes = [2, 1], strides = [1, 1]} : vector<2x4xf32> to vector<2x1xf32>
    %856 = vector.broadcast %855 : vector<2x1xf32> to vector<2x16xf32>
    %857 = arith.mulf %856, %27 : vector<2x16xf32>
    %858 = arith.addf %854, %857 : vector<2x16xf32>
    %859 = vector.extract_strided_slice %821 {offsets = [0, 2], sizes = [2, 1], strides = [1, 1]} : vector<2x4xf32> to vector<2x1xf32>
    %860 = vector.broadcast %859 : vector<2x1xf32> to vector<2x16xf32>
    %861 = arith.mulf %860, %18 : vector<2x16xf32>
    %862 = vector.extract_strided_slice %837 {offsets = [0, 2], sizes = [2, 1], strides = [1, 1]} : vector<2x4xf32> to vector<2x1xf32>
    %863 = vector.broadcast %862 : vector<2x1xf32> to vector<2x16xf32>
    %864 = arith.mulf %863, %30 : vector<2x16xf32>
    %865 = arith.addf %861, %864 : vector<2x16xf32>
    %866 = vector.extract_strided_slice %821 {offsets = [0, 3], sizes = [2, 1], strides = [1, 1]} : vector<2x4xf32> to vector<2x1xf32>
    %867 = vector.broadcast %866 : vector<2x1xf32> to vector<2x16xf32>
    %868 = arith.mulf %867, %21 : vector<2x16xf32>
    %869 = vector.extract_strided_slice %837 {offsets = [0, 3], sizes = [2, 1], strides = [1, 1]} : vector<2x4xf32> to vector<2x1xf32>
    %870 = vector.broadcast %869 : vector<2x1xf32> to vector<2x16xf32>
    %871 = arith.mulf %870, %33 : vector<2x16xf32>
    %872 = arith.addf %868, %871 : vector<2x16xf32>
    %873 = vector.extract_strided_slice %830 {offsets = [0, 0], sizes = [2, 1], strides = [1, 1]} : vector<2x4xf32> to vector<2x1xf32>
    %874 = vector.broadcast %873 : vector<2x1xf32> to vector<2x16xf32>
    %875 = arith.mulf %874, %12 : vector<2x16xf32>
    %876 = vector.extract_strided_slice %844 {offsets = [0, 0], sizes = [2, 1], strides = [1, 1]} : vector<2x4xf32> to vector<2x1xf32>
    %877 = vector.broadcast %876 : vector<2x1xf32> to vector<2x16xf32>
    %878 = arith.mulf %877, %24 : vector<2x16xf32>
    %879 = arith.addf %875, %878 : vector<2x16xf32>
    %880 = vector.extract_strided_slice %830 {offsets = [0, 1], sizes = [2, 1], strides = [1, 1]} : vector<2x4xf32> to vector<2x1xf32>
    %881 = vector.broadcast %880 : vector<2x1xf32> to vector<2x16xf32>
    %882 = arith.mulf %881, %15 : vector<2x16xf32>
    %883 = vector.extract_strided_slice %844 {offsets = [0, 1], sizes = [2, 1], strides = [1, 1]} : vector<2x4xf32> to vector<2x1xf32>
    %884 = vector.broadcast %883 : vector<2x1xf32> to vector<2x16xf32>
    %885 = arith.mulf %884, %27 : vector<2x16xf32>
    %886 = arith.addf %882, %885 : vector<2x16xf32>
    %887 = vector.extract_strided_slice %830 {offsets = [0, 2], sizes = [2, 1], strides = [1, 1]} : vector<2x4xf32> to vector<2x1xf32>
    %888 = vector.broadcast %887 : vector<2x1xf32> to vector<2x16xf32>
    %889 = arith.mulf %888, %18 : vector<2x16xf32>
    %890 = vector.extract_strided_slice %844 {offsets = [0, 2], sizes = [2, 1], strides = [1, 1]} : vector<2x4xf32> to vector<2x1xf32>
    %891 = vector.broadcast %890 : vector<2x1xf32> to vector<2x16xf32>
    %892 = arith.mulf %891, %30 : vector<2x16xf32>
    %893 = arith.addf %889, %892 : vector<2x16xf32>
    %894 = vector.extract_strided_slice %830 {offsets = [0, 3], sizes = [2, 1], strides = [1, 1]} : vector<2x4xf32> to vector<2x1xf32>
    %895 = vector.broadcast %894 : vector<2x1xf32> to vector<2x16xf32>
    %896 = arith.mulf %895, %21 : vector<2x16xf32>
    %897 = vector.extract_strided_slice %844 {offsets = [0, 3], sizes = [2, 1], strides = [1, 1]} : vector<2x4xf32> to vector<2x1xf32>
    %898 = vector.broadcast %897 : vector<2x1xf32> to vector<2x16xf32>
    %899 = arith.mulf %898, %33 : vector<2x16xf32>
    %900 = arith.addf %896, %899 : vector<2x16xf32>
    %901 = arith.mulf %851, %858 : vector<2x16xf32>
    %902 = arith.mulf %879, %886 : vector<2x16xf32>
    %903 = arith.subf %901, %902 : vector<2x16xf32>
    %904 = arith.mulf %851, %886 : vector<2x16xf32>
    %905 = arith.mulf %879, %858 : vector<2x16xf32>
    %906 = arith.addf %904, %905 : vector<2x16xf32>
    %907 = arith.mulf %865, %872 : vector<2x16xf32>
    %908 = arith.mulf %893, %900 : vector<2x16xf32>
    %909 = arith.subf %907, %908 : vector<2x16xf32>
    %910 = arith.mulf %865, %900 : vector<2x16xf32>
    %911 = arith.mulf %893, %872 : vector<2x16xf32>
    %912 = arith.addf %910, %911 : vector<2x16xf32>
    %913 = arith.mulf %903, %909 : vector<2x16xf32>
    %914 = arith.mulf %906, %912 : vector<2x16xf32>
    %915 = arith.subf %913, %914 : vector<2x16xf32>
    %916 = arith.mulf %903, %912 : vector<2x16xf32>
    %917 = arith.mulf %906, %909 : vector<2x16xf32>
    %918 = arith.addf %916, %917 : vector<2x16xf32>
    %919 = tpu.concatenate %915, %918 in 1 : vector<2x16xf32>, vector<2x16xf32> -> vector<2x32xf32>
    %920 = arith.truncf %919 : vector<2x32xf32> to vector<2x32xbf16>
    %cst_137 = arith.constant dense<0.000000e+00> : vector<2x128xf32>
    %921 = tpu.matmul %920, %2, %cst_137 {dimension_numbers = #tpu.dot_dimension_numbers<[1], [0], [0], [1], [0, 0, 1, 1], [], []>} : vector<2x32xbf16>, vector<32x128xbf16>, vector<2x128xf32> -> vector<2x128xf32>
    %922 = vector.extract_strided_slice %921 {offsets = [0, 0], sizes = [2, 64], strides = [1, 1]} : vector<2x128xf32> to vector<2x64xf32>
    %923 = vector.extract_strided_slice %921 {offsets = [0, 64], sizes = [2, 64], strides = [1, 1]} : vector<2x128xf32> to vector<2x64xf32>
    %924 = arith.mulf %922, %922 : vector<2x64xf32>
    %925 = arith.mulf %923, %923 : vector<2x64xf32>
    %926 = arith.addf %924, %925 : vector<2x64xf32>
    %927 = arith.truncf %926 : vector<2x64xf32> to vector<2x64xbf16>
    %cst_138 = arith.constant dense<0.000000e+00> : vector<2x128xf32>
    %928 = tpu.matmul %927, %3, %cst_138 {dimension_numbers = #tpu.dot_dimension_numbers<[1], [0], [0], [1], [0, 0, 1, 1], [], []>} : vector<2x64xbf16>, vector<64x128xbf16>, vector<2x128xf32> -> vector<2x128xf32>
    %929 = arith.addf %928, %6 : vector<2x128xf32>
    %930 = vector.extract_strided_slice %929 {offsets = [0, 0], sizes = [2, 32], strides = [1, 1]} : vector<2x128xf32> to vector<2x32xf32>
    %cst_139 = arith.constant 5.000000e-01 : f32
    %931 = vector.broadcast %cst_139 : f32 to vector<2x32xf32>
    %932 = arith.mulf %931, %930 : vector<2x32xf32>
    %933 = math.tanh %932 : vector<2x32xf32>
    %cst_140 = arith.constant 1.000000e+00 : f32
    %934 = vector.broadcast %cst_140 : f32 to vector<2x32xf32>
    %935 = arith.addf %933, %934 : vector<2x32xf32>
    %cst_141 = arith.constant 5.000000e-01 : f32
    %936 = vector.broadcast %cst_141 : f32 to vector<2x32xf32>
    %937 = arith.mulf %936, %935 : vector<2x32xf32>
    %938 = vector.extract_strided_slice %929 {offsets = [0, 32], sizes = [2, 32], strides = [1, 1]} : vector<2x128xf32> to vector<2x32xf32>
    %cst_142 = arith.constant 5.000000e-01 : f32
    %939 = vector.broadcast %cst_142 : f32 to vector<2x32xf32>
    %940 = arith.mulf %939, %938 : vector<2x32xf32>
    %941 = math.tanh %940 : vector<2x32xf32>
    %cst_143 = arith.constant 1.000000e+00 : f32
    %942 = vector.broadcast %cst_143 : f32 to vector<2x32xf32>
    %943 = arith.addf %941, %942 : vector<2x32xf32>
    %cst_144 = arith.constant 5.000000e-01 : f32
    %944 = vector.broadcast %cst_144 : f32 to vector<2x32xf32>
    %945 = arith.mulf %944, %943 : vector<2x32xf32>
    %946 = vector.extract_strided_slice %929 {offsets = [0, 64], sizes = [2, 32], strides = [1, 1]} : vector<2x128xf32> to vector<2x32xf32>
    %947 = math.tanh %946 : vector<2x32xf32>
    %948 = vector.extract_strided_slice %929 {offsets = [0, 96], sizes = [2, 32], strides = [1, 1]} : vector<2x128xf32> to vector<2x32xf32>
    %cst_145 = arith.constant 5.000000e-01 : f32
    %949 = vector.broadcast %cst_145 : f32 to vector<2x32xf32>
    %950 = arith.mulf %949, %948 : vector<2x32xf32>
    %951 = math.tanh %950 : vector<2x32xf32>
    %cst_146 = arith.constant 1.000000e+00 : f32
    %952 = vector.broadcast %cst_146 : f32 to vector<2x32xf32>
    %953 = arith.addf %951, %952 : vector<2x32xf32>
    %cst_147 = arith.constant 5.000000e-01 : f32
    %954 = vector.broadcast %cst_147 : f32 to vector<2x32xf32>
    %955 = arith.mulf %954, %953 : vector<2x32xf32>
    %956 = arith.mulf %937, %774 : vector<2x32xf32>
    %957 = arith.mulf %945, %947 : vector<2x32xf32>
    %958 = arith.addf %956, %957 : vector<2x32xf32>
    %959 = math.tanh %958 : vector<2x32xf32>
    %960 = arith.mulf %955, %959 : vector<2x32xf32>
    %cst_148 = arith.constant dense<0.000000e+00> : vector<2x4xf32>
    %961 = tpu.matmul %960, %0, %cst_148 {dimension_numbers = #tpu.dot_dimension_numbers<[1], [0], [0], [1], [0, 0, 1, 1], [], []>, precision = #tpu.contract_precision<fp32>} : vector<2x32xf32>, vector<32x4xf32>, vector<2x4xf32> -> vector<2x4xf32>
    %962 = vector.extract_strided_slice %38 {offsets = [10, 0], sizes = [2, 4], strides = [1, 1]} : vector<16x4xf32> to vector<2x4xf32>
    %963 = arith.addf %961, %962 : vector<2x4xf32>
    %cst_149 = arith.constant 5.000000e-01 : f32
    %964 = vector.broadcast %cst_149 : f32 to vector<2x4xf32>
    %965 = arith.mulf %964, %963 : vector<2x4xf32>
    %966 = math.cos %965 : vector<2x4xf32>
    %cst_150 = arith.constant 5.000000e-01 : f32
    %967 = vector.broadcast %cst_150 : f32 to vector<2x4xf32>
    %968 = arith.mulf %967, %963 : vector<2x4xf32>
    %969 = math.sin %968 : vector<2x4xf32>
    %970 = vector.extract_strided_slice %963 {offsets = [0, 0], sizes = [1, 4], strides = [1, 1]} : vector<2x4xf32> to vector<1x4xf32>
    %971 = arith.mulf %970, %970 : vector<1x4xf32>
    %cst_151 = arith.constant 1.000000e+00 : f32
    %972 = vector.broadcast %cst_151 : f32 to vector<1x4xf32>
    %973 = arith.addf %972, %971 : vector<1x4xf32>
    %974 = math.rsqrt %973 : vector<1x4xf32>
    %cst_152 = arith.constant 1.000000e+00 : f32
    %975 = vector.broadcast %cst_152 : f32 to vector<1x4xf32>
    %976 = arith.addf %975, %974 : vector<1x4xf32>
    %cst_153 = arith.constant 5.000000e-01 : f32
    %977 = vector.broadcast %cst_153 : f32 to vector<1x4xf32>
    %978 = arith.mulf %977, %976 : vector<1x4xf32>
    %979 = math.sqrt %978 : vector<1x4xf32>
    %cst_154 = arith.constant 0.000000e+00 : f32
    %980 = vector.broadcast %cst_154 : f32 to vector<1x4xf32>
    %981 = arith.cmpf oge, %970, %980 : vector<1x4xf32>
    %cst_155 = arith.constant 1.000000e+00 : f32
    %cst_156 = arith.constant -1.000000e+00 : f32
    %982 = vector.broadcast %cst_155 : f32 to vector<1x4xf32>
    %983 = vector.broadcast %cst_156 : f32 to vector<1x4xf32>
    %984 = arith.select %981, %982, %983 : vector<1x4xi1>, vector<1x4xf32>
    %cst_157 = arith.constant 1.000000e+00 : f32
    %985 = vector.broadcast %cst_157 : f32 to vector<1x4xf32>
    %986 = arith.subf %985, %974 : vector<1x4xf32>
    %cst_158 = arith.constant 5.000000e-01 : f32
    %987 = vector.broadcast %cst_158 : f32 to vector<1x4xf32>
    %988 = arith.mulf %987, %986 : vector<1x4xf32>
    %cst_159 = arith.constant 0.000000e+00 : f32
    %989 = vector.broadcast %cst_159 : f32 to vector<1x4xf32>
    %990 = arith.maximumf %988, %989 : vector<1x4xf32>
    %991 = math.sqrt %990 : vector<1x4xf32>
    %992 = arith.mulf %984, %991 : vector<1x4xf32>
    %993 = arith.subf %979, %992 : vector<1x4xf32>
    %cst_160 = arith.constant 0.707106769 : f32
    %994 = vector.broadcast %cst_160 : f32 to vector<1x4xf32>
    %995 = arith.mulf %993, %994 : vector<1x4xf32>
    %996 = arith.addf %979, %992 : vector<1x4xf32>
    %cst_161 = arith.constant 0.707106769 : f32
    %997 = vector.broadcast %cst_161 : f32 to vector<1x4xf32>
    %998 = arith.mulf %996, %997 : vector<1x4xf32>
    %999 = arith.mulf %979, %995 : vector<1x4xf32>
    %1000 = vector.broadcast %999 : vector<1x4xf32> to vector<2x4xf32>
    %1001 = arith.mulf %1000, %966 : vector<2x4xf32>
    %1002 = arith.mulf %992, %998 : vector<1x4xf32>
    %1003 = vector.broadcast %1002 : vector<1x4xf32> to vector<2x4xf32>
    %1004 = arith.mulf %1003, %969 : vector<2x4xf32>
    %1005 = arith.subf %1001, %1004 : vector<2x4xf32>
    %1006 = arith.mulf %992, %995 : vector<1x4xf32>
    %cst_162 = arith.constant 0.000000e+00 : f32
    %1007 = vector.broadcast %cst_162 : f32 to vector<1x4xf32>
    %1008 = arith.subf %1007, %1006 : vector<1x4xf32>
    %1009 = vector.broadcast %1008 : vector<1x4xf32> to vector<2x4xf32>
    %1010 = arith.mulf %1009, %966 : vector<2x4xf32>
    %1011 = arith.mulf %979, %998 : vector<1x4xf32>
    %1012 = vector.broadcast %1011 : vector<1x4xf32> to vector<2x4xf32>
    %1013 = arith.mulf %1012, %969 : vector<2x4xf32>
    %1014 = arith.subf %1010, %1013 : vector<2x4xf32>
    %1015 = arith.mulf %979, %998 : vector<1x4xf32>
    %1016 = vector.broadcast %1015 : vector<1x4xf32> to vector<2x4xf32>
    %1017 = arith.mulf %1016, %966 : vector<2x4xf32>
    %1018 = arith.mulf %992, %995 : vector<1x4xf32>
    %1019 = vector.broadcast %1018 : vector<1x4xf32> to vector<2x4xf32>
    %1020 = arith.mulf %1019, %969 : vector<2x4xf32>
    %1021 = arith.subf %1017, %1020 : vector<2x4xf32>
    %1022 = arith.mulf %992, %998 : vector<1x4xf32>
    %1023 = vector.broadcast %1022 : vector<1x4xf32> to vector<2x4xf32>
    %1024 = arith.mulf %1023, %966 : vector<2x4xf32>
    %1025 = arith.mulf %979, %995 : vector<1x4xf32>
    %1026 = vector.broadcast %1025 : vector<1x4xf32> to vector<2x4xf32>
    %1027 = arith.mulf %1026, %969 : vector<2x4xf32>
    %1028 = arith.addf %1024, %1027 : vector<2x4xf32>
    %1029 = vector.extract_strided_slice %1005 {offsets = [0, 0], sizes = [2, 1], strides = [1, 1]} : vector<2x4xf32> to vector<2x1xf32>
    %1030 = vector.broadcast %1029 : vector<2x1xf32> to vector<2x16xf32>
    %1031 = arith.mulf %1030, %12 : vector<2x16xf32>
    %1032 = vector.extract_strided_slice %1021 {offsets = [0, 0], sizes = [2, 1], strides = [1, 1]} : vector<2x4xf32> to vector<2x1xf32>
    %1033 = vector.broadcast %1032 : vector<2x1xf32> to vector<2x16xf32>
    %1034 = arith.mulf %1033, %24 : vector<2x16xf32>
    %1035 = arith.addf %1031, %1034 : vector<2x16xf32>
    %1036 = vector.extract_strided_slice %1005 {offsets = [0, 1], sizes = [2, 1], strides = [1, 1]} : vector<2x4xf32> to vector<2x1xf32>
    %1037 = vector.broadcast %1036 : vector<2x1xf32> to vector<2x16xf32>
    %1038 = arith.mulf %1037, %15 : vector<2x16xf32>
    %1039 = vector.extract_strided_slice %1021 {offsets = [0, 1], sizes = [2, 1], strides = [1, 1]} : vector<2x4xf32> to vector<2x1xf32>
    %1040 = vector.broadcast %1039 : vector<2x1xf32> to vector<2x16xf32>
    %1041 = arith.mulf %1040, %27 : vector<2x16xf32>
    %1042 = arith.addf %1038, %1041 : vector<2x16xf32>
    %1043 = vector.extract_strided_slice %1005 {offsets = [0, 2], sizes = [2, 1], strides = [1, 1]} : vector<2x4xf32> to vector<2x1xf32>
    %1044 = vector.broadcast %1043 : vector<2x1xf32> to vector<2x16xf32>
    %1045 = arith.mulf %1044, %18 : vector<2x16xf32>
    %1046 = vector.extract_strided_slice %1021 {offsets = [0, 2], sizes = [2, 1], strides = [1, 1]} : vector<2x4xf32> to vector<2x1xf32>
    %1047 = vector.broadcast %1046 : vector<2x1xf32> to vector<2x16xf32>
    %1048 = arith.mulf %1047, %30 : vector<2x16xf32>
    %1049 = arith.addf %1045, %1048 : vector<2x16xf32>
    %1050 = vector.extract_strided_slice %1005 {offsets = [0, 3], sizes = [2, 1], strides = [1, 1]} : vector<2x4xf32> to vector<2x1xf32>
    %1051 = vector.broadcast %1050 : vector<2x1xf32> to vector<2x16xf32>
    %1052 = arith.mulf %1051, %21 : vector<2x16xf32>
    %1053 = vector.extract_strided_slice %1021 {offsets = [0, 3], sizes = [2, 1], strides = [1, 1]} : vector<2x4xf32> to vector<2x1xf32>
    %1054 = vector.broadcast %1053 : vector<2x1xf32> to vector<2x16xf32>
    %1055 = arith.mulf %1054, %33 : vector<2x16xf32>
    %1056 = arith.addf %1052, %1055 : vector<2x16xf32>
    %1057 = vector.extract_strided_slice %1014 {offsets = [0, 0], sizes = [2, 1], strides = [1, 1]} : vector<2x4xf32> to vector<2x1xf32>
    %1058 = vector.broadcast %1057 : vector<2x1xf32> to vector<2x16xf32>
    %1059 = arith.mulf %1058, %12 : vector<2x16xf32>
    %1060 = vector.extract_strided_slice %1028 {offsets = [0, 0], sizes = [2, 1], strides = [1, 1]} : vector<2x4xf32> to vector<2x1xf32>
    %1061 = vector.broadcast %1060 : vector<2x1xf32> to vector<2x16xf32>
    %1062 = arith.mulf %1061, %24 : vector<2x16xf32>
    %1063 = arith.addf %1059, %1062 : vector<2x16xf32>
    %1064 = vector.extract_strided_slice %1014 {offsets = [0, 1], sizes = [2, 1], strides = [1, 1]} : vector<2x4xf32> to vector<2x1xf32>
    %1065 = vector.broadcast %1064 : vector<2x1xf32> to vector<2x16xf32>
    %1066 = arith.mulf %1065, %15 : vector<2x16xf32>
    %1067 = vector.extract_strided_slice %1028 {offsets = [0, 1], sizes = [2, 1], strides = [1, 1]} : vector<2x4xf32> to vector<2x1xf32>
    %1068 = vector.broadcast %1067 : vector<2x1xf32> to vector<2x16xf32>
    %1069 = arith.mulf %1068, %27 : vector<2x16xf32>
    %1070 = arith.addf %1066, %1069 : vector<2x16xf32>
    %1071 = vector.extract_strided_slice %1014 {offsets = [0, 2], sizes = [2, 1], strides = [1, 1]} : vector<2x4xf32> to vector<2x1xf32>
    %1072 = vector.broadcast %1071 : vector<2x1xf32> to vector<2x16xf32>
    %1073 = arith.mulf %1072, %18 : vector<2x16xf32>
    %1074 = vector.extract_strided_slice %1028 {offsets = [0, 2], sizes = [2, 1], strides = [1, 1]} : vector<2x4xf32> to vector<2x1xf32>
    %1075 = vector.broadcast %1074 : vector<2x1xf32> to vector<2x16xf32>
    %1076 = arith.mulf %1075, %30 : vector<2x16xf32>
    %1077 = arith.addf %1073, %1076 : vector<2x16xf32>
    %1078 = vector.extract_strided_slice %1014 {offsets = [0, 3], sizes = [2, 1], strides = [1, 1]} : vector<2x4xf32> to vector<2x1xf32>
    %1079 = vector.broadcast %1078 : vector<2x1xf32> to vector<2x16xf32>
    %1080 = arith.mulf %1079, %21 : vector<2x16xf32>
    %1081 = vector.extract_strided_slice %1028 {offsets = [0, 3], sizes = [2, 1], strides = [1, 1]} : vector<2x4xf32> to vector<2x1xf32>
    %1082 = vector.broadcast %1081 : vector<2x1xf32> to vector<2x16xf32>
    %1083 = arith.mulf %1082, %33 : vector<2x16xf32>
    %1084 = arith.addf %1080, %1083 : vector<2x16xf32>
    %1085 = arith.mulf %1035, %1042 : vector<2x16xf32>
    %1086 = arith.mulf %1063, %1070 : vector<2x16xf32>
    %1087 = arith.subf %1085, %1086 : vector<2x16xf32>
    %1088 = arith.mulf %1035, %1070 : vector<2x16xf32>
    %1089 = arith.mulf %1063, %1042 : vector<2x16xf32>
    %1090 = arith.addf %1088, %1089 : vector<2x16xf32>
    %1091 = arith.mulf %1049, %1056 : vector<2x16xf32>
    %1092 = arith.mulf %1077, %1084 : vector<2x16xf32>
    %1093 = arith.subf %1091, %1092 : vector<2x16xf32>
    %1094 = arith.mulf %1049, %1084 : vector<2x16xf32>
    %1095 = arith.mulf %1077, %1056 : vector<2x16xf32>
    %1096 = arith.addf %1094, %1095 : vector<2x16xf32>
    %1097 = arith.mulf %1087, %1093 : vector<2x16xf32>
    %1098 = arith.mulf %1090, %1096 : vector<2x16xf32>
    %1099 = arith.subf %1097, %1098 : vector<2x16xf32>
    %1100 = arith.mulf %1087, %1096 : vector<2x16xf32>
    %1101 = arith.mulf %1090, %1093 : vector<2x16xf32>
    %1102 = arith.addf %1100, %1101 : vector<2x16xf32>
    %1103 = tpu.concatenate %1099, %1102 in 1 : vector<2x16xf32>, vector<2x16xf32> -> vector<2x32xf32>
    %1104 = arith.truncf %1103 : vector<2x32xf32> to vector<2x32xbf16>
    %cst_163 = arith.constant dense<0.000000e+00> : vector<2x128xf32>
    %1105 = tpu.matmul %1104, %2, %cst_163 {dimension_numbers = #tpu.dot_dimension_numbers<[1], [0], [0], [1], [0, 0, 1, 1], [], []>} : vector<2x32xbf16>, vector<32x128xbf16>, vector<2x128xf32> -> vector<2x128xf32>
    %1106 = vector.extract_strided_slice %1105 {offsets = [0, 0], sizes = [2, 64], strides = [1, 1]} : vector<2x128xf32> to vector<2x64xf32>
    %1107 = vector.extract_strided_slice %1105 {offsets = [0, 64], sizes = [2, 64], strides = [1, 1]} : vector<2x128xf32> to vector<2x64xf32>
    %1108 = arith.mulf %1106, %1106 : vector<2x64xf32>
    %1109 = arith.mulf %1107, %1107 : vector<2x64xf32>
    %1110 = arith.addf %1108, %1109 : vector<2x64xf32>
    %1111 = arith.truncf %1110 : vector<2x64xf32> to vector<2x64xbf16>
    %cst_164 = arith.constant dense<0.000000e+00> : vector<2x128xf32>
    %1112 = tpu.matmul %1111, %3, %cst_164 {dimension_numbers = #tpu.dot_dimension_numbers<[1], [0], [0], [1], [0, 0, 1, 1], [], []>} : vector<2x64xbf16>, vector<64x128xbf16>, vector<2x128xf32> -> vector<2x128xf32>
    %1113 = arith.addf %1112, %6 : vector<2x128xf32>
    %1114 = vector.extract_strided_slice %1113 {offsets = [0, 0], sizes = [2, 32], strides = [1, 1]} : vector<2x128xf32> to vector<2x32xf32>
    %cst_165 = arith.constant 5.000000e-01 : f32
    %1115 = vector.broadcast %cst_165 : f32 to vector<2x32xf32>
    %1116 = arith.mulf %1115, %1114 : vector<2x32xf32>
    %1117 = math.tanh %1116 : vector<2x32xf32>
    %cst_166 = arith.constant 1.000000e+00 : f32
    %1118 = vector.broadcast %cst_166 : f32 to vector<2x32xf32>
    %1119 = arith.addf %1117, %1118 : vector<2x32xf32>
    %cst_167 = arith.constant 5.000000e-01 : f32
    %1120 = vector.broadcast %cst_167 : f32 to vector<2x32xf32>
    %1121 = arith.mulf %1120, %1119 : vector<2x32xf32>
    %1122 = vector.extract_strided_slice %1113 {offsets = [0, 32], sizes = [2, 32], strides = [1, 1]} : vector<2x128xf32> to vector<2x32xf32>
    %cst_168 = arith.constant 5.000000e-01 : f32
    %1123 = vector.broadcast %cst_168 : f32 to vector<2x32xf32>
    %1124 = arith.mulf %1123, %1122 : vector<2x32xf32>
    %1125 = math.tanh %1124 : vector<2x32xf32>
    %cst_169 = arith.constant 1.000000e+00 : f32
    %1126 = vector.broadcast %cst_169 : f32 to vector<2x32xf32>
    %1127 = arith.addf %1125, %1126 : vector<2x32xf32>
    %cst_170 = arith.constant 5.000000e-01 : f32
    %1128 = vector.broadcast %cst_170 : f32 to vector<2x32xf32>
    %1129 = arith.mulf %1128, %1127 : vector<2x32xf32>
    %1130 = vector.extract_strided_slice %1113 {offsets = [0, 64], sizes = [2, 32], strides = [1, 1]} : vector<2x128xf32> to vector<2x32xf32>
    %1131 = math.tanh %1130 : vector<2x32xf32>
    %1132 = vector.extract_strided_slice %1113 {offsets = [0, 96], sizes = [2, 32], strides = [1, 1]} : vector<2x128xf32> to vector<2x32xf32>
    %cst_171 = arith.constant 5.000000e-01 : f32
    %1133 = vector.broadcast %cst_171 : f32 to vector<2x32xf32>
    %1134 = arith.mulf %1133, %1132 : vector<2x32xf32>
    %1135 = math.tanh %1134 : vector<2x32xf32>
    %cst_172 = arith.constant 1.000000e+00 : f32
    %1136 = vector.broadcast %cst_172 : f32 to vector<2x32xf32>
    %1137 = arith.addf %1135, %1136 : vector<2x32xf32>
    %cst_173 = arith.constant 5.000000e-01 : f32
    %1138 = vector.broadcast %cst_173 : f32 to vector<2x32xf32>
    %1139 = arith.mulf %1138, %1137 : vector<2x32xf32>
    %1140 = arith.mulf %1121, %958 : vector<2x32xf32>
    %1141 = arith.mulf %1129, %1131 : vector<2x32xf32>
    %1142 = arith.addf %1140, %1141 : vector<2x32xf32>
    %1143 = math.tanh %1142 : vector<2x32xf32>
    %1144 = arith.mulf %1139, %1143 : vector<2x32xf32>
    %cst_174 = arith.constant dense<0.000000e+00> : vector<2x4xf32>
    %1145 = tpu.matmul %1144, %0, %cst_174 {dimension_numbers = #tpu.dot_dimension_numbers<[1], [0], [0], [1], [0, 0, 1, 1], [], []>, precision = #tpu.contract_precision<fp32>} : vector<2x32xf32>, vector<32x4xf32>, vector<2x4xf32> -> vector<2x4xf32>
    %1146 = vector.extract_strided_slice %38 {offsets = [12, 0], sizes = [2, 4], strides = [1, 1]} : vector<16x4xf32> to vector<2x4xf32>
    %1147 = arith.addf %1145, %1146 : vector<2x4xf32>
    %cst_175 = arith.constant 5.000000e-01 : f32
    %1148 = vector.broadcast %cst_175 : f32 to vector<2x4xf32>
    %1149 = arith.mulf %1148, %1147 : vector<2x4xf32>
    %1150 = math.cos %1149 : vector<2x4xf32>
    %cst_176 = arith.constant 5.000000e-01 : f32
    %1151 = vector.broadcast %cst_176 : f32 to vector<2x4xf32>
    %1152 = arith.mulf %1151, %1147 : vector<2x4xf32>
    %1153 = math.sin %1152 : vector<2x4xf32>
    %1154 = vector.extract_strided_slice %1147 {offsets = [0, 0], sizes = [1, 4], strides = [1, 1]} : vector<2x4xf32> to vector<1x4xf32>
    %1155 = arith.mulf %1154, %1154 : vector<1x4xf32>
    %cst_177 = arith.constant 1.000000e+00 : f32
    %1156 = vector.broadcast %cst_177 : f32 to vector<1x4xf32>
    %1157 = arith.addf %1156, %1155 : vector<1x4xf32>
    %1158 = math.rsqrt %1157 : vector<1x4xf32>
    %cst_178 = arith.constant 1.000000e+00 : f32
    %1159 = vector.broadcast %cst_178 : f32 to vector<1x4xf32>
    %1160 = arith.addf %1159, %1158 : vector<1x4xf32>
    %cst_179 = arith.constant 5.000000e-01 : f32
    %1161 = vector.broadcast %cst_179 : f32 to vector<1x4xf32>
    %1162 = arith.mulf %1161, %1160 : vector<1x4xf32>
    %1163 = math.sqrt %1162 : vector<1x4xf32>
    %cst_180 = arith.constant 0.000000e+00 : f32
    %1164 = vector.broadcast %cst_180 : f32 to vector<1x4xf32>
    %1165 = arith.cmpf oge, %1154, %1164 : vector<1x4xf32>
    %cst_181 = arith.constant 1.000000e+00 : f32
    %cst_182 = arith.constant -1.000000e+00 : f32
    %1166 = vector.broadcast %cst_181 : f32 to vector<1x4xf32>
    %1167 = vector.broadcast %cst_182 : f32 to vector<1x4xf32>
    %1168 = arith.select %1165, %1166, %1167 : vector<1x4xi1>, vector<1x4xf32>
    %cst_183 = arith.constant 1.000000e+00 : f32
    %1169 = vector.broadcast %cst_183 : f32 to vector<1x4xf32>
    %1170 = arith.subf %1169, %1158 : vector<1x4xf32>
    %cst_184 = arith.constant 5.000000e-01 : f32
    %1171 = vector.broadcast %cst_184 : f32 to vector<1x4xf32>
    %1172 = arith.mulf %1171, %1170 : vector<1x4xf32>
    %cst_185 = arith.constant 0.000000e+00 : f32
    %1173 = vector.broadcast %cst_185 : f32 to vector<1x4xf32>
    %1174 = arith.maximumf %1172, %1173 : vector<1x4xf32>
    %1175 = math.sqrt %1174 : vector<1x4xf32>
    %1176 = arith.mulf %1168, %1175 : vector<1x4xf32>
    %1177 = arith.subf %1163, %1176 : vector<1x4xf32>
    %cst_186 = arith.constant 0.707106769 : f32
    %1178 = vector.broadcast %cst_186 : f32 to vector<1x4xf32>
    %1179 = arith.mulf %1177, %1178 : vector<1x4xf32>
    %1180 = arith.addf %1163, %1176 : vector<1x4xf32>
    %cst_187 = arith.constant 0.707106769 : f32
    %1181 = vector.broadcast %cst_187 : f32 to vector<1x4xf32>
    %1182 = arith.mulf %1180, %1181 : vector<1x4xf32>
    %1183 = arith.mulf %1163, %1179 : vector<1x4xf32>
    %1184 = vector.broadcast %1183 : vector<1x4xf32> to vector<2x4xf32>
    %1185 = arith.mulf %1184, %1150 : vector<2x4xf32>
    %1186 = arith.mulf %1176, %1182 : vector<1x4xf32>
    %1187 = vector.broadcast %1186 : vector<1x4xf32> to vector<2x4xf32>
    %1188 = arith.mulf %1187, %1153 : vector<2x4xf32>
    %1189 = arith.subf %1185, %1188 : vector<2x4xf32>
    %1190 = arith.mulf %1176, %1179 : vector<1x4xf32>
    %cst_188 = arith.constant 0.000000e+00 : f32
    %1191 = vector.broadcast %cst_188 : f32 to vector<1x4xf32>
    %1192 = arith.subf %1191, %1190 : vector<1x4xf32>
    %1193 = vector.broadcast %1192 : vector<1x4xf32> to vector<2x4xf32>
    %1194 = arith.mulf %1193, %1150 : vector<2x4xf32>
    %1195 = arith.mulf %1163, %1182 : vector<1x4xf32>
    %1196 = vector.broadcast %1195 : vector<1x4xf32> to vector<2x4xf32>
    %1197 = arith.mulf %1196, %1153 : vector<2x4xf32>
    %1198 = arith.subf %1194, %1197 : vector<2x4xf32>
    %1199 = arith.mulf %1163, %1182 : vector<1x4xf32>
    %1200 = vector.broadcast %1199 : vector<1x4xf32> to vector<2x4xf32>
    %1201 = arith.mulf %1200, %1150 : vector<2x4xf32>
    %1202 = arith.mulf %1176, %1179 : vector<1x4xf32>
    %1203 = vector.broadcast %1202 : vector<1x4xf32> to vector<2x4xf32>
    %1204 = arith.mulf %1203, %1153 : vector<2x4xf32>
    %1205 = arith.subf %1201, %1204 : vector<2x4xf32>
    %1206 = arith.mulf %1176, %1182 : vector<1x4xf32>
    %1207 = vector.broadcast %1206 : vector<1x4xf32> to vector<2x4xf32>
    %1208 = arith.mulf %1207, %1150 : vector<2x4xf32>
    %1209 = arith.mulf %1163, %1179 : vector<1x4xf32>
    %1210 = vector.broadcast %1209 : vector<1x4xf32> to vector<2x4xf32>
    %1211 = arith.mulf %1210, %1153 : vector<2x4xf32>
    %1212 = arith.addf %1208, %1211 : vector<2x4xf32>
    %1213 = vector.extract_strided_slice %1189 {offsets = [0, 0], sizes = [2, 1], strides = [1, 1]} : vector<2x4xf32> to vector<2x1xf32>
    %1214 = vector.broadcast %1213 : vector<2x1xf32> to vector<2x16xf32>
    %1215 = arith.mulf %1214, %12 : vector<2x16xf32>
    %1216 = vector.extract_strided_slice %1205 {offsets = [0, 0], sizes = [2, 1], strides = [1, 1]} : vector<2x4xf32> to vector<2x1xf32>
    %1217 = vector.broadcast %1216 : vector<2x1xf32> to vector<2x16xf32>
    %1218 = arith.mulf %1217, %24 : vector<2x16xf32>
    %1219 = arith.addf %1215, %1218 : vector<2x16xf32>
    %1220 = vector.extract_strided_slice %1189 {offsets = [0, 1], sizes = [2, 1], strides = [1, 1]} : vector<2x4xf32> to vector<2x1xf32>
    %1221 = vector.broadcast %1220 : vector<2x1xf32> to vector<2x16xf32>
    %1222 = arith.mulf %1221, %15 : vector<2x16xf32>
    %1223 = vector.extract_strided_slice %1205 {offsets = [0, 1], sizes = [2, 1], strides = [1, 1]} : vector<2x4xf32> to vector<2x1xf32>
    %1224 = vector.broadcast %1223 : vector<2x1xf32> to vector<2x16xf32>
    %1225 = arith.mulf %1224, %27 : vector<2x16xf32>
    %1226 = arith.addf %1222, %1225 : vector<2x16xf32>
    %1227 = vector.extract_strided_slice %1189 {offsets = [0, 2], sizes = [2, 1], strides = [1, 1]} : vector<2x4xf32> to vector<2x1xf32>
    %1228 = vector.broadcast %1227 : vector<2x1xf32> to vector<2x16xf32>
    %1229 = arith.mulf %1228, %18 : vector<2x16xf32>
    %1230 = vector.extract_strided_slice %1205 {offsets = [0, 2], sizes = [2, 1], strides = [1, 1]} : vector<2x4xf32> to vector<2x1xf32>
    %1231 = vector.broadcast %1230 : vector<2x1xf32> to vector<2x16xf32>
    %1232 = arith.mulf %1231, %30 : vector<2x16xf32>
    %1233 = arith.addf %1229, %1232 : vector<2x16xf32>
    %1234 = vector.extract_strided_slice %1189 {offsets = [0, 3], sizes = [2, 1], strides = [1, 1]} : vector<2x4xf32> to vector<2x1xf32>
    %1235 = vector.broadcast %1234 : vector<2x1xf32> to vector<2x16xf32>
    %1236 = arith.mulf %1235, %21 : vector<2x16xf32>
    %1237 = vector.extract_strided_slice %1205 {offsets = [0, 3], sizes = [2, 1], strides = [1, 1]} : vector<2x4xf32> to vector<2x1xf32>
    %1238 = vector.broadcast %1237 : vector<2x1xf32> to vector<2x16xf32>
    %1239 = arith.mulf %1238, %33 : vector<2x16xf32>
    %1240 = arith.addf %1236, %1239 : vector<2x16xf32>
    %1241 = vector.extract_strided_slice %1198 {offsets = [0, 0], sizes = [2, 1], strides = [1, 1]} : vector<2x4xf32> to vector<2x1xf32>
    %1242 = vector.broadcast %1241 : vector<2x1xf32> to vector<2x16xf32>
    %1243 = arith.mulf %1242, %12 : vector<2x16xf32>
    %1244 = vector.extract_strided_slice %1212 {offsets = [0, 0], sizes = [2, 1], strides = [1, 1]} : vector<2x4xf32> to vector<2x1xf32>
    %1245 = vector.broadcast %1244 : vector<2x1xf32> to vector<2x16xf32>
    %1246 = arith.mulf %1245, %24 : vector<2x16xf32>
    %1247 = arith.addf %1243, %1246 : vector<2x16xf32>
    %1248 = vector.extract_strided_slice %1198 {offsets = [0, 1], sizes = [2, 1], strides = [1, 1]} : vector<2x4xf32> to vector<2x1xf32>
    %1249 = vector.broadcast %1248 : vector<2x1xf32> to vector<2x16xf32>
    %1250 = arith.mulf %1249, %15 : vector<2x16xf32>
    %1251 = vector.extract_strided_slice %1212 {offsets = [0, 1], sizes = [2, 1], strides = [1, 1]} : vector<2x4xf32> to vector<2x1xf32>
    %1252 = vector.broadcast %1251 : vector<2x1xf32> to vector<2x16xf32>
    %1253 = arith.mulf %1252, %27 : vector<2x16xf32>
    %1254 = arith.addf %1250, %1253 : vector<2x16xf32>
    %1255 = vector.extract_strided_slice %1198 {offsets = [0, 2], sizes = [2, 1], strides = [1, 1]} : vector<2x4xf32> to vector<2x1xf32>
    %1256 = vector.broadcast %1255 : vector<2x1xf32> to vector<2x16xf32>
    %1257 = arith.mulf %1256, %18 : vector<2x16xf32>
    %1258 = vector.extract_strided_slice %1212 {offsets = [0, 2], sizes = [2, 1], strides = [1, 1]} : vector<2x4xf32> to vector<2x1xf32>
    %1259 = vector.broadcast %1258 : vector<2x1xf32> to vector<2x16xf32>
    %1260 = arith.mulf %1259, %30 : vector<2x16xf32>
    %1261 = arith.addf %1257, %1260 : vector<2x16xf32>
    %1262 = vector.extract_strided_slice %1198 {offsets = [0, 3], sizes = [2, 1], strides = [1, 1]} : vector<2x4xf32> to vector<2x1xf32>
    %1263 = vector.broadcast %1262 : vector<2x1xf32> to vector<2x16xf32>
    %1264 = arith.mulf %1263, %21 : vector<2x16xf32>
    %1265 = vector.extract_strided_slice %1212 {offsets = [0, 3], sizes = [2, 1], strides = [1, 1]} : vector<2x4xf32> to vector<2x1xf32>
    %1266 = vector.broadcast %1265 : vector<2x1xf32> to vector<2x16xf32>
    %1267 = arith.mulf %1266, %33 : vector<2x16xf32>
    %1268 = arith.addf %1264, %1267 : vector<2x16xf32>
    %1269 = arith.mulf %1219, %1226 : vector<2x16xf32>
    %1270 = arith.mulf %1247, %1254 : vector<2x16xf32>
    %1271 = arith.subf %1269, %1270 : vector<2x16xf32>
    %1272 = arith.mulf %1219, %1254 : vector<2x16xf32>
    %1273 = arith.mulf %1247, %1226 : vector<2x16xf32>
    %1274 = arith.addf %1272, %1273 : vector<2x16xf32>
    %1275 = arith.mulf %1233, %1240 : vector<2x16xf32>
    %1276 = arith.mulf %1261, %1268 : vector<2x16xf32>
    %1277 = arith.subf %1275, %1276 : vector<2x16xf32>
    %1278 = arith.mulf %1233, %1268 : vector<2x16xf32>
    %1279 = arith.mulf %1261, %1240 : vector<2x16xf32>
    %1280 = arith.addf %1278, %1279 : vector<2x16xf32>
    %1281 = arith.mulf %1271, %1277 : vector<2x16xf32>
    %1282 = arith.mulf %1274, %1280 : vector<2x16xf32>
    %1283 = arith.subf %1281, %1282 : vector<2x16xf32>
    %1284 = arith.mulf %1271, %1280 : vector<2x16xf32>
    %1285 = arith.mulf %1274, %1277 : vector<2x16xf32>
    %1286 = arith.addf %1284, %1285 : vector<2x16xf32>
    %1287 = tpu.concatenate %1283, %1286 in 1 : vector<2x16xf32>, vector<2x16xf32> -> vector<2x32xf32>
    %1288 = arith.truncf %1287 : vector<2x32xf32> to vector<2x32xbf16>
    %cst_189 = arith.constant dense<0.000000e+00> : vector<2x128xf32>
    %1289 = tpu.matmul %1288, %2, %cst_189 {dimension_numbers = #tpu.dot_dimension_numbers<[1], [0], [0], [1], [0, 0, 1, 1], [], []>} : vector<2x32xbf16>, vector<32x128xbf16>, vector<2x128xf32> -> vector<2x128xf32>
    %1290 = vector.extract_strided_slice %1289 {offsets = [0, 0], sizes = [2, 64], strides = [1, 1]} : vector<2x128xf32> to vector<2x64xf32>
    %1291 = vector.extract_strided_slice %1289 {offsets = [0, 64], sizes = [2, 64], strides = [1, 1]} : vector<2x128xf32> to vector<2x64xf32>
    %1292 = arith.mulf %1290, %1290 : vector<2x64xf32>
    %1293 = arith.mulf %1291, %1291 : vector<2x64xf32>
    %1294 = arith.addf %1292, %1293 : vector<2x64xf32>
    %1295 = arith.truncf %1294 : vector<2x64xf32> to vector<2x64xbf16>
    %cst_190 = arith.constant dense<0.000000e+00> : vector<2x128xf32>
    %1296 = tpu.matmul %1295, %3, %cst_190 {dimension_numbers = #tpu.dot_dimension_numbers<[1], [0], [0], [1], [0, 0, 1, 1], [], []>} : vector<2x64xbf16>, vector<64x128xbf16>, vector<2x128xf32> -> vector<2x128xf32>
    %1297 = arith.addf %1296, %6 : vector<2x128xf32>
    %1298 = vector.extract_strided_slice %1297 {offsets = [0, 0], sizes = [2, 32], strides = [1, 1]} : vector<2x128xf32> to vector<2x32xf32>
    %cst_191 = arith.constant 5.000000e-01 : f32
    %1299 = vector.broadcast %cst_191 : f32 to vector<2x32xf32>
    %1300 = arith.mulf %1299, %1298 : vector<2x32xf32>
    %1301 = math.tanh %1300 : vector<2x32xf32>
    %cst_192 = arith.constant 1.000000e+00 : f32
    %1302 = vector.broadcast %cst_192 : f32 to vector<2x32xf32>
    %1303 = arith.addf %1301, %1302 : vector<2x32xf32>
    %cst_193 = arith.constant 5.000000e-01 : f32
    %1304 = vector.broadcast %cst_193 : f32 to vector<2x32xf32>
    %1305 = arith.mulf %1304, %1303 : vector<2x32xf32>
    %1306 = vector.extract_strided_slice %1297 {offsets = [0, 32], sizes = [2, 32], strides = [1, 1]} : vector<2x128xf32> to vector<2x32xf32>
    %cst_194 = arith.constant 5.000000e-01 : f32
    %1307 = vector.broadcast %cst_194 : f32 to vector<2x32xf32>
    %1308 = arith.mulf %1307, %1306 : vector<2x32xf32>
    %1309 = math.tanh %1308 : vector<2x32xf32>
    %cst_195 = arith.constant 1.000000e+00 : f32
    %1310 = vector.broadcast %cst_195 : f32 to vector<2x32xf32>
    %1311 = arith.addf %1309, %1310 : vector<2x32xf32>
    %cst_196 = arith.constant 5.000000e-01 : f32
    %1312 = vector.broadcast %cst_196 : f32 to vector<2x32xf32>
    %1313 = arith.mulf %1312, %1311 : vector<2x32xf32>
    %1314 = vector.extract_strided_slice %1297 {offsets = [0, 64], sizes = [2, 32], strides = [1, 1]} : vector<2x128xf32> to vector<2x32xf32>
    %1315 = math.tanh %1314 : vector<2x32xf32>
    %1316 = vector.extract_strided_slice %1297 {offsets = [0, 96], sizes = [2, 32], strides = [1, 1]} : vector<2x128xf32> to vector<2x32xf32>
    %cst_197 = arith.constant 5.000000e-01 : f32
    %1317 = vector.broadcast %cst_197 : f32 to vector<2x32xf32>
    %1318 = arith.mulf %1317, %1316 : vector<2x32xf32>
    %1319 = math.tanh %1318 : vector<2x32xf32>
    %cst_198 = arith.constant 1.000000e+00 : f32
    %1320 = vector.broadcast %cst_198 : f32 to vector<2x32xf32>
    %1321 = arith.addf %1319, %1320 : vector<2x32xf32>
    %cst_199 = arith.constant 5.000000e-01 : f32
    %1322 = vector.broadcast %cst_199 : f32 to vector<2x32xf32>
    %1323 = arith.mulf %1322, %1321 : vector<2x32xf32>
    %1324 = arith.mulf %1305, %1142 : vector<2x32xf32>
    %1325 = arith.mulf %1313, %1315 : vector<2x32xf32>
    %1326 = arith.addf %1324, %1325 : vector<2x32xf32>
    %1327 = math.tanh %1326 : vector<2x32xf32>
    %1328 = arith.mulf %1323, %1327 : vector<2x32xf32>
    %cst_200 = arith.constant dense<0.000000e+00> : vector<2x4xf32>
    %1329 = tpu.matmul %1328, %0, %cst_200 {dimension_numbers = #tpu.dot_dimension_numbers<[1], [0], [0], [1], [0, 0, 1, 1], [], []>, precision = #tpu.contract_precision<fp32>} : vector<2x32xf32>, vector<32x4xf32>, vector<2x4xf32> -> vector<2x4xf32>
    %1330 = vector.extract_strided_slice %38 {offsets = [14, 0], sizes = [2, 4], strides = [1, 1]} : vector<16x4xf32> to vector<2x4xf32>
    %1331 = arith.addf %1329, %1330 : vector<2x4xf32>
    %cst_201 = arith.constant 5.000000e-01 : f32
    %1332 = vector.broadcast %cst_201 : f32 to vector<2x4xf32>
    %1333 = arith.mulf %1332, %1331 : vector<2x4xf32>
    %1334 = math.cos %1333 : vector<2x4xf32>
    %cst_202 = arith.constant 5.000000e-01 : f32
    %1335 = vector.broadcast %cst_202 : f32 to vector<2x4xf32>
    %1336 = arith.mulf %1335, %1331 : vector<2x4xf32>
    %1337 = math.sin %1336 : vector<2x4xf32>
    %1338 = vector.extract_strided_slice %1331 {offsets = [0, 0], sizes = [1, 4], strides = [1, 1]} : vector<2x4xf32> to vector<1x4xf32>
    %1339 = arith.mulf %1338, %1338 : vector<1x4xf32>
    %cst_203 = arith.constant 1.000000e+00 : f32
    %1340 = vector.broadcast %cst_203 : f32 to vector<1x4xf32>
    %1341 = arith.addf %1340, %1339 : vector<1x4xf32>
    %1342 = math.rsqrt %1341 : vector<1x4xf32>
    %cst_204 = arith.constant 1.000000e+00 : f32
    %1343 = vector.broadcast %cst_204 : f32 to vector<1x4xf32>
    %1344 = arith.addf %1343, %1342 : vector<1x4xf32>
    %cst_205 = arith.constant 5.000000e-01 : f32
    %1345 = vector.broadcast %cst_205 : f32 to vector<1x4xf32>
    %1346 = arith.mulf %1345, %1344 : vector<1x4xf32>
    %1347 = math.sqrt %1346 : vector<1x4xf32>
    %cst_206 = arith.constant 0.000000e+00 : f32
    %1348 = vector.broadcast %cst_206 : f32 to vector<1x4xf32>
    %1349 = arith.cmpf oge, %1338, %1348 : vector<1x4xf32>
    %cst_207 = arith.constant 1.000000e+00 : f32
    %cst_208 = arith.constant -1.000000e+00 : f32
    %1350 = vector.broadcast %cst_207 : f32 to vector<1x4xf32>
    %1351 = vector.broadcast %cst_208 : f32 to vector<1x4xf32>
    %1352 = arith.select %1349, %1350, %1351 : vector<1x4xi1>, vector<1x4xf32>
    %cst_209 = arith.constant 1.000000e+00 : f32
    %1353 = vector.broadcast %cst_209 : f32 to vector<1x4xf32>
    %1354 = arith.subf %1353, %1342 : vector<1x4xf32>
    %cst_210 = arith.constant 5.000000e-01 : f32
    %1355 = vector.broadcast %cst_210 : f32 to vector<1x4xf32>
    %1356 = arith.mulf %1355, %1354 : vector<1x4xf32>
    %cst_211 = arith.constant 0.000000e+00 : f32
    %1357 = vector.broadcast %cst_211 : f32 to vector<1x4xf32>
    %1358 = arith.maximumf %1356, %1357 : vector<1x4xf32>
    %1359 = math.sqrt %1358 : vector<1x4xf32>
    %1360 = arith.mulf %1352, %1359 : vector<1x4xf32>
    %1361 = arith.subf %1347, %1360 : vector<1x4xf32>
    %cst_212 = arith.constant 0.707106769 : f32
    %1362 = vector.broadcast %cst_212 : f32 to vector<1x4xf32>
    %1363 = arith.mulf %1361, %1362 : vector<1x4xf32>
    %1364 = arith.addf %1347, %1360 : vector<1x4xf32>
    %cst_213 = arith.constant 0.707106769 : f32
    %1365 = vector.broadcast %cst_213 : f32 to vector<1x4xf32>
    %1366 = arith.mulf %1364, %1365 : vector<1x4xf32>
    %1367 = arith.mulf %1347, %1363 : vector<1x4xf32>
    %1368 = vector.broadcast %1367 : vector<1x4xf32> to vector<2x4xf32>
    %1369 = arith.mulf %1368, %1334 : vector<2x4xf32>
    %1370 = arith.mulf %1360, %1366 : vector<1x4xf32>
    %1371 = vector.broadcast %1370 : vector<1x4xf32> to vector<2x4xf32>
    %1372 = arith.mulf %1371, %1337 : vector<2x4xf32>
    %1373 = arith.subf %1369, %1372 : vector<2x4xf32>
    %1374 = arith.mulf %1360, %1363 : vector<1x4xf32>
    %cst_214 = arith.constant 0.000000e+00 : f32
    %1375 = vector.broadcast %cst_214 : f32 to vector<1x4xf32>
    %1376 = arith.subf %1375, %1374 : vector<1x4xf32>
    %1377 = vector.broadcast %1376 : vector<1x4xf32> to vector<2x4xf32>
    %1378 = arith.mulf %1377, %1334 : vector<2x4xf32>
    %1379 = arith.mulf %1347, %1366 : vector<1x4xf32>
    %1380 = vector.broadcast %1379 : vector<1x4xf32> to vector<2x4xf32>
    %1381 = arith.mulf %1380, %1337 : vector<2x4xf32>
    %1382 = arith.subf %1378, %1381 : vector<2x4xf32>
    %1383 = arith.mulf %1347, %1366 : vector<1x4xf32>
    %1384 = vector.broadcast %1383 : vector<1x4xf32> to vector<2x4xf32>
    %1385 = arith.mulf %1384, %1334 : vector<2x4xf32>
    %1386 = arith.mulf %1360, %1363 : vector<1x4xf32>
    %1387 = vector.broadcast %1386 : vector<1x4xf32> to vector<2x4xf32>
    %1388 = arith.mulf %1387, %1337 : vector<2x4xf32>
    %1389 = arith.subf %1385, %1388 : vector<2x4xf32>
    %1390 = arith.mulf %1360, %1366 : vector<1x4xf32>
    %1391 = vector.broadcast %1390 : vector<1x4xf32> to vector<2x4xf32>
    %1392 = arith.mulf %1391, %1334 : vector<2x4xf32>
    %1393 = arith.mulf %1347, %1363 : vector<1x4xf32>
    %1394 = vector.broadcast %1393 : vector<1x4xf32> to vector<2x4xf32>
    %1395 = arith.mulf %1394, %1337 : vector<2x4xf32>
    %1396 = arith.addf %1392, %1395 : vector<2x4xf32>
    %1397 = vector.extract_strided_slice %1373 {offsets = [0, 0], sizes = [2, 1], strides = [1, 1]} : vector<2x4xf32> to vector<2x1xf32>
    %1398 = vector.broadcast %1397 : vector<2x1xf32> to vector<2x16xf32>
    %1399 = arith.mulf %1398, %12 : vector<2x16xf32>
    %1400 = vector.extract_strided_slice %1389 {offsets = [0, 0], sizes = [2, 1], strides = [1, 1]} : vector<2x4xf32> to vector<2x1xf32>
    %1401 = vector.broadcast %1400 : vector<2x1xf32> to vector<2x16xf32>
    %1402 = arith.mulf %1401, %24 : vector<2x16xf32>
    %1403 = arith.addf %1399, %1402 : vector<2x16xf32>
    %1404 = vector.extract_strided_slice %1373 {offsets = [0, 1], sizes = [2, 1], strides = [1, 1]} : vector<2x4xf32> to vector<2x1xf32>
    %1405 = vector.broadcast %1404 : vector<2x1xf32> to vector<2x16xf32>
    %1406 = arith.mulf %1405, %15 : vector<2x16xf32>
    %1407 = vector.extract_strided_slice %1389 {offsets = [0, 1], sizes = [2, 1], strides = [1, 1]} : vector<2x4xf32> to vector<2x1xf32>
    %1408 = vector.broadcast %1407 : vector<2x1xf32> to vector<2x16xf32>
    %1409 = arith.mulf %1408, %27 : vector<2x16xf32>
    %1410 = arith.addf %1406, %1409 : vector<2x16xf32>
    %1411 = vector.extract_strided_slice %1373 {offsets = [0, 2], sizes = [2, 1], strides = [1, 1]} : vector<2x4xf32> to vector<2x1xf32>
    %1412 = vector.broadcast %1411 : vector<2x1xf32> to vector<2x16xf32>
    %1413 = arith.mulf %1412, %18 : vector<2x16xf32>
    %1414 = vector.extract_strided_slice %1389 {offsets = [0, 2], sizes = [2, 1], strides = [1, 1]} : vector<2x4xf32> to vector<2x1xf32>
    %1415 = vector.broadcast %1414 : vector<2x1xf32> to vector<2x16xf32>
    %1416 = arith.mulf %1415, %30 : vector<2x16xf32>
    %1417 = arith.addf %1413, %1416 : vector<2x16xf32>
    %1418 = vector.extract_strided_slice %1373 {offsets = [0, 3], sizes = [2, 1], strides = [1, 1]} : vector<2x4xf32> to vector<2x1xf32>
    %1419 = vector.broadcast %1418 : vector<2x1xf32> to vector<2x16xf32>
    %1420 = arith.mulf %1419, %21 : vector<2x16xf32>
    %1421 = vector.extract_strided_slice %1389 {offsets = [0, 3], sizes = [2, 1], strides = [1, 1]} : vector<2x4xf32> to vector<2x1xf32>
    %1422 = vector.broadcast %1421 : vector<2x1xf32> to vector<2x16xf32>
    %1423 = arith.mulf %1422, %33 : vector<2x16xf32>
    %1424 = arith.addf %1420, %1423 : vector<2x16xf32>
    %1425 = vector.extract_strided_slice %1382 {offsets = [0, 0], sizes = [2, 1], strides = [1, 1]} : vector<2x4xf32> to vector<2x1xf32>
    %1426 = vector.broadcast %1425 : vector<2x1xf32> to vector<2x16xf32>
    %1427 = arith.mulf %1426, %12 : vector<2x16xf32>
    %1428 = vector.extract_strided_slice %1396 {offsets = [0, 0], sizes = [2, 1], strides = [1, 1]} : vector<2x4xf32> to vector<2x1xf32>
    %1429 = vector.broadcast %1428 : vector<2x1xf32> to vector<2x16xf32>
    %1430 = arith.mulf %1429, %24 : vector<2x16xf32>
    %1431 = arith.addf %1427, %1430 : vector<2x16xf32>
    %1432 = vector.extract_strided_slice %1382 {offsets = [0, 1], sizes = [2, 1], strides = [1, 1]} : vector<2x4xf32> to vector<2x1xf32>
    %1433 = vector.broadcast %1432 : vector<2x1xf32> to vector<2x16xf32>
    %1434 = arith.mulf %1433, %15 : vector<2x16xf32>
    %1435 = vector.extract_strided_slice %1396 {offsets = [0, 1], sizes = [2, 1], strides = [1, 1]} : vector<2x4xf32> to vector<2x1xf32>
    %1436 = vector.broadcast %1435 : vector<2x1xf32> to vector<2x16xf32>
    %1437 = arith.mulf %1436, %27 : vector<2x16xf32>
    %1438 = arith.addf %1434, %1437 : vector<2x16xf32>
    %1439 = vector.extract_strided_slice %1382 {offsets = [0, 2], sizes = [2, 1], strides = [1, 1]} : vector<2x4xf32> to vector<2x1xf32>
    %1440 = vector.broadcast %1439 : vector<2x1xf32> to vector<2x16xf32>
    %1441 = arith.mulf %1440, %18 : vector<2x16xf32>
    %1442 = vector.extract_strided_slice %1396 {offsets = [0, 2], sizes = [2, 1], strides = [1, 1]} : vector<2x4xf32> to vector<2x1xf32>
    %1443 = vector.broadcast %1442 : vector<2x1xf32> to vector<2x16xf32>
    %1444 = arith.mulf %1443, %30 : vector<2x16xf32>
    %1445 = arith.addf %1441, %1444 : vector<2x16xf32>
    %1446 = vector.extract_strided_slice %1382 {offsets = [0, 3], sizes = [2, 1], strides = [1, 1]} : vector<2x4xf32> to vector<2x1xf32>
    %1447 = vector.broadcast %1446 : vector<2x1xf32> to vector<2x16xf32>
    %1448 = arith.mulf %1447, %21 : vector<2x16xf32>
    %1449 = vector.extract_strided_slice %1396 {offsets = [0, 3], sizes = [2, 1], strides = [1, 1]} : vector<2x4xf32> to vector<2x1xf32>
    %1450 = vector.broadcast %1449 : vector<2x1xf32> to vector<2x16xf32>
    %1451 = arith.mulf %1450, %33 : vector<2x16xf32>
    %1452 = arith.addf %1448, %1451 : vector<2x16xf32>
    %1453 = arith.mulf %1403, %1410 : vector<2x16xf32>
    %1454 = arith.mulf %1431, %1438 : vector<2x16xf32>
    %1455 = arith.subf %1453, %1454 : vector<2x16xf32>
    %1456 = arith.mulf %1403, %1438 : vector<2x16xf32>
    %1457 = arith.mulf %1431, %1410 : vector<2x16xf32>
    %1458 = arith.addf %1456, %1457 : vector<2x16xf32>
    %1459 = arith.mulf %1417, %1424 : vector<2x16xf32>
    %1460 = arith.mulf %1445, %1452 : vector<2x16xf32>
    %1461 = arith.subf %1459, %1460 : vector<2x16xf32>
    %1462 = arith.mulf %1417, %1452 : vector<2x16xf32>
    %1463 = arith.mulf %1445, %1424 : vector<2x16xf32>
    %1464 = arith.addf %1462, %1463 : vector<2x16xf32>
    %1465 = arith.mulf %1455, %1461 : vector<2x16xf32>
    %1466 = arith.mulf %1458, %1464 : vector<2x16xf32>
    %1467 = arith.subf %1465, %1466 : vector<2x16xf32>
    %1468 = arith.mulf %1455, %1464 : vector<2x16xf32>
    %1469 = arith.mulf %1458, %1461 : vector<2x16xf32>
    %1470 = arith.addf %1468, %1469 : vector<2x16xf32>
    %1471 = tpu.concatenate %1467, %1470 in 1 : vector<2x16xf32>, vector<2x16xf32> -> vector<2x32xf32>
    %1472 = arith.truncf %1471 : vector<2x32xf32> to vector<2x32xbf16>
    %cst_215 = arith.constant dense<0.000000e+00> : vector<2x128xf32>
    %1473 = tpu.matmul %1472, %2, %cst_215 {dimension_numbers = #tpu.dot_dimension_numbers<[1], [0], [0], [1], [0, 0, 1, 1], [], []>} : vector<2x32xbf16>, vector<32x128xbf16>, vector<2x128xf32> -> vector<2x128xf32>
    %1474 = vector.extract_strided_slice %1473 {offsets = [0, 0], sizes = [2, 64], strides = [1, 1]} : vector<2x128xf32> to vector<2x64xf32>
    %1475 = vector.extract_strided_slice %1473 {offsets = [0, 64], sizes = [2, 64], strides = [1, 1]} : vector<2x128xf32> to vector<2x64xf32>
    %1476 = arith.mulf %1474, %1474 : vector<2x64xf32>
    %1477 = arith.mulf %1475, %1475 : vector<2x64xf32>
    %1478 = arith.addf %1476, %1477 : vector<2x64xf32>
    %1479 = arith.truncf %1478 : vector<2x64xf32> to vector<2x64xbf16>
    %cst_216 = arith.constant dense<0.000000e+00> : vector<2x128xf32>
    %1480 = tpu.matmul %1479, %3, %cst_216 {dimension_numbers = #tpu.dot_dimension_numbers<[1], [0], [0], [1], [0, 0, 1, 1], [], []>} : vector<2x64xbf16>, vector<64x128xbf16>, vector<2x128xf32> -> vector<2x128xf32>
    %1481 = arith.addf %1480, %6 : vector<2x128xf32>
    %1482 = vector.extract_strided_slice %1481 {offsets = [0, 0], sizes = [2, 32], strides = [1, 1]} : vector<2x128xf32> to vector<2x32xf32>
    %cst_217 = arith.constant 5.000000e-01 : f32
    %1483 = vector.broadcast %cst_217 : f32 to vector<2x32xf32>
    %1484 = arith.mulf %1483, %1482 : vector<2x32xf32>
    %1485 = math.tanh %1484 : vector<2x32xf32>
    %cst_218 = arith.constant 1.000000e+00 : f32
    %1486 = vector.broadcast %cst_218 : f32 to vector<2x32xf32>
    %1487 = arith.addf %1485, %1486 : vector<2x32xf32>
    %cst_219 = arith.constant 5.000000e-01 : f32
    %1488 = vector.broadcast %cst_219 : f32 to vector<2x32xf32>
    %1489 = arith.mulf %1488, %1487 : vector<2x32xf32>
    %1490 = vector.extract_strided_slice %1481 {offsets = [0, 32], sizes = [2, 32], strides = [1, 1]} : vector<2x128xf32> to vector<2x32xf32>
    %cst_220 = arith.constant 5.000000e-01 : f32
    %1491 = vector.broadcast %cst_220 : f32 to vector<2x32xf32>
    %1492 = arith.mulf %1491, %1490 : vector<2x32xf32>
    %1493 = math.tanh %1492 : vector<2x32xf32>
    %cst_221 = arith.constant 1.000000e+00 : f32
    %1494 = vector.broadcast %cst_221 : f32 to vector<2x32xf32>
    %1495 = arith.addf %1493, %1494 : vector<2x32xf32>
    %cst_222 = arith.constant 5.000000e-01 : f32
    %1496 = vector.broadcast %cst_222 : f32 to vector<2x32xf32>
    %1497 = arith.mulf %1496, %1495 : vector<2x32xf32>
    %1498 = vector.extract_strided_slice %1481 {offsets = [0, 64], sizes = [2, 32], strides = [1, 1]} : vector<2x128xf32> to vector<2x32xf32>
    %1499 = math.tanh %1498 : vector<2x32xf32>
    %1500 = vector.extract_strided_slice %1481 {offsets = [0, 96], sizes = [2, 32], strides = [1, 1]} : vector<2x128xf32> to vector<2x32xf32>
    %cst_223 = arith.constant 5.000000e-01 : f32
    %1501 = vector.broadcast %cst_223 : f32 to vector<2x32xf32>
    %1502 = arith.mulf %1501, %1500 : vector<2x32xf32>
    %1503 = math.tanh %1502 : vector<2x32xf32>
    %cst_224 = arith.constant 1.000000e+00 : f32
    %1504 = vector.broadcast %cst_224 : f32 to vector<2x32xf32>
    %1505 = arith.addf %1503, %1504 : vector<2x32xf32>
    %cst_225 = arith.constant 5.000000e-01 : f32
    %1506 = vector.broadcast %cst_225 : f32 to vector<2x32xf32>
    %1507 = arith.mulf %1506, %1505 : vector<2x32xf32>
    %1508 = arith.mulf %1489, %1326 : vector<2x32xf32>
    %1509 = arith.mulf %1497, %1499 : vector<2x32xf32>
    %1510 = arith.addf %1508, %1509 : vector<2x32xf32>
    %1511 = math.tanh %1510 : vector<2x32xf32>
    %1512 = arith.mulf %1507, %1511 : vector<2x32xf32>
    %1513 = tpu.concatenate %224, %408, %592, %776, %960, %1144, %1328, %1512 in 1 : vector<2x32xf32>, vector<2x32xf32>, vector<2x32xf32>, vector<2x32xf32>, vector<2x32xf32>, vector<2x32xf32>, vector<2x32xf32>, vector<2x32xf32> -> vector<2x256xf32>
    %c0_226 = arith.constant 0 : index
    %c0_227 = arith.constant 0 : index
    %1514 = vector.load %arg9[%c0_226, %c0_227] : memref<2x256xf32, #tpu.memory_space<vmem>>, vector<2x256xf32>
    tpu.vector_store %arg9[%c0_226, %c0_227], %1513 {strides = array<i32>} : memref<2x256xf32, #tpu.memory_space<vmem>>, vector<2x256xf32>,
    %c0_228 = arith.constant 0 : index
    %c0_229 = arith.constant 0 : index
    %1515 = vector.load %arg10[%c0_228, %c0_229] : memref<2x32xf32, #tpu.memory_space<vmem>>, vector<2x32xf32>
    tpu.vector_store %arg10[%c0_228, %c0_229], %1512 {strides = array<i32>} : memref<2x32xf32, #tpu.memory_space<vmem>>, vector<2x32xf32>,
    %c0_230 = arith.constant 0 : index
    %c0_231 = arith.constant 0 : index
    %1516 = vector.load %arg11[%c0_230, %c0_231] : memref<2x32xf32, #tpu.memory_space<vmem>>, vector<2x32xf32>
    tpu.vector_store %arg11[%c0_230, %c0_231], %1510 {strides = array<i32>} : memref<2x32xf32, #tpu.memory_space<vmem>>, vector<2x32xf32>,
    return
  }
  func.func @transform_0(%arg0: i32) -> (i32, i32) {
    %c0_i32 = arith.constant 0 : i32
    %c0_i32_0 = arith.constant 0 : i32
    %c0_i32_1 = arith.constant 0 : i32
    return %c0_i32, %c0_i32_0 : i32, i32
  }
  func.func @transform_1(%arg0: i32) -> (i32, i32) {
    %c0_i32 = arith.constant 0 : i32
    %c0_i32_0 = arith.constant 0 : i32
    %c0_i32_1 = arith.constant 0 : i32
    return %c0_i32, %c0_i32_0 : i32, i32
  }
  func.func @transform_2(%arg0: i32) -> (i32, i32) {
    %c0_i32 = arith.constant 0 : i32
    %c0_i32_0 = arith.constant 0 : i32
    %c0_i32_1 = arith.constant 0 : i32
    return %c0_i32, %c0_i32_0 : i32, i32
  }
  func.func @transform_3(%arg0: i32) -> (i32, i32) {
    %c0_i32 = arith.constant 0 : i32
    %c0_i32_0 = arith.constant 0 : i32
    %c0_i32_1 = arith.constant 0 : i32
    return %c0_i32, %c0_i32_0 : i32, i32
  }
  func.func @transform_4(%arg0: i32) -> (i32, i32) {
    %c0_i32 = arith.constant 0 : i32
    %c0_i32_0 = arith.constant 0 : i32
    %c0_i32_1 = arith.constant 0 : i32
    return %c0_i32, %c0_i32_0 : i32, i32
  }
  func.func @transform_5(%arg0: i32) -> (i32, i32) {
    %c0_i32 = arith.constant 0 : i32
    %c0_i32_0 = arith.constant 0 : i32
    %c0_i32_1 = arith.constant 0 : i32
    return %c0_i32, %c0_i32_0 : i32, i32
  }
  func.func @transform_6(%arg0: i32) -> (i32, i32) {
    %c0_i32 = arith.constant 0 : i32
    %c0_i32_0 = arith.constant 0 : i32
    %c0_i32_1 = arith.constant 0 : i32
    return %c0_i32, %c0_i32_0 : i32, i32
  }
  func.func @transform_7(%arg0: i32) -> (i32, i32) {
    %c0_i32 = arith.constant 0 : i32
    %c0_i32_0 = arith.constant 0 : i32
    %c0_i32_1 = arith.constant 0 : i32
    return %c0_i32, %c0_i32_0 : i32, i32
  }
  func.func @transform_8(%arg0: i32) -> (i32, i32) {
    %c0_i32 = arith.constant 0 : i32
    %c0_i32_0 = arith.constant 0 : i32
    %c0_i32_1 = arith.constant 0 : i32
    return %c0_i32, %c0_i32_0 : i32, i32
  }
  func.func @transform_9(%arg0: i32) -> (i32, i32) {
    %c0_i32 = arith.constant 0 : i32
    %c0_i32_0 = arith.constant 0 : i32
    %c0_i32_1 = arith.constant 0 : i32
    return %c0_i32, %c0_i32_0 : i32, i32
  }
  func.func @transform_10(%arg0: i32) -> (i32, i32) {
    %c0_i32 = arith.constant 0 : i32
    %c0_i32_0 = arith.constant 0 : i32
    %c0_i32_1 = arith.constant 0 : i32
    return %c0_i32, %c0_i32_0 : i32, i32
  }
}

</mosaic_0001>

<bundles_post_ra>
// kernel: qlstm_pallas.1
= control target key start
LH: loop header
LB: loop body
LE: loop exit
PB: predicated region body
PF: predicated region fallthrough
CT: control target
= control target key end

     0   :  { %16 = vsyncpa [#allocation3], 0  ;;  %vm109_vm0 = vcmask 1043456   ;;  %v12169_v3 = vmov 0.0|0.0   ;;  %vm102_vm1 = vcmask 31744   ;;  %vm10568_vm2 = vmmov 0   ;;  %s12154_s0 = inlined_call_operand.vmem [shape: f32[16,4], index: 0, kind: input, shape index: {}]   ;;  %s12155_s1 = inlined_call_operand.vmem [shape: f32[32,4], index: 1, kind: input, shape index: {}]   ;;  %s12156_s2 = inlined_call_operand.vmem [shape: f32[4,4], index: 2, kind: input, shape index: {}]   ;;  %s12157_s3 = inlined_call_operand.vmem [shape: f32[1,4], index: 3, kind: input, shape index: {}]   ;;  %s12158_s4 = inlined_call_operand.vmem [shape: bf16[32,128], index: 4, kind: input, shape index: {}]   ;;  %s12159_s5 = inlined_call_operand.vmem [shape: bf16[64,128], index: 5, kind: input, shape index: {}]   ;;  %s12160_s6 = inlined_call_operand.vmem [shape: f32[1,128], index: 6, kind: input, shape index: {}]   ;;  %s12161_s7 = inlined_call_operand.vmem [shape: f32[4,16], index: 7, kind: input, shape index: {}]   ;;  %s12162_s8 = inlined_call_operand.vmem [shape: f32[2,256], index: 8, kind: output, shape index: {0}]   ;;  %s12163_s9 = inlined_call_operand.hbm [shape: f32[2,32], index: 9, kind: output, shape index: {1}]   ;;  %s12164_s10 = inlined_call_operand.hbm [shape: f32[2,32], index: 10, kind: output, shape index: {2}]  }
   0x1   :  { %v35_v0 = vld [vmem:[%s12155_s1] sm:$0xff]  ;;  %v36_v1 = vld [vmem:[%s12155_s1 + $0x8] sm:$0xff]  ;;  %v37_v2 = vld [vmem:[%s12155_s1 + $0x10] sm:$0xff]  ;;  %9814 = vmatprep.subr.bf16.mxu1 %v12169_v3  ;;  %v12171_v15 = vmov 0.0  }
   0x2   :  { %v607_v4 = vand.u32 4294901760, %v35_v0  ;;  %v610_v5 = vand.u32 4294901760, %v36_v1  ;;  %v38_v6 = vld [vmem:[%s12155_s1 + $0x18] sm:$0xff]  ;;  %v613_v7 = vand.u32 4294901760, %v37_v2  ;;  %v95_v8 = vld [vmem:[%s12156_s2] sm:$0xf]  ;;  %9134 = vmatprep.mubr.msk.f32.mxu1 %vm10568_vm2, %v12171_v15 }
   0x3   :  { %v616_v9 = vand.u32 4294901760, %v38_v6  ;;  %v111_v10 = vsel %vm109_vm0, %v95_v8, 0  ;;  %v93_v11 = vld [vmem:[%s12154_s0] sm:$0xff]  ;;  %v94_v12 = vld [vmem:[%s12154_s0 + $0x8] sm:$0xff] }
   0x4   :  { %v10664_v13 = vpack.c.bf16 %v610_v5, %v607_v4  ;;  %v10666_v14 = vand.u32 4294901760, %v111_v10  ;;  %v104_v16 = vsel %vm102_vm1, %v93_v11, 0  ;;  %v107_v17 = vsel %vm102_vm1, %v94_v12, 0 }
   0x5   :  { %v10670_v18 = vpack.c.bf16 %v616_v9, %v613_v7  ;;  %v10672_v19 = vand.u32 4294901760, %v104_v16  ;;  %v10674_v20 = vand.u32 4294901760, %v107_v17  ;;  %v10676_v21 = vsub.f32 %v35_v0, %v607_v4 }
   0x6   :  { %9816 = vmatpush3.bf16.msra.mxu1 %v10664_v13  ;;  %9096 = vmatprep.subr.mxu0 %v10666_v14  ;;  %v201_v22 = vsub.f32 %v111_v10, %v10666_v14  ;;  %v10681_v23 = vsub.f32 %v36_v1, %v610_v5  ;;  %v10683_v24 = vsub.f32 %v37_v2, %v613_v7 }
   0x7   :  { %9817 = vmatprep.subr.bf16.mxu1 %v12169_v3  ;;  %9097 = vmatpush3.msra.mxu0 %v10666_v14  ;;  %v180_v25 = vsub.f32 %v104_v16, %v10672_v19  ;;  %v10689_v26 = vsub.f32 %v107_v17, %v10674_v20  ;;  %v688_v27 = vand.u32 4294901760, %v10676_v21  ;;  %v10692_v28 = vsub.f32 %v38_v6, %v616_v9 }
   0x8   :  { %v10694_v29 = vand.u32 4294901760, %v201_v22  ;;  %v695_v30 = vand.u32 4294901760, %v10681_v23  ;;  %v702_v31 = vand.u32 4294901760, %v10683_v24 }
   0x9   :  { %v181_v32 = vand.u32 4294901760, %v180_v25  ;;  %v191_v33 = vand.u32 4294901760, %v10689_v26  ;;  %v689_v34 = vsub.f32 %v10676_v21, %v688_v27  ;;  %v709_v35 = vand.u32 4294901760, %v10692_v28 }
   0xa   :  { %9819 = vmatpush3.bf16.msra.mxu1 %v10670_v18  ;;  %v203_v36 = vsub.f32 %v201_v22, %v10694_v29  ;;  %v696_v37 = vsub.f32 %v10681_v23, %v695_v30  ;;  %v703_v38 = vsub.f32 %v10683_v24, %v702_v31 }
   0xb   :  { %17 = vsyncpa [#allocation5], 0  ;;  %v182_v39 = vsub.f32 %v180_v25, %v181_v32  ;;  %9820 = vmatprep.subr.bf16.mxu1 %v12169_v3  ;;  %v192_v40 = vsub.f32 %v10689_v26, %v191_v33  ;;  %v690_v41 = vand.u32 4294901760, %v689_v34  ;;  %v710_v42 = vsub.f32 %v10692_v28, %v709_v35  ;;  %v10783_v57 = vld [vmem:[%s12157_s3] ss:$0 sm:$0xff]  ;;  %s10581_s11 = smov 16  }
   0xc   :  { %v204_v43 = vand.u32 4294901760, %v203_v36  ;;  %v697_v44 = vand.u32 4294901760, %v696_v37  ;;  %v704_v45 = vand.u32 4294901760, %v703_v38  ;;  %v10721_v51 = vpack.c.bf16 %v10681_v23, %v10676_v21  ;;  %s10582_s20 = smov 64   ;;  %s10583_s23 = smov 96  }
   0xd   :  { %v183_v46 = vand.u32 4294901760, %v182_v39  ;;  %9135 = vmatmul.mubr.f32.vlgmr.msra.gmra.mrb[0].mxu1 %v12171_v15  ;;  %v193_v47 = vand.u32 4294901760, %v192_v40  ;;  %v711_v48 = vand.u32 4294901760, %v710_v42  ;;  %v10729_v52 = vpack.c.bf16 %v10692_v28, %v10683_v24  ;;  %s10584_s24 = smov 32  }
   0xe   :  { %9101 = vmatprep.subr.mxu0 %v204_v43  ;;  %v10709_v49 = vpack.c.bf16 %v697_v44, %v690_v41  ;;  %9145 = vmatprep.mubr.msk.f32.mxu1 %vm10568_vm2, %v12171_v15  ;;  %v10746_v53 = vpack.c.bf16 %v695_v30, %v688_v27  ;;  %v10751_v54 = vpack.c.bf16 %v709_v35, %v702_v31  ;;  %v12185_v55 = vmov 1  }
   0xf   :  { %9098 = vmatprep.mubr.f32.mxu0 %v183_v46  ;;  %v10714_v50 = vpack.c.bf16 %v711_v48, %v704_v45  ;;  %10255 = vset.pattern.permute.xlu1 %v12185_v55  ;;  %v12175_v56 = vmov 0   ;;  %v186_v58 = vadd.f32 nan, %v10783_v57  ;;  %v12190_v23 = vmov 683565275  }
  0x10   :  { %9099 = vmatmul.mubr.f32.vlgmr.msra.gmra.mrb[0].mxu0 %v193_v47  ;;  %9822 = vmatpush3.bf16.msra.mxu1 %v10709_v49  ;;  %v12167_v28 = vmov 2131351028   ;;  %v12173_v31 = vmov 2102212464   ;;  %v12177_v34 = vmov 920167782  }
  0x11   :  { %9102 = vmatpush3.msra.mxu0 %v204_v43  ;;  %9823 = vmatprep.subr.bf16.mxu1 %v12169_v3  ;;  %v272_v59 = vadd.f32 nan, %v186_v58  ;;  %v12179_v37 = vmov 1326507024  }
  0x12   :  { %9103 = vmatprep.mubr.f32.mxu0 %v10672_v19  ;;  %9106 = vmatprep.subr.mxu0 %v201_v22 }
  0x13   :  { %10254 = vset.pattern.permute.xlu0 %v12175_v56  ;;  %v352_v60 = vadd.f32 nan, %v272_v59 }
  0x14   :  { %9825 = vmatpush3.bf16.msra.mxu1 %v10714_v50 }
  0x15   :  { %9826 = vmatprep.subr.bf16.mxu1 %v12169_v3  ;;  %v433_v61 = vadd.f32 nan, %v352_v60 }
  0x17   :  { %9146 = vmatmul.mubr.f32.vlgmr.msra.gmra.mrb[0].mxu1 %v12171_v15  ;;  %v515_v62 = vadd.f32 nan, %v433_v61 }
  0x18   :  { %9104 = vmatmul.mubr.f32.vlgmr.msra.gmra.mrb[0].mxu0 %v10674_v20  ;;  %9828 = vmatpush3.bf16.msra.mxu1 %v10721_v51 }
  0x19   :  { %9107 = vmatpush3.msra.mxu0 %v201_v22  ;;  %9829 = vmatprep.subr.bf16.mxu1 %v12169_v3 }
  0x1a   :  { %9156 = vmatprep.mubr.msk.f32.mxu1 %vm10568_vm2, %v12171_v15  ;;  %9108 = vmatprep.mubr.f32.mxu0 %v180_v25  ;;  %v12165_v25 = vmov 2475754826  }
  0x1b   :  { %9111 = vmatprep.subr.mxu0 %v10666_v14 }
  0x1c   :  { %9831 = vmatpush3.bf16.msra.mxu1 %v10729_v52 }
  0x1d   :  { %9832 = vmatprep.subr.bf16.mxu1 %v12169_v3 }
  0x1f   :  { %9157 = vmatmul.mubr.f32.vlgmr.msra.gmra.mrb[0].mxu1 %v12171_v15 }
  0x20   :  { %9109 = vmatmul.mubr.f32.vlgmr.msra.gmra.mrb[0].mxu0 %v10689_v26  ;;  %9834 = vmatpush3.bf16.msra.mxu1 %v10664_v13 }
  0x21   :  { %9112 = vmatpush3.msra.mxu0 %v10666_v14  ;;  %9835 = vmatprep.subr.bf16.mxu1 %v12169_v3 }
  0x22   :  { %9167 = vmatprep.mubr.msk.f32.mxu1 %vm10568_vm2, %v12171_v15  ;;  %9113 = vmatprep.mubr.f32.mxu0 %v181_v32 }
  0x23   :  { %9116 = vmatprep.subr.mxu0 %v10694_v29 }
  0x24   :  { %9837 = vmatpush3.bf16.msra.mxu1 %v10670_v18 }
  0x25   :  { %9838 = vmatprep.subr.bf16.mxu1 %v12169_v3 }
  0x27   :  { %9168 = vmatmul.mubr.f32.vlgmr.msra.gmra.mrb[0].mxu1 %v12171_v15 }
  0x28   :  { %9114 = vmatmul.mubr.f32.vlgmr.msra.gmra.mrb[0].mxu0 %v191_v33  ;;  %9840 = vmatpush3.bf16.msra.mxu1 %v10746_v53 }
  0x29   :  { %9117 = vmatpush3.msra.mxu0 %v10694_v29  ;;  %9841 = vmatprep.subr.bf16.mxu1 %v12169_v3 }
  0x2a   :  { %9178 = vmatprep.mubr.msk.f32.mxu1 %vm10568_vm2, %v12171_v15  ;;  %9118 = vmatprep.mubr.f32.mxu0 %v10672_v19 }
  0x2b   :  { %9121 = vmatprep.subr.mxu0 %v10666_v14 }
  0x2c   :  { %9843 = vmatpush3.bf16.msra.mxu1 %v10751_v54 }
  0x2d   :  { %9844 = vmatprep.subr.bf16.mxu1 %v12169_v3 }
  0x2f   :  { %9179 = vmatmul.mubr.f32.vlgmr.msra.gmra.mrb[0].mxu1 %v12171_v15 }
  0x30   :  { %9119 = vmatmul.mubr.f32.vlgmr.msra.gmra.mrb[0].mxu0 %v10674_v20  ;;  %9846 = vmatpush3.bf16.msra.mxu1 %v10664_v13 }
  0x31   :  { %9122 = vmatpush3.msra.mxu0 %v10666_v14  ;;  %9847 = vmatprep.subr.bf16.mxu1 %v12169_v3 }
  0x32   :  { %9189 = vmatprep.mubr.msk.f32.mxu1 %vm10568_vm2, %v12171_v15  ;;  %9123 = vmatprep.mubr.f32.mxu0 %v10672_v19 }
  0x33   :  { %9200 = vmatprep.subr.bf16.mxu0 %v12171_v15 }
  0x34   :  { %9849 = vmatpush3.bf16.msra.mxu1 %v10670_v18 }
  0x35   :  { %9192 = vmatprep.subr.bf16.mxu1 %v12171_v15 }
  0x37   :  { %9190 = vmatmul.mubr.f32.vlgmr.msra.gmra.mrb[0].mxu1 %v12171_v15 }
  0x38   :  { %9124 = vmatmul.mubr.f32.vlgmr.msra.gmra.mrb[0].mxu0 %v10674_v20  ;;  %9196 = vmatprep.mubr.msk.bf16.mxu1 %vm10568_vm2, %v12171_v15 }
  0x39   :  { %9208 = vmatprep.mubr.msk.bf16.mxu0 %vm10568_vm2, %v12171_v15 }
 0x10a   :  { %v1087_v63 = vpop.f32.mrb[0].mxu1 }
 0x10b   :  { %v10786_v0 = vpop.f32.mrb[0].mxu0  ;;  %v9191_v1 = vpop.f32.mrb[1].mxu1 }
 0x10c   :  { %12216 = vst [vmem:[#allocation8_spill] sm:$0xff] %v10786_v0  ;;  %v10789_v2 = vadd.f32 %v10786_v0, %v515_v62  ;;  %v10791_v4 = vpop.f32.mrb[1].mxu0 }
 0x10d   :  { %v593_v5 = vadd.f32 %v10791_v4, %v515_v62 }
 0x10f   :  { %v10794_v6 = vadd.f32 %v1087_v63, %v593_v5 }
 0x111   :  { %v10797_v7 = vmul.f32 0.5, %v10794_v6  ;;  %v1299_v11 = vmul.f32 %v10794_v6, %v10794_v6  ;;  %vm1311_vm11 = vcmp.ge.f32.partialorder %v10794_v6, 0.0 }
 0x113   :  { %v1095_v8 = vand.u32 2139095040, %v10797_v7  ;;  %v1092_v14 = vand.u32 2147483647, %v10797_v7  ;;  %v1300_v17 = vadd.f32 1.0, %v1299_v11  ;;  %vm1094_vm14 = vcmp.lt.s32.totalorder %v10797_v7, 0 }
 0x114   :  { %vm1184_vm1 = vweird.f32 %v10797_v7 }
 0x115   :  { %v1096_v9 = vshrl.u32 %v1095_v8, 23  ;;  %v1099_v20 = vand.u32 8388607, %v1092_v14  ;;  %10370 = vrsqrt.f32 %v1300_v17  ;;  %vm1093_vm15 = vcmp.le.f32.partialorder %v1092_v14, 0.7853982 }
 0x117   :  { %v8687_v10 = vadd.s32 4294967169, %v1096_v9  ;;  %v1100_v39 = vor.u32 8388608, %v1099_v20 }
 0x119   :  { %v1102_v12 = vadd.s32 1, %v8687_v10  ;;  %v1140_v62 = vshll.u32 %v1100_v39, 8 }
 0x11b   :  { %vm1103_vm3 = vcmp.gt.s32.totalorder %v1102_v12, 0 }
 0x11c   :  { %v1104_v16 = vsel %vm1103_vm3, %v1102_v12, 0 }
 0x11d   :  { %v1106_v19 = vand.u32 31, %v1104_v16  ;;  %v1105_v22 = vshrl.u32 %v1104_v16, 5 }
 0x11f   :  { %v1107_v21 = vsub.s32 32, %v1106_v19  ;;  %v1109_v24 = vshll.u32 %v12190_v23, %v1106_v19  ;;  %v1112_v26 = vshll.u32 %v12165_v25, %v1106_v19  ;;  %v1115_v30 = vshll.u32 %v12167_v28, %v1106_v19  ;;  %v10371_v16 = vpop.eup %10370 }
 0x120   :  { %v1118_v33 = vshll.u32 %v12173_v31, %v1106_v19  ;;  %v1121_v36 = vshll.u32 %v12177_v34, %v1106_v19  ;;  %vm1124_vm4 = vcmp.lt.s32.totalorder %v1105_v22, 1  ;;  %vm1127_vm5 = vcmp.lt.s32.totalorder %v1105_v22, 4 }
 0x121   :  { %v1110_v27 = vshrl.u32 %v12165_v25, %v1107_v21  ;;  %v1113_v29 = vshrl.u32 %v12167_v28, %v1107_v21  ;;  %v1116_v32 = vshrl.u32 %v12173_v31, %v1107_v21  ;;  %v1119_v35 = vshrl.u32 %v12177_v34, %v1107_v21 }
 0x122   :  { %v1122_v38 = vshrl.u32 %v12179_v37, %v1107_v21  ;;  %v1108_v48 = vshrl.u32 %v12190_v23, %v1107_v21  ;;  %vm1126_vm6 = vcmp.lt.s32.totalorder %v1105_v22, 3  ;;  %vm1125_vm7 = vcmp.lt.s32.totalorder %v1105_v22, 2 }
 0x123   :  { %v1111_v40 = vor.u32 %v1110_v27, %v1109_v24  ;;  %v1114_v41 = vor.u32 %v1113_v29, %v1112_v26  ;;  %v1117_v42 = vor.u32 %v1116_v32, %v1115_v30  ;;  %v1120_v43 = vor.u32 %v1119_v35, %v1118_v33 }
 0x124   :  { %v1123_v44 = vor.u32 %v1122_v38, %v1121_v36  ;;  %v1313_v20 = vsub.f32 1.0, %v10371_v16  ;;  %v1302_v33 = vadd.f32 1.0, %v10371_v16 }
 0x125   :  { %v1129_v45 = vsel %vm1127_vm5, %v1117_v42, 2102212464  ;;  %v1132_v46 = vsel %vm1124_vm4, %v1111_v40, %v1114_v41  ;;  %v1136_v47 = vsel %vm1124_vm4, %v1114_v41, %v1117_v42  ;;  %v1133_v58 = vsel %vm1127_vm5, %v1120_v43, 920167782 }
 0x126   :  { %v1137_v59 = vsel %vm1127_vm5, %v1123_v44, 1326507024  ;;  %v1134_v60 = vsel %vm1126_vm6, %v1117_v42, %v1133_v58  ;;  %v1128_v63 = vsel %vm1124_vm4, %v1108_v48, %v1111_v40  ;;  %v1130_v1 = vsel %vm1126_vm6, %v1114_v41, %v1129_v45 }
 0x127   :  { %v1138_v61 = vsel %vm1126_vm6, %v1120_v43, %v1137_v59  ;;  %v1135_v5 = vsel %vm1125_vm7, %v1132_v46, %v1134_v60  ;;  %v1131_v17 = vsel %vm1125_vm7, %v1128_v63, %v1130_v1  ;;  %v1314_v26 = vmul.f32 0.5, %v1313_v20 }
 0x128   :  { %v1139_v8 = vsel %vm1125_vm7, %v1136_v47, %v1138_v61  ;;  %v10819_v11 = vmul.u32.u64.low %v1140_v62, %v1135_v5  ;;  %v10820_v12 = vmul.u32.u64.high %v1140_v62, %v1135_v5, %v10819_v11  ;;  %v1147_v21 = vmul.u32 %v1140_v62, %v1131_v17 }
 0x129   :  { %v10816_v9 = vmul.u32.u64.low %v1140_v62, %v1139_v8  ;;  %v10817_v10 = vmul.u32.u64.high %v1140_v62, %v1139_v8, %v10816_v9  ;;  %v1315_v30 = vmax.f32 %v1314_v26, 0.0  ;;  %v1303_v38 = vmul.f32 0.5, %v1302_v33 }
 0x12a   :  { %v1150_v19 = vadd.s32 1, %v10820_v12  ;;  %v12188_v17 = vmov -1.0  }
 0x12b   :  { %vm1149_vm8 = vc.u32 %v10817_v10, %v10819_v11  ;;  %10372 = vrsqrt.f32 %v1315_v30  ;;  %v1148_v44 = vadd.s32 %v10819_v11, %v10817_v10  ;;  %vm1318_vm10 = vcmp.eq.f32.partialorder %v1315_v30, inf }
 0x12c   :  { %v1151_v22 = vsel %vm1149_vm8, %v1150_v19, %v10820_v12  ;;  %10374 = vrsqrt.f32 %v1303_v38  ;;  %v1321_v5 = vand.u32 2147483648, %v1315_v30  ;;  %vm1320_vm12 = vcmp.eq.f32.partialorder %v1315_v30, 0.0 }
 0x12d   :  { %v1152_v24 = vadd.s32 %v1151_v22, %v1147_v21  ;;  %v1312_v19 = vsel %vm1311_vm11, 1.0, %v12188_v17  ;;  %vm1306_vm13 = vcmp.eq.f32.partialorder %v1303_v38, inf  ;;  %vm1308_vm0 = vcmp.eq.f32.partialorder %v1303_v38, 0.0 }
 0x12e   :  { %vm1568_vm11 = vcmask 523264  }
 0x12f   :  { %v1153_v27 = vadd.s32 536870912, %v1152_v24 }
 0x131   :  { %v1154_v29 = vshrl.u32 %v1153_v27, 30 }
 0x133   :  { %v1155_v32 = vshll.u32 %v1154_v29, 30  ;;  %v1178_v16 = vsub.s32 4, %v1154_v29 }
 0x135   :  { %v1156_v35 = vsub.s32 %v1152_v24, %v1155_v32  ;;  %v10373_v42 = vpop.eup %10372  ;;  %v1309_v24 = vand.u32 2147483648, %v1303_v38  ;;  %v1179_v26 = vsel %vm1094_vm14, %v1178_v16, %v1154_v29 }
 0x136   :  { %v1317_v59 = vmul.f32 %v10373_v42, %v1315_v30  ;;  %v10375_v62 = vpop.eup %10374  ;;  %v1181_v33 = vsel %vm1093_vm15, 0, %v1179_v26 }
 0x137   :  { %v1158_v36 = vsub.s32 0, %v1156_v35  ;;  %v1305_v12 = vmul.f32 %v10375_v62, %v1303_v38  ;;  %v1185_v42 = vand.u32 3, %v1181_v33 }
 0x138   :  { %v1319_v1 = vsel %vm1318_vm10, %v1315_v30, %v1317_v59  ;;  %vm602_vm10 = vcmask 261120  }
 0x139   :  { %v8688_v39 = vmin.u32 %v1158_v36, %v1156_v35  ;;  %v1322_v10 = vsel %vm1320_vm12, %v1321_v5, %v1319_v1  ;;  %v1307_v22 = vsel %vm1306_vm13, %v1303_v38, %v1305_v12  ;;  %vm1186_vm3 = vcmp.lt.s32.totalorder %v1185_v42, 2 }
 0x13a   :  { %v1323_v21 = vmul.f32 %v1322_v10, %v1312_v19  ;;  %v1310_v30 = vsel %vm1308_vm0, %v1309_v24, %v1307_v22  ;;  %vm1187_vm4 = vcmp.eq.s32.totalorder %v1185_v42, 0  ;;  %vm1190_vm5 = vcmp.eq.s32.totalorder %v1185_v42, 2  ;;  %v10863_v42 = vld [vmem:[%s12158_s4] sm:$0xff]  }
 0x13b   :  { %v1160_v40 = vclz %v8688_v39  ;;  %v1288_v39 = vadd.s32 3, %v1181_v33  ;;  %9193 = vmatpush3.bf16.msra.mxu1 %v10863_v42 }
 0x13c   :  { %v1324_v32 = vsub.f32 %v1310_v30, %v1323_v21  ;;  %v1326_v36 = vadd.f32 %v1323_v21, %v1310_v30  ;;  %9194 = vmatprep.subr.bf16.mxu1 %v12171_v15 }
 0x13d   :  { %v8689_v41 = vadd.s32 4294967294, %v1160_v40 }
 0x13e   :  { %v1325_v40 = vmul.f32 0.70710677, %v1324_v32 }
 0x13f   :  { %vm8690_vm9 = vcmp.lt.s32.totalorder %v8689_v41, 0 }
 0x140   :  { %v1163_v43 = vsel %vm8690_vm9, 0, %v8689_v41  ;;  %v1341_v14 = vmul.f32 %v1325_v40, %v1323_v21  ;;  %v1328_v38 = vmul.f32 %v1325_v40, %v1310_v30  ;;  %v12181_v40 = vmov 3  }
 0x141   :  { %v1164_v45 = vsub.s32 32, %v1163_v43  ;;  %v1168_v46 = vsub.s32 4294967266, %v1163_v43  ;;  %v1165_v47 = vshll.u32 %v1156_v35, %v1163_v43  ;;  %v61_v35 = vlaneseq }
 0x142   :  { %v1327_v43 = vmul.f32 0.70710677, %v1326_v36  ;;  %vm1479_vm9 = vcmask 130048  }
 0x143   :  { %v1166_v48 = vshrl.u32 %v1148_v44, %v1164_v45  ;;  %v1169_v58 = vadd.s32 127, %v1168_v46  ;;  %v10832_v41 = vshrl.u32 %v61_v35, 7  ;;  %v1289_v44 = vand.u32 3, %v1288_v39 }
 0x145   :  { %v1167_v60 = vor.u32 %v1166_v48, %v1165_v47  ;;  %v1170_v61 = vshll.u32 %v1169_v58, 23  ;;  %v10835_v29 = vsub.s32 0, %v10832_v41  ;;  %v1334_v48 = vmul.f32 %v1327_v43, %v1323_v21 }
 0x146   :  { %v1348_v58 = vmul.f32 %v1327_v43, %v1310_v30  ;;  %vm1294_vm6 = vcmp.eq.s32.totalorder %v1289_v44, 2  ;;  %vm1290_vm7 = vcmp.lt.s32.totalorder %v1289_v44, 2  ;;  %vm1291_vm8 = vcmp.eq.s32.totalorder %v1289_v44, 0 }
 0x147   :  { %v1171_v63 = vor.u32 4788187, %v1170_v61  ;;  %v1174_v9 = vcvt.s32.f32 %v1167_v60  ;;  %v1342_v60 = vsub.f32 0.0, %v1341_v14  ;;  %v1332_v5 = vrot.slane %v1328_v38, %v10835_v29 }
 0x148   :  { %v1338_v10 = vrot.slane %v1334_v48, %v10835_v29 }
 0x149   :  { %v1172_v8 = vand.u32 2147483647, %v1171_v63 }
 0x14b   :  { %v1175_v11 = vmul.f32 %v1174_v9, %v1172_v8  ;;  %v1359_v8 = vrot.slane %v1341_v14, %v10835_v29 }
 0x14d   :  { %v1176_v20 = vxor.u32 2147483648, %v1175_v11 }
 0x14f   :  { %v1177_v6 = vsel %vm1094_vm14, %v1176_v20, %v1175_v11  ;;  %v1352_v11 = vrot.slane %v1348_v58, %v10835_v29  ;;  %v1346_v20 = vrot.slane %v1342_v60, %v10835_v29 }
 0x150   :  { %v1180_v27 = vsel %vm1093_vm15, %v10797_v7, %v1177_v6  ;;  %v12183_v7 = vmov 2  }
 0x151   :  { %10376 = vcosq.f32 %v1180_v27 }
 0x152   :  { %10378 = vsinq.f32 %v1180_v27 }
 0x15b   :  { %v10377_v45 = vpop.eup %10376 }
 0x15c   :  { %v10379_v46 = vpop.eup %10378  ;;  %v1191_v47 = vxor.u32 2147483648, %v10377_v45 }
 0x15d   :  { %v1188_v59 = vxor.u32 2147483648, %v10379_v46 }
 0x15e   :  { %v1192_v61 = vsel %vm1190_vm5, %v1191_v47, %v10379_v46  ;;  %v1296_v62 = vsel %vm1294_vm6, %v1191_v47, %v10379_v46 }
 0x15f   :  { %v1189_v63 = vsel %vm1187_vm4, %v10377_v45, %v1188_v59  ;;  %v1293_v1 = vsel %vm1291_vm8, %v10377_v45, %v1188_v59 }
 0x160   :  { %v1193_v9 = vsel %vm1186_vm3, %v1189_v63, %v1192_v61  ;;  %v1297_v12 = vsel %vm1290_vm7, %v1293_v1, %v1296_v62  ;;  %v59_v61 = vld [vmem:[%s12161_s7] sm:$0xf]  ;;  %v75_v63 = vsub.s32 3, %v10832_v41  ;;  %v67_v1 = vsub.s32 1, %v10832_v41 }
 0x161   :  { %v1194_v16 = vsel %vm1184_vm1, nan, %v1193_v9  ;;  %v1298_v19 = vsel %vm1184_vm1, nan, %v1297_v12  ;;  %v60_v62 = vsub.f32 1.0, %v59_v61 }
 0x162   :  { %v1333_v21 = vmul.f32 %v1332_v5, %v1194_v16  ;;  %v1339_v22 = vmul.f32 %v1338_v10, %v1298_v19  ;;  %v1355_v24 = vmul.f32 %v1352_v11, %v1194_v16  ;;  %v1360_v6 = vmul.f32 %v1359_v8, %v1298_v19 }
 0x163   :  { %v1347_v26 = vmul.f32 %v1346_v20, %v1194_v16  ;;  %v1353_v27 = vmul.f32 %v1352_v11, %v1298_v19  ;;  %v1362_v30 = vmul.f32 %v1338_v10, %v1194_v16  ;;  %v1363_v32 = vmul.f32 %v1332_v5, %v1298_v19 }
 0x164   :  { %v1340_v33 = vsub.f32 %v1333_v21, %v1339_v22  ;;  %v1361_v35 = vsub.f32 %v1355_v24, %v1360_v6  ;;  %v71_v5 = vsub.s32 2, %v10832_v41  ;;  %v10873_v12 = vrot.slane %v60_v62, %v67_v1 }
 0x165   :  { %v1354_v36 = vsub.f32 %v1347_v26, %v1353_v27  ;;  %v1364_v39 = vadd.f32 %v1363_v32, %v1362_v30  ;;  %v10876_v10 = vrot.slane %v60_v62, %v10835_v29  ;;  %v10878_v11 = vrot.slane %v59_v61, %v75_v63 }
 0x166   :  { %1379 = vperm.xlu1 %10255, %v1340_v33   ;;  %1367 = vperm.xlu0 %10254, %v1340_v33   ;;  %v10880_v16 = vrot.slane %v60_v62, %v75_v63  ;;  %v10882_v19 = vrot.slane %v59_v61, %v67_v1  ;;  %v10885_v20 = vrot.slane %v59_v61, %v10835_v29 }
 0x167   :  { %v10887_v21 = vrot.slane %v60_v62, %v71_v5  ;;  %v10889_v22 = vrot.slane %v59_v61, %v71_v5 }
 0x168   :  { %12217 = vst [vmem:[#allocation9_spill] sm:$0xff] %v10882_v19  ;;  %12218 = vst [vmem:[#allocation10_spill] sm:$0xff] %v10885_v20 }
 0x169   :  { %12219 = vst [vmem:[#allocation11_spill] sm:$0xff] %v10887_v21 }
 0x16a   :  { %1384 = vperm.xlu1 %10255, %v1361_v35   ;;  %1373 = vperm.xlu0 %10254, %v1361_v35  }
 0x16e   :  { %10257 = vset.pattern.permute.xlu1 %v12183_v7  ;;  %10256 = vset.pattern.permute.xlu0 %v12183_v7 }
 0x16f   :  { %1395 = vperm.xlu1 %10257, %v1361_v35   ;;  %1390 = vperm.xlu0 %10256, %v1340_v33  }
 0x173   :  { %10258 = vset.pattern.permute.xlu1 %v12181_v40  ;;  %10259 = vset.pattern.permute.xlu0 %v12181_v40 }
 0x174   :  { %1401 = vperm.xlu1 %10258, %v1340_v33   ;;  %1406 = vperm.xlu0 %10259, %v1361_v35  }
 0x178   :  { %10260 = vset.pattern.permute.xlu1 %v12175_v56  ;;  %10261 = vset.pattern.permute.xlu0 %v12185_v55 }
 0x179   :  { %1413 = vperm.xlu1 %10260, %v1354_v36   ;;  %1425 = vperm.xlu0 %10261, %v1354_v36  }
 0x17d   :  { %1419 = vperm.xlu1 %10260, %v1364_v39   ;;  %10264 = vset.pattern.permute.xlu0 %v12183_v7 }
 0x17e   :  { %1441 = vperm.xlu0 %10264, %v1364_v39  }
 0x181   :  { %10262 = vset.pattern.permute.xlu1 %v12185_v55 }
 0x182   :  { %1430 = vperm.xlu1 %10262, %v1364_v39   ;;  %10266 = vset.pattern.permute.xlu0 %v12175_v56 }
 0x186   :  { %10263 = vset.pattern.permute.xlu1 %v12183_v7 }
 0x187   :  { %1436 = vperm.xlu1 %10263, %v1354_v36  }
 0x18b   :  { %10265 = vset.pattern.permute.xlu1 %v12181_v40 }
 0x18c   :  { %1447 = vperm.xlu1 %10265, %v1354_v36  }
 0x190   :  { %1452 = vperm.xlu1 %10265, %v1364_v39  }
 0x194   :  { %10267 = vset.pattern.permute.xlu1 %v12175_v56 }
 0x1e5   :  { %v1380_v43 = vpop.permute.xlu1 %1379  ;;  %v1368_v14 = vpop.permute.xlu0 %1367 }
 0x1e6   :  { %v1382_v39 = vmul.f32 %v1380_v43, %v10882_v19 }
 0x1e9   :  { %v1385_v44 = vpop.permute.xlu1 %1384  ;;  %v1374_v38 = vpop.permute.xlu0 %1373 }
 0x1ea   :  { %v1387_v24 = vmul.f32 %v1385_v44, %v10873_v12  ;;  %v1376_v6 = vmul.f32 %v1374_v38, %v10876_v10 }
 0x1ec   :  { %v1388_v62 = vadd.f32 %v1387_v24, %v1382_v39 }
 0x1ee   :  { %v1396_v45 = vpop.permute.xlu1 %1395  ;;  %v1391_v48 = vpop.permute.xlu0 %1390 }
 0x1ef   :  { %v1398_v44 = vmul.f32 %v1396_v45, %v10887_v21  ;;  %v1393_v38 = vmul.f32 %v1391_v48, %v10889_v22 }
 0x1f1   :  { %v1399_v45 = vadd.f32 %v1398_v44, %v1393_v38 }
 0x1f3   :  { %v1402_v46 = vpop.permute.xlu1 %1401  ;;  %v1407_v59 = vpop.permute.xlu0 %1406 }
 0x1f4   :  { %v1404_v26 = vmul.f32 %v1402_v46, %v10878_v11  ;;  %v1409_v27 = vmul.f32 %v1407_v59, %v10880_v16 }
 0x1f6   :  { %v1410_v1 = vadd.f32 %v1409_v27, %v1404_v26 }
 0x1f8   :  { %v1414_v47 = vpop.permute.xlu1 %1413  ;;  %v1426_v8 = vpop.permute.xlu0 %1425  ;;  %v1463_v24 = vmul.f32 %v1410_v1, %v1399_v45 }
 0x1f9   :  { %v1428_v33 = vmul.f32 %v1426_v8, %v10882_v19  ;;  %v1416_v46 = vmul.f32 %v1414_v47, %v10885_v20 }
 0x1fc   :  { %v1420_v58 = vpop.permute.xlu1 %1419 }
 0x1fd   :  { %v1442_v30 = vpop.permute.xlu0 %1441  ;;  %v1422_v35 = vmul.f32 %v1420_v58, %v10876_v10 }
 0x1fe   :  { %v1444_v59 = vmul.f32 %v1442_v30, %v10887_v21 }
 0x1ff   :  { %v1423_v58 = vadd.f32 %v1422_v35, %v1416_v46 }
 0x201   :  { %v1431_v60 = vpop.permute.xlu1 %1430 }
 0x202   :  { %v1433_v41 = vmul.f32 %v1431_v60, %v10873_v12  ;;  %v1370_v60 = vmul.f32 %v1368_v14, %v10885_v20  ;;  %v10910_v14 = vld [vmem:[%s12158_s4 + $0x8] sm:$0xff]  }
 0x203   :  { %9195 = vmatpush3.bf16.msra.mxu1 %v10910_v14 }
 0x204   :  { %v1434_v61 = vadd.f32 %v1433_v41, %v1428_v33  ;;  %v1377_v63 = vadd.f32 %v1376_v6, %v1370_v60  ;;  %9278 = vmatprep.subr.bf16.mxu1 %v12171_v15  ;;  %v1461_v6 = vmul.f32 %v1423_v58, %v1388_v62 }
 0x206   :  { %v1437_v9 = vpop.permute.xlu1 %1436  ;;  %v1458_v47 = vmul.f32 %v1434_v61, %v1423_v58  ;;  %v1460_v48 = vmul.f32 %v1434_v61, %v1377_v63  ;;  %v1457_v41 = vmul.f32 %v1388_v62, %v1377_v63  ;;  %v10932_v58 = vld [vmem:[%s12159_s5 + $0x8] sm:$0xff]  }
 0x207   :  { %v1439_v36 = vmul.f32 %v1437_v9, %v10889_v22 }
 0x208   :  { %v1459_v33 = vsub.f32 %v1457_v41, %v1458_v47  ;;  %v1462_v35 = vadd.f32 %v1461_v6, %v1460_v48 }
 0x209   :  { %v1445_v8 = vadd.f32 %v1444_v59, %v1439_v36 }
 0x20b   :  { %v1448_v32 = vpop.permute.xlu1 %1447  ;;  %v1467_v26 = vmul.f32 %v1445_v8, %v1410_v1 }
 0x20c   :  { %v1450_v9 = vmul.f32 %v1448_v32, %v10878_v11 }
 0x20f   :  { %v1453_v5 = vpop.permute.xlu1 %1452 }
 0x210   :  { %v1455_v43 = vmul.f32 %v1453_v5, %v10880_v16  ;;  %v10926_v5 = vld [vmem:[%s12159_s5] sm:$0xff]  }
 0x211   :  { %9201 = vmatpush3.bf16.msra.mxu0 %v10926_v5 }
 0x212   :  { %v1456_v30 = vadd.f32 %v1455_v43, %v1450_v9  ;;  %9202 = vmatprep.subr.bf16.mxu0 %v12171_v15  ;;  %v10947_v9 = vld [vmem:[%s12159_s5 + $0x18] sm:$0xff]  }
 0x214   :  { %v1464_v27 = vmul.f32 %v1456_v30, %v1445_v8  ;;  %v1466_v32 = vmul.f32 %v1456_v30, %v1399_v45  ;;  %v10939_v8 = vld [vmem:[%s12159_s5 + $0x10] sm:$0xff]  }
 0x215   :  { %9203 = vmatpush3.bf16.msra.mxu0 %v10932_v58 }
 0x216   :  { %v1465_v36 = vsub.f32 %v1463_v24, %v1464_v27  ;;  %v1468_v39 = vadd.f32 %v1467_v26, %v1466_v32  ;;  %9204 = vmatprep.subr.bf16.mxu0 %v12171_v15  ;;  %v10962_v26 = vld [vmem:[%s12160_s6] ss:$0 sm:$0xff] }
 0x218   :  { %v1472_v60 = vmul.f32 %v1468_v39, %v1459_v33  ;;  %v1473_v46 = vmul.f32 %v1465_v36, %v1462_v35  ;;  %v1470_v44 = vmul.f32 %v1468_v39, %v1462_v35  ;;  %v1469_v38 = vmul.f32 %v1465_v36, %v1459_v33 }
 0x219   :  { %9205 = vmatpush3.bf16.msra.mxu0 %v10939_v8 }
 0x21a   :  { %v1474_v59 = vadd.f32 %v1473_v46, %v1472_v60  ;;  %v1471_v61 = vsub.f32 %v1469_v38, %v1470_v44  ;;  %9206 = vmatprep.subr.bf16.mxu0 %v12171_v15 }
 0x21c   :  { %1476 = vrot.lane.b32.xlu0 %v1474_v59, %s10581_s11 }
 0x21d   :  { %9207 = vmatpush3.bf16.msra.mxu0 %v10947_v9 }
 0x21e   :  { %9850 = vmatprep.subr.bf16.mxu0 %v12169_v3 }
 0x28e   :  { %v1477_v63 = vpop.permute.xlu0 %1476 }
 0x28f   :  { %v1480_v62 = vsel %vm1479_vm9, %v1471_v61, %v1477_v63 }
 0x290   :  { %v1481_v1 = vpack.c.bf16 %v1480_v62, %v1480_v62 }
 0x292   :  { %9197 = vmatmul.mubr.msk.bf16.vlgmr.msra.gmra.mrb[4].mxu1 %vm602_vm10, %v1481_v1 }
 0x293   :  { %9279 = vmatpush3.bf16.msra.mxu1 %v10863_v42  ;;  %9282 = vmatprep.mubr.msk.bf16.mxu1 %vm10568_vm2, %v12171_v15 }
 0x294   :  { %9280 = vmatprep.subr.bf16.mxu1 %v12171_v15 }
 0x297   :  { %9281 = vmatpush3.bf16.msra.mxu1 %v10910_v14 }
 0x298   :  { %9286 = vmatprep.subr.bf16.mxu1 %v12171_v15 }
 0x365   :  { %v1531_v43 = vpop.f32.mrb[4].mxu1 }
 0x366   :  { %v1537_v45 = vmul.f32 %v1531_v43, %v1531_v43  ;;  %v9198_v47 = vpop.f32.mrb[5].mxu1 }
 0x367   :  { %v1534_v48 = vpop.f32.mrb[6].mxu1 }
 0x368   :  { %1539 = vrot.lane.b32.xlu1 %v1537_v45, %s10582_s20  ;;  %v9199_v30 = vpop.f32.mrb[7].mxu1 }
 0x3da   :  { %v1540_v41 = vpop.permute.xlu1 %1539 }
 0x3db   :  { %v1542_v24 = vadd.f32 %v1540_v41, %v1537_v45 }
 0x3dd   :  { %v1543_v6 = vpack.c.bf16 %v1542_v24, %v1542_v24 }
 0x3df   :  { %9209 = vmatmul.mubr.msk.bf16.vlgmr.msra.gmra.mrb[4].mxu0 %vm1568_vm11, %v1543_v6 }
 0x3e0   :  { %9852 = vmatpush3.bf16.msra.mxu0 %v10664_v13  ;;  %9220 = vmatprep.mubr.msk.f32.mxu0 %vm10568_vm2, %v12171_v15 }
 0x3e1   :  { %9853 = vmatprep.subr.bf16.mxu0 %v12169_v3 }
 0x3e4   :  { %9855 = vmatpush3.bf16.msra.mxu0 %v10670_v18 }
 0x3e5   :  { %9856 = vmatprep.subr.bf16.mxu0 %v12169_v3 }
 0x4b2   :  { %v1606_v27 = vpop.f32.mrb[4].mxu0 }
 0x4b3   :  { %v1607_v32 = vadd.f32 %v10962_v26, %v1606_v27  ;;  %v9210_v33 = vpop.f32.mrb[5].mxu0 }
 0x4b4   :  { %v1609_v35 = vpop.f32.mrb[6].mxu0  ;;  %v11014_v33 = vadd.f32 %v10783_v57, %v10791_v4 }
 0x4b5   :  { %10380 = vtanh.f32 %v1607_v32  ;;  %v9211_v36 = vpop.f32.mrb[7].mxu0  ;;  %v1612_v60 = vmul.f32 0.5, %v1607_v32 }
 0x4b6   :  { %v1638_v35 = vrot.slane %v11014_v33, 2 }
 0x4b7   :  { %10382 = vtanh.f32 %v1612_v60 }
 0x4bf   :  { %v10381_v39 = vpop.eup %10380 }
 0x4c0   :  { %1619 = vrot.lane.b32.xlu0 %v10381_v39, %s10583_s23 }
 0x4c1   :  { %v10383_v46 = vpop.eup %10382 }
 0x4c2   :  { %v1614_v44 = vadd.f32 1.0, %v10383_v46 }
 0x4c4   :  { %v1615_v38 = vmul.f32 0.5, %v1614_v44 }
 0x4c6   :  { %v1617_v63 = vmul.f32 0.0, %v1615_v38 }
 0x532   :  { %v1620_v59 = vpop.permute.xlu0 %1619 }
 0x533   :  { %v1622_v61 = vmul.f32 %v1620_v59, %v1615_v38 }
 0x535   :  { %1624 = vrot.lane.b32.xlu1 %v1622_v61, %s10583_s23 }
 0x5a7   :  { %v1625_v62 = vpop.permute.xlu1 %1624 }
 0x5a8   :  { %v10967_v1 = vadd.f32 %v1625_v62, %v1617_v63 }
 0x5aa   :  { %10384 = vtanh.f32 %v10967_v1 }
 0x5b4   :  { %v10385_v43 = vpop.eup %10384 }
 0x5b5   :  { %1630 = vrot.lane.b32.xlu0 %v10385_v43, %s10583_s23 }
 0x627   :  { %v1631_v45 = vpop.permute.xlu0 %1630 }
 0x628   :  { %v1633_v47 = vmul.f32 %v1631_v45, %v1615_v38 }
 0x62a   :  { %1635 = vrot.lane.b32.xlu1 %v1633_v47, %s10584_s24 }
 0x69c   :  { %v10972_v48 = vpop.permute.xlu1 %1635 }
 0x69d   :  { %12220 = vst [vmem:[#allocation12_spill] sm:$0xff] %v10972_v48  ;;  %v1640_v30 = vsel %vm602_vm10, %v10972_v48, 0 }
 0x69e   :  { %v1711_v41 = vand.u32 4294901760, %v1640_v30 }
 0x6a0   :  { %v1712_v24 = vsub.f32 %v1640_v30, %v1711_v41 }
 0x6a2   :  { %v1713_v6 = vand.u32 4294901760, %v1712_v24 }
 0x6a4   :  { %v1714_v27 = vsub.f32 %v1712_v24, %v1713_v6 }
 0x6a6   :  { %v1715_v32 = vand.u32 4294901760, %v1714_v27 }
 0x6a8   :  { %9221 = vmatmul.mubr.f32.vlgmr.msra.gmra.mrb[2].mxu0 %v1715_v32 }
 0x6a9   :  { %9858 = vmatpush3.bf16.msra.mxu0 %v10709_v49  ;;  %9231 = vmatprep.mubr.msk.f32.mxu0 %vm10568_vm2, %v12171_v15 }
 0x6aa   :  { %9859 = vmatprep.subr.bf16.mxu0 %v12169_v3 }
 0x6ad   :  { %9861 = vmatpush3.bf16.msra.mxu0 %v10714_v50 }
 0x6ae   :  { %9862 = vmatprep.subr.bf16.mxu0 %v12169_v3 }
 0x6b0   :  { %9232 = vmatmul.mubr.f32.vlgmr.msra.gmra.mrb[2].mxu0 %v1711_v41 }
 0x6b1   :  { %9864 = vmatpush3.bf16.msra.mxu0 %v10721_v51  ;;  %9242 = vmatprep.mubr.msk.f32.mxu0 %vm10568_vm2, %v12171_v15 }
 0x6b2   :  { %9865 = vmatprep.subr.bf16.mxu0 %v12169_v3 }
 0x6b5   :  { %9867 = vmatpush3.bf16.msra.mxu0 %v10729_v52 }
 0x6b6   :  { %9868 = vmatprep.subr.bf16.mxu0 %v12169_v3 }
 0x6b8   :  { %9243 = vmatmul.mubr.f32.vlgmr.msra.gmra.mrb[2].mxu0 %v1712_v24 }
 0x6b9   :  { %9870 = vmatpush3.bf16.msra.mxu0 %v10664_v13  ;;  %9253 = vmatprep.mubr.msk.f32.mxu0 %vm10568_vm2, %v12171_v15 }
 0x6ba   :  { %9871 = vmatprep.subr.bf16.mxu0 %v12169_v3 }
 0x6bd   :  { %9873 = vmatpush3.bf16.msra.mxu0 %v10670_v18 }
 0x6be   :  { %9874 = vmatprep.subr.bf16.mxu0 %v12169_v3 }
 0x6c0   :  { %9254 = vmatmul.mubr.f32.vlgmr.msra.gmra.mrb[2].mxu0 %v1713_v6 }
 0x6c1   :  { %9876 = vmatpush3.bf16.msra.mxu0 %v10746_v53  ;;  %9264 = vmatprep.mubr.msk.f32.mxu0 %vm10568_vm2, %v12171_v15 }
 0x6c2   :  { %9877 = vmatprep.subr.bf16.mxu0 %v12169_v3 }
 0x6c5   :  { %9879 = vmatpush3.bf16.msra.mxu0 %v10751_v54 }
 0x6c6   :  { %9880 = vmatprep.subr.bf16.mxu0 %v12169_v3 }
 0x6c8   :  { %9265 = vmatmul.mubr.f32.vlgmr.msra.gmra.mrb[2].mxu0 %v1711_v41 }
 0x6c9   :  { %9882 = vmatpush3.bf16.msra.mxu0 %v10664_v13  ;;  %9275 = vmatprep.mubr.msk.f32.mxu0 %vm10568_vm2, %v12171_v15 }
 0x6ca   :  { %9883 = vmatprep.subr.bf16.mxu0 %v12169_v3 }
 0x6cd   :  { %9885 = vmatpush3.bf16.msra.mxu0 %v10670_v18 }
 0x6ce   :  { %9364 = vmatprep.subr.bf16.mxu0 %v12171_v15 }
 0x6d0   :  { %9276 = vmatmul.mubr.f32.vlgmr.msra.gmra.mrb[2].mxu0 %v1711_v41 }
 0x6d1   :  { %9365 = vmatpush3.bf16.msra.mxu0 %v10863_v42  ;;  %9368 = vmatprep.mubr.msk.bf16.mxu0 %vm10568_vm2, %v12171_v15 }
 0x6d2   :  { %9366 = vmatprep.subr.bf16.mxu0 %v12171_v15 }
 0x6d5   :  { %9367 = vmatpush3.bf16.msra.mxu0 %v10910_v14 }
 0x6d6   :  { %9372 = vmatprep.subr.bf16.mxu0 %v12171_v15 }
 0x7a3   :  { %v2123_v36 = vpop.f32.mrb[2].mxu0 }
 0x7a4   :  { %v11017_v39 = vadd.f32 %v2123_v36, %v1638_v35  ;;  %v9277_v60 = vpop.f32.mrb[3].mxu0 }
 0x7a6   :  { %v11020_v42 = vmul.f32 0.5, %v11017_v39  ;;  %v2335_v59 = vmul.f32 %v11017_v39, %v11017_v39  ;;  %vm2347_vm5 = vcmp.ge.f32.partialorder %v11017_v39, 0.0 }
 0x7a8   :  { %v2131_v46 = vand.u32 2139095040, %v11020_v42  ;;  %v2128_v57 = vand.u32 2147483647, %v11020_v42  ;;  %v2336_v63 = vadd.f32 1.0, %v2335_v59  ;;  %vm2130_vm8 = vcmp.lt.s32.totalorder %v11020_v42, 0 }
 0x7aa   :  { %v2132_v44 = vshrl.u32 %v2131_v46, 23  ;;  %v2135_v43 = vand.u32 8388607, %v2128_v57  ;;  %10386 = vrsqrt.f32 %v2336_v63 }
 0x7ac   :  { %v8703_v38 = vadd.s32 4294967169, %v2132_v44  ;;  %v2136_v44 = vor.u32 8388608, %v2135_v43 }
 0x7ae   :  { %v2138_v61 = vadd.s32 1, %v8703_v38 }
 0x7b0   :  { %vm2139_vm12 = vcmp.gt.s32.totalorder %v2138_v61, 0 }
 0x7b1   :  { %v2140_v4 = vsel %vm2139_vm12, %v2138_v61, 0  ;;  %vm2129_vm12 = vcmp.le.f32.partialorder %v2128_v57, 0.7853982 }
 0x7b2   :  { %v2142_v62 = vand.u32 31, %v2140_v4  ;;  %v2141_v47 = vshrl.u32 %v2140_v4, 5 }
 0x7b4   :  { %v2143_v45 = vsub.s32 32, %v2142_v62  ;;  %v2145_v30 = vshll.u32 %v12190_v23, %v2142_v62  ;;  %v2148_v41 = vshll.u32 %v12165_v25, %v2142_v62  ;;  %v2151_v27 = vshll.u32 %v12167_v28, %v2142_v62 }
 0x7b5   :  { %v2154_v35 = vshll.u32 %v12173_v31, %v2142_v62  ;;  %v2157_v60 = vshll.u32 %v12177_v34, %v2142_v62  ;;  %vm2160_vm13 = vcmp.lt.s32.totalorder %v2141_v47, 1  ;;  %vm2163_vm14 = vcmp.lt.s32.totalorder %v2141_v47, 4 }
 0x7b6   :  { %v2146_v24 = vshrl.u32 %v12165_v25, %v2143_v45  ;;  %v2149_v6 = vshrl.u32 %v12167_v28, %v2143_v45  ;;  %v2152_v32 = vshrl.u32 %v12173_v31, %v2143_v45  ;;  %v2155_v36 = vshrl.u32 %v12177_v34, %v2143_v45 }
 0x7b7   :  { %v2158_v46 = vshrl.u32 %v12179_v37, %v2143_v45  ;;  %v2144_v15 = vshrl.u32 %v12190_v23, %v2143_v45  ;;  %vm2162_vm15 = vcmp.lt.s32.totalorder %v2141_v47, 3  ;;  %vm2161_vm0 = vcmp.lt.s32.totalorder %v2141_v47, 2 }
 0x7b8   :  { %v2147_v38 = vor.u32 %v2146_v24, %v2145_v30  ;;  %v2150_v59 = vor.u32 %v2149_v6, %v2148_v41  ;;  %v2153_v61 = vor.u32 %v2152_v32, %v2151_v27  ;;  %v2156_v4 = vor.u32 %v2155_v36, %v2154_v35  ;;  %v10387_v36 = vpop.eup %10386 }
 0x7b9   :  { %v2159_v63 = vor.u32 %v2158_v46, %v2157_v60  ;;  %v2176_v37 = vshll.u32 %v2136_v44, 8  ;;  %v2349_v47 = vsub.f32 1.0, %v10387_v36  ;;  %v2338_v44 = vadd.f32 1.0, %v10387_v36 }
 0x7ba   :  { %v2165_v25 = vsel %vm2163_vm14, %v2153_v61, 2102212464  ;;  %v2168_v28 = vsel %vm2160_vm13, %v2147_v38, %v2150_v59  ;;  %v2172_v3 = vsel %vm2160_vm13, %v2150_v59, %v2153_v61  ;;  %v2169_v31 = vsel %vm2163_vm14, %v2156_v4, 920167782 }
 0x7bb   :  { %v2173_v56 = vsel %vm2163_vm14, %v2159_v63, 1326507024  ;;  %v2170_v62 = vsel %vm2162_vm15, %v2153_v61, %v2169_v31  ;;  %v2164_v43 = vsel %vm2160_vm13, %v2144_v15, %v2147_v38  ;;  %v2166_v30 = vsel %vm2162_vm15, %v2150_v59, %v2165_v25 }
 0x7bc   :  { %v2174_v34 = vsel %vm2162_vm15, %v2156_v4, %v2173_v56  ;;  %v2171_v41 = vsel %vm2161_vm0, %v2168_v28, %v2170_v62  ;;  %v2167_v60 = vsel %vm2161_vm0, %v2164_v43, %v2166_v30  ;;  %v2350_v25 = vmul.f32 0.5, %v2349_v47 }
 0x7bd   :  { %v2175_v24 = vsel %vm2161_vm0, %v2172_v3, %v2174_v34  ;;  %v11042_v32 = vmul.u32.u64.low %v2176_v37, %v2171_v41  ;;  %v11043_v35 = vmul.u32.u64.high %v2176_v37, %v2171_v41, %v11042_v32  ;;  %v2183_v31 = vmul.u32 %v2176_v37, %v2167_v60 }
 0x7be   :  { %v11039_v6 = vmul.u32.u64.low %v2176_v37, %v2175_v24  ;;  %v11040_v27 = vmul.u32.u64.high %v2176_v37, %v2175_v24, %v11039_v6  ;;  %v2351_v34 = vmax.f32 %v2350_v25, 0.0  ;;  %v2339_v61 = vmul.f32 0.5, %v2338_v44 }
 0x7bf   :  { %v2186_v45 = vadd.s32 1, %v11043_v35  ;;  %vm2220_vm14 = vweird.f32 %v11020_v42 }
 0x7c0   :  { %vm2185_vm1 = vc.u32 %v11040_v27, %v11042_v32  ;;  %10388 = vrsqrt.f32 %v2351_v34  ;;  %v2184_v30 = vadd.s32 %v11042_v32, %v11040_v27  ;;  %vm2354_vm4 = vcmp.eq.f32.partialorder %v2351_v34, inf }
 0x7c1   :  { %v2187_v56 = vsel %vm2185_vm1, %v2186_v45, %v11043_v35  ;;  %10390 = vrsqrt.f32 %v2339_v61  ;;  %v2357_v25 = vand.u32 2147483648, %v2351_v34  ;;  %vm2356_vm6 = vcmp.eq.f32.partialorder %v2351_v34, 0.0 }
 0x7c2   :  { %v2188_v15 = vadd.s32 %v2187_v56, %v2183_v31  ;;  %vm2342_vm7 = vcmp.eq.f32.partialorder %v2339_v61, inf  ;;  %vm2344_vm13 = vcmp.eq.f32.partialorder %v2339_v61, 0.0 }
 0x7c4   :  { %v2189_v28 = vadd.s32 536870912, %v2188_v15 }
 0x7c6   :  { %v2190_v3 = vshrl.u32 %v2189_v28, 30 }
 0x7c8   :  { %v2191_v46 = vshll.u32 %v2190_v3, 30 }
 0x7ca   :  { %v2192_v38 = vsub.s32 %v2188_v15, %v2191_v46  ;;  %v10389_v43 = vpop.eup %10388 }
 0x7cb   :  { %v2353_v45 = vmul.f32 %v10389_v43, %v2351_v34  ;;  %v10391_v31 = vpop.eup %10390  ;;  %v2345_v43 = vand.u32 2147483648, %v2339_v61 }
 0x7cc   :  { %v2194_v59 = vsub.s32 0, %v2192_v38  ;;  %v2341_v44 = vmul.f32 %v10391_v31, %v2339_v61 }
 0x7cd   :  { %v2355_v15 = vsel %vm2354_vm4, %v2351_v34, %v2353_v45 }
 0x7ce   :  { %v8704_v4 = vmin.u32 %v2194_v59, %v2192_v38  ;;  %v2358_v27 = vsel %vm2356_vm6, %v2357_v25, %v2355_v15  ;;  %v2214_v59 = vsub.s32 4, %v2190_v3 }
 0x7d0   :  { %v2196_v63 = vclz %v8704_v4 }
 0x7d2   :  { %v8705_v62 = vadd.s32 4294967294, %v2196_v63  ;;  %v2343_v63 = vsel %vm2342_vm7, %v2339_v61, %v2341_v44 }
 0x7d4   :  { %vm8706_vm3 = vcmp.lt.s32.totalorder %v8705_v62, 0 }
 0x7d5   :  { %v2199_v37 = vsel %vm8706_vm3, 0, %v8705_v62 }
 0x7d6   :  { %v2200_v41 = vsub.s32 32, %v2199_v37  ;;  %v2204_v24 = vsub.s32 4294967266, %v2199_v37  ;;  %v2201_v6 = vshll.u32 %v2192_v38, %v2199_v37  ;;  %v2348_v38 = vsel %vm2347_vm5, 1.0, %v12188_v17 }
 0x7d7   :  { %v2359_v62 = vmul.f32 %v2358_v27, %v2348_v38  ;;  %v2215_v37 = vsel %vm2130_vm8, %v2214_v59, %v2190_v3 }
 0x7d8   :  { %v2202_v35 = vshrl.u32 %v2184_v30, %v2200_v41  ;;  %v2205_v60 = vadd.s32 127, %v2204_v24  ;;  %v2346_v30 = vsel %vm2344_vm13, %v2345_v43, %v2343_v63  ;;  %v2217_v24 = vsel %vm2129_vm12, 0, %v2215_v37 }
 0x7d9   :  { %v2360_v41 = vsub.f32 %v2346_v30, %v2359_v62  ;;  %v2221_v45 = vand.u32 3, %v2217_v24 }
 0x7da   :  { %v2203_v36 = vor.u32 %v2202_v35, %v2201_v6  ;;  %v2206_v47 = vshll.u32 %v2205_v60, 23  ;;  %v2362_v6 = vadd.f32 %v2359_v62, %v2346_v30  ;;  %v2324_v35 = vadd.s32 3, %v2217_v24 }
 0x7db   :  { %v2361_v60 = vmul.f32 0.70710677, %v2360_v41  ;;  %vm2222_vm15 = vcmp.lt.s32.totalorder %v2221_v45, 2  ;;  %vm2223_vm0 = vcmp.eq.s32.totalorder %v2221_v45, 0  ;;  %vm2226_vm1 = vcmp.eq.s32.totalorder %v2221_v45, 2 }
 0x7dc   :  { %v2207_v56 = vor.u32 4788187, %v2206_v47  ;;  %v2210_v46 = vcvt.s32.f32 %v2203_v36  ;;  %v2363_v36 = vmul.f32 0.70710677, %v2362_v6  ;;  %v2325_v47 = vand.u32 3, %v2324_v35 }
 0x7dd   :  { %v2377_v31 = vmul.f32 %v2361_v60, %v2359_v62  ;;  %v2364_v57 = vmul.f32 %v2361_v60, %v2346_v30 }
 0x7de   :  { %v2208_v28 = vand.u32 2147483647, %v2207_v56  ;;  %v2384_v15 = vmul.f32 %v2363_v36, %v2346_v30  ;;  %v2370_v25 = vmul.f32 %v2363_v36, %v2359_v62  ;;  %vm2330_vm3 = vcmp.eq.s32.totalorder %v2325_v47, 2 }
 0x7df   :  { %vm2326_vm4 = vcmp.lt.s32.totalorder %v2325_v47, 2  ;;  %vm2327_vm5 = vcmp.eq.s32.totalorder %v2325_v47, 0  ;;  %v2395_v38 = vrot.slane %v2377_v31, %v10835_v29 }
 0x7e0   :  { %v2211_v32 = vmul.f32 %v2210_v46, %v2208_v28  ;;  %v2378_v46 = vsub.f32 0.0, %v2377_v31  ;;  %v2374_v62 = vrot.slane %v2370_v25, %v10835_v29 }
 0x7e2   :  { %v2212_v4 = vxor.u32 2147483648, %v2211_v32  ;;  %v2382_v30 = vrot.slane %v2378_v46, %v10835_v29 }
 0x7e4   :  { %v2213_v39 = vsel %vm2130_vm8, %v2212_v4, %v2211_v32  ;;  %v2368_v4 = vrot.slane %v2364_v57, %v10835_v29 }
 0x7e5   :  { %v2216_v34 = vsel %vm2129_vm12, %v11020_v42, %v2213_v39  ;;  %v2388_v39 = vrot.slane %v2384_v15, %v10835_v29  ;;  %v12221_v42 = vmov 0  }
 0x7e6   :  { %10392 = vcosq.f32 %v2216_v34 }
 0x7e7   :  { %10394 = vsinq.f32 %v2216_v34 }
 0x7f0   :  { %v10393_v56 = vpop.eup %10392 }
 0x7f1   :  { %v10395_v3 = vpop.eup %10394  ;;  %v2227_v61 = vxor.u32 2147483648, %v10393_v56 }
 0x7f2   :  { %v2224_v28 = vxor.u32 2147483648, %v10395_v3 }
 0x7f3   :  { %v2228_v44 = vsel %vm2226_vm1, %v2227_v61, %v10395_v3  ;;  %v2332_v27 = vsel %vm2330_vm3, %v2227_v61, %v10395_v3 }
 0x7f4   :  { %v2225_v32 = vsel %vm2223_vm0, %v10393_v56, %v2224_v28  ;;  %v2329_v59 = vsel %vm2327_vm5, %v10393_v56, %v2224_v28 }
 0x7f5   :  { %v2229_v63 = vsel %vm2222_vm15, %v2225_v32, %v2228_v44  ;;  %v2333_v43 = vsel %vm2326_vm4, %v2329_v59, %v2332_v27 }
 0x7f6   :  { %v2230_v37 = vsel %vm2220_vm14, nan, %v2229_v63  ;;  %v2334_v34 = vsel %vm2220_vm14, nan, %v2333_v43 }
 0x7f7   :  { %v2391_v41 = vmul.f32 %v2388_v39, %v2230_v37  ;;  %v2396_v24 = vmul.f32 %v2395_v38, %v2334_v34  ;;  %v2369_v6 = vmul.f32 %v2368_v4, %v2230_v37  ;;  %v2375_v35 = vmul.f32 %v2374_v62, %v2334_v34 }
 0x7f8   :  { %v2398_v60 = vmul.f32 %v2374_v62, %v2230_v37  ;;  %v2399_v45 = vmul.f32 %v2368_v4, %v2334_v34  ;;  %v2383_v36 = vmul.f32 %v2382_v30, %v2230_v37  ;;  %v2389_v47 = vmul.f32 %v2388_v39, %v2334_v34 }
 0x7f9   :  { %v2397_v31 = vsub.f32 %v2391_v41, %v2396_v24  ;;  %v2376_v56 = vsub.f32 %v2369_v6, %v2375_v35 }
 0x7fa   :  { %v2400_v57 = vadd.f32 %v2399_v45, %v2398_v60  ;;  %v2390_v3 = vsub.f32 %v2383_v36, %v2389_v47 }
 0x7fb   :  { %2409 = vperm.xlu1 %10267, %v2397_v31   ;;  %2403 = vperm.xlu0 %10266, %v2376_v56  }
 0x7ff   :  { %10268 = vset.pattern.permute.xlu1 %v12185_v55  ;;  %10269 = vset.pattern.permute.xlu0 %v12185_v55 }
 0x800   :  { %2415 = vperm.xlu1 %10268, %v2376_v56   ;;  %2420 = vperm.xlu0 %10269, %v2397_v31  }
 0x804   :  { %10270 = vset.pattern.permute.xlu1 %v12183_v7  ;;  %10271 = vset.pattern.permute.xlu0 %v12181_v40 }
 0x805   :  { %2426 = vperm.xlu1 %10270, %v2376_v56   ;;  %2437 = vperm.xlu0 %10271, %v2376_v56  }
 0x809   :  { %2431 = vperm.xlu1 %10270, %v2397_v31   ;;  %10274 = vset.pattern.permute.xlu0 %v12221_v42 }
 0x80a   :  { %2455 = vperm.xlu0 %10274, %v2400_v57  }
 0x80d   :  { %10272 = vset.pattern.permute.xlu1 %v12181_v40 }
 0x80e   :  { %2442 = vperm.xlu1 %10272, %v2397_v31   ;;  %10276 = vset.pattern.permute.xlu0 %v12183_v7 }
 0x80f   :  { %2472 = vperm.xlu0 %10276, %v2390_v3  }
 0x812   :  { %10273 = vset.pattern.permute.xlu1 %v12221_v42 }
 0x813   :  { %2449 = vperm.xlu1 %10273, %v2390_v3   ;;  %10279 = vset.pattern.permute.xlu0 %v12181_v40 }
 0x814   :  { %2488 = vperm.xlu0 %10279, %v2400_v57  }
 0x817   :  { %10275 = vset.pattern.permute.xlu1 %v12185_v55 }
 0x818   :  { %2461 = vperm.xlu1 %10275, %v2390_v3   ;;  %10280 = vset.pattern.permute.xlu0 %v12221_v42 }
 0x81c   :  { %2466 = vperm.xlu1 %10275, %v2400_v57  }
 0x820   :  { %10277 = vset.pattern.permute.xlu1 %v12183_v7 }
 0x821   :  { %2477 = vperm.xlu1 %10277, %v2400_v57  }
 0x825   :  { %10278 = vset.pattern.permute.xlu1 %v12181_v40 }
 0x826   :  { %2483 = vperm.xlu1 %10278, %v2390_v3  }
 0x82a   :  { %10281 = vset.pattern.permute.xlu1 %v12221_v42 }
 0x87a   :  { %v2410_v61 = vpop.permute.xlu1 %2409  ;;  %v2404_v28 = vpop.permute.xlu0 %2403 }
 0x87b   :  { %v2412_v39 = vmul.f32 %v2410_v61, %v10876_v10  ;;  %v2406_v34 = vmul.f32 %v2404_v28, %v10885_v20 }
 0x87d   :  { %v2413_v3 = vadd.f32 %v2412_v39, %v2406_v34 }
 0x87f   :  { %v2416_v15 = vpop.permute.xlu1 %2415  ;;  %v2421_v44 = vpop.permute.xlu0 %2420 }
 0x880   :  { %v2418_v30 = vmul.f32 %v2416_v15, %v10882_v19  ;;  %v2423_v41 = vmul.f32 %v2421_v44, %v10873_v12 }
 0x882   :  { %v2424_v61 = vadd.f32 %v2423_v41, %v2418_v30 }
 0x884   :  { %v2427_v25 = vpop.permute.xlu1 %2426  ;;  %v2438_v32 = vpop.permute.xlu0 %2437 }
 0x885   :  { %v2440_v45 = vmul.f32 %v2438_v32, %v10878_v11  ;;  %v2429_v15 = vmul.f32 %v2427_v25, %v10889_v22 }
 0x888   :  { %v2432_v46 = vpop.permute.xlu1 %2431 }
 0x889   :  { %v2456_v38 = vpop.permute.xlu0 %2455  ;;  %v2434_v36 = vmul.f32 %v2432_v46, %v10887_v21 }
 0x88a   :  { %v2458_v31 = vmul.f32 %v2456_v38, %v10876_v10  ;;  %v2493_v38 = vmul.f32 %v2424_v61, %v2413_v3 }
 0x88d   :  { %v2443_v27 = vpop.permute.xlu1 %2442 }
 0x88e   :  { %v2473_v43 = vpop.permute.xlu0 %2472  ;;  %v2445_v24 = vmul.f32 %v2443_v27, %v10880_v16 }
 0x88f   :  { %v2475_v56 = vmul.f32 %v2473_v43, %v10889_v22 }
 0x890   :  { %v2446_v28 = vadd.f32 %v2445_v24, %v2440_v45 }
 0x892   :  { %v2450_v59 = vpop.permute.xlu1 %2449 }
 0x893   :  { %v2452_v6 = vmul.f32 %v2450_v59, %v10885_v20  ;;  %v2489_v47 = vpop.permute.xlu0 %2488 }
 0x894   :  { %v2491_v59 = vmul.f32 %v2489_v47, %v10880_v16 }
 0x895   :  { %v2459_v27 = vadd.f32 %v2458_v31, %v2452_v6 }
 0x897   :  { %v2462_v4 = vpop.permute.xlu1 %2461  ;;  %v2497_v43 = vmul.f32 %v2459_v27, %v2424_v61 }
 0x898   :  { %v2464_v35 = vmul.f32 %v2462_v4, %v10882_v19 }
 0x89b   :  { %v2467_v63 = vpop.permute.xlu1 %2466 }
 0x89c   :  { %v2469_v62 = vmul.f32 %v2467_v63, %v10873_v12  ;;  %v2435_v63 = vadd.f32 %v2434_v36, %v2429_v15 }
 0x89e   :  { %v2470_v57 = vadd.f32 %v2469_v62, %v2464_v35  ;;  %v2499_v7 = vmul.f32 %v2446_v28, %v2435_v63 }
 0x8a0   :  { %v2478_v37 = vpop.permute.xlu1 %2477  ;;  %v2494_v46 = vmul.f32 %v2470_v57, %v2459_v27 }
 0x8a1   :  { %v2480_v60 = vmul.f32 %v2478_v37, %v10887_v21  ;;  %v2496_v37 = vmul.f32 %v2470_v57, %v2413_v3 }
 0x8a2   :  { %v2495_v30 = vsub.f32 %v2493_v38, %v2494_v46 }
 0x8a3   :  { %v2481_v4 = vadd.f32 %v2480_v60, %v2475_v56  ;;  %v2498_v25 = vadd.f32 %v2497_v43, %v2496_v37 }
 0x8a5   :  { %v2484_v44 = vpop.permute.xlu1 %2483  ;;  %v2503_v62 = vmul.f32 %v2481_v4, %v2446_v28 }
 0x8a6   :  { %v2486_v32 = vmul.f32 %v2484_v44, %v10878_v11 }
 0x8a8   :  { %v2492_v40 = vadd.f32 %v2491_v59, %v2486_v32 }
 0x8aa   :  { %v2500_v39 = vmul.f32 %v2492_v40, %v2481_v4  ;;  %v2502_v34 = vmul.f32 %v2492_v40, %v2435_v63  ;;  %v12222_v40 = vmov 0.0  }
 0x8ac   :  { %v2501_v41 = vsub.f32 %v2499_v7, %v2500_v39  ;;  %v2504_v24 = vadd.f32 %v2503_v62, %v2502_v34  ;;  %v12223_v7 = vmov 0.0|0.0  }
 0x8ae   :  { %v2508_v6 = vmul.f32 %v2504_v24, %v2495_v30  ;;  %v2509_v35 = vmul.f32 %v2501_v41, %v2498_v25  ;;  %v2506_v45 = vmul.f32 %v2504_v24, %v2498_v25  ;;  %v2505_v60 = vmul.f32 %v2501_v41, %v2495_v30 }
 0x8b0   :  { %v2510_v47 = vadd.f32 %v2509_v35, %v2508_v6  ;;  %v2507_v31 = vsub.f32 %v2505_v60, %v2506_v45 }
 0x8b2   :  { %2512 = vrot.lane.b32.xlu1 %v2510_v47, %s10581_s11 }
 0x924   :  { %v2513_v36 = vpop.permute.xlu1 %2512 }
 0x925   :  { %v2515_v56 = vsel %vm1479_vm9, %v2507_v31, %v2513_v36  ;;  %v11163_v36 = vld [vmem:[%s12158_s4] sm:$0xff]  }
 0x926   :  { %v2516_v57 = vpack.c.bf16 %v2515_v56, %v2515_v56  ;;  %v2635_v56 = vrot.slane %v11014_v33, 4 }
 0x928   :  { %9283 = vmatmul.mubr.msk.bf16.vlgmr.msra.gmra.mrb[8].mxu1 %vm602_vm10, %v2516_v57 }
 0x929   :  { %9287 = vmatpush3.bf16.msra.mxu1 %v10926_v5  ;;  %9294 = vmatprep.mubr.msk.bf16.mxu1 %vm10568_vm2, %v12222_v40 }
 0x92a   :  { %9288 = vmatprep.subr.bf16.mxu1 %v12222_v40 }
 0x92d   :  { %9289 = vmatpush3.bf16.msra.mxu1 %v10932_v58 }
 0x92e   :  { %9290 = vmatprep.subr.bf16.mxu1 %v12222_v40 }
 0x931   :  { %9291 = vmatpush3.bf16.msra.mxu1 %v10939_v8 }
 0x932   :  { %9292 = vmatprep.subr.bf16.mxu1 %v12222_v40 }
 0x935   :  { %9293 = vmatpush3.bf16.msra.mxu1 %v10947_v9 }
 0x936   :  { %9886 = vmatprep.subr.bf16.mxu1 %v12223_v7 }
 0x9fb   :  { %v2554_v3 = vpop.f32.mrb[8].mxu1 }
 0x9fc   :  { %v2560_v61 = vmul.f32 %v2554_v3, %v2554_v3  ;;  %v9284_v5 = vpop.f32.mrb[9].mxu1 }
 0x9fd   :  { %v2557_v15 = vpop.f32.mrb[10].mxu1 }
 0x9fe   :  { %2562 = vrot.lane.b32.xlu1 %v2560_v61, %s10582_s20  ;;  %v9285_v28 = vpop.f32.mrb[11].mxu1 }
 0xa70   :  { %v2563_v44 = vpop.permute.xlu1 %2562 }
 0xa71   :  { %v2565_v27 = vadd.f32 %v2563_v44, %v2560_v61 }
 0xa73   :  { %v2566_v58 = vpack.c.bf16 %v2565_v27, %v2565_v27 }
 0xa75   :  { %9295 = vmatmul.mubr.msk.bf16.vlgmr.msra.gmra.mrb[12].mxu1 %vm1568_vm11, %v2566_v58 }
 0xa76   :  { %9888 = vmatpush3.bf16.msra.mxu1 %v10664_v13  ;;  %9306 = vmatprep.mubr.msk.f32.mxu1 %vm10568_vm2, %v12222_v40 }
 0xa77   :  { %9889 = vmatprep.subr.bf16.mxu1 %v12223_v7 }
 0xa7a   :  { %9891 = vmatpush3.bf16.msra.mxu1 %v10670_v18 }
 0xa7b   :  { %9892 = vmatprep.subr.bf16.mxu1 %v12223_v7 }
 0xb48   :  { %v2604_v8 = vpop.f32.mrb[12].mxu1 }
 0xb49   :  { %v2605_v9 = vadd.f32 %v10962_v26, %v2604_v8  ;;  %v9296_v59 = vpop.f32.mrb[13].mxu1 }
 0xb4a   :  { %v2607_v4 = vpop.f32.mrb[14].mxu1 }
 0xb4b   :  { %10396 = vtanh.f32 %v2605_v9  ;;  %v9297_v32 = vpop.f32.mrb[15].mxu1  ;;  %v2610_v46 = vmul.f32 0.5, %v2605_v9 }
 0xb4d   :  { %10398 = vtanh.f32 %v2610_v46 }
 0xb55   :  { %v10397_v63 = vpop.eup %10396 }
 0xb56   :  { %2617 = vrot.lane.b32.xlu0 %v10397_v63, %s10583_s23 }
 0xb57   :  { %v10399_v37 = vpop.eup %10398 }
 0xb58   :  { %v2612_v38 = vadd.f32 1.0, %v10399_v37  ;;  %v12225_v37 = vmov 2475754826  }
 0xb5a   :  { %v2613_v43 = vmul.f32 0.5, %v2612_v38 }
 0xb5c   :  { %v2615_v34 = vmul.f32 %v2613_v43, %v10967_v1 }
 0xbc8   :  { %v2618_v62 = vpop.permute.xlu0 %2617 }
 0xbc9   :  { %v2620_v39 = vmul.f32 %v2618_v62, %v2613_v43  ;;  %v12226_v62 = vmov 2131351028  }
 0xbcb   :  { %2622 = vrot.lane.b32.xlu1 %v2620_v39, %s10583_s23 }
 0xc3d   :  { %v2623_v30 = vpop.permute.xlu1 %2622 }
 0xc3e   :  { %v11121_v26 = vadd.f32 %v2623_v30, %v2615_v34  ;;  %v12227_v30 = vmov 2102212464  }
 0xc40   :  { %10400 = vtanh.f32 %v11121_v26 }
 0xc4a   :  { %v10401_v25 = vpop.eup %10400 }
 0xc4b   :  { %2628 = vrot.lane.b32.xlu0 %v10401_v25, %s10583_s23 }
 0xcbd   :  { %v2629_v41 = vpop.permute.xlu0 %2628 }
 0xcbe   :  { %v11125_v24 = vmul.f32 %v2629_v41, %v2613_v43 }
 0xcc0   :  { %12224 = vst [vmem:[#allocation13_spill] sm:$0xff] %v11125_v24  ;;  %2633 = vrot.lane.b32.xlu1 %v11125_v24, %s10584_s24 }
 0xd32   :  { %v2634_v6 = vpop.permute.xlu1 %2633 }
 0xd33   :  { %v2637_v35 = vsel %vm602_vm10, %v2634_v6, 0  ;;  %v12228_v6 = vmov 920167782  }
 0xd34   :  { %v2708_v45 = vand.u32 4294901760, %v2637_v35 }
 0xd36   :  { %v2709_v60 = vsub.f32 %v2637_v35, %v2708_v45 }
 0xd38   :  { %v2710_v1 = vand.u32 4294901760, %v2709_v60 }
 0xd3a   :  { %v2711_v47 = vsub.f32 %v2709_v60, %v2710_v1 }
 0xd3c   :  { %v2712_v31 = vand.u32 4294901760, %v2711_v47 }
 0xd3e   :  { %9307 = vmatmul.mubr.f32.vlgmr.msra.gmra.mrb[2].mxu1 %v2712_v31 }
 0xd3f   :  { %9894 = vmatpush3.bf16.msra.mxu1 %v10709_v49  ;;  %9317 = vmatprep.mubr.msk.f32.mxu1 %vm10568_vm2, %v12222_v40 }
 0xd40   :  { %9895 = vmatprep.subr.bf16.mxu1 %v12223_v7 }
 0xd43   :  { %9897 = vmatpush3.bf16.msra.mxu1 %v10714_v50 }
 0xd44   :  { %9898 = vmatprep.subr.bf16.mxu1 %v12223_v7 }
 0xd46   :  { %9318 = vmatmul.mubr.f32.vlgmr.msra.gmra.mrb[2].mxu1 %v2708_v45 }
 0xd47   :  { %9900 = vmatpush3.bf16.msra.mxu1 %v10721_v51  ;;  %9328 = vmatprep.mubr.msk.f32.mxu1 %vm10568_vm2, %v12222_v40 }
 0xd48   :  { %9901 = vmatprep.subr.bf16.mxu1 %v12223_v7 }
 0xd4b   :  { %9903 = vmatpush3.bf16.msra.mxu1 %v10729_v52 }
 0xd4c   :  { %9904 = vmatprep.subr.bf16.mxu1 %v12223_v7 }
 0xd4e   :  { %9329 = vmatmul.mubr.f32.vlgmr.msra.gmra.mrb[2].mxu1 %v2709_v60  ;;  %v12229_v60 = vmov 1326507024  }
 0xd4f   :  { %9906 = vmatpush3.bf16.msra.mxu1 %v10664_v13  ;;  %9339 = vmatprep.mubr.msk.f32.mxu1 %vm10568_vm2, %v12222_v40 }
 0xd50   :  { %9907 = vmatprep.subr.bf16.mxu1 %v12223_v7 }
 0xd53   :  { %9909 = vmatpush3.bf16.msra.mxu1 %v10670_v18 }
 0xd54   :  { %9910 = vmatprep.subr.bf16.mxu1 %v12223_v7 }
 0xd56   :  { %9340 = vmatmul.mubr.f32.vlgmr.msra.gmra.mrb[2].mxu1 %v2710_v1 }
 0xd57   :  { %9912 = vmatpush3.bf16.msra.mxu1 %v10746_v53  ;;  %9350 = vmatprep.mubr.msk.f32.mxu1 %vm10568_vm2, %v12222_v40 }
 0xd58   :  { %9913 = vmatprep.subr.bf16.mxu1 %v12223_v7 }
 0xd5b   :  { %9915 = vmatpush3.bf16.msra.mxu1 %v10751_v54 }
 0xd5c   :  { %9916 = vmatprep.subr.bf16.mxu1 %v12223_v7 }
 0xd5e   :  { %9351 = vmatmul.mubr.f32.vlgmr.msra.gmra.mrb[2].mxu1 %v2708_v45 }
 0xd5f   :  { %9918 = vmatpush3.bf16.msra.mxu1 %v10664_v13  ;;  %9361 = vmatprep.mubr.msk.f32.mxu1 %vm10568_vm2, %v12222_v40 }
 0xd60   :  { %9919 = vmatprep.subr.bf16.mxu1 %v12223_v7 }
 0xd63   :  { %9921 = vmatpush3.bf16.msra.mxu1 %v10670_v18 }
 0xd64   :  { %9450 = vmatprep.subr.bf16.mxu1 %v12222_v40 }
 0xd66   :  { %9362 = vmatmul.mubr.f32.vlgmr.msra.gmra.mrb[2].mxu1 %v2708_v45 }
 0xd67   :  { %9451 = vmatpush3.bf16.msra.mxu1 %v11163_v36  ;;  %9454 = vmatprep.mubr.msk.bf16.mxu1 %vm10568_vm2, %v12222_v40 }
 0xd68   :  { %9452 = vmatprep.subr.bf16.mxu1 %v12222_v40 }
 0xd6b   :  { %9453 = vmatpush3.bf16.msra.mxu1 %v10910_v14 }
 0xd6c   :  { %9458 = vmatprep.subr.bf16.mxu1 %v12222_v40 }
 0xe39   :  { %v3120_v57 = vpop.f32.mrb[2].mxu1 }
 0xe3a   :  { %v11172_v3 = vadd.f32 %v3120_v57, %v2635_v56  ;;  %v9363_v61 = vpop.f32.mrb[3].mxu1 }
 0xe3c   :  { %v11175_v5 = vmul.f32 0.5, %v11172_v3  ;;  %v3332_v27 = vmul.f32 %v11172_v3, %v11172_v3  ;;  %vm3344_vm1 = vcmp.ge.f32.partialorder %v11172_v3, 0.0 }
 0xe3e   :  { %v3128_v15 = vand.u32 2139095040, %v11175_v5  ;;  %v12187_v14 = vand.u32 2147483647, %v11175_v5  ;;  %v3333_v9 = vadd.f32 1.0, %v3332_v27  ;;  %vm3127_vm5 = vcmp.lt.s32.totalorder %v11175_v5, 0 }
 0xe40   :  { %v3129_v28 = vshrl.u32 %v3128_v15, 23  ;;  %v3132_v4 = vand.u32 8388607, %v12187_v14  ;;  %10402 = vrsqrt.f32 %v3333_v9 }
 0xe42   :  { %v8713_v44 = vadd.s32 4294967169, %v3129_v28  ;;  %v3133_v47 = vor.u32 8388608, %v3132_v4 }
 0xe44   :  { %v3135_v58 = vadd.s32 1, %v8713_v44  ;;  %v3173_v14 = vshll.u32 %v3133_v47, 8 }
 0xe46   :  { %vm3136_vm6 = vcmp.gt.s32.totalorder %v3135_v58, 0 }
 0xe47   :  { %v3137_v8 = vsel %vm3136_vm6, %v3135_v58, 0 }
 0xe48   :  { %v3139_v59 = vand.u32 31, %v3137_v8  ;;  %v3138_v63 = vshrl.u32 %v3137_v8, 5 }
 0xe4a   :  { %v3140_v32 = vsub.s32 32, %v3139_v59  ;;  %v3142_v46 = vshll.u32 %v12190_v23, %v3139_v59  ;;  %v3145_v38 = vshll.u32 %v12225_v37, %v3139_v59  ;;  %v3148_v34 = vshll.u32 %v12226_v62, %v3139_v59 }
 0xe4b   :  { %v3151_v41 = vshll.u32 %v12227_v30, %v3139_v59  ;;  %v3154_v45 = vshll.u32 %v12228_v6, %v3139_v59  ;;  %vm3157_vm7 = vcmp.lt.s32.totalorder %v3138_v63, 1  ;;  %vm3160_vm8 = vcmp.lt.s32.totalorder %v3138_v63, 4 }
 0xe4c   :  { %v3143_v43 = vshrl.u32 %v12225_v37, %v3140_v32  ;;  %v3146_v39 = vshrl.u32 %v12226_v62, %v3140_v32  ;;  %v3149_v25 = vshrl.u32 %v12227_v30, %v3140_v32  ;;  %v3152_v35 = vshrl.u32 %v12228_v6, %v3140_v32 }
 0xe4d   :  { %v3155_v1 = vshrl.u32 %v12229_v60, %v3140_v32  ;;  %v3141_v58 = vshrl.u32 %v12190_v23, %v3140_v32  ;;  %vm3159_vm12 = vcmp.lt.s32.totalorder %v3138_v63, 3  ;;  %vm3158_vm13 = vcmp.lt.s32.totalorder %v3138_v63, 2 }
 0xe4e   :  { %v3144_v31 = vor.u32 %v3143_v43, %v3142_v46  ;;  %v3147_v56 = vor.u32 %v3146_v39, %v3145_v38  ;;  %v3150_v57 = vor.u32 %v3149_v25, %v3148_v34  ;;  %v3153_v61 = vor.u32 %v3152_v35, %v3151_v41  ;;  %v10403_v35 = vpop.eup %10402 }
 0xe4f   :  { %v3156_v15 = vor.u32 %v3155_v1, %v3154_v45  ;;  %v3346_v63 = vsub.f32 1.0, %v10403_v35 }
 0xe50   :  { %v3162_v28 = vsel %vm3160_vm8, %v3150_v57, 2102212464  ;;  %v3165_v44 = vsel %vm3157_vm7, %v3144_v31, %v3147_v56  ;;  %v3169_v27 = vsel %vm3157_vm7, %v3147_v56, %v3150_v57  ;;  %v3166_v8 = vsel %vm3160_vm8, %v3153_v61, 920167782 }
 0xe51   :  { %v3170_v9 = vsel %vm3160_vm8, %v3156_v15, 1326507024  ;;  %v3167_v59 = vsel %vm3159_vm12, %v3150_v57, %v3166_v8  ;;  %v3161_v4 = vsel %vm3157_vm7, %v3141_v58, %v3144_v31  ;;  %v3163_v46 = vsel %vm3159_vm12, %v3147_v56, %v3162_v28 }
 0xe52   :  { %v3171_v55 = vsel %vm3159_vm12, %v3153_v61, %v3170_v9  ;;  %v3168_v38 = vsel %vm3158_vm13, %v3165_v44, %v3167_v59  ;;  %v3164_v45 = vsel %vm3158_vm13, %v3161_v4, %v3163_v46  ;;  %v3347_v56 = vmul.f32 0.5, %v3346_v63 }
 0xe53   :  { %v3172_v43 = vsel %vm3158_vm13, %v3169_v27, %v3171_v55  ;;  %v11197_v25 = vmul.u32.u64.low %v3173_v14, %v3168_v38  ;;  %v11198_v41 = vmul.u32.u64.high %v3173_v14, %v3168_v38, %v11197_v25  ;;  %v3180_v1 = vmul.u32 %v3173_v14, %v3164_v45 }
 0xe54   :  { %v11194_v39 = vmul.u32.u64.low %v3173_v14, %v3172_v43  ;;  %v11195_v34 = vmul.u32.u64.high %v3173_v14, %v3172_v43, %v11194_v39  ;;  %v3348_v61 = vmax.f32 %v3347_v56, 0.0  ;;  %v3335_v28 = vadd.f32 1.0, %v10403_v35 }
 0xe55   :  { %v3183_v32 = vadd.s32 1, %v11198_v41  ;;  %vm3217_vm8 = vweird.f32 %v11175_v5 }
 0xe56   :  { %vm3182_vm14 = vc.u32 %v11195_v34, %v11197_v25  ;;  %10404 = vrsqrt.f32 %v3348_v61  ;;  %v3336_v58 = vmul.f32 0.5, %v3335_v28  ;;  %v3181_v46 = vadd.s32 %v11197_v25, %v11195_v34 }
 0xe57   :  { %v3184_v47 = vsel %vm3182_vm14, %v3183_v32, %v11198_v41  ;;  %vm3351_vm0 = vcmp.eq.f32.partialorder %v3348_v61, inf  ;;  %v3354_v56 = vand.u32 2147483648, %v3348_v61  ;;  %vm3353_vm3 = vcmp.eq.f32.partialorder %v3348_v61, 0.0 }
 0xe58   :  { %v3185_v31 = vadd.s32 %v3184_v47, %v3180_v1  ;;  %10406 = vrsqrt.f32 %v3336_v58  ;;  %vm3339_vm4 = vcmp.eq.f32.partialorder %v3336_v58, inf  ;;  %vm3341_vm7 = vcmp.eq.f32.partialorder %v3336_v58, 0.0 }
 0xe5a   :  { %v3186_v57 = vadd.s32 536870912, %v3185_v31 }
 0xe5c   :  { %v3187_v55 = vshrl.u32 %v3186_v57, 30 }
 0xe5e   :  { %v3188_v15 = vshll.u32 %v3187_v55, 30 }
 0xe60   :  { %v3189_v44 = vsub.s32 %v3185_v31, %v3188_v15  ;;  %v10405_v4 = vpop.eup %10404 }
 0xe61   :  { %v3350_v32 = vmul.f32 %v10405_v4, %v3348_v61  ;;  %v3342_v4 = vand.u32 2147483648, %v3336_v58 }
 0xe62   :  { %v3191_v27 = vsub.s32 0, %v3189_v44  ;;  %v10407_v1 = vpop.eup %10406 }
 0xe63   :  { %v3352_v31 = vsel %vm3351_vm0, %v3348_v61, %v3350_v32  ;;  %v3338_v28 = vmul.f32 %v10407_v1, %v3336_v58 }
 0xe64   :  { %v8714_v8 = vmin.u32 %v3191_v27, %v3189_v44  ;;  %v3355_v34 = vsel %vm3353_vm3, %v3354_v56, %v3352_v31  ;;  %v3211_v27 = vsub.s32 4, %v3187_v55 }
 0xe66   :  { %v3193_v9 = vclz %v8714_v8 }
 0xe68   :  { %v8715_v59 = vadd.s32 4294967294, %v3193_v9  ;;  %v3340_v9 = vsel %vm3339_vm4, %v3336_v58, %v3338_v28 }
 0xe6a   :  { %vm8716_vm15 = vcmp.lt.s32.totalorder %v8715_v59, 0 }
 0xe6b   :  { %v3196_v14 = vsel %vm8716_vm15, 0, %v8715_v59 }
 0xe6c   :  { %v3197_v38 = vsub.s32 32, %v3196_v14  ;;  %v3201_v43 = vsub.s32 4294967266, %v3196_v14  ;;  %v3198_v39 = vshll.u32 %v3189_v44, %v3196_v14  ;;  %v3345_v44 = vsel %vm3344_vm1, 1.0, %v12188_v17 }
 0xe6d   :  { %v3356_v59 = vmul.f32 %v3355_v34, %v3345_v44  ;;  %v12230_v14 = vand.u32 2147483647, %v11175_v5 }
 0xe6e   :  { %v3199_v41 = vshrl.u32 %v3181_v46, %v3197_v38  ;;  %v3202_v45 = vadd.s32 127, %v3201_v43  ;;  %v3212_v46 = vsel %vm3127_vm5, %v3211_v27, %v3187_v55  ;;  %v3343_v38 = vsel %vm3341_vm7, %v3342_v4, %v3340_v9 }
 0xe6f   :  { %vm3126_vm6 = vcmp.le.f32.partialorder %v12230_v14, 0.7853982  ;;  %v3357_v43 = vsub.f32 %v3343_v38, %v3356_v59 }
 0xe70   :  { %v3200_v35 = vor.u32 %v3199_v41, %v3198_v39  ;;  %v3203_v63 = vshll.u32 %v3202_v45, 23  ;;  %v3214_v39 = vsel %vm3126_vm6, 0, %v3212_v46  ;;  %v3359_v41 = vadd.f32 %v3356_v59, %v3343_v38 }
 0xe71   :  { %v3321_v45 = vadd.s32 3, %v3214_v39  ;;  %v3358_v32 = vmul.f32 0.70710677, %v3357_v43 }
 0xe72   :  { %v3204_v47 = vor.u32 4788187, %v3203_v63  ;;  %v3207_v15 = vcvt.s32.f32 %v3200_v35  ;;  %v3218_v35 = vand.u32 3, %v3214_v39  ;;  %v3360_v63 = vmul.f32 0.70710677, %v3359_v41 }
 0xe73   :  { %v3322_v1 = vand.u32 3, %v3321_v45  ;;  %v3361_v55 = vmul.f32 %v3358_v32, %v3343_v38 }
 0xe74   :  { %v3205_v57 = vand.u32 2147483647, %v3204_v47  ;;  %v3374_v47 = vmul.f32 %v3358_v32, %v3356_v59  ;;  %vm3219_vm12 = vcmp.lt.s32.totalorder %v3218_v35, 2  ;;  %vm3220_vm13 = vcmp.eq.s32.totalorder %v3218_v35, 0 }
 0xe75   :  { %vm3223_vm14 = vcmp.eq.s32.totalorder %v3218_v35, 2  ;;  %vm3327_vm15 = vcmp.eq.s32.totalorder %v3322_v1, 2  ;;  %vm3323_vm0 = vcmp.lt.s32.totalorder %v3322_v1, 2  ;;  %vm3324_vm1 = vcmp.eq.s32.totalorder %v3322_v1, 0 }
 0xe76   :  { %v3208_v25 = vmul.f32 %v3207_v15, %v3205_v57  ;;  %v3381_v57 = vmul.f32 %v3360_v63, %v3343_v38  ;;  %v3367_v15 = vmul.f32 %v3360_v63, %v3356_v59  ;;  %v3375_v34 = vsub.f32 0.0, %v3374_v47 }
 0xe77   :  { %v3392_v9 = vrot.slane %v3374_v47, %v10835_v29  ;;  %v3365_v4 = vrot.slane %v3361_v55, %v10835_v29 }
 0xe78   :  { %v3209_v8 = vxor.u32 2147483648, %v3208_v25  ;;  %v3385_v46 = vrot.slane %v3381_v57, %v10835_v29  ;;  %v3371_v59 = vrot.slane %v3367_v15, %v10835_v29  ;;  %v3379_v43 = vrot.slane %v3375_v34, %v10835_v29 }
 0xe79   :  { %v12231_v57 = vmov 1   ;;  %v12233_v15 = vmov 3  }
 0xe7a   :  { %v3210_v3 = vsel %vm3127_vm5, %v3209_v8, %v3208_v25 }
 0xe7b   :  { %v3213_v61 = vsel %vm3126_vm6, %v11175_v5, %v3210_v3  ;;  %v12232_v5 = vmov 2  }
 0xe7c   :  { %10408 = vcosq.f32 %v3213_v61 }
 0xe7d   :  { %10410 = vsinq.f32 %v3213_v61 }
 0xe86   :  { %v10409_v31 = vpop.eup %10408 }
 0xe87   :  { %v10411_v58 = vpop.eup %10410  ;;  %v3224_v56 = vxor.u32 2147483648, %v10409_v31 }
 0xe88   :  { %v3221_v28 = vxor.u32 2147483648, %v10411_v58 }
 0xe89   :  { %v3225_v25 = vsel %vm3223_vm14, %v3224_v56, %v10411_v58  ;;  %v3329_v27 = vsel %vm3327_vm15, %v3224_v56, %v10411_v58 }
 0xe8a   :  { %v3222_v44 = vsel %vm3220_vm13, %v10409_v31, %v3221_v28  ;;  %v3326_v8 = vsel %vm3324_vm1, %v10409_v31, %v3221_v28 }
 0xe8b   :  { %v3226_v14 = vsel %vm3219_vm12, %v3222_v44, %v3225_v25  ;;  %v3330_v3 = vsel %vm3323_vm0, %v3326_v8, %v3329_v27 }
 0xe8c   :  { %v3227_v61 = vsel %vm3217_vm8, nan, %v3226_v14  ;;  %v3331_v38 = vsel %vm3217_vm8, nan, %v3330_v3 }
 0xe8d   :  { %v3388_v39 = vmul.f32 %v3385_v46, %v3227_v61  ;;  %v3393_v41 = vmul.f32 %v3392_v9, %v3331_v38  ;;  %v3366_v45 = vmul.f32 %v3365_v4, %v3227_v61  ;;  %v3372_v32 = vmul.f32 %v3371_v59, %v3331_v38 }
 0xe8e   :  { %v3395_v63 = vmul.f32 %v3371_v59, %v3227_v61  ;;  %v3396_v35 = vmul.f32 %v3365_v4, %v3331_v38  ;;  %v3380_v1 = vmul.f32 %v3379_v43, %v3227_v61  ;;  %v3386_v47 = vmul.f32 %v3385_v46, %v3331_v38 }
 0xe8f   :  { %v3394_v31 = vsub.f32 %v3388_v39, %v3393_v41  ;;  %v3373_v55 = vsub.f32 %v3366_v45, %v3372_v32 }
 0xe90   :  { %v3397_v58 = vadd.f32 %v3396_v35, %v3395_v63  ;;  %v3387_v56 = vsub.f32 %v3380_v1, %v3386_v47 }
 0xe91   :  { %3406 = vperm.xlu1 %10281, %v3394_v31   ;;  %3400 = vperm.xlu0 %10280, %v3373_v55  }
 0xe95   :  { %10282 = vset.pattern.permute.xlu1 %v12231_v57  ;;  %10283 = vset.pattern.permute.xlu0 %v12231_v57 }
 0xe96   :  { %3412 = vperm.xlu1 %10282, %v3373_v55   ;;  %3417 = vperm.xlu0 %10283, %v3394_v31  }
 0xe9a   :  { %10284 = vset.pattern.permute.xlu1 %v12232_v5  ;;  %10285 = vset.pattern.permute.xlu0 %v12233_v15 }
 0xe9b   :  { %3423 = vperm.xlu1 %10284, %v3373_v55   ;;  %3434 = vperm.xlu0 %10285, %v3373_v55  }
 0xe9f   :  { %3428 = vperm.xlu1 %10284, %v3394_v31   ;;  %10288 = vset.pattern.permute.xlu0 %v12221_v42 }
 0xea0   :  { %3452 = vperm.xlu0 %10288, %v3397_v58  }
 0xea3   :  { %10286 = vset.pattern.permute.xlu1 %v12233_v15 }
 0xea4   :  { %3439 = vperm.xlu1 %10286, %v3394_v31   ;;  %10290 = vset.pattern.permute.xlu0 %v12232_v5 }
 0xea5   :  { %3469 = vperm.xlu0 %10290, %v3387_v56  }
 0xea8   :  { %10287 = vset.pattern.permute.xlu1 %v12221_v42 }
 0xea9   :  { %3446 = vperm.xlu1 %10287, %v3387_v56   ;;  %10293 = vset.pattern.permute.xlu0 %v12233_v15 }
 0xeaa   :  { %3485 = vperm.xlu0 %10293, %v3397_v58  }
 0xead   :  { %10289 = vset.pattern.permute.xlu1 %v12231_v57 }
 0xeae   :  { %3458 = vperm.xlu1 %10289, %v3387_v56   ;;  %10294 = vset.pattern.permute.xlu0 %v12221_v42 }
 0xeb2   :  { %3463 = vperm.xlu1 %10289, %v3397_v58  }
 0xeb6   :  { %10291 = vset.pattern.permute.xlu1 %v12232_v5 }
 0xeb7   :  { %3474 = vperm.xlu1 %10291, %v3397_v58  }
 0xebb   :  { %10292 = vset.pattern.permute.xlu1 %v12233_v15 }
 0xebc   :  { %3480 = vperm.xlu1 %10292, %v3387_v56  }
 0xec0   :  { %10295 = vset.pattern.permute.xlu1 %v12221_v42 }
 0xf10   :  { %v3407_v28 = vpop.permute.xlu1 %3406  ;;  %v3401_v27 = vpop.permute.xlu0 %3400 }
 0xf11   :  { %v3409_v38 = vmul.f32 %v3407_v28, %v10876_v10  ;;  %v3403_v41 = vmul.f32 %v3401_v27, %v10885_v20 }
 0xf13   :  { %v3410_v27 = vadd.f32 %v3409_v38, %v3403_v41 }
 0xf15   :  { %v3413_v34 = vpop.permute.xlu1 %3412  ;;  %v3418_v8 = vpop.permute.xlu0 %3417 }
 0xf16   :  { %v3415_v45 = vmul.f32 %v3413_v34, %v10882_v19  ;;  %v3420_v32 = vmul.f32 %v3418_v8, %v10873_v12 }
 0xf18   :  { %v3421_v8 = vadd.f32 %v3420_v32, %v3415_v45 }
 0xf1a   :  { %v3424_v25 = vpop.permute.xlu1 %3423  ;;  %v3435_v4 = vpop.permute.xlu0 %3434 }
 0xf1b   :  { %v3437_v31 = vmul.f32 %v3435_v4, %v10878_v11 }
 0xf1e   :  { %v3429_v44 = vpop.permute.xlu1 %3428 }
 0xf1f   :  { %v3453_v3 = vpop.permute.xlu0 %3452  ;;  %v3431_v55 = vmul.f32 %v3429_v44, %v10887_v21 }
 0xf20   :  { %v3455_v56 = vmul.f32 %v3453_v3, %v10876_v10  ;;  %v3490_v3 = vmul.f32 %v3421_v8, %v3410_v27 }
 0xf23   :  { %v3440_v9 = vpop.permute.xlu1 %3439 }
 0xf24   :  { %v3470_v61 = vpop.permute.xlu0 %3469  ;;  %v3442_v63 = vmul.f32 %v3440_v9, %v10880_v16  ;;  %v3426_v9 = vmul.f32 %v3424_v25, %v10889_v22 }
 0xf25   :  { %v3472_v28 = vmul.f32 %v3470_v61, %v10889_v22 }
 0xf26   :  { %v3432_v23 = vadd.f32 %v3431_v55, %v3426_v9 }
 0xf28   :  { %v3447_v14 = vpop.permute.xlu1 %3446 }
 0xf29   :  { %v3449_v35 = vmul.f32 %v3447_v14, %v10885_v20  ;;  %v3486_v58 = vpop.permute.xlu0 %3485 }
 0xf2b   :  { %v3456_v17 = vadd.f32 %v3455_v56, %v3449_v35 }
 0xf2d   :  { %v3459_v46 = vpop.permute.xlu1 %3458  ;;  %v3494_v61 = vmul.f32 %v3456_v17, %v3421_v8 }
 0xf2e   :  { %v3461_v1 = vmul.f32 %v3459_v46, %v10882_v19  ;;  %v3488_v46 = vmul.f32 %v3486_v58, %v10880_v16 }
 0xf31   :  { %v3464_v59 = vpop.permute.xlu1 %3463 }
 0xf32   :  { %v3466_v43 = vmul.f32 %v3464_v59, %v10873_v12  ;;  %v3443_v59 = vadd.f32 %v3442_v63, %v3437_v31 }
 0xf34   :  { %v3467_v34 = vadd.f32 %v3466_v43, %v3461_v1  ;;  %v3496_v0 = vmul.f32 %v3443_v59, %v3432_v23 }
 0xf36   :  { %v3475_v39 = vpop.permute.xlu1 %3474  ;;  %v3491_v44 = vmul.f32 %v3467_v34, %v3456_v17  ;;  %v3493_v48 = vmul.f32 %v3467_v34, %v3410_v27  ;;  %v11273_v17 = vld [vmem:[%s12159_s5 + $0x10] sm:$0xff]  }
 0xf37   :  { %v3477_v47 = vmul.f32 %v3475_v39, %v10887_v21 }
 0xf38   :  { %v3492_v45 = vsub.f32 %v3490_v3, %v3491_v44  ;;  %v3495_v25 = vadd.f32 %v3494_v61, %v3493_v48  ;;  %v11280_v48 = vld [vmem:[%s12159_s5 + $0x18] sm:$0xff]   ;;  %v11295_v44 = vld [vmem:[%s12160_s6] ss:$0 sm:$0xff] }
 0xf39   :  { %v3478_v39 = vadd.f32 %v3477_v47, %v3472_v28 }
 0xf3b   :  { %v3481_v14 = vpop.permute.xlu1 %3480  ;;  %v3500_v43 = vmul.f32 %v3478_v39, %v3443_v59 }
 0xf3c   :  { %v3483_v4 = vmul.f32 %v3481_v14, %v10878_v11 }
 0xf3e   :  { %v3489_v24 = vadd.f32 %v3488_v46, %v3483_v4 }
 0xf40   :  { %v3497_v38 = vmul.f32 %v3489_v24, %v3478_v39  ;;  %v3499_v41 = vmul.f32 %v3489_v24, %v3432_v23  ;;  %v11257_v23 = vld [vmem:[%s12159_s5] sm:$0xff]  }
 0xf42   :  { %v3498_v32 = vsub.f32 %v3496_v0, %v3497_v38  ;;  %v3501_v63 = vadd.f32 %v3500_v43, %v3499_v41  ;;  %v11266_v0 = vld [vmem:[%s12159_s5 + $0x8] sm:$0xff]  }
 0xf44   :  { %v3505_v35 = vmul.f32 %v3501_v63, %v3492_v45  ;;  %v3506_v1 = vmul.f32 %v3498_v32, %v3495_v25  ;;  %v3503_v31 = vmul.f32 %v3501_v63, %v3495_v25  ;;  %v3502_v47 = vmul.f32 %v3498_v32, %v3492_v45 }
 0xf46   :  { %v3507_v58 = vadd.f32 %v3506_v1, %v3505_v35  ;;  %v3504_v56 = vsub.f32 %v3502_v47, %v3503_v31 }
 0xf48   :  { %3509 = vrot.lane.b32.xlu1 %v3507_v58, %s10581_s11 }
 0xfba   :  { %v3510_v55 = vpop.permute.xlu1 %3509 }
 0xfbb   :  { %v3512_v28 = vsel %vm1479_vm9, %v3504_v56, %v3510_v55 }
 0xfbc   :  { %v3513_v34 = vpack.c.bf16 %v3512_v28, %v3512_v28 }
 0xfbe   :  { %9369 = vmatmul.mubr.msk.bf16.vlgmr.msra.gmra.mrb[8].mxu0 %vm602_vm10, %v3513_v34 }
 0xfbf   :  { %9373 = vmatpush3.bf16.msra.mxu0 %v11257_v23  ;;  %9380 = vmatprep.mubr.msk.bf16.mxu0 %vm10568_vm2, %v12222_v40 }
 0xfc0   :  { %9374 = vmatprep.subr.bf16.mxu0 %v12222_v40 }
 0xfc3   :  { %9375 = vmatpush3.bf16.msra.mxu0 %v11266_v0 }
 0xfc4   :  { %9376 = vmatprep.subr.bf16.mxu0 %v12222_v40 }
 0xfc7   :  { %9377 = vmatpush3.bf16.msra.mxu0 %v11273_v17 }
 0xfc8   :  { %9378 = vmatprep.subr.bf16.mxu0 %v12222_v40 }
 0xfcb   :  { %9379 = vmatpush3.bf16.msra.mxu0 %v11280_v48 }
 0xfcc   :  { %9922 = vmatprep.subr.bf16.mxu0 %v12223_v7 }
0x1091   :  { %v3551_v24 = vpop.f32.mrb[8].mxu0 }
0x1092   :  { %v3557_v27 = vmul.f32 %v3551_v24, %v3551_v24  ;;  %v9370_v8 = vpop.f32.mrb[9].mxu0 }
0x1093   :  { %v3554_v9 = vpop.f32.mrb[10].mxu0 }
0x1094   :  { %3559 = vrot.lane.b32.xlu1 %v3557_v27, %s10582_s20  ;;  %v9371_v59 = vpop.f32.mrb[11].mxu0 }
0x1106   :  { %v3560_v14 = vpop.permute.xlu1 %3559 }
0x1107   :  { %v3562_v46 = vadd.f32 %v3560_v14, %v3557_v27  ;;  %v11347_v14 = vld [vmem:[%s12158_s4 + $0x8] sm:$0xff]  }
0x1109   :  { %v3563_v39 = vpack.c.bf16 %v3562_v46, %v3562_v46  ;;  %v3632_v46 = vrot.slane %v11014_v33, 6 }
0x110b   :  { %9381 = vmatmul.mubr.msk.bf16.vlgmr.msra.gmra.mrb[12].mxu0 %vm1568_vm11, %v3563_v39 }
0x110c   :  { %9924 = vmatpush3.bf16.msra.mxu0 %v10664_v13  ;;  %9392 = vmatprep.mubr.msk.f32.mxu0 %vm10568_vm2, %v12222_v40 }
0x110d   :  { %9925 = vmatprep.subr.bf16.mxu0 %v12223_v7 }
0x1110   :  { %9927 = vmatpush3.bf16.msra.mxu0 %v10670_v18 }
0x1111   :  { %9928 = vmatprep.subr.bf16.mxu0 %v12223_v7 }
0x11de   :  { %v3601_v4 = vpop.f32.mrb[12].mxu0 }
0x11df   :  { %v3602_v3 = vadd.f32 %v11295_v44, %v3601_v4  ;;  %v9382_v61 = vpop.f32.mrb[13].mxu0 }
0x11e0   :  { %v3604_v43 = vpop.f32.mrb[14].mxu0 }
0x11e1   :  { %10412 = vtanh.f32 %v3602_v3  ;;  %v9383_v38 = vpop.f32.mrb[15].mxu0  ;;  %v3607_v45 = vmul.f32 0.5, %v3602_v3 }
0x11e3   :  { %10414 = vtanh.f32 %v3607_v45 }
0x11eb   :  { %v10413_v41 = vpop.eup %10412 }
0x11ec   :  { %3614 = vrot.lane.b32.xlu0 %v10413_v41, %s10583_s23 }
0x11ed   :  { %v10415_v25 = vpop.eup %10414 }
0x11ee   :  { %v3609_v32 = vadd.f32 1.0, %v10415_v25 }
0x11f0   :  { %v3610_v63 = vmul.f32 0.5, %v3609_v32 }
0x11f2   :  { %v3612_v31 = vmul.f32 %v3610_v63, %v11121_v26 }
0x125e   :  { %v3615_v35 = vpop.permute.xlu0 %3614 }
0x125f   :  { %v3617_v1 = vmul.f32 %v3615_v35, %v3610_v63 }
0x1261   :  { %3619 = vrot.lane.b32.xlu1 %v3617_v1, %s10583_s23 }
0x12d3   :  { %v3620_v47 = vpop.permute.xlu1 %3619 }
0x12d4   :  { %v11301_v58 = vadd.f32 %v3620_v47, %v3612_v31  ;;  %v12235_v47 = vmov 683565275  }
0x12d6   :  { %10416 = vtanh.f32 %v11301_v58 }
0x12e0   :  { %v10417_v56 = vpop.eup %10416 }
0x12e1   :  { %3625 = vrot.lane.b32.xlu0 %v10417_v56, %s10583_s23 }
0x1353   :  { %v3626_v55 = vpop.permute.xlu0 %3625 }
0x1354   :  { %v11305_v28 = vmul.f32 %v3626_v55, %v3610_v63 }
0x1356   :  { %12234 = vst [vmem:[#allocation14_spill] sm:$0xff] %v11305_v28  ;;  %3630 = vrot.lane.b32.xlu1 %v11305_v28, %s10584_s24 }
0x13c8   :  { %v3631_v34 = vpop.permute.xlu1 %3630 }
0x13c9   :  { %v3634_v24 = vsel %vm602_vm10, %v3631_v34, 0 }
0x13ca   :  { %v3705_v27 = vand.u32 4294901760, %v3634_v24 }
0x13cc   :  { %v3706_v8 = vsub.f32 %v3634_v24, %v3705_v27 }
0x13ce   :  { %v3707_v26 = vand.u32 4294901760, %v3706_v8 }
0x13d0   :  { %v3708_v9 = vsub.f32 %v3706_v8, %v3707_v26 }
0x13d2   :  { %v3709_v59 = vand.u32 4294901760, %v3708_v9 }
0x13d4   :  { %9393 = vmatmul.mubr.f32.vlgmr.msra.gmra.mrb[16].mxu0 %v3709_v59 }
0x13d5   :  { %9930 = vmatpush3.bf16.msra.mxu0 %v10709_v49  ;;  %9403 = vmatprep.mubr.msk.f32.mxu0 %vm10568_vm2, %v12222_v40 }
0x13d6   :  { %9931 = vmatprep.subr.bf16.mxu0 %v12223_v7 }
0x13d9   :  { %9933 = vmatpush3.bf16.msra.mxu0 %v10714_v50 }
0x13da   :  { %9934 = vmatprep.subr.bf16.mxu0 %v12223_v7 }
0x13dc   :  { %9404 = vmatmul.mubr.f32.vlgmr.msra.gmra.mrb[16].mxu0 %v3705_v27 }
0x13dd   :  { %9936 = vmatpush3.bf16.msra.mxu0 %v10721_v51  ;;  %9414 = vmatprep.mubr.msk.f32.mxu0 %vm10568_vm2, %v12222_v40 }
0x13de   :  { %9937 = vmatprep.subr.bf16.mxu0 %v12223_v7 }
0x13e1   :  { %9939 = vmatpush3.bf16.msra.mxu0 %v10729_v52 }
0x13e2   :  { %9940 = vmatprep.subr.bf16.mxu0 %v12223_v7 }
0x13e4   :  { %9415 = vmatmul.mubr.f32.vlgmr.msra.gmra.mrb[16].mxu0 %v3706_v8 }
0x13e5   :  { %9942 = vmatpush3.bf16.msra.mxu0 %v10664_v13  ;;  %9425 = vmatprep.mubr.msk.f32.mxu0 %vm10568_vm2, %v12222_v40 }
0x13e6   :  { %9943 = vmatprep.subr.bf16.mxu0 %v12223_v7 }
0x13e9   :  { %9945 = vmatpush3.bf16.msra.mxu0 %v10670_v18 }
0x13ea   :  { %9946 = vmatprep.subr.bf16.mxu0 %v12223_v7 }
0x13ec   :  { %9426 = vmatmul.mubr.f32.vlgmr.msra.gmra.mrb[16].mxu0 %v3707_v26 }
0x13ed   :  { %9948 = vmatpush3.bf16.msra.mxu0 %v10746_v53  ;;  %9436 = vmatprep.mubr.msk.f32.mxu0 %vm10568_vm2, %v12222_v40 }
0x13ee   :  { %9949 = vmatprep.subr.bf16.mxu0 %v12223_v7 }
0x13f1   :  { %9951 = vmatpush3.bf16.msra.mxu0 %v10751_v54 }
0x13f2   :  { %9952 = vmatprep.subr.bf16.mxu0 %v12223_v7 }
0x13f4   :  { %9437 = vmatmul.mubr.f32.vlgmr.msra.gmra.mrb[16].mxu0 %v3705_v27 }
0x13f5   :  { %9954 = vmatpush3.bf16.msra.mxu0 %v10664_v13  ;;  %9447 = vmatprep.mubr.msk.f32.mxu0 %vm10568_vm2, %v12222_v40 }
0x13f6   :  { %9955 = vmatprep.subr.bf16.mxu0 %v12223_v7 }
0x13f9   :  { %9957 = vmatpush3.bf16.msra.mxu0 %v10670_v18 }
0x13fa   :  { %9536 = vmatprep.subr.bf16.mxu0 %v12222_v40 }
0x13fc   :  { %9448 = vmatmul.mubr.f32.vlgmr.msra.gmra.mrb[16].mxu0 %v3705_v27 }
0x13fd   :  { %9537 = vmatpush3.bf16.msra.mxu0 %v11163_v36  ;;  %9540 = vmatprep.mubr.msk.bf16.mxu0 %vm10568_vm2, %v12222_v40 }
0x13fe   :  { %9538 = vmatprep.subr.bf16.mxu0 %v12222_v40 }
0x1401   :  { %9539 = vmatpush3.bf16.msra.mxu0 %v11347_v14 }
0x1402   :  { %9544 = vmatprep.subr.bf16.mxu0 %v12222_v40 }
0x14cf   :  { %v4117_v39 = vpop.f32.mrb[16].mxu0 }
0x14d0   :  { %v11352_v4 = vadd.f32 %v4117_v39, %v3632_v46  ;;  %v9449_v36 = vpop.f32.mrb[17].mxu0 }
0x14d2   :  { %v11355_v3 = vmul.f32 0.5, %v11352_v4  ;;  %v4329_v41 = vmul.f32 %v11352_v4, %v11352_v4  ;;  %vm4341_vm14 = vcmp.ge.f32.partialorder %v11352_v4, 0.0 }
0x14d4   :  { %v4125_v61 = vand.u32 2139095040, %v11355_v3  ;;  %v12195_v25 = vand.u32 2147483647, %v11355_v3  ;;  %v4330_v33 = vadd.f32 1.0, %v4329_v41  ;;  %vm4124_vm1 = vcmp.lt.s32.totalorder %v11355_v3, 0 }
0x14d6   :  { %v4126_v43 = vshrl.u32 %v4125_v61, 23  ;;  %v4129_v35 = vand.u32 8388607, %v12195_v25  ;;  %10418 = vrsqrt.f32 %v4330_v33 }
0x14d8   :  { %v8723_v38 = vadd.s32 4294967169, %v4126_v43  ;;  %v4130_v39 = vor.u32 8388608, %v4129_v35 }
0x14da   :  { %v4132_v45 = vadd.s32 1, %v8723_v38 }
0x14dc   :  { %vm4133_vm3 = vcmp.gt.s32.totalorder %v4132_v45, 0 }
0x14dd   :  { %v4134_v32 = vsel %vm4133_vm3, %v4132_v45, 0 }
0x14de   :  { %v4136_v63 = vand.u32 31, %v4134_v32  ;;  %v4135_v31 = vshrl.u32 %v4134_v32, 5 }
0x14e0   :  { %v4137_v1 = vsub.s32 32, %v4136_v63  ;;  %v4139_v56 = vshll.u32 %v12235_v47, %v4136_v63  ;;  %v4142_v55 = vshll.u32 %v12225_v37, %v4136_v63  ;;  %v4145_v27 = vshll.u32 %v12226_v62, %v4136_v63 }
0x14e1   :  { %v4148_v26 = vshll.u32 %v12227_v30, %v4136_v63  ;;  %v4151_v59 = vshll.u32 %v12228_v6, %v4136_v63  ;;  %vm4154_vm4 = vcmp.lt.s32.totalorder %v4135_v31, 1  ;;  %vm4157_vm5 = vcmp.lt.s32.totalorder %v4135_v31, 4 }
0x14e2   :  { %v4140_v34 = vshrl.u32 %v12225_v37, %v4137_v1  ;;  %v4143_v24 = vshrl.u32 %v12226_v62, %v4137_v1  ;;  %v4146_v8 = vshrl.u32 %v12227_v30, %v4137_v1  ;;  %v4149_v9 = vshrl.u32 %v12228_v6, %v4137_v1 }
0x14e3   :  { %v4152_v46 = vshrl.u32 %v12229_v60, %v4137_v1  ;;  %v4138_v25 = vshrl.u32 %v12235_v47, %v4137_v1  ;;  %vm4156_vm6 = vcmp.lt.s32.totalorder %v4135_v31, 3  ;;  %vm4155_vm7 = vcmp.lt.s32.totalorder %v4135_v31, 2 }
0x14e4   :  { %v4141_v36 = vor.u32 %v4140_v34, %v4139_v56  ;;  %v4144_v61 = vor.u32 %v4143_v24, %v4142_v55  ;;  %v4147_v43 = vor.u32 %v4146_v8, %v4145_v27  ;;  %v4150_v38 = vor.u32 %v4149_v9, %v4148_v26  ;;  %v10419_v9 = vpop.eup %10418 }
0x14e5   :  { %v4153_v41 = vor.u32 %v4152_v46, %v4151_v59  ;;  %v4170_v60 = vshll.u32 %v4130_v39, 8  ;;  %v4343_v31 = vsub.f32 1.0, %v10419_v9 }
0x14e6   :  { %v4159_v45 = vsel %vm4157_vm5, %v4147_v43, 2102212464  ;;  %v4162_v32 = vsel %vm4154_vm4, %v4141_v36, %v4144_v61  ;;  %v4166_v33 = vsel %vm4154_vm4, %v4144_v61, %v4147_v43  ;;  %v4163_v28 = vsel %vm4157_vm5, %v4150_v38, 920167782 }
0x14e7   :  { %v4167_v30 = vsel %vm4157_vm5, %v4153_v41, 1326507024  ;;  %v4164_v63 = vsel %vm4156_vm6, %v4147_v43, %v4163_v28  ;;  %v4158_v35 = vsel %vm4154_vm4, %v4138_v25, %v4141_v36  ;;  %v4160_v56 = vsel %vm4156_vm6, %v4144_v61, %v4159_v45 }
0x14e8   :  { %v4168_v6 = vsel %vm4156_vm6, %v4150_v38, %v4167_v30  ;;  %v4165_v55 = vsel %vm4155_vm7, %v4162_v32, %v4164_v63  ;;  %v4161_v59 = vsel %vm4155_vm7, %v4158_v35, %v4160_v56  ;;  %v4344_v46 = vmul.f32 0.5, %v4343_v31 }
0x14e9   :  { %v4169_v34 = vsel %vm4155_vm7, %v4166_v33, %v4168_v6  ;;  %v11377_v8 = vmul.u32.u64.low %v4170_v60, %v4165_v55  ;;  %v11378_v26 = vmul.u32.u64.high %v4170_v60, %v4165_v55, %v11377_v8  ;;  %v4177_v28 = vmul.u32 %v4170_v60, %v4161_v59 }
0x14ea   :  { %v11374_v24 = vmul.u32.u64.low %v4170_v60, %v4169_v34  ;;  %v11375_v27 = vmul.u32.u64.high %v4170_v60, %v4169_v34, %v11374_v24  ;;  %v4345_v36 = vmax.f32 %v4344_v46, 0.0  ;;  %v4332_v43 = vadd.f32 1.0, %v10419_v9 }
0x14eb   :  { %v4180_v1 = vadd.s32 1, %v11378_v26  ;;  %vm4214_vm5 = vweird.f32 %v11355_v3 }
0x14ec   :  { %vm4179_vm8 = vc.u32 %v11375_v27, %v11377_v8  ;;  %10420 = vrsqrt.f32 %v4345_v36  ;;  %v4333_v45 = vmul.f32 0.5, %v4332_v43  ;;  %v4178_v56 = vadd.s32 %v11377_v8, %v11375_v27 }
0x14ed   :  { %v4181_v30 = vsel %vm4179_vm8, %v4180_v1, %v11378_v26  ;;  %vm4348_vm13 = vcmp.eq.f32.partialorder %v4345_v36, inf  ;;  %v4351_v46 = vand.u32 2147483648, %v4345_v36  ;;  %vm4350_vm15 = vcmp.eq.f32.partialorder %v4345_v36, 0.0 }
0x14ee   :  { %v4182_v25 = vadd.s32 %v4181_v30, %v4177_v28  ;;  %10422 = vrsqrt.f32 %v4333_v45  ;;  %vm4336_vm0 = vcmp.eq.f32.partialorder %v4333_v45, inf  ;;  %vm4338_vm4 = vcmp.eq.f32.partialorder %v4333_v45, 0.0 }
0x14f0   :  { %v4183_v39 = vadd.s32 536870912, %v4182_v25 }
0x14f2   :  { %v4184_v6 = vshrl.u32 %v4183_v39, 30 }
0x14f4   :  { %v4185_v61 = vshll.u32 %v4184_v6, 30 }
0x14f6   :  { %v4186_v38 = vsub.s32 %v4182_v25, %v4185_v61  ;;  %v10421_v35 = vpop.eup %10420 }
0x14f7   :  { %v4347_v1 = vmul.f32 %v10421_v35, %v4345_v36 }
0x14f8   :  { %v4188_v41 = vsub.s32 0, %v4186_v38  ;;  %v10423_v28 = vpop.eup %10422 }
0x14f9   :  { %v4349_v25 = vsel %vm4348_vm13, %v4345_v36, %v4347_v1  ;;  %v4335_v43 = vmul.f32 %v10423_v28, %v4333_v45 }
0x14fa   :  { %v8724_v32 = vmin.u32 %v4188_v41, %v4186_v38  ;;  %v4352_v27 = vsel %vm4350_vm15, %v4351_v46, %v4349_v25  ;;  %v4208_v41 = vsub.s32 4, %v4184_v6 }
0x14fc   :  { %v4190_v33 = vclz %v8724_v32 }
0x14fe   :  { %v8725_v63 = vadd.s32 4294967294, %v4190_v33 }
0x1500   :  { %vm8726_vm12 = vcmp.lt.s32.totalorder %v8725_v63, 0 }
0x1501   :  { %v4193_v60 = vsel %vm8726_vm12, 0, %v8725_v63  ;;  %v4337_v63 = vsel %vm4336_vm0, %v4333_v45, %v4335_v43 }
0x1502   :  { %v4194_v55 = vsub.s32 32, %v4193_v60  ;;  %v4198_v34 = vsub.s32 4294967266, %v4193_v60  ;;  %v4195_v24 = vshll.u32 %v4186_v38, %v4193_v60  ;;  %v12236_v38 = vmov -1.0  }
0x1503   :  { %v4342_v32 = vsel %vm4341_vm14, 1.0, %v12236_v38  ;;  %v4339_v60 = vand.u32 2147483648, %v4333_v45 }
0x1504   :  { %v4196_v26 = vshrl.u32 %v4178_v56, %v4194_v55  ;;  %v4199_v59 = vadd.s32 127, %v4198_v34  ;;  %v4353_v35 = vmul.f32 %v4352_v27, %v4342_v32  ;;  %v12237_v56 = vand.u32 2147483647, %v11355_v3 }
0x1505   :  { %v4209_v55 = vsel %vm4124_vm1, %v4208_v41, %v4184_v6  ;;  %v4340_v34 = vsel %vm4338_vm4, %v4339_v60, %v4337_v63 }
0x1506   :  { %v4197_v9 = vor.u32 %v4196_v26, %v4195_v24  ;;  %v4200_v31 = vshll.u32 %v4199_v59, 23  ;;  %vm4123_vm3 = vcmp.le.f32.partialorder %v12237_v56, 0.7853982  ;;  %v4354_v24 = vsub.f32 %v4340_v34, %v4353_v35 }
0x1507   :  { %v4211_v26 = vsel %vm4123_vm3, 0, %v4209_v55  ;;  %v4356_v59 = vadd.f32 %v4353_v35, %v4340_v34 }
0x1508   :  { %v4201_v30 = vor.u32 4788187, %v4200_v31  ;;  %v4204_v61 = vcvt.s32.f32 %v4197_v9  ;;  %v4318_v1 = vadd.s32 3, %v4211_v26  ;;  %v4355_v9 = vmul.f32 0.70710677, %v4354_v24 }
0x1509   :  { %v4215_v31 = vand.u32 3, %v4211_v26  ;;  %v4357_v28 = vmul.f32 0.70710677, %v4356_v59 }
0x150a   :  { %v4202_v39 = vand.u32 2147483647, %v4201_v30  ;;  %v4319_v30 = vand.u32 3, %v4318_v1  ;;  %v4371_v25 = vmul.f32 %v4355_v9, %v4353_v35  ;;  %v4358_v6 = vmul.f32 %v4355_v9, %v4340_v34 }
0x150b   :  { %vm4216_vm6 = vcmp.lt.s32.totalorder %v4215_v31, 2  ;;  %vm4217_vm7 = vcmp.eq.s32.totalorder %v4215_v31, 0  ;;  %v4364_v43 = vmul.f32 %v4357_v28, %v4353_v35  ;;  %vm4220_vm8 = vcmp.eq.s32.totalorder %v4215_v31, 2 }
0x150c   :  { %v4205_v8 = vmul.f32 %v4204_v61, %v4202_v39  ;;  %v4378_v61 = vmul.f32 %v4357_v28, %v4340_v34  ;;  %vm4324_vm12 = vcmp.eq.s32.totalorder %v4319_v30, 2  ;;  %vm4320_vm13 = vcmp.lt.s32.totalorder %v4319_v30, 2 }
0x150d   :  { %vm4321_vm14 = vcmp.eq.s32.totalorder %v4319_v30, 0  ;;  %v4389_v60 = vrot.slane %v4371_v25, %v10835_v29  ;;  %v4362_v56 = vrot.slane %v4358_v6, %v10835_v29  ;;  %v4368_v35 = vrot.slane %v4364_v43, %v10835_v29 }
0x150e   :  { %v4206_v33 = vxor.u32 2147483648, %v4205_v8 }
0x1510   :  { %v4207_v4 = vsel %vm4124_vm1, %v4206_v33, %v4205_v8  ;;  %v4372_v8 = vsub.f32 0.0, %v4371_v25 }
0x1511   :  { %v4210_v36 = vsel %vm4123_vm3, %v11355_v3, %v4207_v4 }
0x1512   :  { %10424 = vcosq.f32 %v4210_v36  ;;  %v4376_v26 = vrot.slane %v4372_v8, %v10835_v29 }
0x1513   :  { %10426 = vsinq.f32 %v4210_v36  ;;  %v4382_v36 = vrot.slane %v4378_v61, %v10835_v29 }
0x151c   :  { %v10425_v46 = vpop.eup %10424 }
0x151d   :  { %v10427_v45 = vpop.eup %10426  ;;  %v4221_v39 = vxor.u32 2147483648, %v10425_v46 }
0x151e   :  { %v4218_v27 = vxor.u32 2147483648, %v10427_v45 }
0x151f   :  { %v4222_v41 = vsel %vm4220_vm8, %v4221_v39, %v10427_v45  ;;  %v4326_v32 = vsel %vm4324_vm12, %v4221_v39, %v10427_v45 }
0x1520   :  { %v4219_v33 = vsel %vm4217_vm7, %v10425_v46, %v4218_v27  ;;  %v4323_v63 = vsel %vm4321_vm14, %v10425_v46, %v4218_v27 }
0x1521   :  { %v4223_v4 = vsel %vm4216_vm6, %v4219_v33, %v4222_v41  ;;  %v4327_v55 = vsel %vm4320_vm13, %v4323_v63, %v4326_v32 }
0x1522   :  { %v4224_v34 = vsel %vm4214_vm5, nan, %v4223_v4  ;;  %v4328_v24 = vsel %vm4214_vm5, nan, %v4327_v55 }
0x1523   :  { %v4385_v59 = vmul.f32 %v4382_v36, %v4224_v34  ;;  %v4390_v1 = vmul.f32 %v4389_v60, %v4328_v24  ;;  %v4363_v9 = vmul.f32 %v4362_v56, %v4224_v34  ;;  %v4369_v28 = vmul.f32 %v4368_v35, %v4328_v24 }
0x1524   :  { %v4392_v30 = vmul.f32 %v4368_v35, %v4224_v34  ;;  %v4393_v31 = vmul.f32 %v4362_v56, %v4328_v24  ;;  %v4377_v25 = vmul.f32 %v4376_v26, %v4224_v34  ;;  %v4383_v46 = vmul.f32 %v4382_v36, %v4328_v24 }
0x1525   :  { %v4391_v6 = vsub.f32 %v4385_v59, %v4390_v1  ;;  %v4370_v45 = vsub.f32 %v4363_v9, %v4369_v28 }
0x1526   :  { %v4394_v39 = vadd.f32 %v4393_v31, %v4392_v30  ;;  %v4384_v61 = vsub.f32 %v4377_v25, %v4383_v46 }
0x1527   :  { %4403 = vperm.xlu1 %10295, %v4391_v6   ;;  %4397 = vperm.xlu0 %10294, %v4370_v45  }
0x152b   :  { %10296 = vset.pattern.permute.xlu1 %v12231_v57  ;;  %10297 = vset.pattern.permute.xlu0 %v12231_v57 }
0x152c   :  { %4409 = vperm.xlu1 %10296, %v4370_v45   ;;  %4414 = vperm.xlu0 %10297, %v4391_v6  }
0x1530   :  { %10298 = vset.pattern.permute.xlu1 %v12232_v5  ;;  %10299 = vset.pattern.permute.xlu0 %v12233_v15 }
0x1531   :  { %4420 = vperm.xlu1 %10298, %v4370_v45   ;;  %4431 = vperm.xlu0 %10299, %v4370_v45  }
0x1535   :  { %4425 = vperm.xlu1 %10298, %v4391_v6   ;;  %10302 = vset.pattern.permute.xlu0 %v12221_v42 }
0x1536   :  { %4449 = vperm.xlu0 %10302, %v4394_v39  }
0x1539   :  { %10300 = vset.pattern.permute.xlu1 %v12233_v15 }
0x153a   :  { %4436 = vperm.xlu1 %10300, %v4391_v6   ;;  %10304 = vset.pattern.permute.xlu0 %v12232_v5 }
0x153b   :  { %4466 = vperm.xlu0 %10304, %v4384_v61  }
0x153e   :  { %10301 = vset.pattern.permute.xlu1 %v12221_v42 }
0x153f   :  { %4443 = vperm.xlu1 %10301, %v4384_v61   ;;  %10307 = vset.pattern.permute.xlu0 %v12233_v15 }
0x1540   :  { %4482 = vperm.xlu0 %10307, %v4394_v39  }
0x1543   :  { %10303 = vset.pattern.permute.xlu1 %v12231_v57 }
0x1544   :  { %4455 = vperm.xlu1 %10303, %v4384_v61   ;;  %10308 = vset.pattern.permute.xlu0 %v12221_v42 }
0x1548   :  { %4460 = vperm.xlu1 %10303, %v4394_v39  }
0x154c   :  { %10305 = vset.pattern.permute.xlu1 %v12232_v5 }
0x154d   :  { %4471 = vperm.xlu1 %10305, %v4394_v39  }
0x1551   :  { %10306 = vset.pattern.permute.xlu1 %v12233_v15 }
0x1552   :  { %4477 = vperm.xlu1 %10306, %v4384_v61  }
0x1556   :  { %10309 = vset.pattern.permute.xlu1 %v12221_v42 }
0x15a6   :  { %v4404_v3 = vpop.permute.xlu1 %4403  ;;  %v4398_v8 = vpop.permute.xlu0 %4397 }
0x15a7   :  { %v4406_v35 = vmul.f32 %v4404_v3, %v10876_v10  ;;  %v4400_v26 = vmul.f32 %v4398_v8, %v10885_v20 }
0x15a9   :  { %v4407_v3 = vadd.f32 %v4406_v35, %v4400_v26 }
0x15ab   :  { %v4410_v43 = vpop.permute.xlu1 %4409  ;;  %v4415_v32 = vpop.permute.xlu0 %4414 }
0x15ac   :  { %v4412_v59 = vmul.f32 %v4410_v43, %v10882_v19  ;;  %v4417_v1 = vmul.f32 %v4415_v32, %v10873_v12 }
0x15ae   :  { %v4418_v43 = vadd.f32 %v4417_v1, %v4412_v59 }
0x15b0   :  { %v4421_v27 = vpop.permute.xlu1 %4420  ;;  %v4432_v63 = vpop.permute.xlu0 %4431 }
0x15b1   :  { %v4434_v25 = vmul.f32 %v4432_v63, %v10878_v11  ;;  %v4423_v8 = vmul.f32 %v4421_v27, %v10889_v22 }
0x15b4   :  { %v4426_v41 = vpop.permute.xlu1 %4425 }
0x15b5   :  { %v4450_v56 = vpop.permute.xlu0 %4449  ;;  %v4428_v46 = vmul.f32 %v4426_v41, %v10887_v21 }
0x15b6   :  { %v4452_v45 = vmul.f32 %v4450_v56, %v10876_v10  ;;  %v4487_v56 = vmul.f32 %v4418_v43, %v4407_v3 }
0x15b9   :  { %v4437_v33 = vpop.permute.xlu1 %4436 }
0x15ba   :  { %v4467_v36 = vpop.permute.xlu0 %4466  ;;  %v4439_v9 = vmul.f32 %v4437_v33, %v10880_v16 }
0x15bb   :  { %v4469_v39 = vmul.f32 %v4467_v36, %v10889_v22 }
0x15bc   :  { %v4440_v32 = vadd.f32 %v4439_v9, %v4434_v25 }
0x15be   :  { %v4444_v60 = vpop.permute.xlu1 %4443 }
0x15bf   :  { %v4446_v28 = vmul.f32 %v4444_v60, %v10885_v20  ;;  %v4483_v6 = vpop.permute.xlu0 %4482 }
0x15c1   :  { %v4453_v60 = vadd.f32 %v4452_v45, %v4446_v28 }
0x15c3   :  { %v4456_v4 = vpop.permute.xlu1 %4455  ;;  %v4491_v36 = vmul.f32 %v4453_v60, %v4418_v43 }
0x15c4   :  { %v4458_v30 = vmul.f32 %v4456_v4, %v10882_v19  ;;  %v4485_v4 = vmul.f32 %v4483_v6, %v10880_v16 }
0x15c7   :  { %v4461_v55 = vpop.permute.xlu1 %4460 }
0x15c8   :  { %v4463_v34 = vmul.f32 %v4461_v55, %v10873_v12 }
0x15ca   :  { %v4464_v61 = vadd.f32 %v4463_v34, %v4458_v30 }
0x15cc   :  { %v4472_v24 = vpop.permute.xlu1 %4471  ;;  %v4488_v41 = vmul.f32 %v4464_v61, %v4453_v60 }
0x15cd   :  { %v4474_v31 = vmul.f32 %v4472_v24, %v10887_v21  ;;  %v4429_v24 = vadd.f32 %v4428_v46, %v4423_v8  ;;  %v4490_v21 = vmul.f32 %v4464_v61, %v4407_v3 }
0x15ce   :  { %v4489_v59 = vsub.f32 %v4487_v56, %v4488_v41 }
0x15cf   :  { %v4475_v55 = vadd.f32 %v4474_v31, %v4469_v39  ;;  %v4493_v20 = vmul.f32 %v4440_v32, %v4429_v24  ;;  %v4492_v27 = vadd.f32 %v4491_v36, %v4490_v21 }
0x15d1   :  { %v4478_v33 = vpop.permute.xlu1 %4477  ;;  %v4497_v34 = vmul.f32 %v4475_v55, %v4440_v32 }
0x15d2   :  { %v4480_v63 = vmul.f32 %v4478_v33, %v10878_v11 }
0x15d4   :  { %v4486_v19 = vadd.f32 %v4485_v4, %v4480_v63 }
0x15d6   :  { %v4494_v35 = vmul.f32 %v4486_v19, %v4475_v55  ;;  %v4496_v26 = vmul.f32 %v4486_v19, %v4429_v24 }
0x15d8   :  { %v4495_v1 = vsub.f32 %v4493_v20, %v4494_v35  ;;  %v4498_v9 = vadd.f32 %v4497_v34, %v4496_v26 }
0x15da   :  { %v4502_v28 = vmul.f32 %v4498_v9, %v4489_v59  ;;  %v4503_v30 = vmul.f32 %v4495_v1, %v4492_v27  ;;  %v4500_v25 = vmul.f32 %v4498_v9, %v4492_v27  ;;  %v4499_v31 = vmul.f32 %v4495_v1, %v4489_v59 }
0x15dc   :  { %v4504_v6 = vadd.f32 %v4503_v30, %v4502_v28  ;;  %v4501_v45 = vsub.f32 %v4499_v31, %v4500_v25 }
0x15de   :  { %4506 = vrot.lane.b32.xlu1 %v4504_v6, %s10581_s11  ;;  %v11498_v6 = vld [vmem:[%s12158_s4] sm:$0xff]  }
0x1650   :  { %v4507_v46 = vpop.permute.xlu1 %4506 }
0x1651   :  { %v4509_v39 = vsel %vm1479_vm9, %v4501_v45, %v4507_v46 }
0x1652   :  { %v4510_v61 = vpack.c.bf16 %v4509_v39, %v4509_v39 }
0x1654   :  { %9455 = vmatmul.mubr.msk.bf16.vlgmr.msra.gmra.mrb[16].mxu1 %vm602_vm10, %v4510_v61 }
0x1655   :  { %9459 = vmatpush3.bf16.msra.mxu1 %v11257_v23  ;;  %9466 = vmatprep.mubr.msk.bf16.mxu1 %vm10568_vm2, %v12222_v40 }
0x1656   :  { %9460 = vmatprep.subr.bf16.mxu1 %v12222_v40 }
0x1659   :  { %9461 = vmatpush3.bf16.msra.mxu1 %v11266_v0 }
0x165a   :  { %9462 = vmatprep.subr.bf16.mxu1 %v12222_v40 }
0x165d   :  { %9463 = vmatpush3.bf16.msra.mxu1 %v11273_v17 }
0x165e   :  { %9464 = vmatprep.subr.bf16.mxu1 %v12222_v40 }
0x1661   :  { %9465 = vmatpush3.bf16.msra.mxu1 %v11280_v48 }
0x1662   :  { %9958 = vmatprep.subr.bf16.mxu1 %v12223_v7 }
0x1727   :  { %v4548_v19 = vpop.f32.mrb[16].mxu1 }
0x1728   :  { %v4554_v20 = vmul.f32 %v4548_v19, %v4548_v19  ;;  %v9456_v21 = vpop.f32.mrb[17].mxu1 }
0x1729   :  { %v4551_v23 = vpop.f32.mrb[18].mxu1 }
0x172a   :  { %4556 = vrot.lane.b32.xlu1 %v4554_v20, %s10582_s20  ;;  %v9457_v3 = vpop.f32.mrb[19].mxu1 }
0x179c   :  { %v4557_v43 = vpop.permute.xlu1 %4556 }
0x179d   :  { %v4559_v8 = vadd.f32 %v4557_v43, %v4554_v20 }
0x179f   :  { %v4560_v0 = vpack.c.bf16 %v4559_v8, %v4559_v8 }
0x17a1   :  { %9467 = vmatmul.mubr.msk.bf16.vlgmr.msra.gmra.mrb[20].mxu1 %vm1568_vm11, %v4560_v0 }
0x17a2   :  { %9960 = vmatpush3.bf16.msra.mxu1 %v10664_v13  ;;  %9478 = vmatprep.mubr.msk.f32.mxu1 %vm10568_vm2, %v12222_v40 }
0x17a3   :  { %9961 = vmatprep.subr.bf16.mxu1 %v12223_v7 }
0x17a6   :  { %9963 = vmatpush3.bf16.msra.mxu1 %v10670_v18 }
0x17a7   :  { %9964 = vmatprep.subr.bf16.mxu1 %v12223_v7 }
0x1874   :  { %v4598_v17 = vpop.f32.mrb[20].mxu1 }
0x1875   :  { %v4599_v48 = vadd.f32 %v11295_v44, %v4598_v17  ;;  %v9468_v32 = vpop.f32.mrb[21].mxu1 }
0x1876   :  { %v4601_v33 = vpop.f32.mrb[22].mxu1 }
0x1877   :  { %10428 = vtanh.f32 %v4599_v48  ;;  %v9469_v60 = vpop.f32.mrb[23].mxu1  ;;  %v4604_v55 = vmul.f32 0.5, %v4599_v48 }
0x1879   :  { %10430 = vtanh.f32 %v4604_v55 }
0x1881   :  { %v10429_v4 = vpop.eup %10428 }
0x1882   :  { %4611 = vrot.lane.b32.xlu0 %v10429_v4, %s10583_s23 }
0x1883   :  { %v10431_v63 = vpop.eup %10430 }
0x1884   :  { %v4606_v24 = vadd.f32 1.0, %v10431_v63  ;;  %v12239_v63 = vmov 2102212464  }
0x1886   :  { %v4607_v41 = vmul.f32 0.5, %v4606_v24 }
0x1888   :  { %v4609_v34 = vmul.f32 %v4607_v41, %v11301_v58 }
0x18f4   :  { %v4612_v56 = vpop.permute.xlu0 %4611 }
0x18f5   :  { %v4614_v36 = vmul.f32 %v4612_v56, %v4607_v41  ;;  %v12240_v56 = vmov 920167782  }
0x18f7   :  { %4616 = vrot.lane.b32.xlu1 %v4614_v36, %s10583_s23 }
0x1969   :  { %v4617_v35 = vpop.permute.xlu1 %4616 }
0x196a   :  { %v11456_v44 = vadd.f32 %v4617_v35, %v4609_v34  ;;  %v12241_v35 = vmov 1326507024  }
0x196c   :  { %10432 = vtanh.f32 %v11456_v44 }
0x1976   :  { %v10433_v26 = vpop.eup %10432 }
0x1977   :  { %4622 = vrot.lane.b32.xlu0 %v10433_v26, %s10583_s23 }
0x19e9   :  { %v4623_v59 = vpop.permute.xlu0 %4622 }
0x19ea   :  { %v11460_v27 = vmul.f32 %v4623_v59, %v4607_v41 }
0x19ec   :  { %12238 = vst [vmem:[#allocation15_spill] sm:$0xff] %v11460_v27  ;;  %4627 = vrot.lane.b32.xlu1 %v11460_v27, %s10584_s24 }
0x1a5e   :  { %v4628_v1 = vpop.permute.xlu1 %4627 }
0x1a5f   :  { %v4629_v9 = vsel %vm602_vm10, %v4628_v1, 0 }
0x1a60   :  { %v4700_v28 = vand.u32 4294901760, %v4629_v9 }
0x1a62   :  { %v4701_v30 = vsub.f32 %v4629_v9, %v4700_v28 }
0x1a64   :  { %v4702_v58 = vand.u32 4294901760, %v4701_v30 }
0x1a66   :  { %v4703_v25 = vsub.f32 %v4701_v30, %v4702_v58 }
0x1a68   :  { %v4704_v31 = vand.u32 4294901760, %v4703_v25 }
0x1a6a   :  { %9479 = vmatmul.mubr.f32.vlgmr.msra.gmra.mrb[24].mxu1 %v4704_v31 }
0x1a6b   :  { %9966 = vmatpush3.bf16.msra.mxu1 %v10709_v49  ;;  %9489 = vmatprep.mubr.msk.f32.mxu1 %vm10568_vm2, %v12222_v40 }
0x1a6c   :  { %9967 = vmatprep.subr.bf16.mxu1 %v12223_v7 }
0x1a6f   :  { %9969 = vmatpush3.bf16.msra.mxu1 %v10714_v50 }
0x1a70   :  { %9970 = vmatprep.subr.bf16.mxu1 %v12223_v7 }
0x1a72   :  { %9490 = vmatmul.mubr.f32.vlgmr.msra.gmra.mrb[24].mxu1 %v4700_v28 }
0x1a73   :  { %9972 = vmatpush3.bf16.msra.mxu1 %v10721_v51  ;;  %9500 = vmatprep.mubr.msk.f32.mxu1 %vm10568_vm2, %v12222_v40 }
0x1a74   :  { %9973 = vmatprep.subr.bf16.mxu1 %v12223_v7 }
0x1a77   :  { %9975 = vmatpush3.bf16.msra.mxu1 %v10729_v52 }
0x1a78   :  { %9976 = vmatprep.subr.bf16.mxu1 %v12223_v7 }
0x1a7a   :  { %9501 = vmatmul.mubr.f32.vlgmr.msra.gmra.mrb[24].mxu1 %v4701_v30 }
0x1a7b   :  { %9978 = vmatpush3.bf16.msra.mxu1 %v10664_v13  ;;  %9511 = vmatprep.mubr.msk.f32.mxu1 %vm10568_vm2, %v12222_v40 }
0x1a7c   :  { %9979 = vmatprep.subr.bf16.mxu1 %v12223_v7 }
0x1a7f   :  { %9981 = vmatpush3.bf16.msra.mxu1 %v10670_v18 }
0x1a80   :  { %9982 = vmatprep.subr.bf16.mxu1 %v12223_v7 }
0x1a82   :  { %9512 = vmatmul.mubr.f32.vlgmr.msra.gmra.mrb[24].mxu1 %v4702_v58 }
0x1a83   :  { %9984 = vmatpush3.bf16.msra.mxu1 %v10746_v53  ;;  %9522 = vmatprep.mubr.msk.f32.mxu1 %vm10568_vm2, %v12222_v40 }
0x1a84   :  { %9985 = vmatprep.subr.bf16.mxu1 %v12223_v7 }
0x1a87   :  { %9987 = vmatpush3.bf16.msra.mxu1 %v10751_v54 }
0x1a88   :  { %9988 = vmatprep.subr.bf16.mxu1 %v12223_v7 }
0x1a8a   :  { %9523 = vmatmul.mubr.f32.vlgmr.msra.gmra.mrb[24].mxu1 %v4700_v28 }
0x1a8b   :  { %9990 = vmatpush3.bf16.msra.mxu1 %v10664_v13  ;;  %9533 = vmatprep.mubr.msk.f32.mxu1 %vm10568_vm2, %v12222_v40 }
0x1a8c   :  { %9991 = vmatprep.subr.bf16.mxu1 %v12223_v7 }
0x1a8f   :  { %9993 = vmatpush3.bf16.msra.mxu1 %v10670_v18 }
0x1a90   :  { %9622 = vmatprep.subr.bf16.mxu1 %v12222_v40 }
0x1a92   :  { %9534 = vmatmul.mubr.f32.vlgmr.msra.gmra.mrb[24].mxu1 %v4700_v28 }
0x1a93   :  { %9623 = vmatpush3.bf16.msra.mxu1 %v11498_v6  ;;  %9626 = vmatprep.mubr.msk.bf16.mxu1 %vm10568_vm2, %v12222_v40 }
0x1a94   :  { %9624 = vmatprep.subr.bf16.mxu1 %v12222_v40 }
0x1a97   :  { %9625 = vmatpush3.bf16.msra.mxu1 %v11347_v14 }
0x1a98   :  { %9630 = vmatprep.subr.bf16.mxu1 %v12222_v40 }
0x1b65   :  { %v5112_v45 = vpop.f32.mrb[24].mxu1 }
0x1b66   :  { %v11507_v46 = vadd.f32 %v5112_v45, %v10789_v2  ;;  %v9535_v39 = vpop.f32.mrb[25].mxu1 }
0x1b68   :  { %v11510_v61 = vmul.f32 0.5, %v11507_v46  ;;  %v5324_v23 = vmul.f32 %v11507_v46, %v11507_v46  ;;  %vm5336_vm8 = vcmp.ge.f32.partialorder %v11507_v46, 0.0 }
0x1b6a   :  { %v5120_v19 = vand.u32 2139095040, %v11510_v61  ;;  %v5117_v14 = vand.u32 2147483647, %v11510_v61  ;;  %v5325_v8 = vadd.f32 1.0, %v5324_v23  ;;  %vm5119_vm14 = vcmp.lt.s32.totalorder %v11510_v61, 0 }
0x1b6c   :  { %v5121_v20 = vshrl.u32 %v5120_v19, 23  ;;  %v5124_v2 = vand.u32 8388607, %v5117_v14  ;;  %10434 = vrsqrt.f32 %v5325_v8 }
0x1b6e   :  { %v8733_v21 = vadd.s32 4294967169, %v5121_v20  ;;  %v5125_v59 = vor.u32 8388608, %v5124_v2 }
0x1b70   :  { %v5127_v3 = vadd.s32 1, %v8733_v21 }
0x1b72   :  { %vm5128_vm15 = vcmp.gt.s32.totalorder %v5127_v3, 0 }
0x1b73   :  { %v5129_v43 = vsel %vm5128_vm15, %v5127_v3, 0  ;;  %v5165_v3 = vshll.u32 %v5125_v59, 8  ;;  %vm5118_vm15 = vcmp.le.f32.partialorder %v5117_v14, 0.7853982 }
0x1b74   :  { %v5131_v0 = vand.u32 31, %v5129_v43  ;;  %v5130_v48 = vshrl.u32 %v5129_v43, 5 }
0x1b76   :  { %v5132_v17 = vsub.s32 32, %v5131_v0  ;;  %v5134_v32 = vshll.u32 %v12235_v47, %v5131_v0  ;;  %v5137_v33 = vshll.u32 %v12225_v37, %v5131_v0  ;;  %v5140_v55 = vshll.u32 %v12226_v62, %v5131_v0 }
0x1b77   :  { %v5143_v41 = vshll.u32 %v12239_v63, %v5131_v0  ;;  %v5146_v34 = vshll.u32 %v12240_v56, %v5131_v0  ;;  %vm5149_vm0 = vcmp.lt.s32.totalorder %v5130_v48, 1  ;;  %vm5152_vm1 = vcmp.lt.s32.totalorder %v5130_v48, 4 }
0x1b78   :  { %v5135_v60 = vshrl.u32 %v12225_v37, %v5132_v17  ;;  %v5138_v4 = vshrl.u32 %v12226_v62, %v5132_v17  ;;  %v5141_v24 = vshrl.u32 %v12239_v63, %v5132_v17  ;;  %v5144_v36 = vshrl.u32 %v12240_v56, %v5132_v17 }
0x1b79   :  { %v5147_v26 = vshrl.u32 %v12241_v35, %v5132_v17  ;;  %v5133_v39 = vshrl.u32 %v12235_v47, %v5132_v17  ;;  %vm5151_vm3 = vcmp.lt.s32.totalorder %v5130_v48, 3  ;;  %vm5150_vm4 = vcmp.lt.s32.totalorder %v5130_v48, 2 }
0x1b7a   :  { %v5136_v1 = vor.u32 %v5135_v60, %v5134_v32  ;;  %v5139_v9 = vor.u32 %v5138_v4, %v5137_v33  ;;  %v5142_v28 = vor.u32 %v5141_v24, %v5140_v55  ;;  %v5145_v30 = vor.u32 %v5144_v36, %v5143_v41  ;;  %v10435_v55 = vpop.eup %10434 }
0x1b7b   :  { %v5148_v58 = vor.u32 %v5147_v26, %v5146_v34  ;;  %v5338_v48 = vsub.f32 1.0, %v10435_v55 }
0x1b7c   :  { %v5154_v25 = vsel %vm5152_vm1, %v5142_v28, 2102212464  ;;  %v5157_v31 = vsel %vm5149_vm0, %v5136_v1, %v5139_v9  ;;  %v5161_v45 = vsel %vm5149_vm0, %v5139_v9, %v5142_v28  ;;  %v5158_v19 = vsel %vm5152_vm1, %v5145_v30, 920167782 }
0x1b7d   :  { %v5162_v20 = vsel %vm5152_vm1, %v5148_v58, 1326507024  ;;  %v5159_v21 = vsel %vm5151_vm3, %v5142_v28, %v5158_v19  ;;  %v5153_v43 = vsel %vm5149_vm0, %v5133_v39, %v5136_v1  ;;  %v5155_v8 = vsel %vm5151_vm3, %v5139_v9, %v5154_v25 }
0x1b7e   :  { %v5163_v23 = vsel %vm5151_vm3, %v5145_v30, %v5162_v20  ;;  %v5160_v0 = vsel %vm5150_vm4, %v5157_v31, %v5159_v21  ;;  %v5156_v24 = vsel %vm5150_vm4, %v5153_v43, %v5155_v8  ;;  %v5339_v26 = vmul.f32 0.5, %v5338_v48 }
0x1b7f   :  { %v5164_v2 = vsel %vm5150_vm4, %v5161_v45, %v5163_v23  ;;  %v11532_v60 = vmul.u32.u64.low %v5165_v3, %v5160_v0  ;;  %v11533_v4 = vmul.u32.u64.high %v5165_v3, %v5160_v0, %v11532_v60  ;;  %v5172_v41 = vmul.u32 %v5165_v3, %v5156_v24 }
0x1b80   :  { %v11529_v32 = vmul.u32.u64.low %v5165_v3, %v5164_v2  ;;  %v11530_v33 = vmul.u32.u64.high %v5165_v3, %v5164_v2, %v11529_v32  ;;  %v5340_v9 = vmax.f32 %v5339_v26, 0.0  ;;  %v5327_v30 = vadd.f32 1.0, %v10435_v55 }
0x1b81   :  { %v5175_v17 = vadd.s32 1, %v11533_v4  ;;  %vm5209_vm1 = vweird.f32 %v11510_v61 }
0x1b82   :  { %vm5174_vm5 = vc.u32 %v11530_v33, %v11532_v60  ;;  %10436 = vrsqrt.f32 %v5340_v9  ;;  %v5328_v31 = vmul.f32 0.5, %v5327_v30  ;;  %v5173_v23 = vadd.s32 %v11532_v60, %v11530_v33 }
0x1b83   :  { %v5176_v36 = vsel %vm5174_vm5, %v5175_v17, %v11533_v4  ;;  %vm5343_vm7 = vcmp.eq.f32.partialorder %v5340_v9, inf  ;;  %vm5345_vm12 = vcmp.eq.f32.partialorder %v5340_v9, 0.0 }
0x1b84   :  { %v5177_v34 = vadd.s32 %v5176_v36, %v5172_v41  ;;  %10438 = vrsqrt.f32 %v5328_v31  ;;  %v5346_v41 = vand.u32 2147483648, %v5340_v9  ;;  %vm5331_vm13 = vcmp.eq.f32.partialorder %v5328_v31, inf }
0x1b85   :  { %vm5333_vm0 = vcmp.eq.f32.partialorder %v5328_v31, 0.0 }
0x1b86   :  { %v5178_v59 = vadd.s32 536870912, %v5177_v34 }
0x1b88   :  { %v5179_v1 = vshrl.u32 %v5178_v59, 30 }
0x1b8a   :  { %v5180_v28 = vshll.u32 %v5179_v1, 30  ;;  %v5203_v59 = vsub.s32 4, %v5179_v1 }
0x1b8c   :  { %v5181_v58 = vsub.s32 %v5177_v34, %v5180_v28  ;;  %v10437_v20 = vpop.eup %10436  ;;  %v5337_v28 = vsel %vm5336_vm8, 1.0, %v12236_v38 }
0x1b8d   :  { %v5342_v32 = vmul.f32 %v10437_v20, %v5340_v9 }
0x1b8e   :  { %v5183_v25 = vsub.s32 0, %v5181_v58  ;;  %v10439_v24 = vpop.eup %10438 }
0x1b8f   :  { %v5344_v48 = vsel %vm5343_vm7, %v5340_v9, %v5342_v32  ;;  %v5330_v26 = vmul.f32 %v10439_v24, %v5328_v31 }
0x1b90   :  { %v8734_v45 = vmin.u32 %v5183_v25, %v5181_v58  ;;  %v5347_v33 = vsel %vm5345_vm12, %v5346_v41, %v5344_v48 }
0x1b91   :  { %v5348_v25 = vmul.f32 %v5347_v33, %v5337_v28 }
0x1b92   :  { %v5185_v39 = vclz %v8734_v45  ;;  %v5334_v45 = vand.u32 2147483648, %v5328_v31 }
0x1b94   :  { %v8735_v19 = vadd.s32 4294967294, %v5185_v39  ;;  %v5204_v39 = vsel %vm5119_vm14, %v5203_v59, %v5179_v1 }
0x1b96   :  { %vm8736_vm6 = vcmp.lt.s32.totalorder %v8735_v19, 0 }
0x1b97   :  { %v5188_v21 = vsel %vm8736_vm6, 0, %v8735_v19 }
0x1b98   :  { %v5189_v3 = vsub.s32 32, %v5188_v21  ;;  %v5193_v43 = vsub.s32 4294967266, %v5188_v21  ;;  %v5190_v8 = vshll.u32 %v5181_v58, %v5188_v21  ;;  %v5332_v58 = vsel %vm5331_vm13, %v5328_v31, %v5330_v26 }
0x1b99   :  { %v5335_v19 = vsel %vm5333_vm0, %v5334_v45, %v5332_v58  ;;  %v5206_v21 = vsel %vm5118_vm15, 0, %v5204_v39 }
0x1b9a   :  { %v5191_v0 = vshrl.u32 %v5173_v23, %v5189_v3  ;;  %v5194_v2 = vadd.s32 127, %v5193_v43  ;;  %v5349_v20 = vsub.f32 %v5335_v19, %v5348_v25  ;;  %v5351_v23 = vadd.f32 %v5348_v25, %v5335_v19 }
0x1b9b   :  { %v5313_v3 = vadd.s32 3, %v5206_v21 }
0x1b9c   :  { %v5192_v4 = vor.u32 %v5191_v0, %v5190_v8  ;;  %v5195_v55 = vshll.u32 %v5194_v2, 23  ;;  %v5350_v43 = vmul.f32 0.70710677, %v5349_v20  ;;  %v5210_v8 = vand.u32 3, %v5206_v21 }
0x1b9d   :  { %v5352_v0 = vmul.f32 0.70710677, %v5351_v23  ;;  %v5314_v2 = vand.u32 3, %v5313_v3 }
0x1b9e   :  { %v5196_v17 = vor.u32 4788187, %v5195_v55  ;;  %v5199_v34 = vcvt.s32.f32 %v5192_v4  ;;  %v5366_v32 = vmul.f32 %v5350_v43, %v5348_v25  ;;  %vm5211_vm3 = vcmp.lt.s32.totalorder %v5210_v8, 2 }
0x1b9f   :  { %v5353_v14 = vmul.f32 %v5350_v43, %v5335_v19  ;;  %vm5212_vm4 = vcmp.eq.s32.totalorder %v5210_v8, 0  ;;  %v5373_v55 = vmul.f32 %v5352_v0, %v5335_v19  ;;  %v5359_v24 = vmul.f32 %v5352_v0, %v5348_v25 }
0x1ba0   :  { %v5197_v36 = vand.u32 2147483647, %v5196_v17  ;;  %vm5215_vm5 = vcmp.eq.s32.totalorder %v5210_v8, 2  ;;  %vm5319_vm6 = vcmp.eq.s32.totalorder %v5314_v2, 2  ;;  %v5367_v48 = vsub.f32 0.0, %v5366_v32 }
0x1ba1   :  { %vm5315_vm7 = vcmp.lt.s32.totalorder %v5314_v2, 2  ;;  %vm5316_vm8 = vcmp.eq.s32.totalorder %v5314_v2, 0  ;;  %v5384_v33 = vrot.slane %v5366_v32, %v10835_v29  ;;  %v5363_v58 = vrot.slane %v5359_v24, %v10835_v29 }
0x1ba2   :  { %v5200_v60 = vmul.f32 %v5199_v34, %v5197_v36 }
0x1ba4   :  { %v5201_v30 = vxor.u32 2147483648, %v5200_v60 }
0x1ba6   :  { %v5202_v46 = vsel %vm5119_vm14, %v5201_v30, %v5200_v60  ;;  %v5357_v60 = vrot.slane %v5353_v14, %v10835_v29  ;;  %v5377_v30 = vrot.slane %v5373_v55, %v10835_v29 }
0x1ba7   :  { %v5205_v9 = vsel %vm5118_vm15, %v11510_v61, %v5202_v46  ;;  %v5371_v46 = vrot.slane %v5367_v48, %v10835_v29 }
0x1ba8   :  { %10440 = vcosq.f32 %v5205_v9 }
0x1ba9   :  { %10442 = vsinq.f32 %v5205_v9 }
0x1bb2   :  { %v10441_v4 = vpop.eup %10440 }
0x1bb3   :  { %v10443_v1 = vpop.eup %10442  ;;  %v5216_v31 = vxor.u32 2147483648, %v10441_v4 }
0x1bb4   :  { %v5213_v17 = vxor.u32 2147483648, %v10443_v1 }
0x1bb5   :  { %v5217_v41 = vsel %vm5215_vm5, %v5216_v31, %v10443_v1  ;;  %v5321_v36 = vsel %vm5319_vm6, %v5216_v31, %v10443_v1 }
0x1bb6   :  { %v5214_v34 = vsel %vm5212_vm4, %v10441_v4, %v5213_v17  ;;  %v5318_v26 = vsel %vm5316_vm8, %v10441_v4, %v5213_v17 }
0x1bb7   :  { %v5218_v59 = vsel %vm5211_vm3, %v5214_v34, %v5217_v41  ;;  %v5322_v28 = vsel %vm5315_vm7, %v5318_v26, %v5321_v36 }
0x1bb8   :  { %v5219_v25 = vsel %vm5209_vm1, nan, %v5218_v59  ;;  %v5323_v45 = vsel %vm5209_vm1, nan, %v5322_v28  ;;  %v12242_v28 = vld [vmem:[#allocation10_spill] sm:$0xff] }
0x1bb9   :  { %v5380_v39 = vmul.f32 %v5377_v30, %v5219_v25  ;;  %v5385_v9 = vmul.f32 %v5384_v33, %v5323_v45  ;;  %v5358_v19 = vmul.f32 %v5357_v60, %v5219_v25  ;;  %v5364_v20 = vmul.f32 %v5363_v58, %v5323_v45 }
0x1bba   :  { %v5387_v21 = vmul.f32 %v5363_v58, %v5219_v25  ;;  %v5388_v23 = vmul.f32 %v5357_v60, %v5323_v45  ;;  %v5372_v3 = vmul.f32 %v5371_v46, %v5219_v25  ;;  %v5378_v43 = vmul.f32 %v5377_v30, %v5323_v45  ;;  %v12243_v58 = vld [vmem:[#allocation9_spill] sm:$0xff] }
0x1bbb   :  { %v5386_v8 = vsub.f32 %v5380_v39, %v5385_v9  ;;  %v5365_v0 = vsub.f32 %v5358_v19, %v5364_v20  ;;  %v12244_v19 = vld [vmem:[#allocation11_spill] sm:$0xff] }
0x1bbc   :  { %v5389_v2 = vadd.f32 %v5388_v23, %v5387_v21  ;;  %v5379_v32 = vsub.f32 %v5372_v3, %v5378_v43 }
0x1bbd   :  { %5398 = vperm.xlu1 %10309, %v5386_v8   ;;  %5392 = vperm.xlu0 %10308, %v5365_v0  }
0x1bc1   :  { %10310 = vset.pattern.permute.xlu1 %v12231_v57  ;;  %10311 = vset.pattern.permute.xlu0 %v12231_v57 }
0x1bc2   :  { %5404 = vperm.xlu1 %10310, %v5365_v0   ;;  %5409 = vperm.xlu0 %10311, %v5386_v8  }
0x1bc6   :  { %10312 = vset.pattern.permute.xlu1 %v12232_v5  ;;  %10313 = vset.pattern.permute.xlu0 %v12233_v15 }
0x1bc7   :  { %5415 = vperm.xlu1 %10312, %v5365_v0   ;;  %5426 = vperm.xlu0 %10313, %v5365_v0  }
0x1bcb   :  { %5420 = vperm.xlu1 %10312, %v5386_v8   ;;  %10316 = vset.pattern.permute.xlu0 %v12221_v42 }
0x1bcc   :  { %5444 = vperm.xlu0 %10316, %v5389_v2  }
0x1bcf   :  { %10314 = vset.pattern.permute.xlu1 %v12233_v15 }
0x1bd0   :  { %5431 = vperm.xlu1 %10314, %v5386_v8   ;;  %10318 = vset.pattern.permute.xlu0 %v12232_v5 }
0x1bd1   :  { %5461 = vperm.xlu0 %10318, %v5379_v32  }
0x1bd4   :  { %10315 = vset.pattern.permute.xlu1 %v12221_v42 }
0x1bd5   :  { %5438 = vperm.xlu1 %10315, %v5379_v32   ;;  %10321 = vset.pattern.permute.xlu0 %v12233_v15 }
0x1bd6   :  { %5477 = vperm.xlu0 %10321, %v5389_v2  }
0x1bd9   :  { %10317 = vset.pattern.permute.xlu1 %v12231_v57 }
0x1bda   :  { %5450 = vperm.xlu1 %10317, %v5379_v32   ;;  %10322 = vset.pattern.permute.xlu0 %v12221_v42 }
0x1bde   :  { %5455 = vperm.xlu1 %10317, %v5389_v2  }
0x1be2   :  { %10319 = vset.pattern.permute.xlu1 %v12232_v5 }
0x1be3   :  { %5466 = vperm.xlu1 %10319, %v5389_v2  }
0x1be7   :  { %10320 = vset.pattern.permute.xlu1 %v12233_v15 }
0x1be8   :  { %5472 = vperm.xlu1 %10320, %v5379_v32  }
0x1bec   :  { %10323 = vset.pattern.permute.xlu1 %v12221_v42 }
0x1c3c   :  { %v5399_v61 = vpop.permute.xlu1 %5398  ;;  %v5393_v1 = vpop.permute.xlu0 %5392 }
0x1c3d   :  { %v5401_v33 = vmul.f32 %v5399_v61, %v10876_v10  ;;  %v5395_v30 = vmul.f32 %v5393_v1, %v12242_v28 }
0x1c3f   :  { %v5402_v2 = vadd.f32 %v5401_v33, %v5395_v30 }
0x1c41   :  { %v5405_v4 = vpop.permute.xlu1 %5404  ;;  %v5410_v55 = vpop.permute.xlu0 %5409 }
0x1c42   :  { %v5407_v25 = vmul.f32 %v5405_v4, %v12243_v58  ;;  %v5412_v45 = vmul.f32 %v5410_v55, %v10873_v12 }
0x1c44   :  { %v5413_v32 = vadd.f32 %v5412_v45, %v5407_v25 }
0x1c46   :  { %v5416_v14 = vpop.permute.xlu1 %5415  ;;  %v5427_v17 = vpop.permute.xlu0 %5426 }
0x1c47   :  { %v5429_v21 = vmul.f32 %v5427_v17, %v10878_v11  ;;  %v5418_v61 = vmul.f32 %v5416_v14, %v10889_v22 }
0x1c4a   :  { %v5421_v31 = vpop.permute.xlu1 %5420 }
0x1c4b   :  { %v5445_v41 = vpop.permute.xlu0 %5444  ;;  %v5423_v23 = vmul.f32 %v5421_v31, %v12244_v19 }
0x1c4c   :  { %v5447_v43 = vmul.f32 %v5445_v41, %v10876_v10  ;;  %v5482_v41 = vmul.f32 %v5413_v32, %v5402_v2 }
0x1c4f   :  { %v5432_v24 = vpop.permute.xlu1 %5431 }
0x1c50   :  { %v5462_v26 = vpop.permute.xlu0 %5461  ;;  %v5434_v46 = vmul.f32 %v5432_v24, %v10880_v16 }
0x1c51   :  { %v5464_v8 = vmul.f32 %v5462_v26, %v10889_v22 }
0x1c52   :  { %v5435_v4 = vadd.f32 %v5434_v46, %v5429_v21 }
0x1c54   :  { %v5439_v48 = vpop.permute.xlu1 %5438 }
0x1c55   :  { %v5441_v39 = vmul.f32 %v5439_v48, %v12242_v28  ;;  %v5478_v3 = vpop.permute.xlu0 %5477 }
0x1c56   :  { %v5480_v24 = vmul.f32 %v5478_v3, %v10880_v16 }
0x1c57   :  { %v5448_v55 = vadd.f32 %v5447_v43, %v5441_v39 }
0x1c59   :  { %v5451_v36 = vpop.permute.xlu1 %5450  ;;  %v5486_v26 = vmul.f32 %v5448_v55, %v5413_v32  ;;  %v11608_v32 = vld [vmem:[%s12159_s5 + $0x10] sm:$0xff]  }
0x1c5a   :  { %v5453_v9 = vmul.f32 %v5451_v36, %v12243_v58  ;;  %v5424_v36 = vadd.f32 %v5423_v23, %v5418_v61  ;;  %v11615_v61 = vld [vmem:[%s12159_s5 + $0x18] sm:$0xff]  }
0x1c5c   :  { %v5488_v27 = vmul.f32 %v5435_v4, %v5424_v36 }
0x1c5d   :  { %v5456_v34 = vpop.permute.xlu1 %5455 }
0x1c5e   :  { %v5458_v60 = vmul.f32 %v5456_v34, %v10873_v12 }
0x1c60   :  { %v5459_v0 = vadd.f32 %v5458_v60, %v5453_v9 }
0x1c62   :  { %v5467_v59 = vpop.permute.xlu1 %5466  ;;  %v5483_v31 = vmul.f32 %v5459_v0, %v5448_v55  ;;  %v5485_v34 = vmul.f32 %v5459_v0, %v5402_v2  ;;  %v11592_v2 = vld [vmem:[%s12159_s5] sm:$0xff]  }
0x1c63   :  { %v5469_v20 = vmul.f32 %v5467_v59, %v12244_v19 }
0x1c64   :  { %v5484_v25 = vsub.f32 %v5482_v41, %v5483_v31  ;;  %v5487_v14 = vadd.f32 %v5486_v26, %v5485_v34 }
0x1c65   :  { %v5470_v48 = vadd.f32 %v5469_v20, %v5464_v8 }
0x1c67   :  { %v5473_v1 = vpop.permute.xlu1 %5472  ;;  %v5492_v60 = vmul.f32 %v5470_v48, %v5435_v4 }
0x1c68   :  { %v5475_v17 = vmul.f32 %v5473_v1, %v10878_v11 }
0x1c6a   :  { %v5481_v59 = vadd.f32 %v5480_v24, %v5475_v17 }
0x1c6c   :  { %v5489_v33 = vmul.f32 %v5481_v59, %v5470_v48  ;;  %v5491_v30 = vmul.f32 %v5481_v59, %v5424_v36  ;;  %v11630_v59 = vld [vmem:[%s12160_s6] ss:$0 sm:$0xff] }
0x1c6e   :  { %v5490_v45 = vsub.f32 %v5488_v27, %v5489_v33  ;;  %v5493_v46 = vadd.f32 %v5492_v60, %v5491_v30  ;;  %v11601_v27 = vld [vmem:[%s12159_s5 + $0x8] sm:$0xff]  }
0x1c70   :  { %v5497_v39 = vmul.f32 %v5493_v46, %v5484_v25  ;;  %v5498_v9 = vmul.f32 %v5490_v45, %v5487_v14  ;;  %v5495_v21 = vmul.f32 %v5493_v46, %v5487_v14  ;;  %v5494_v20 = vmul.f32 %v5490_v45, %v5484_v25 }
0x1c72   :  { %v5499_v3 = vadd.f32 %v5498_v9, %v5497_v39  ;;  %v5496_v43 = vsub.f32 %v5494_v20, %v5495_v21 }
0x1c74   :  { %5501 = vrot.lane.b32.xlu1 %v5499_v3, %s10581_s11 }
0x1ce6   :  { %v5502_v23 = vpop.permute.xlu1 %5501 }
0x1ce7   :  { %v5504_v8 = vsel %vm1479_vm9, %v5496_v43, %v5502_v23 }
0x1ce8   :  { %v5505_v0 = vpack.c.bf16 %v5504_v8, %v5504_v8 }
0x1cea   :  { %9541 = vmatmul.mubr.msk.bf16.vlgmr.msra.gmra.mrb[20].mxu0 %vm602_vm10, %v5505_v0 }
0x1ceb   :  { %9545 = vmatpush3.bf16.msra.mxu0 %v11592_v2  ;;  %9552 = vmatprep.mubr.msk.bf16.mxu0 %vm10568_vm2, %v12222_v40 }
0x1cec   :  { %9546 = vmatprep.subr.bf16.mxu0 %v12222_v40 }
0x1cef   :  { %9547 = vmatpush3.bf16.msra.mxu0 %v11601_v27 }
0x1cf0   :  { %9548 = vmatprep.subr.bf16.mxu0 %v12222_v40 }
0x1cf3   :  { %9549 = vmatpush3.bf16.msra.mxu0 %v11608_v32 }
0x1cf4   :  { %9550 = vmatprep.subr.bf16.mxu0 %v12222_v40 }
0x1cf7   :  { %9551 = vmatpush3.bf16.msra.mxu0 %v11615_v61 }
0x1cf8   :  { %9994 = vmatprep.subr.bf16.mxu0 %v12223_v7 }
0x1dbd   :  { %v5543_v4 = vpop.f32.mrb[20].mxu0 }
0x1dbe   :  { %v5549_v1 = vmul.f32 %v5543_v4, %v5543_v4  ;;  %v9542_v55 = vpop.f32.mrb[21].mxu0 }
0x1dbf   :  { %v5546_v24 = vpop.f32.mrb[22].mxu0 }
0x1dc0   :  { %5551 = vrot.lane.b32.xlu1 %v5549_v1, %s10582_s20  ;;  %v9543_v48 = vpop.f32.mrb[23].mxu0 }
0x1e32   :  { %v5552_v17 = vpop.permute.xlu1 %5551 }
0x1e33   :  { %v5554_v36 = vadd.f32 %v5552_v17, %v5549_v1  ;;  %v11682_v17 = vld [vmem:[%s12158_s4 + $0x8] sm:$0xff]  }
0x1e35   :  { %v5555_v31 = vpack.c.bf16 %v5554_v36, %v5554_v36  ;;  %v10512_v36 = vld [vmem:[%s12157_s3] ss:$0 sm:$0xff] }
0x1e37   :  { %9553 = vmatmul.mubr.msk.bf16.vlgmr.msra.gmra.mrb[24].mxu0 %vm1568_vm11, %v5555_v31  ;;  %v12246_v31 = vld [vmem:[#allocation8_spill] sm:$0xff] }
0x1e38   :  { %9996 = vmatpush3.bf16.msra.mxu0 %v10664_v13  ;;  %9564 = vmatprep.mubr.msk.f32.mxu0 %vm10568_vm2, %v12222_v40 }
0x1e39   :  { %9997 = vmatprep.subr.bf16.mxu0 %v12223_v7 }
0x1e3c   :  { %9999 = vmatpush3.bf16.msra.mxu0 %v10670_v18 }
0x1e3d   :  { %10000 = vmatprep.subr.bf16.mxu0 %v12223_v7 }
0x1f0a   :  { %v5593_v34 = vpop.f32.mrb[24].mxu0 }
0x1f0b   :  { %v5594_v41 = vadd.f32 %v11630_v59, %v5593_v34  ;;  %v9554_v26 = vpop.f32.mrb[25].mxu0 }
0x1f0c   :  { %v5596_v60 = vpop.f32.mrb[26].mxu0 }
0x1f0d   :  { %10444 = vtanh.f32 %v5594_v41  ;;  %v9555_v33 = vpop.f32.mrb[27].mxu0  ;;  %v5599_v25 = vmul.f32 0.5, %v5594_v41 }
0x1f0f   :  { %10446 = vtanh.f32 %v5599_v25 }
0x1f17   :  { %v10445_v30 = vpop.eup %10444 }
0x1f18   :  { %5606 = vrot.lane.b32.xlu0 %v10445_v30, %s10583_s23 }
0x1f19   :  { %v10447_v14 = vpop.eup %10446 }
0x1f1a   :  { %v5601_v45 = vadd.f32 1.0, %v10447_v14 }
0x1f1c   :  { %v5602_v46 = vmul.f32 0.5, %v5601_v45 }
0x1f1e   :  { %v5604_v21 = vmul.f32 %v5602_v46, %v11456_v44 }
0x1f8a   :  { %v5607_v39 = vpop.permute.xlu0 %5606 }
0x1f8b   :  { %v5609_v9 = vmul.f32 %v5607_v39, %v5602_v46 }
0x1f8d   :  { %5611 = vrot.lane.b32.xlu1 %v5609_v9, %s10583_s23 }
0x1fff   :  { %v5612_v20 = vpop.permute.xlu1 %5611 }
0x2000   :  { %v11636_v3 = vadd.f32 %v5612_v20, %v5604_v21 }
0x2002   :  { %10448 = vtanh.f32 %v11636_v3 }
0x200c   :  { %v10449_v43 = vpop.eup %10448 }
0x200d   :  { %5617 = vrot.lane.b32.xlu0 %v10449_v43, %s10583_s23 }
0x207f   :  { %v5618_v23 = vpop.permute.xlu0 %5617 }
0x2080   :  { %v5620_v8 = vmul.f32 %v5618_v23, %v5602_v46 }
0x2082   :  { %5622 = vrot.lane.b32.xlu1 %v5620_v8, %s10584_s24 }
0x20f4   :  { %v11641_v0 = vpop.permute.xlu1 %5622 }
0x20f5   :  { %12245 = vst [vmem:[#allocation10_spill] sm:$0xff] %v11641_v0  ;;  %v5627_v4 = vsel %vm602_vm10, %v11641_v0, 0 }
0x20f6   :  { %v5698_v1 = vand.u32 4294901760, %v5627_v4 }
0x20f8   :  { %v5699_v55 = vsub.f32 %v5627_v4, %v5698_v1 }
0x20fa   :  { %v5700_v44 = vand.u32 4294901760, %v5699_v55 }
0x20fc   :  { %v5701_v24 = vsub.f32 %v5699_v55, %v5700_v44 }
0x20fe   :  { %v5702_v48 = vand.u32 4294901760, %v5701_v24 }
0x2100   :  { %9565 = vmatmul.mubr.f32.vlgmr.msra.gmra.mrb[18].mxu0 %v5702_v48 }
0x2101   :  { %10002 = vmatpush3.bf16.msra.mxu0 %v10709_v49  ;;  %9575 = vmatprep.mubr.msk.f32.mxu0 %vm10568_vm2, %v12222_v40 }
0x2102   :  { %10003 = vmatprep.subr.bf16.mxu0 %v12223_v7 }
0x2105   :  { %10005 = vmatpush3.bf16.msra.mxu0 %v10714_v50 }
0x2106   :  { %10006 = vmatprep.subr.bf16.mxu0 %v12223_v7 }
0x2108   :  { %9576 = vmatmul.mubr.f32.vlgmr.msra.gmra.mrb[18].mxu0 %v5698_v1 }
0x2109   :  { %10008 = vmatpush3.bf16.msra.mxu0 %v10721_v51  ;;  %9586 = vmatprep.mubr.msk.f32.mxu0 %vm10568_vm2, %v12222_v40 }
0x210a   :  { %10009 = vmatprep.subr.bf16.mxu0 %v12223_v7 }
0x210d   :  { %10011 = vmatpush3.bf16.msra.mxu0 %v10729_v52 }
0x210e   :  { %10012 = vmatprep.subr.bf16.mxu0 %v12223_v7 }
0x2110   :  { %9587 = vmatmul.mubr.f32.vlgmr.msra.gmra.mrb[18].mxu0 %v5699_v55 }
0x2111   :  { %10014 = vmatpush3.bf16.msra.mxu0 %v10664_v13  ;;  %9597 = vmatprep.mubr.msk.f32.mxu0 %vm10568_vm2, %v12222_v40 }
0x2112   :  { %10015 = vmatprep.subr.bf16.mxu0 %v12223_v7 }
0x2115   :  { %10017 = vmatpush3.bf16.msra.mxu0 %v10670_v18 }
0x2116   :  { %10018 = vmatprep.subr.bf16.mxu0 %v12223_v7 }
0x2118   :  { %9598 = vmatmul.mubr.f32.vlgmr.msra.gmra.mrb[18].mxu0 %v5700_v44 }
0x2119   :  { %10020 = vmatpush3.bf16.msra.mxu0 %v10746_v53  ;;  %9608 = vmatprep.mubr.msk.f32.mxu0 %vm10568_vm2, %v12222_v40 }
0x211a   :  { %10021 = vmatprep.subr.bf16.mxu0 %v12223_v7 }
0x211d   :  { %10023 = vmatpush3.bf16.msra.mxu0 %v10751_v54 }
0x211e   :  { %10024 = vmatprep.subr.bf16.mxu0 %v12223_v7 }
0x2120   :  { %9609 = vmatmul.mubr.f32.vlgmr.msra.gmra.mrb[18].mxu0 %v5698_v1 }
0x2121   :  { %10026 = vmatpush3.bf16.msra.mxu0 %v10664_v13  ;;  %9619 = vmatprep.mubr.msk.f32.mxu0 %vm10568_vm2, %v12222_v40 }
0x2122   :  { %10027 = vmatprep.subr.bf16.mxu0 %v12223_v7 }
0x2125   :  { %10029 = vmatpush3.bf16.msra.mxu0 %v10670_v18 }
0x2126   :  { %9708 = vmatprep.subr.bf16.mxu0 %v12222_v40 }
0x2128   :  { %9620 = vmatmul.mubr.f32.vlgmr.msra.gmra.mrb[18].mxu0 %v5698_v1 }
0x2129   :  { %9709 = vmatpush3.bf16.msra.mxu0 %v11498_v6  ;;  %9712 = vmatprep.mubr.msk.bf16.mxu0 %vm10568_vm2, %v12222_v40  ;;  %v11690_v6 = vadd.f32 %v10512_v36, %v12246_v31 }
0x212a   :  { %9710 = vmatprep.subr.bf16.mxu0 %v12222_v40 }
0x212b   :  { %v5625_v34 = vrot.slane %v11690_v6, 2 }
0x212d   :  { %9711 = vmatpush3.bf16.msra.mxu0 %v11682_v17 }
0x212e   :  { %9716 = vmatprep.subr.bf16.mxu0 %v12222_v40 }
0x21fb   :  { %v6110_v41 = vpop.f32.mrb[18].mxu0 }
0x21fc   :  { %v11693_v26 = vadd.f32 %v6110_v41, %v5625_v34  ;;  %v9621_v60 = vpop.f32.mrb[19].mxu0 }
0x21fe   :  { %v11696_v33 = vmul.f32 0.5, %v11693_v26  ;;  %v6322_v45 = vmul.f32 %v11693_v26, %v11693_v26  ;;  %vm6334_vm5 = vcmp.ge.f32.partialorder %v11693_v26, 0.0 }
0x2200   :  { %v6118_v30 = vand.u32 2139095040, %v11696_v33  ;;  %v12207_v39 = vand.u32 2147483647, %v11696_v33  ;;  %v6323_v21 = vadd.f32 1.0, %v6322_v45  ;;  %vm6117_vm8 = vcmp.lt.s32.totalorder %v11696_v33, 0 }
0x2202   :  { %v6119_v25 = vshrl.u32 %v6118_v30, 23  ;;  %v6122_v43 = vand.u32 8388607, %v12207_v39  ;;  %10450 = vrsqrt.f32 %v6323_v21 }
0x2204   :  { %v8743_v14 = vadd.s32 4294967169, %v6119_v25  ;;  %v6123_v60 = vor.u32 8388608, %v6122_v43 }
0x2206   :  { %v6125_v46 = vadd.s32 1, %v8743_v14 }
0x2208   :  { %vm6126_vm12 = vcmp.gt.s32.totalorder %v6125_v46, 0 }
0x2209   :  { %v6127_v9 = vsel %vm6126_vm12, %v6125_v46, 0 }
0x220a   :  { %v6129_v20 = vand.u32 31, %v6127_v9  ;;  %v6128_v8 = vshrl.u32 %v6127_v9, 5 }
0x220c   :  { %v6130_v23 = vsub.s32 32, %v6129_v20  ;;  %v6132_v4 = vshll.u32 %v12235_v47, %v6129_v20  ;;  %v6135_v1 = vshll.u32 %v12225_v37, %v6129_v20  ;;  %v6138_v24 = vshll.u32 %v12226_v62, %v6129_v20 }
0x220d   :  { %v6141_v36 = vshll.u32 %v12239_v63, %v6129_v20  ;;  %v6144_v34 = vshll.u32 %v12240_v56, %v6129_v20  ;;  %vm6147_vm13 = vcmp.lt.s32.totalorder %v6128_v8, 1  ;;  %vm6150_vm14 = vcmp.lt.s32.totalorder %v6128_v8, 4 }
0x220e   :  { %v6133_v55 = vshrl.u32 %v12225_v37, %v6130_v23  ;;  %v6136_v44 = vshrl.u32 %v12226_v62, %v6130_v23  ;;  %v6139_v48 = vshrl.u32 %v12239_v63, %v6130_v23  ;;  %v6142_v31 = vshrl.u32 %v12240_v56, %v6130_v23 }
0x220f   :  { %v6145_v41 = vshrl.u32 %v12241_v35, %v6130_v23  ;;  %v6131_v0 = vshrl.u32 %v12235_v47, %v6130_v23  ;;  %vm6149_vm15 = vcmp.lt.s32.totalorder %v6128_v8, 3  ;;  %vm6148_vm0 = vcmp.lt.s32.totalorder %v6128_v8, 2 }
0x2210   :  { %v6134_v30 = vor.u32 %v6133_v55, %v6132_v4  ;;  %v6137_v25 = vor.u32 %v6136_v44, %v6135_v1  ;;  %v6140_v14 = vor.u32 %v6139_v48, %v6138_v24  ;;  %v6143_v45 = vor.u32 %v6142_v31, %v6141_v36  ;;  %v10451_v31 = vpop.eup %10450 }
0x2211   :  { %v6146_v46 = vor.u32 %v6145_v41, %v6144_v34  ;;  %v6163_v35 = vshll.u32 %v6123_v60, 8  ;;  %v6336_v8 = vsub.f32 1.0, %v10451_v31 }
0x2212   :  { %v6152_v9 = vsel %vm6150_vm14, %v6140_v14, 2102212464  ;;  %v6155_v21 = vsel %vm6147_vm13, %v6134_v30, %v6137_v25  ;;  %v6159_v39 = vsel %vm6147_vm13, %v6137_v25, %v6140_v14  ;;  %v6156_v63 = vsel %vm6150_vm14, %v6143_v45, 920167782 }
0x2213   :  { %v6160_v62 = vsel %vm6150_vm14, %v6146_v46, 1326507024  ;;  %v6157_v20 = vsel %vm6149_vm15, %v6140_v14, %v6156_v63  ;;  %v6151_v43 = vsel %vm6147_vm13, %v6131_v0, %v6134_v30  ;;  %v6153_v4 = vsel %vm6149_vm15, %v6137_v25, %v6152_v9 }
0x2214   :  { %v6161_v56 = vsel %vm6149_vm15, %v6143_v45, %v6160_v62  ;;  %v6158_v1 = vsel %vm6148_vm0, %v6155_v21, %v6157_v20  ;;  %v6154_v34 = vsel %vm6148_vm0, %v6151_v43, %v6153_v4  ;;  %v6337_v41 = vmul.f32 0.5, %v6336_v8 }
0x2215   :  { %v6162_v55 = vsel %vm6148_vm0, %v6159_v39, %v6161_v56  ;;  %v11718_v48 = vmul.u32.u64.low %v6163_v35, %v6158_v1  ;;  %v11719_v36 = vmul.u32.u64.high %v6163_v35, %v6158_v1, %v11718_v48  ;;  %v6170_v63 = vmul.u32 %v6163_v35, %v6154_v34 }
0x2216   :  { %v11715_v44 = vmul.u32.u64.low %v6163_v35, %v6162_v55  ;;  %v11716_v24 = vmul.u32.u64.high %v6163_v35, %v6162_v55, %v11715_v44  ;;  %v6338_v39 = vmax.f32 %v6337_v41, 0.0  ;;  %v6325_v25 = vadd.f32 1.0, %v10451_v31 }
0x2217   :  { %v6173_v23 = vadd.s32 1, %v11719_v36  ;;  %vm6207_vm14 = vweird.f32 %v11696_v33 }
0x2218   :  { %vm6172_vm1 = vc.u32 %v11716_v24, %v11718_v48  ;;  %10452 = vrsqrt.f32 %v6338_v39  ;;  %v6326_v46 = vmul.f32 0.5, %v6325_v25  ;;  %v6171_v4 = vadd.s32 %v11718_v48, %v11716_v24 }
0x2219   :  { %v6174_v62 = vsel %vm6172_vm1, %v6173_v23, %v11719_v36  ;;  %vm6341_vm4 = vcmp.eq.f32.partialorder %v6338_v39, inf  ;;  %v6344_v41 = vand.u32 2147483648, %v6338_v39  ;;  %vm6343_vm6 = vcmp.eq.f32.partialorder %v6338_v39, 0.0 }
0x221a   :  { %v6175_v0 = vadd.s32 %v6174_v62, %v6170_v63  ;;  %10454 = vrsqrt.f32 %v6326_v46  ;;  %vm6329_vm7 = vcmp.eq.f32.partialorder %v6326_v46, inf  ;;  %vm6331_vm13 = vcmp.eq.f32.partialorder %v6326_v46, 0.0 }
0x221c   :  { %v6176_v60 = vadd.s32 536870912, %v6175_v0 }
0x221e   :  { %v6177_v56 = vshrl.u32 %v6176_v60, 30 }
0x2220   :  { %v6178_v30 = vshll.u32 %v6177_v56, 30 }
0x2222   :  { %v6179_v14 = vsub.s32 %v6175_v0, %v6178_v30  ;;  %v10453_v43 = vpop.eup %10452 }
0x2223   :  { %v6340_v23 = vmul.f32 %v10453_v43, %v6338_v39  ;;  %v6332_v43 = vand.u32 2147483648, %v6326_v46 }
0x2224   :  { %v6181_v45 = vsub.s32 0, %v6179_v14  ;;  %v10455_v63 = vpop.eup %10454 }
0x2225   :  { %v6342_v0 = vsel %vm6341_vm4, %v6338_v39, %v6340_v23  ;;  %v6328_v25 = vmul.f32 %v10455_v63, %v6326_v46 }
0x2226   :  { %v8744_v9 = vmin.u32 %v6181_v45, %v6179_v14  ;;  %v6345_v24 = vsel %vm6343_vm6, %v6344_v41, %v6342_v0  ;;  %v6201_v45 = vsub.s32 4, %v6177_v56 }
0x2228   :  { %v6183_v21 = vclz %v8744_v9 }
0x222a   :  { %v8745_v20 = vadd.s32 4294967294, %v6183_v21  ;;  %v6330_v21 = vsel %vm6329_vm7, %v6326_v46, %v6328_v25 }
0x222c   :  { %vm8746_vm3 = vcmp.lt.s32.totalorder %v8745_v20, 0 }
0x222d   :  { %v6186_v35 = vsel %vm8746_vm3, 0, %v8745_v20 }
0x222e   :  { %v6187_v1 = vsub.s32 32, %v6186_v35  ;;  %v6191_v55 = vsub.s32 4294967266, %v6186_v35  ;;  %v6188_v44 = vshll.u32 %v6179_v14, %v6186_v35  ;;  %v6335_v14 = vsel %vm6334_vm5, 1.0, %v12236_v38 }
0x222f   :  { %v6346_v20 = vmul.f32 %v6345_v24, %v6335_v14  ;;  %v12247_v35 = vand.u32 2147483647, %v11696_v33 }
0x2230   :  { %v6189_v36 = vshrl.u32 %v6171_v4, %v6187_v1  ;;  %v6192_v34 = vadd.s32 127, %v6191_v55  ;;  %v6202_v4 = vsel %vm6117_vm8, %v6201_v45, %v6177_v56  ;;  %v6333_v1 = vsel %vm6331_vm13, %v6332_v43, %v6330_v21 }
0x2231   :  { %vm6116_vm12 = vcmp.le.f32.partialorder %v12247_v35, 0.7853982  ;;  %v6347_v55 = vsub.f32 %v6333_v1, %v6346_v20 }
0x2232   :  { %v6190_v31 = vor.u32 %v6189_v36, %v6188_v44  ;;  %v6193_v8 = vshll.u32 %v6192_v34, 23  ;;  %v6204_v44 = vsel %vm6116_vm12, 0, %v6202_v4  ;;  %v6349_v36 = vadd.f32 %v6346_v20, %v6333_v1 }
0x2233   :  { %v6311_v34 = vadd.s32 3, %v6204_v44  ;;  %v6348_v23 = vmul.f32 0.70710677, %v6347_v55 }
0x2234   :  { %v6194_v62 = vor.u32 4788187, %v6193_v8  ;;  %v6197_v30 = vcvt.s32.f32 %v6190_v31  ;;  %v6208_v31 = vand.u32 3, %v6204_v44  ;;  %v6350_v8 = vmul.f32 0.70710677, %v6349_v36 }
0x2235   :  { %v6312_v63 = vand.u32 3, %v6311_v34  ;;  %v6351_v56 = vmul.f32 %v6348_v23, %v6333_v1 }
0x2236   :  { %v6195_v60 = vand.u32 2147483647, %v6194_v62  ;;  %v6364_v62 = vmul.f32 %v6348_v23, %v6346_v20  ;;  %vm6209_vm15 = vcmp.lt.s32.totalorder %v6208_v31, 2  ;;  %vm6210_vm0 = vcmp.eq.s32.totalorder %v6208_v31, 0 }
0x2237   :  { %vm6213_vm1 = vcmp.eq.s32.totalorder %v6208_v31, 2  ;;  %vm6317_vm3 = vcmp.eq.s32.totalorder %v6312_v63, 2  ;;  %vm6313_vm4 = vcmp.lt.s32.totalorder %v6312_v63, 2  ;;  %vm6314_vm5 = vcmp.eq.s32.totalorder %v6312_v63, 0 }
0x2238   :  { %v6198_v48 = vmul.f32 %v6197_v30, %v6195_v60  ;;  %v6371_v60 = vmul.f32 %v6350_v8, %v6333_v1  ;;  %v6357_v30 = vmul.f32 %v6350_v8, %v6346_v20  ;;  %v6365_v24 = vsub.f32 0.0, %v6364_v62 }
0x2239   :  { %v6382_v21 = vrot.slane %v6364_v62, %v10835_v29  ;;  %v6355_v43 = vrot.slane %v6351_v56, %v10835_v29 }
0x223a   :  { %v6199_v9 = vxor.u32 2147483648, %v6198_v48  ;;  %v6375_v4 = vrot.slane %v6371_v60, %v10835_v29  ;;  %v6361_v20 = vrot.slane %v6357_v30, %v10835_v29  ;;  %v6369_v55 = vrot.slane %v6365_v24, %v10835_v29 }
0x223c   :  { %v6200_v26 = vsel %vm6117_vm8, %v6199_v9, %v6198_v48 }
0x223d   :  { %v6203_v39 = vsel %vm6116_vm12, %v11696_v33, %v6200_v26 }
0x223e   :  { %10456 = vcosq.f32 %v6203_v39 }
0x223f   :  { %10458 = vsinq.f32 %v6203_v39 }
0x2248   :  { %v10457_v0 = vpop.eup %10456 }
0x2249   :  { %v10459_v46 = vpop.eup %10458  ;;  %v6214_v41 = vxor.u32 2147483648, %v10457_v0 }
0x224a   :  { %v6211_v25 = vxor.u32 2147483648, %v10459_v46 }
0x224b   :  { %v6215_v48 = vsel %vm6213_vm1, %v6214_v41, %v10459_v46  ;;  %v6319_v45 = vsel %vm6317_vm3, %v6214_v41, %v10459_v46 }
0x224c   :  { %v6212_v14 = vsel %vm6210_vm0, %v10457_v0, %v6211_v25  ;;  %v6316_v9 = vsel %vm6314_vm5, %v10457_v0, %v6211_v25 }
0x224d   :  { %v6216_v35 = vsel %vm6209_vm15, %v6212_v14, %v6215_v48  ;;  %v6320_v26 = vsel %vm6313_vm4, %v6316_v9, %v6319_v45 }
0x224e   :  { %v6217_v39 = vsel %vm6207_vm14, nan, %v6216_v35  ;;  %v6321_v1 = vsel %vm6207_vm14, nan, %v6320_v26 }
0x224f   :  { %v6378_v44 = vmul.f32 %v6375_v4, %v6217_v39  ;;  %v6383_v36 = vmul.f32 %v6382_v21, %v6321_v1  ;;  %v6356_v34 = vmul.f32 %v6355_v43, %v6217_v39  ;;  %v6362_v23 = vmul.f32 %v6361_v20, %v6321_v1 }
0x2250   :  { %v6385_v8 = vmul.f32 %v6361_v20, %v6217_v39  ;;  %v6386_v31 = vmul.f32 %v6355_v43, %v6321_v1  ;;  %v6370_v63 = vmul.f32 %v6369_v55, %v6217_v39  ;;  %v6376_v62 = vmul.f32 %v6375_v4, %v6321_v1 }
0x2251   :  { %v6384_v0 = vsub.f32 %v6378_v44, %v6383_v36  ;;  %v6363_v56 = vsub.f32 %v6356_v34, %v6362_v23 }
0x2252   :  { %v6387_v46 = vadd.f32 %v6386_v31, %v6385_v8  ;;  %v6377_v41 = vsub.f32 %v6370_v63, %v6376_v62 }
0x2253   :  { %6396 = vperm.xlu1 %10323, %v6384_v0   ;;  %6390 = vperm.xlu0 %10322, %v6363_v56  }
0x2257   :  { %10324 = vset.pattern.permute.xlu1 %v12231_v57  ;;  %10325 = vset.pattern.permute.xlu0 %v12231_v57 }
0x2258   :  { %6402 = vperm.xlu1 %10324, %v6363_v56   ;;  %6407 = vperm.xlu0 %10325, %v6384_v0  }
0x225c   :  { %10326 = vset.pattern.permute.xlu1 %v12232_v5  ;;  %10327 = vset.pattern.permute.xlu0 %v12233_v15 }
0x225d   :  { %6413 = vperm.xlu1 %10326, %v6363_v56   ;;  %6424 = vperm.xlu0 %10327, %v6363_v56  }
0x2261   :  { %6418 = vperm.xlu1 %10326, %v6384_v0   ;;  %10330 = vset.pattern.permute.xlu0 %v12221_v42 }
0x2262   :  { %6442 = vperm.xlu0 %10330, %v6387_v46  }
0x2265   :  { %10328 = vset.pattern.permute.xlu1 %v12233_v15 }
0x2266   :  { %6429 = vperm.xlu1 %10328, %v6384_v0   ;;  %10332 = vset.pattern.permute.xlu0 %v12232_v5 }
0x2267   :  { %6459 = vperm.xlu0 %10332, %v6377_v41  }
0x226a   :  { %10329 = vset.pattern.permute.xlu1 %v12221_v42 }
0x226b   :  { %6436 = vperm.xlu1 %10329, %v6377_v41   ;;  %10335 = vset.pattern.permute.xlu0 %v12233_v15 }
0x226c   :  { %6475 = vperm.xlu0 %10335, %v6387_v46  }
0x226f   :  { %10331 = vset.pattern.permute.xlu1 %v12231_v57 }
0x2270   :  { %6448 = vperm.xlu1 %10331, %v6377_v41   ;;  %10336 = vset.pattern.permute.xlu0 %v12221_v42 }
0x2274   :  { %6453 = vperm.xlu1 %10331, %v6387_v46  }
0x2278   :  { %10333 = vset.pattern.permute.xlu1 %v12232_v5 }
0x2279   :  { %6464 = vperm.xlu1 %10333, %v6387_v46  }
0x227d   :  { %10334 = vset.pattern.permute.xlu1 %v12233_v15 }
0x227e   :  { %6470 = vperm.xlu1 %10334, %v6377_v41  }
0x2282   :  { %10337 = vset.pattern.permute.xlu1 %v12221_v42 }
0x22d2   :  { %v6397_v33 = vpop.permute.xlu1 %6396  ;;  %v6391_v25 = vpop.permute.xlu0 %6390 }
0x22d3   :  { %v6399_v4 = vmul.f32 %v6397_v33, %v10876_v10  ;;  %v6393_v1 = vmul.f32 %v6391_v25, %v12242_v28 }
0x22d5   :  { %v6400_v41 = vadd.f32 %v6399_v4, %v6393_v1 }
0x22d7   :  { %v6403_v60 = vpop.permute.xlu1 %6402  ;;  %v6408_v48 = vpop.permute.xlu0 %6407 }
0x22d8   :  { %v6405_v55 = vmul.f32 %v6403_v60, %v12243_v58  ;;  %v6410_v44 = vmul.f32 %v6408_v48, %v10873_v12 }
0x22da   :  { %v6411_v33 = vadd.f32 %v6410_v44, %v6405_v55 }
0x22dc   :  { %v6414_v30 = vpop.permute.xlu1 %6413  ;;  %v6425_v14 = vpop.permute.xlu0 %6424 }
0x22dd   :  { %v6427_v31 = vmul.f32 %v6425_v14, %v10878_v11  ;;  %v6416_v60 = vmul.f32 %v6414_v30, %v10889_v22 }
0x22e0   :  { %v6419_v24 = vpop.permute.xlu1 %6418 }
0x22e1   :  { %v6443_v21 = vpop.permute.xlu0 %6442  ;;  %v6421_v63 = vmul.f32 %v6419_v24, %v12244_v19 }
0x22e2   :  { %v6445_v0 = vmul.f32 %v6443_v21, %v10876_v10  ;;  %v6480_v21 = vmul.f32 %v6411_v33, %v6400_v41 }
0x22e5   :  { %v6430_v45 = vpop.permute.xlu1 %6429 }
0x22e6   :  { %v6460_v26 = vpop.permute.xlu0 %6459  ;;  %v6432_v36 = vmul.f32 %v6430_v45, %v10880_v16 }
0x22e7   :  { %v6462_v56 = vmul.f32 %v6460_v26, %v10889_v22 }
0x22e8   :  { %v6433_v25 = vadd.f32 %v6432_v36, %v6427_v31 }
0x22ea   :  { %v6437_v9 = vpop.permute.xlu1 %6436 }
0x22eb   :  { %v6439_v34 = vmul.f32 %v6437_v9, %v12242_v28  ;;  %v6476_v62 = vpop.permute.xlu0 %6475 }
0x22ec   :  { %v6478_v9 = vmul.f32 %v6476_v62, %v10880_v16 }
0x22ed   :  { %v6446_v45 = vadd.f32 %v6445_v0, %v6439_v34 }
0x22ef   :  { %v6449_v43 = vpop.permute.xlu1 %6448  ;;  %v6484_v26 = vmul.f32 %v6446_v45, %v6411_v33 }
0x22f0   :  { %v6451_v23 = vmul.f32 %v6449_v43, %v12243_v58 }
0x22f3   :  { %v6454_v35 = vpop.permute.xlu1 %6453 }
0x22f4   :  { %v6456_v20 = vmul.f32 %v6454_v35, %v10873_v12  ;;  %v6422_v35 = vadd.f32 %v6421_v63, %v6416_v60 }
0x22f6   :  { %v6457_v46 = vadd.f32 %v6456_v20, %v6451_v23  ;;  %v6486_v58 = vmul.f32 %v6433_v25, %v6422_v35 }
0x22f8   :  { %v6465_v39 = vpop.permute.xlu1 %6464  ;;  %v6481_v24 = vmul.f32 %v6457_v46, %v6446_v45 }
0x22f9   :  { %v6467_v8 = vmul.f32 %v6465_v39, %v12244_v19  ;;  %v6483_v39 = vmul.f32 %v6457_v46, %v6400_v41 }
0x22fa   :  { %v6482_v55 = vsub.f32 %v6480_v21, %v6481_v24 }
0x22fb   :  { %v6468_v43 = vadd.f32 %v6467_v8, %v6462_v56  ;;  %v6485_v30 = vadd.f32 %v6484_v26, %v6483_v39 }
0x22fd   :  { %v6471_v48 = vpop.permute.xlu1 %6470  ;;  %v6490_v20 = vmul.f32 %v6468_v43, %v6433_v25 }
0x22fe   :  { %v6473_v14 = vmul.f32 %v6471_v48, %v10878_v11 }
0x2300   :  { %v6479_v19 = vadd.f32 %v6478_v9, %v6473_v14 }
0x2302   :  { %v6487_v4 = vmul.f32 %v6479_v19, %v6468_v43  ;;  %v6489_v1 = vmul.f32 %v6479_v19, %v6422_v35 }
0x2304   :  { %v6488_v44 = vsub.f32 %v6486_v58, %v6487_v4  ;;  %v6491_v36 = vadd.f32 %v6490_v20, %v6489_v1 }
0x2306   :  { %v6495_v34 = vmul.f32 %v6491_v36, %v6482_v55  ;;  %v6496_v23 = vmul.f32 %v6488_v44, %v6485_v30  ;;  %v6493_v31 = vmul.f32 %v6491_v36, %v6485_v30  ;;  %v6492_v8 = vmul.f32 %v6488_v44, %v6482_v55 }
0x2308   :  { %v6497_v62 = vadd.f32 %v6496_v23, %v6495_v34  ;;  %v6494_v0 = vsub.f32 %v6492_v8, %v6493_v31 }
0x230a   :  { %6499 = vrot.lane.b32.xlu1 %v6497_v62, %s10581_s11  ;;  %v10513_v62 = vld [vmem:[%s12158_s4] sm:$0xff]  }
0x237c   :  { %v6500_v63 = vpop.permute.xlu1 %6499 }
0x237d   :  { %v6502_v56 = vsel %vm1479_vm9, %v6494_v0, %v6500_v63  ;;  %v6622_v0 = vrot.slane %v11690_v6, 4 }
0x237e   :  { %v6503_v46 = vpack.c.bf16 %v6502_v56, %v6502_v56 }
0x2380   :  { %9627 = vmatmul.mubr.msk.bf16.vlgmr.msra.gmra.mrb[28].mxu1 %vm602_vm10, %v6503_v46 }
0x2381   :  { %9631 = vmatpush3.bf16.msra.mxu1 %v11592_v2  ;;  %9638 = vmatprep.mubr.msk.bf16.mxu1 %vm10568_vm2, %v12222_v40 }
0x2382   :  { %9632 = vmatprep.subr.bf16.mxu1 %v12222_v40 }
0x2385   :  { %9633 = vmatpush3.bf16.msra.mxu1 %v11601_v27 }
0x2386   :  { %9634 = vmatprep.subr.bf16.mxu1 %v12222_v40 }
0x2389   :  { %9635 = vmatpush3.bf16.msra.mxu1 %v11608_v32 }
0x238a   :  { %9636 = vmatprep.subr.bf16.mxu1 %v12222_v40 }
0x238d   :  { %9637 = vmatpush3.bf16.msra.mxu1 %v11615_v61 }
0x238e   :  { %10030 = vmatprep.subr.bf16.mxu1 %v12223_v7 }
0x2453   :  { %v6541_v58 = vpop.f32.mrb[28].mxu1 }
0x2454   :  { %v6547_v19 = vmul.f32 %v6541_v58, %v6541_v58  ;;  %v9628_v2 = vpop.f32.mrb[29].mxu1 }
0x2455   :  { %v6544_v41 = vpop.f32.mrb[30].mxu1 }
0x2456   :  { %6549 = vrot.lane.b32.xlu1 %v6547_v19, %s10582_s20  ;;  %v9629_v33 = vpop.f32.mrb[31].mxu1 }
0x24c8   :  { %v6550_v60 = vpop.permute.xlu1 %6549 }
0x24c9   :  { %v6552_v25 = vadd.f32 %v6550_v60, %v6547_v19 }
0x24cb   :  { %v6553_v27 = vpack.c.bf16 %v6552_v25, %v6552_v25 }
0x24cd   :  { %9639 = vmatmul.mubr.msk.bf16.vlgmr.msra.gmra.mrb[32].mxu1 %vm1568_vm11, %v6553_v27 }
0x24ce   :  { %10032 = vmatpush3.bf16.msra.mxu1 %v10664_v13  ;;  %9650 = vmatprep.mubr.msk.f32.mxu1 %vm10568_vm2, %v12222_v40 }
0x24cf   :  { %10033 = vmatprep.subr.bf16.mxu1 %v12223_v7 }
0x24d2   :  { %10035 = vmatpush3.bf16.msra.mxu1 %v10670_v18 }
0x24d3   :  { %10036 = vmatprep.subr.bf16.mxu1 %v12223_v7 }
0x25a0   :  { %v6591_v32 = vpop.f32.mrb[32].mxu1 }
0x25a1   :  { %v6592_v61 = vadd.f32 %v11630_v59, %v6591_v32  ;;  %v9640_v48 = vpop.f32.mrb[33].mxu1 }
0x25a2   :  { %v6594_v45 = vpop.f32.mrb[34].mxu1 }
0x25a3   :  { %10460 = vtanh.f32 %v6592_v61  ;;  %v9641_v9 = vpop.f32.mrb[35].mxu1  ;;  %v6597_v14 = vmul.f32 0.5, %v6592_v61 }
0x25a5   :  { %10462 = vtanh.f32 %v6597_v14 }
0x25ad   :  { %v10461_v43 = vpop.eup %10460 }
0x25ae   :  { %6604 = vrot.lane.b32.xlu0 %v10461_v43, %s10583_s23 }
0x25af   :  { %v10463_v35 = vpop.eup %10462 }
0x25b0   :  { %v6599_v24 = vadd.f32 1.0, %v10463_v35  ;;  %v12249_v35 = vmov 2131351028  }
0x25b2   :  { %v6600_v39 = vmul.f32 0.5, %v6599_v24 }
0x25b4   :  { %v6602_v20 = vmul.f32 %v6600_v39, %v11636_v3 }
0x2620   :  { %v6605_v21 = vpop.permute.xlu0 %6604 }
0x2621   :  { %v6607_v26 = vmul.f32 %v6605_v21, %v6600_v39  ;;  %v12250_v21 = vmov 2102212464  }
0x2623   :  { %6609 = vrot.lane.b32.xlu1 %v6607_v26, %s10583_s23 }
0x2695   :  { %v6610_v4 = vpop.permute.xlu1 %6609 }
0x2696   :  { %v11797_v59 = vadd.f32 %v6610_v4, %v6602_v20  ;;  %v12251_v4 = vmov 920167782  }
0x2698   :  { %10464 = vtanh.f32 %v11797_v59 }
0x26a2   :  { %v10465_v1 = vpop.eup %10464 }
0x26a3   :  { %6615 = vrot.lane.b32.xlu0 %v10465_v1, %s10583_s23 }
0x2715   :  { %v6616_v55 = vpop.permute.xlu0 %6615 }
0x2716   :  { %v11801_v30 = vmul.f32 %v6616_v55, %v6600_v39 }
0x2718   :  { %12248 = vst [vmem:[#allocation8_spill] sm:$0xff] %v11801_v30  ;;  %6620 = vrot.lane.b32.xlu1 %v11801_v30, %s10584_s24 }
0x278a   :  { %v6621_v44 = vpop.permute.xlu1 %6620 }
0x278b   :  { %v6624_v36 = vsel %vm602_vm10, %v6621_v44, 0  ;;  %v12252_v44 = vmov 1326507024  }
0x278c   :  { %v6695_v34 = vand.u32 4294901760, %v6624_v36 }
0x278e   :  { %v6696_v23 = vsub.f32 %v6624_v36, %v6695_v34 }
0x2790   :  { %v6697_v3 = vand.u32 4294901760, %v6696_v23 }
0x2792   :  { %v6698_v31 = vsub.f32 %v6696_v23, %v6697_v3 }
0x2794   :  { %v6699_v8 = vand.u32 4294901760, %v6698_v31 }
0x2796   :  { %9651 = vmatmul.mubr.f32.vlgmr.msra.gmra.mrb[26].mxu1 %v6699_v8 }
0x2797   :  { %10038 = vmatpush3.bf16.msra.mxu1 %v10709_v49  ;;  %9661 = vmatprep.mubr.msk.f32.mxu1 %vm10568_vm2, %v12222_v40 }
0x2798   :  { %10039 = vmatprep.subr.bf16.mxu1 %v12223_v7 }
0x279b   :  { %10041 = vmatpush3.bf16.msra.mxu1 %v10714_v50 }
0x279c   :  { %10042 = vmatprep.subr.bf16.mxu1 %v12223_v7 }
0x279e   :  { %9662 = vmatmul.mubr.f32.vlgmr.msra.gmra.mrb[26].mxu1 %v6695_v34 }
0x279f   :  { %10044 = vmatpush3.bf16.msra.mxu1 %v10721_v51  ;;  %9672 = vmatprep.mubr.msk.f32.mxu1 %vm10568_vm2, %v12222_v40 }
0x27a0   :  { %10045 = vmatprep.subr.bf16.mxu1 %v12223_v7 }
0x27a3   :  { %10047 = vmatpush3.bf16.msra.mxu1 %v10729_v52 }
0x27a4   :  { %10048 = vmatprep.subr.bf16.mxu1 %v12223_v7 }
0x27a6   :  { %9673 = vmatmul.mubr.f32.vlgmr.msra.gmra.mrb[26].mxu1 %v6696_v23 }
0x27a7   :  { %10050 = vmatpush3.bf16.msra.mxu1 %v10664_v13  ;;  %9683 = vmatprep.mubr.msk.f32.mxu1 %vm10568_vm2, %v12222_v40 }
0x27a8   :  { %10051 = vmatprep.subr.bf16.mxu1 %v12223_v7 }
0x27ab   :  { %10053 = vmatpush3.bf16.msra.mxu1 %v10670_v18 }
0x27ac   :  { %10054 = vmatprep.subr.bf16.mxu1 %v12223_v7 }
0x27ae   :  { %9684 = vmatmul.mubr.f32.vlgmr.msra.gmra.mrb[26].mxu1 %v6697_v3 }
0x27af   :  { %10056 = vmatpush3.bf16.msra.mxu1 %v10746_v53  ;;  %9694 = vmatprep.mubr.msk.f32.mxu1 %vm10568_vm2, %v12222_v40 }
0x27b0   :  { %10057 = vmatprep.subr.bf16.mxu1 %v12223_v7 }
0x27b3   :  { %10059 = vmatpush3.bf16.msra.mxu1 %v10751_v54 }
0x27b4   :  { %10060 = vmatprep.subr.bf16.mxu1 %v12223_v7 }
0x27b6   :  { %9695 = vmatmul.mubr.f32.vlgmr.msra.gmra.mrb[26].mxu1 %v6695_v34 }
0x27b7   :  { %10062 = vmatpush3.bf16.msra.mxu1 %v10664_v13  ;;  %9705 = vmatprep.mubr.msk.f32.mxu1 %vm10568_vm2, %v12222_v40 }
0x27b8   :  { %10063 = vmatprep.subr.bf16.mxu1 %v12223_v7 }
0x27bb   :  { %10065 = vmatpush3.bf16.msra.mxu1 %v10670_v18 }
0x27bc   :  { %9794 = vmatprep.subr.bf16.mxu1 %v12222_v40 }
0x27be   :  { %9706 = vmatmul.mubr.f32.vlgmr.msra.gmra.mrb[26].mxu1 %v6695_v34 }
0x27bf   :  { %9795 = vmatpush3.bf16.msra.mxu1 %v10513_v62  ;;  %9798 = vmatprep.mubr.msk.bf16.mxu1 %vm10568_vm2, %v12222_v40 }
0x27c0   :  { %9796 = vmatprep.subr.bf16.mxu1 %v12222_v40 }
0x27c3   :  { %9797 = vmatpush3.bf16.msra.mxu1 %v11682_v17 }
0x27c4   :  { %9802 = vmatprep.subr.bf16.mxu1 %v12222_v40 }
0x2891   :  { %v7107_v63 = vpop.f32.mrb[26].mxu1 }
0x2892   :  { %v11845_v56 = vadd.f32 %v7107_v63, %v6622_v0  ;;  %v9707_v46 = vpop.f32.mrb[27].mxu1 }
0x2894   :  { %v11848_v58 = vmul.f32 0.5, %v11845_v56  ;;  %v7319_v33 = vmul.f32 %v11845_v56, %v11845_v56  ;;  %vm7331_vm1 = vcmp.ge.f32.partialorder %v11845_v56, 0.0 }
0x2896   :  { %v7115_v19 = vand.u32 2139095040, %v11848_v58  ;;  %v7112_v17 = vand.u32 2147483647, %v11848_v58  ;;  %v7320_v27 = vadd.f32 1.0, %v7319_v33  ;;  %vm7114_vm5 = vcmp.lt.s32.totalorder %v11848_v58, 0 }
0x2898   :  { %v7116_v2 = vshrl.u32 %v7115_v19, 23  ;;  %v7119_v61 = vand.u32 8388607, %v7112_v17  ;;  %10466 = vrsqrt.f32 %v7320_v27 }
0x289a   :  { %v8753_v41 = vadd.s32 4294967169, %v7116_v2  ;;  %v7120_v34 = vor.u32 8388608, %v7119_v61 }
0x289c   :  { %v7122_v60 = vadd.s32 1, %v8753_v41 }
0x289e   :  { %vm7123_vm6 = vcmp.gt.s32.totalorder %v7122_v60, 0 }
0x289f   :  { %v7124_v25 = vsel %vm7123_vm6, %v7122_v60, 0  ;;  %vm7113_vm6 = vcmp.le.f32.partialorder %v7112_v17, 0.7853982 }
0x28a0   :  { %v7126_v32 = vand.u32 31, %v7124_v25  ;;  %v7125_v45 = vshrl.u32 %v7124_v25, 5  ;;  %v7160_v25 = vshll.u32 %v7120_v34, 8 }
0x28a2   :  { %v7127_v48 = vsub.s32 32, %v7126_v32  ;;  %v7129_v9 = vshll.u32 %v12235_v47, %v7126_v32  ;;  %v7132_v43 = vshll.u32 %v12225_v37, %v7126_v32  ;;  %v7135_v39 = vshll.u32 %v12249_v35, %v7126_v32 }
0x28a3   :  { %v7138_v20 = vshll.u32 %v12250_v21, %v7126_v32  ;;  %v7141_v55 = vshll.u32 %v12251_v4, %v7126_v32  ;;  %vm7144_vm7 = vcmp.lt.s32.totalorder %v7125_v45, 1  ;;  %vm7147_vm8 = vcmp.lt.s32.totalorder %v7125_v45, 4 }
0x28a4   :  { %v7130_v14 = vshrl.u32 %v12225_v37, %v7127_v48  ;;  %v7133_v24 = vshrl.u32 %v12249_v35, %v7127_v48  ;;  %v7136_v26 = vshrl.u32 %v12250_v21, %v7127_v48  ;;  %v7139_v1 = vshrl.u32 %v12251_v4, %v7127_v48 }
0x28a5   :  { %v7142_v36 = vshrl.u32 %v12252_v44, %v7127_v48  ;;  %v7128_v19 = vshrl.u32 %v12235_v47, %v7127_v48  ;;  %vm7146_vm12 = vcmp.lt.s32.totalorder %v7125_v45, 3  ;;  %vm7145_vm13 = vcmp.lt.s32.totalorder %v7125_v45, 2 }
0x28a6   :  { %v7131_v23 = vor.u32 %v7130_v14, %v7129_v9  ;;  %v7134_v3 = vor.u32 %v7133_v24, %v7132_v43  ;;  %v7137_v31 = vor.u32 %v7136_v26, %v7135_v39  ;;  %v7140_v8 = vor.u32 %v7139_v1, %v7138_v20  ;;  %v10467_v26 = vpop.eup %10466 }
0x28a7   :  { %v7143_v62 = vor.u32 %v7142_v36, %v7141_v55  ;;  %v7333_v45 = vsub.f32 1.0, %v10467_v26 }
0x28a8   :  { %v7149_v0 = vsel %vm7147_vm8, %v7137_v31, 2102212464  ;;  %v7152_v63 = vsel %vm7144_vm7, %v7131_v23, %v7134_v3  ;;  %v7156_v46 = vsel %vm7144_vm7, %v7134_v3, %v7137_v31  ;;  %v7153_v2 = vsel %vm7147_vm8, %v7140_v8, 920167782 }
0x28a9   :  { %v7157_v41 = vsel %vm7147_vm8, %v7143_v62, 1326507024  ;;  %v7154_v33 = vsel %vm7146_vm12, %v7137_v31, %v7153_v2  ;;  %v7148_v27 = vsel %vm7144_vm7, %v7128_v19, %v7131_v23  ;;  %v7150_v32 = vsel %vm7146_vm12, %v7134_v3, %v7149_v0 }
0x28aa   :  { %v7158_v60 = vsel %vm7146_vm12, %v7140_v8, %v7157_v41  ;;  %v7155_v61 = vsel %vm7145_vm13, %v7152_v63, %v7154_v33  ;;  %v7151_v20 = vsel %vm7145_vm13, %v7148_v27, %v7150_v32  ;;  %v7334_v34 = vmul.f32 0.5, %v7333_v45 }
0x28ab   :  { %v7159_v9 = vsel %vm7145_vm13, %v7156_v46, %v7158_v60  ;;  %v11870_v24 = vmul.u32.u64.low %v7160_v25, %v7155_v61  ;;  %v11871_v39 = vmul.u32.u64.high %v7160_v25, %v7155_v61, %v11870_v24  ;;  %v7167_v1 = vmul.u32 %v7160_v25, %v7151_v20 }
0x28ac   :  { %v11867_v43 = vmul.u32.u64.low %v7160_v25, %v7159_v9  ;;  %v11868_v14 = vmul.u32.u64.high %v7160_v25, %v7159_v9, %v11867_v43  ;;  %v7335_v31 = vmax.f32 %v7334_v34, 0.0  ;;  %v7322_v62 = vadd.f32 1.0, %v10467_v26 }
0x28ad   :  { %v7170_v48 = vadd.s32 1, %v11871_v39  ;;  %vm7204_vm8 = vweird.f32 %v11848_v58 }
0x28ae   :  { %vm7169_vm14 = vc.u32 %v11868_v14, %v11870_v24  ;;  %10468 = vrsqrt.f32 %v7335_v31  ;;  %v7323_v46 = vmul.f32 0.5, %v7322_v62  ;;  %v7168_v25 = vadd.s32 %v11870_v24, %v11868_v14 }
0x28af   :  { %v7171_v55 = vsel %vm7169_vm14, %v7170_v48, %v11871_v39  ;;  %vm7338_vm0 = vcmp.eq.f32.partialorder %v7335_v31, inf  ;;  %vm7340_vm3 = vcmp.eq.f32.partialorder %v7335_v31, 0.0  ;;  %v7332_v62 = vsel %vm7331_vm1, 1.0, %v12236_v38 }
0x28b0   :  { %v7172_v36 = vadd.s32 %v7171_v55, %v7167_v1  ;;  %10470 = vrsqrt.f32 %v7323_v46  ;;  %v7341_v55 = vand.u32 2147483648, %v7335_v31  ;;  %vm7326_vm4 = vcmp.eq.f32.partialorder %v7323_v46, inf }
0x28b1   :  { %vm7328_vm7 = vcmp.eq.f32.partialorder %v7323_v46, 0.0 }
0x28b2   :  { %v7173_v23 = vadd.s32 536870912, %v7172_v36 }
0x28b4   :  { %v7174_v3 = vshrl.u32 %v7173_v23, 30 }
0x28b6   :  { %v7175_v8 = vshll.u32 %v7174_v3, 30 }
0x28b8   :  { %v7176_v0 = vsub.s32 %v7172_v36, %v7175_v8  ;;  %v10469_v33 = vpop.eup %10468  ;;  %v7198_v8 = vsub.s32 4, %v7174_v3 }
0x28b9   :  { %v7337_v39 = vmul.f32 %v10469_v33, %v7335_v31 }
0x28ba   :  { %v7178_v63 = vsub.s32 0, %v7176_v0  ;;  %v10471_v48 = vpop.eup %10470 }
0x28bb   :  { %v7339_v1 = vsel %vm7338_vm0, %v7335_v31, %v7337_v39  ;;  %v7325_v23 = vmul.f32 %v10471_v48, %v7323_v46 }
0x28bc   :  { %v8754_v19 = vmin.u32 %v7178_v63, %v7176_v0  ;;  %v7342_v14 = vsel %vm7340_vm3, %v7341_v55, %v7339_v1 }
0x28bd   :  { %v7327_v63 = vsel %vm7326_vm4, %v7323_v46, %v7325_v23 }
0x28be   :  { %v7180_v2 = vclz %v8754_v19  ;;  %v7343_v19 = vmul.f32 %v7342_v14, %v7332_v62 }
0x28c0   :  { %v8755_v41 = vadd.s32 4294967294, %v7180_v2  ;;  %v7329_v2 = vand.u32 2147483648, %v7323_v46 }
0x28c2   :  { %vm8756_vm15 = vcmp.lt.s32.totalorder %v8755_v41, 0  ;;  %v7330_v33 = vsel %vm7328_vm7, %v7329_v2, %v7327_v63 }
0x28c3   :  { %v7183_v60 = vsel %vm8756_vm15, 0, %v8755_v41  ;;  %v7199_v41 = vsel %vm7114_vm5, %v7198_v8, %v7174_v3 }
0x28c4   :  { %v7184_v27 = vsub.s32 32, %v7183_v60  ;;  %v7188_v32 = vsub.s32 4294967266, %v7183_v60  ;;  %v7185_v61 = vshll.u32 %v7176_v0, %v7183_v60  ;;  %v7344_v60 = vsub.f32 %v7330_v33, %v7343_v19 }
0x28c6   :  { %v7186_v9 = vshrl.u32 %v7168_v25, %v7184_v27  ;;  %v7189_v43 = vadd.s32 127, %v7188_v32  ;;  %v7201_v25 = vsel %vm7113_vm6, 0, %v7199_v41  ;;  %v7346_v27 = vadd.f32 %v7343_v19, %v7330_v33 }
0x28c7   :  { %v7308_v32 = vadd.s32 3, %v7201_v25 }
0x28c8   :  { %v7187_v26 = vor.u32 %v7186_v9, %v7185_v61  ;;  %v7190_v20 = vshll.u32 %v7189_v43, 23  ;;  %v7345_v61 = vmul.f32 0.70710677, %v7344_v60  ;;  %v7205_v9 = vand.u32 3, %v7201_v25 }
0x28c9   :  { %v7347_v43 = vmul.f32 0.70710677, %v7346_v27  ;;  %v7309_v39 = vand.u32 3, %v7308_v32 }
0x28ca   :  { %v7191_v45 = vor.u32 4788187, %v7190_v20  ;;  %v7194_v34 = vcvt.s32.f32 %v7187_v26  ;;  %v7361_v26 = vmul.f32 %v7345_v61, %v7343_v19  ;;  %vm7206_vm12 = vcmp.lt.s32.totalorder %v7205_v9, 2 }
0x28cb   :  { %v7348_v17 = vmul.f32 %v7345_v61, %v7330_v33  ;;  %vm7207_vm13 = vcmp.eq.s32.totalorder %v7205_v9, 0  ;;  %v7368_v48 = vmul.f32 %v7347_v43, %v7330_v33  ;;  %vm7210_vm14 = vcmp.eq.s32.totalorder %v7205_v9, 2 }
0x28cc   :  { %v7192_v36 = vand.u32 2147483647, %v7191_v45  ;;  %v7354_v45 = vmul.f32 %v7347_v43, %v7343_v19  ;;  %vm7314_vm15 = vcmp.eq.s32.totalorder %v7309_v39, 2  ;;  %v7362_v55 = vsub.f32 0.0, %v7361_v26 }
0x28cd   :  { %vm7310_vm0 = vcmp.lt.s32.totalorder %v7309_v39, 2  ;;  %vm7311_vm1 = vcmp.eq.s32.totalorder %v7309_v39, 0  ;;  %v7352_v8 = vrot.slane %v7348_v17, %v10835_v29  ;;  %v7372_v63 = vrot.slane %v7368_v48, %v10835_v29 }
0x28ce   :  { %v7195_v24 = vmul.f32 %v7194_v34, %v7192_v36  ;;  %v7358_v19 = vrot.slane %v7354_v45, %v10835_v29  ;;  %v7366_v41 = vrot.slane %v7362_v55, %v10835_v29 }
0x28d0   :  { %v7196_v0 = vxor.u32 2147483648, %v7195_v24 }
0x28d2   :  { %v7197_v56 = vsel %vm7114_vm5, %v7196_v0, %v7195_v24  ;;  %v7379_v24 = vrot.slane %v7361_v26, %v10835_v29 }
0x28d3   :  { %v7200_v31 = vsel %vm7113_vm6, %v11848_v58, %v7197_v56 }
0x28d4   :  { %10472 = vcosq.f32 %v7200_v31 }
0x28d5   :  { %10474 = vsinq.f32 %v7200_v31 }
0x28de   :  { %v10473_v20 = vpop.eup %10472 }
0x28df   :  { %v10475_v3 = vpop.eup %10474  ;;  %v7211_v46 = vxor.u32 2147483648, %v10473_v20 }
0x28e0   :  { %v7208_v1 = vxor.u32 2147483648, %v10475_v3 }
0x28e1   :  { %v7212_v36 = vsel %vm7210_vm14, %v7211_v46, %v10475_v3  ;;  %v7316_v34 = vsel %vm7314_vm15, %v7211_v46, %v10475_v3 }
0x28e2   :  { %v7209_v23 = vsel %vm7207_vm13, %v10473_v20, %v7208_v1  ;;  %v7313_v14 = vsel %vm7311_vm1, %v10473_v20, %v7208_v1 }
0x28e3   :  { %v7213_v62 = vsel %vm7206_vm12, %v7209_v23, %v7212_v36  ;;  %v7317_v0 = vsel %vm7310_vm0, %v7313_v14, %v7316_v34 }
0x28e4   :  { %v7214_v2 = vsel %vm7204_vm8, nan, %v7213_v62  ;;  %v7318_v56 = vsel %vm7204_vm8, nan, %v7317_v0 }
0x28e5   :  { %v7375_v31 = vmul.f32 %v7372_v63, %v7214_v2  ;;  %v7380_v33 = vmul.f32 %v7379_v24, %v7318_v56  ;;  %v7353_v60 = vmul.f32 %v7352_v8, %v7214_v2  ;;  %v7359_v25 = vmul.f32 %v7358_v19, %v7318_v56 }
0x28e6   :  { %v7382_v27 = vmul.f32 %v7358_v19, %v7214_v2  ;;  %v7383_v32 = vmul.f32 %v7352_v8, %v7318_v56  ;;  %v7367_v61 = vmul.f32 %v7366_v41, %v7214_v2  ;;  %v7373_v9 = vmul.f32 %v7372_v63, %v7318_v56  ;;  %v12253_v19 = vld [vmem:[#allocation9_spill] sm:$0xff] }
0x28e7   :  { %v7381_v43 = vsub.f32 %v7375_v31, %v7380_v33  ;;  %v7360_v39 = vsub.f32 %v7353_v60, %v7359_v25  ;;  %v12254_v60 = vld [vmem:[#allocation11_spill] sm:$0xff] }
0x28e8   :  { %v7384_v26 = vadd.f32 %v7383_v32, %v7382_v27  ;;  %v7374_v20 = vsub.f32 %v7367_v61, %v7373_v9 }
0x28e9   :  { %7393 = vperm.xlu1 %10337, %v7381_v43   ;;  %7387 = vperm.xlu0 %10336, %v7360_v39  }
0x28ed   :  { %10338 = vset.pattern.permute.xlu1 %v12231_v57  ;;  %10339 = vset.pattern.permute.xlu0 %v12231_v57 }
0x28ee   :  { %7399 = vperm.xlu1 %10338, %v7360_v39   ;;  %7404 = vperm.xlu0 %10339, %v7381_v43  }
0x28f2   :  { %10340 = vset.pattern.permute.xlu1 %v12232_v5  ;;  %10341 = vset.pattern.permute.xlu0 %v12233_v15 }
0x28f3   :  { %7410 = vperm.xlu1 %10340, %v7360_v39   ;;  %7421 = vperm.xlu0 %10341, %v7360_v39  }
0x28f7   :  { %7415 = vperm.xlu1 %10340, %v7381_v43   ;;  %10344 = vset.pattern.permute.xlu0 %v12221_v42 }
0x28f8   :  { %7439 = vperm.xlu0 %10344, %v7384_v26  }
0x28fb   :  { %10342 = vset.pattern.permute.xlu1 %v12233_v15 }
0x28fc   :  { %7426 = vperm.xlu1 %10342, %v7381_v43   ;;  %10346 = vset.pattern.permute.xlu0 %v12232_v5 }
0x28fd   :  { %7456 = vperm.xlu0 %10346, %v7374_v20  }
0x2900   :  { %10343 = vset.pattern.permute.xlu1 %v12221_v42 }
0x2901   :  { %7433 = vperm.xlu1 %10343, %v7374_v20   ;;  %10349 = vset.pattern.permute.xlu0 %v12233_v15 }
0x2902   :  { %7472 = vperm.xlu0 %10349, %v7384_v26  }
0x2905   :  { %10345 = vset.pattern.permute.xlu1 %v12231_v57 }
0x2906   :  { %7445 = vperm.xlu1 %10345, %v7374_v20   ;;  %10350 = vset.pattern.permute.xlu0 %v12221_v42 }
0x290a   :  { %7450 = vperm.xlu1 %10345, %v7384_v26  }
0x290e   :  { %10347 = vset.pattern.permute.xlu1 %v12232_v5 }
0x290f   :  { %7461 = vperm.xlu1 %10347, %v7384_v26  }
0x2913   :  { %10348 = vset.pattern.permute.xlu1 %v12233_v15 }
0x2914   :  { %7467 = vperm.xlu1 %10348, %v7374_v20  }
0x2918   :  { %10351 = vset.pattern.permute.xlu1 %v12221_v42 }
0x2968   :  { %v7394_v58 = vpop.permute.xlu1 %7393  ;;  %v7388_v46 = vpop.permute.xlu0 %7387 }
0x2969   :  { %v7396_v8 = vmul.f32 %v7394_v58, %v10876_v10  ;;  %v7390_v63 = vmul.f32 %v7388_v46, %v12242_v28 }
0x296b   :  { %v7397_v26 = vadd.f32 %v7396_v8, %v7390_v63 }
0x296d   :  { %v7400_v17 = vpop.permute.xlu1 %7399  ;;  %v7405_v45 = vpop.permute.xlu0 %7404 }
0x296e   :  { %v7402_v2 = vmul.f32 %v7400_v17, %v12253_v19  ;;  %v7407_v56 = vmul.f32 %v7405_v45, %v10873_v12 }
0x2970   :  { %v7408_v20 = vadd.f32 %v7407_v56, %v7402_v2 }
0x2972   :  { %v7411_v3 = vpop.permute.xlu1 %7410  ;;  %v7422_v55 = vpop.permute.xlu0 %7421 }
0x2973   :  { %v7424_v27 = vmul.f32 %v7422_v55, %v10878_v11  ;;  %v7413_v58 = vmul.f32 %v7411_v3, %v10889_v22 }
0x2976   :  { %v7416_v48 = vpop.permute.xlu1 %7415 }
0x2977   :  { %v7440_v34 = vpop.permute.xlu0 %7439  ;;  %v7418_v32 = vmul.f32 %v7416_v48, %v12254_v60 }
0x2978   :  { %v7442_v9 = vmul.f32 %v7440_v34, %v10876_v10  ;;  %v7477_v34 = vmul.f32 %v7408_v20, %v7397_v26 }
0x297b   :  { %v7427_v1 = vpop.permute.xlu1 %7426 }
0x297c   :  { %v7457_v24 = vpop.permute.xlu0 %7456  ;;  %v7429_v41 = vmul.f32 %v7427_v1, %v10880_v16 }
0x297d   :  { %v7459_v43 = vmul.f32 %v7457_v24, %v10889_v22 }
0x297e   :  { %v7430_v17 = vadd.f32 %v7429_v41, %v7424_v27 }
0x2980   :  { %v7434_v36 = vpop.permute.xlu1 %7433 }
0x2981   :  { %v7436_v31 = vmul.f32 %v7434_v36, %v12242_v28  ;;  %v7473_v61 = vpop.permute.xlu0 %7472 }
0x2982   :  { %v7475_v1 = vmul.f32 %v7473_v61, %v10880_v16 }
0x2983   :  { %v7443_v45 = vadd.f32 %v7442_v9, %v7436_v31 }
0x2985   :  { %v7446_v23 = vpop.permute.xlu1 %7445  ;;  %v7481_v24 = vmul.f32 %v7443_v45, %v7408_v20  ;;  %v11946_v20 = vld [vmem:[%s12159_s5 + $0x10] sm:$0xff]  }
0x2986   :  { %v7448_v33 = vmul.f32 %v7446_v23, %v12253_v19  ;;  %v7419_v23 = vadd.f32 %v7418_v32, %v7413_v58  ;;  %v11953_v58 = vld [vmem:[%s12159_s5 + $0x18] sm:$0xff]  }
0x2988   :  { %v7483_v30 = vmul.f32 %v7430_v17, %v7419_v23 }
0x2989   :  { %v7451_v14 = vpop.permute.xlu1 %7450 }
0x298a   :  { %v7453_v62 = vmul.f32 %v7451_v14, %v10873_v12 }
0x298c   :  { %v7454_v39 = vadd.f32 %v7453_v62, %v7448_v33 }
0x298e   :  { %v7462_v0 = vpop.permute.xlu1 %7461  ;;  %v7478_v48 = vmul.f32 %v7454_v39, %v7443_v45  ;;  %v7480_v14 = vmul.f32 %v7454_v39, %v7397_v26  ;;  %v11930_v26 = vld [vmem:[%s12159_s5] sm:$0xff]  }
0x298f   :  { %v7464_v25 = vmul.f32 %v7462_v0, %v12254_v60 }
0x2990   :  { %v7479_v2 = vsub.f32 %v7477_v34, %v7478_v48  ;;  %v7482_v3 = vadd.f32 %v7481_v24, %v7480_v14 }
0x2991   :  { %v7465_v36 = vadd.f32 %v7464_v25, %v7459_v43 }
0x2993   :  { %v7468_v46 = vpop.permute.xlu1 %7467  ;;  %v7487_v62 = vmul.f32 %v7465_v36, %v7430_v17 }
0x2994   :  { %v7470_v55 = vmul.f32 %v7468_v46, %v10878_v11 }
0x2996   :  { %v7476_v0 = vadd.f32 %v7475_v1, %v7470_v55 }
0x2998   :  { %v7484_v8 = vmul.f32 %v7476_v0, %v7465_v36  ;;  %v7486_v63 = vmul.f32 %v7476_v0, %v7419_v23  ;;  %v11968_v0 = vld [vmem:[%s12160_s6] ss:$0 sm:$0xff]  ;;  %s10585_s6 = smov [#allocation4]  }
0x299a   :  { %v7485_v56 = vsub.f32 %v7483_v30, %v7484_v8  ;;  %v7488_v41 = vadd.f32 %v7487_v62, %v7486_v63  ;;  %v11939_v30 = vld [vmem:[%s12159_s5 + $0x8] sm:$0xff]  }
0x299c   :  { %v7492_v31 = vmul.f32 %v7488_v41, %v7479_v2  ;;  %v7493_v33 = vmul.f32 %v7485_v56, %v7482_v3  ;;  %v7490_v27 = vmul.f32 %v7488_v41, %v7482_v3  ;;  %v7489_v25 = vmul.f32 %v7485_v56, %v7479_v2 }
0x299e   :  { %v7494_v61 = vadd.f32 %v7493_v33, %v7492_v31  ;;  %v7491_v9 = vsub.f32 %v7489_v25, %v7490_v27 }
0x29a0   :  { %7496 = vrot.lane.b32.xlu1 %v7494_v61, %s10581_s11 }
0x2a12   :  { %v7497_v32 = vpop.permute.xlu1 %7496 }
0x2a13   :  { %v7499_v43 = vsel %vm1479_vm9, %v7491_v9, %v7497_v32 }
0x2a14   :  { %v7500_v39 = vpack.c.bf16 %v7499_v43, %v7499_v43 }
0x2a16   :  { %9713 = vmatmul.mubr.msk.bf16.vlgmr.msra.gmra.mrb[28].mxu0 %vm602_vm10, %v7500_v39 }
0x2a17   :  { %9717 = vmatpush3.bf16.msra.mxu0 %v11930_v26  ;;  %9724 = vmatprep.mubr.msk.bf16.mxu0 %vm10568_vm2, %v12222_v40 }
0x2a18   :  { %9718 = vmatprep.subr.bf16.mxu0 %v12222_v40 }
0x2a1b   :  { %9719 = vmatpush3.bf16.msra.mxu0 %v11939_v30 }
0x2a1c   :  { %9720 = vmatprep.subr.bf16.mxu0 %v12222_v40 }
0x2a1f   :  { %9721 = vmatpush3.bf16.msra.mxu0 %v11946_v20 }
0x2a20   :  { %9722 = vmatprep.subr.bf16.mxu0 %v12222_v40 }
0x2a23   :  { %9723 = vmatpush3.bf16.msra.mxu0 %v11953_v58 }
0x2a24   :  { %10066 = vmatprep.subr.bf16.mxu0 %v12223_v7 }
0x2ae9   :  { %v7538_v17 = vpop.f32.mrb[28].mxu0 }
0x2aea   :  { %v7544_v46 = vmul.f32 %v7538_v17, %v7538_v17  ;;  %v9714_v45 = vpop.f32.mrb[29].mxu0 }
0x2aeb   :  { %v7541_v1 = vpop.f32.mrb[30].mxu0 }
0x2aec   :  { %7546 = vrot.lane.b32.xlu1 %v7544_v46, %s10582_s20  ;;  %v9715_v36 = vpop.f32.mrb[31].mxu0 }
0x2b5e   :  { %v7547_v55 = vpop.permute.xlu1 %7546 }
0x2b5f   :  { %v7549_v23 = vadd.f32 %v7547_v55, %v7544_v46 }
0x2b61   :  { %v7550_v48 = vpack.c.bf16 %v7549_v23, %v7549_v23 }
0x2b63   :  { %9725 = vmatmul.mubr.msk.bf16.vlgmr.msra.gmra.mrb[32].mxu0 %vm1568_vm11, %v7550_v48 }
0x2b64   :  { %10068 = vmatpush3.bf16.msra.mxu0 %v10664_v13  ;;  %9736 = vmatprep.mubr.msk.f32.mxu0 %vm10568_vm2, %v12222_v40 }
0x2b65   :  { %10069 = vmatprep.subr.bf16.mxu0 %v12223_v7 }
0x2b68   :  { %10071 = vmatpush3.bf16.msra.mxu0 %v10670_v18 }
0x2b69   :  { %10072 = vmatprep.subr.bf16.mxu0 %v12223_v7 }
0x2c36   :  { %v7588_v14 = vpop.f32.mrb[32].mxu0 }
0x2c37   :  { %v7589_v34 = vadd.f32 %v11968_v0, %v7588_v14  ;;  %v9726_v24 = vpop.f32.mrb[33].mxu0 }
0x2c38   :  { %v7591_v62 = vpop.f32.mrb[34].mxu0 }
0x2c39   :  { %10476 = vtanh.f32 %v7589_v34  ;;  %v9727_v8 = vpop.f32.mrb[35].mxu0  ;;  %v7594_v2 = vmul.f32 0.5, %v7589_v34 }
0x2c3b   :  { %10478 = vtanh.f32 %v7594_v2 }
0x2c43   :  { %v10477_v63 = vpop.eup %10476 }
0x2c44   :  { %7601 = vrot.lane.b32.xlu0 %v10477_v63, %s10583_s23 }
0x2c45   :  { %v10479_v3 = vpop.eup %10478 }
0x2c46   :  { %v7596_v56 = vadd.f32 1.0, %v10479_v3 }
0x2c48   :  { %v7597_v41 = vmul.f32 0.5, %v7596_v56 }
0x2c4a   :  { %v7599_v27 = vmul.f32 %v7597_v41, %v11797_v59 }
0x2cb6   :  { %v7602_v31 = vpop.permute.xlu0 %7601 }
0x2cb7   :  { %v7604_v33 = vmul.f32 %v7602_v31, %v7597_v41 }
0x2cb9   :  { %7606 = vrot.lane.b32.xlu1 %v7604_v33, %s10583_s23 }
0x2d2b   :  { %v7607_v25 = vpop.permute.xlu1 %7606 }
0x2d2c   :  { %v11974_v61 = vadd.f32 %v7607_v25, %v7599_v27 }
0x2d2e   :  { %10480 = vtanh.f32 %v11974_v61 }
0x2d38   :  { %v10481_v9 = vpop.eup %10480 }
0x2d39   :  { %7612 = vrot.lane.b32.xlu0 %v10481_v9, %s10583_s23 }
0x2dab   :  { %v7613_v32 = vpop.permute.xlu0 %7612 }
0x2dac   :  { %v11978_v43 = vmul.f32 %v7613_v32, %v7597_v41 }
0x2dae   :  { %7617 = vrot.lane.b32.xlu1 %v11978_v43, %s10584_s24 }
0x2e20   :  { %v7618_v39 = vpop.permute.xlu1 %7617 }
0x2e21   :  { %v7621_v17 = vsel %vm602_vm10, %v7618_v39, 0 }
0x2e22   :  { %v7692_v46 = vand.u32 4294901760, %v7621_v17 }
0x2e24   :  { %v7693_v45 = vsub.f32 %v7621_v17, %v7692_v46 }
0x2e26   :  { %v7694_v59 = vand.u32 4294901760, %v7693_v45 }
0x2e28   :  { %v7695_v1 = vsub.f32 %v7693_v45, %v7694_v59 }
0x2e2a   :  { %v7696_v36 = vand.u32 4294901760, %v7695_v1 }
0x2e2c   :  { %9737 = vmatmul.mubr.f32.vlgmr.msra.gmra.mrb[36].mxu0 %v7696_v36 }
0x2e2d   :  { %10074 = vmatpush3.bf16.msra.mxu0 %v10709_v49  ;;  %9747 = vmatprep.mubr.msk.f32.mxu0 %vm10568_vm2, %v12222_v40  ;;  %v7619_v49 = vrot.slane %v11690_v6, 6 }
0x2e2e   :  { %10075 = vmatprep.subr.bf16.mxu0 %v12223_v7 }
0x2e31   :  { %10077 = vmatpush3.bf16.msra.mxu0 %v10714_v50 }
0x2e32   :  { %10078 = vmatprep.subr.bf16.mxu0 %v12223_v7 }
0x2e34   :  { %9748 = vmatmul.mubr.f32.vlgmr.msra.gmra.mrb[36].mxu0 %v7692_v46 }
0x2e35   :  { %10080 = vmatpush3.bf16.msra.mxu0 %v10721_v51  ;;  %9758 = vmatprep.mubr.msk.f32.mxu0 %vm10568_vm2, %v12222_v40 }
0x2e36   :  { %10081 = vmatprep.subr.bf16.mxu0 %v12223_v7 }
0x2e39   :  { %10083 = vmatpush3.bf16.msra.mxu0 %v10729_v52 }
0x2e3a   :  { %10084 = vmatprep.subr.bf16.mxu0 %v12223_v7 }
0x2e3c   :  { %9759 = vmatmul.mubr.f32.vlgmr.msra.gmra.mrb[36].mxu0 %v7693_v45 }
0x2e3d   :  { %10086 = vmatpush3.bf16.msra.mxu0 %v10664_v13  ;;  %9769 = vmatprep.mubr.msk.f32.mxu0 %vm10568_vm2, %v12222_v40 }
0x2e3e   :  { %10087 = vmatprep.subr.bf16.mxu0 %v12223_v7 }
0x2e41   :  { %10089 = vmatpush3.bf16.msra.mxu0 %v10670_v18 }
0x2e42   :  { %10090 = vmatprep.subr.bf16.mxu0 %v12223_v7 }
0x2e44   :  { %9770 = vmatmul.mubr.f32.vlgmr.msra.gmra.mrb[36].mxu0 %v7694_v59 }
0x2e45   :  { %10092 = vmatpush3.bf16.msra.mxu0 %v10746_v53  ;;  %9780 = vmatprep.mubr.msk.f32.mxu0 %vm10568_vm2, %v12222_v40 }
0x2e46   :  { %10093 = vmatprep.subr.bf16.mxu0 %v12223_v7 }
0x2e49   :  { %10095 = vmatpush3.bf16.msra.mxu0 %v10751_v54 }
0x2e4a   :  { %10096 = vmatprep.subr.bf16.mxu0 %v12223_v7 }
0x2e4c   :  { %9781 = vmatmul.mubr.f32.vlgmr.msra.gmra.mrb[36].mxu0 %v7692_v46 }
0x2e4d   :  { %10098 = vmatpush3.bf16.msra.mxu0 %v10664_v13  ;;  %9791 = vmatprep.mubr.msk.f32.mxu0 %vm10568_vm2, %v12222_v40 }
0x2e4e   :  { %10099 = vmatprep.subr.bf16.mxu0 %v12223_v7 }
0x2e51   :  { %10101 = vmatpush3.bf16.msra.mxu0 %v10670_v18 }
0x2e54   :  { %9792 = vmatmul.mubr.f32.vlgmr.msra.gmra.mrb[36].mxu0 %v7692_v46 }
0x2f27   :  { %v8104_v50 = vpop.f32.mrb[36].mxu0 }
0x2f28   :  { %v12013_v51 = vadd.f32 %v8104_v50, %v7619_v49  ;;  %v9793_v52 = vpop.f32.mrb[37].mxu0 }
0x2f2a   :  { %v12016_v53 = vmul.f32 0.5, %v12013_v51  ;;  %v8316_v23 = vmul.f32 %v12013_v51, %v12013_v51  ;;  %vm8328_vm14 = vcmp.ge.f32.partialorder %v12013_v51, 0.0 }
0x2f2c   :  { %v8112_v54 = vand.u32 2139095040, %v12016_v53  ;;  %v8109_v18 = vand.u32 2147483647, %v12016_v53  ;;  %v8317_v6 = vadd.f32 1.0, %v8316_v23  ;;  %vm8111_vm1 = vcmp.lt.s32.totalorder %v12016_v53, 0 }
0x2f2e   :  { %v8113_v13 = vshrl.u32 %v8112_v54, 23  ;;  %v8116_v34 = vand.u32 8388607, %v8109_v18  ;;  %10482 = vrsqrt.f32 %v8317_v6 }
0x2f30   :  { %v8763_v55 = vadd.s32 4294967169, %v8113_v13  ;;  %v8117_v9 = vor.u32 8388608, %v8116_v34 }
0x2f32   :  { %v8119_v7 = vadd.s32 1, %v8763_v55 }
0x2f34   :  { %vm8120_vm3 = vcmp.gt.s32.totalorder %v8119_v7, 0 }
0x2f35   :  { %v8121_v48 = vsel %vm8120_vm3, %v8119_v7, 0  ;;  %vm8110_vm3 = vcmp.le.f32.partialorder %v8109_v18, 0.7853982 }
0x2f36   :  { %v8123_v14 = vand.u32 31, %v8121_v48  ;;  %v8122_v62 = vshrl.u32 %v8121_v48, 5 }
0x2f38   :  { %v8124_v24 = vsub.s32 32, %v8123_v14  ;;  %v8126_v8 = vshll.u32 %v12235_v47, %v8123_v14  ;;  %v8129_v63 = vshll.u32 %v12225_v37, %v8123_v14  ;;  %v8132_v56 = vshll.u32 %v12249_v35, %v8123_v14  ;;  %v10483_v6 = vpop.eup %10482 }
0x2f39   :  { %v8135_v31 = vshll.u32 %v12250_v21, %v8123_v14  ;;  %v8138_v27 = vshll.u32 %v12251_v4, %v8123_v14  ;;  %vm8141_vm4 = vcmp.lt.s32.totalorder %v8122_v62, 1  ;;  %vm8144_vm5 = vcmp.lt.s32.totalorder %v8122_v62, 4 }
0x2f3a   :  { %v8127_v2 = vshrl.u32 %v12225_v37, %v8124_v24  ;;  %v8130_v3 = vshrl.u32 %v12249_v35, %v8124_v24  ;;  %v8133_v41 = vshrl.u32 %v12250_v21, %v8124_v24  ;;  %v8136_v33 = vshrl.u32 %v12251_v4, %v8124_v24 }
0x2f3b   :  { %v8139_v25 = vshrl.u32 %v12252_v44, %v8124_v24  ;;  %v8125_v1 = vshrl.u32 %v12235_v47, %v8124_v24  ;;  %vm8143_vm6 = vcmp.lt.s32.totalorder %v8122_v62, 3  ;;  %vm8142_vm7 = vcmp.lt.s32.totalorder %v8122_v62, 2 }
0x2f3c   :  { %v8128_v32 = vor.u32 %v8127_v2, %v8126_v8  ;;  %v8131_v39 = vor.u32 %v8130_v3, %v8129_v63  ;;  %v8134_v17 = vor.u32 %v8133_v41, %v8132_v56  ;;  %v8137_v46 = vor.u32 %v8136_v33, %v8135_v31 }
0x2f3d   :  { %v8140_v37 = vor.u32 %v8139_v25, %v8138_v27  ;;  %v8157_v44 = vshll.u32 %v8117_v9, 8  ;;  %v8330_v34 = vsub.f32 1.0, %v10483_v6  ;;  %v8319_v31 = vadd.f32 1.0, %v10483_v6 }
0x2f3e   :  { %v8146_v45 = vsel %vm8144_vm5, %v8134_v17, 2102212464  ;;  %v8149_v35 = vsel %vm8141_vm4, %v8128_v32, %v8131_v39  ;;  %v8153_v59 = vsel %vm8141_vm4, %v8131_v39, %v8134_v17  ;;  %v8150_v21 = vsel %vm8144_vm5, %v8137_v46, 920167782 }
0x2f3f   :  { %v8154_v36 = vsel %vm8144_vm5, %v8140_v37, 1326507024  ;;  %v8151_v4 = vsel %vm8143_vm6, %v8134_v17, %v8150_v21  ;;  %v8145_v50 = vsel %vm8141_vm4, %v8125_v1, %v8128_v32  ;;  %v8147_v52 = vsel %vm8143_vm6, %v8131_v39, %v8146_v45 }
0x2f40   :  { %v8155_v49 = vsel %vm8143_vm6, %v8137_v46, %v8154_v36  ;;  %v8152_v54 = vsel %vm8142_vm7, %v8149_v35, %v8151_v4  ;;  %v8148_v14 = vsel %vm8142_vm7, %v8145_v50, %v8147_v52  ;;  %v8331_v63 = vmul.f32 0.5, %v8330_v34 }
0x2f41   :  { %v8156_v13 = vsel %vm8142_vm7, %v8153_v59, %v8155_v49  ;;  %v12038_v7 = vmul.u32.u64.low %v8157_v44, %v8152_v54  ;;  %v12039_v48 = vmul.u32.u64.high %v8157_v44, %v8152_v54, %v12038_v7  ;;  %v8164_v24 = vmul.u32 %v8157_v44, %v8148_v14 }
0x2f42   :  { %v12035_v55 = vmul.u32.u64.low %v8157_v44, %v8156_v13  ;;  %v12036_v23 = vmul.u32.u64.high %v8157_v44, %v8156_v13, %v12035_v55  ;;  %v8332_v56 = vmax.f32 %v8331_v63, 0.0  ;;  %v8320_v25 = vmul.f32 0.5, %v8319_v31 }
0x2f43   :  { %v8167_v47 = vadd.s32 1, %v12039_v48  ;;  %v8329_v14 = vsel %vm8328_vm14, 1.0, %v12236_v38  ;;  %vm8201_vm5 = vweird.f32 %v12016_v53 }
0x2f44   :  { %vm8166_vm8 = vc.u32 %v12036_v23, %v12038_v7  ;;  %10484 = vrsqrt.f32 %v8332_v56  ;;  %v8165_v37 = vadd.s32 %v12038_v7, %v12036_v23  ;;  %vm8335_vm13 = vcmp.eq.f32.partialorder %v8332_v56, inf }
0x2f45   :  { %v8168_v62 = vsel %vm8166_vm8, %v8167_v47, %v12039_v48  ;;  %10486 = vrsqrt.f32 %v8320_v25  ;;  %v8338_v54 = vand.u32 2147483648, %v8332_v56  ;;  %vm8337_vm15 = vcmp.eq.f32.partialorder %v8332_v56, 0.0 }
0x2f46   :  { %v8169_v8 = vadd.s32 %v8168_v62, %v8164_v24  ;;  %vm8323_vm0 = vcmp.eq.f32.partialorder %v8320_v25, inf  ;;  %v8326_v62 = vand.u32 2147483648, %v8320_v25  ;;  %vm8325_vm4 = vcmp.eq.f32.partialorder %v8320_v25, 0.0 }
0x2f48   :  { %v8170_v2 = vadd.s32 536870912, %v8169_v8 }
0x2f4a   :  { %v8171_v3 = vshrl.u32 %v8170_v2, 30 }
0x2f4c   :  { %v8172_v41 = vshll.u32 %v8171_v3, 30  ;;  %v8195_v6 = vsub.s32 4, %v8171_v3 }
0x2f4e   :  { %v8173_v33 = vsub.s32 %v8169_v8, %v8172_v41  ;;  %v10485_v17 = vpop.eup %10484  ;;  %v8196_v8 = vsel %vm8111_vm1, %v8195_v6, %v8171_v3 }
0x2f4f   :  { %v8334_v36 = vmul.f32 %v10485_v17, %v8332_v56  ;;  %v10487_v44 = vpop.eup %10486  ;;  %v8198_v41 = vsel %vm8110_vm3, 0, %v8196_v8 }
0x2f50   :  { %v8175_v27 = vsub.s32 0, %v8173_v33  ;;  %v8322_v48 = vmul.f32 %v10487_v44, %v8320_v25  ;;  %v8305_v31 = vadd.s32 3, %v8198_v41 }
0x2f51   :  { %v8336_v52 = vsel %vm8335_vm13, %v8332_v56, %v8334_v36 }
0x2f52   :  { %v8764_v9 = vmin.u32 %v8175_v27, %v8173_v33  ;;  %v8339_v23 = vsel %vm8337_vm15, %v8338_v54, %v8336_v52  ;;  %v8324_v34 = vsel %vm8323_vm0, %v8320_v25, %v8322_v48  ;;  %v8202_v27 = vand.u32 3, %v8198_v41 }
0x2f53   :  { %v8340_v24 = vmul.f32 %v8339_v23, %v8329_v14  ;;  %v8327_v2 = vsel %vm8325_vm4, %v8326_v62, %v8324_v34 }
0x2f54   :  { %v8177_v32 = vclz %v8764_v9  ;;  %vm8203_vm6 = vcmp.lt.s32.totalorder %v8202_v27, 2  ;;  %vm8204_vm7 = vcmp.eq.s32.totalorder %v8202_v27, 0  ;;  %vm8207_vm8 = vcmp.eq.s32.totalorder %v8202_v27, 2 }
0x2f55   :  { %v8341_v56 = vsub.f32 %v8327_v2, %v8340_v24  ;;  %v8343_v38 = vadd.f32 %v8340_v24, %v8327_v2 }
0x2f56   :  { %v8765_v39 = vadd.s32 4294967294, %v8177_v32  ;;  %v8306_v32 = vand.u32 3, %v8305_v31 }
0x2f57   :  { %v8344_v9 = vmul.f32 0.70710677, %v8343_v38 }
0x2f58   :  { %vm8766_vm12 = vcmp.lt.s32.totalorder %v8765_v39, 0  ;;  %vm8307_vm13 = vcmp.lt.s32.totalorder %v8306_v32, 2  ;;  %vm8308_vm14 = vcmp.eq.s32.totalorder %v8306_v32, 0 }
0x2f59   :  { %v8180_v46 = vsel %vm8766_vm12, 0, %v8765_v39  ;;  %vm8311_vm12 = vcmp.eq.s32.totalorder %v8306_v32, 2 }
0x2f5a   :  { %v8181_v45 = vsub.s32 32, %v8180_v46  ;;  %v8185_v35 = vsub.s32 4294967266, %v8180_v46  ;;  %v8182_v59 = vshll.u32 %v8173_v33, %v8180_v46  ;;  %v8342_v33 = vmul.f32 0.70710677, %v8341_v56 }
0x2f5b   :  { %v8365_v46 = vmul.f32 %v8344_v9, %v8327_v2 }
0x2f5c   :  { %v8183_v1 = vshrl.u32 %v8165_v37, %v8181_v45  ;;  %v8186_v21 = vadd.s32 127, %v8185_v35  ;;  %v8358_v39 = vmul.f32 %v8342_v33, %v8340_v24  ;;  %v8345_v18 = vmul.f32 %v8342_v33, %v8327_v2 }
0x2f5d   :  { %v8351_v37 = vmul.f32 %v8344_v9, %v8340_v24  ;;  %v8369_v52 = vrot.slane %v8365_v46, %v10835_v29 }
0x2f5e   :  { %v8184_v4 = vor.u32 %v8183_v1, %v8182_v59  ;;  %v8187_v49 = vshll.u32 %v8186_v21, 23  ;;  %v8359_v35 = vsub.f32 0.0, %v8358_v39 }
0x2f5f   :  { %v8355_v54 = vrot.slane %v8351_v37, %v10835_v29 }
0x2f60   :  { %v8188_v50 = vor.u32 4788187, %v8187_v49  ;;  %v8191_v55 = vcvt.s32.f32 %v8184_v4  ;;  %v8376_v4 = vrot.slane %v8358_v39, %v10835_v29  ;;  %v8349_v49 = vrot.slane %v8345_v18, %v10835_v29 }
0x2f61   :  { %v8363_v48 = vrot.slane %v8359_v35, %v10835_v29 }
0x2f62   :  { %v8189_v13 = vand.u32 2147483647, %v8188_v50 }
0x2f64   :  { %v8192_v7 = vmul.f32 %v8191_v55, %v8189_v13 }
0x2f66   :  { %v8193_v47 = vxor.u32 2147483648, %v8192_v7 }
0x2f68   :  { %v8194_v51 = vsel %vm8111_vm1, %v8193_v47, %v8192_v7 }
0x2f69   :  { %v8197_v63 = vsel %vm8110_vm3, %v12016_v53, %v8194_v51 }
0x2f6a   :  { %10488 = vcosq.f32 %v8197_v63 }
0x2f6b   :  { %10490 = vsinq.f32 %v8197_v63 }
0x2f74   :  { %v10489_v17 = vpop.eup %10488 }
0x2f75   :  { %v10491_v3 = vpop.eup %10490  ;;  %v8208_v25 = vxor.u32 2147483648, %v10489_v17 }
0x2f76   :  { %v8205_v45 = vxor.u32 2147483648, %v10491_v3 }
0x2f77   :  { %v8209_v59 = vsel %vm8207_vm8, %v8208_v25, %v10491_v3  ;;  %v8313_v1 = vsel %vm8311_vm12, %v8208_v25, %v10491_v3 }
0x2f78   :  { %v8206_v21 = vsel %vm8204_vm7, %v10489_v17, %v8205_v45  ;;  %v8310_v36 = vsel %vm8308_vm14, %v10489_v17, %v8205_v45 }
0x2f79   :  { %v8210_v44 = vsel %vm8203_vm6, %v8206_v21, %v8209_v59  ;;  %v8314_v50 = vsel %vm8307_vm13, %v8310_v36, %v8313_v1 }
0x2f7a   :  { %v8211_v13 = vsel %vm8201_vm5, nan, %v8210_v44  ;;  %v8315_v55 = vsel %vm8201_vm5, nan, %v8314_v50 }
0x2f7b   :  { %v8372_v23 = vmul.f32 %v8369_v52, %v8211_v13  ;;  %v8377_v7 = vmul.f32 %v8376_v4, %v8315_v55  ;;  %v8350_v6 = vmul.f32 %v8349_v49, %v8211_v13  ;;  %v8356_v14 = vmul.f32 %v8355_v54, %v8315_v55 }
0x2f7c   :  { %v8379_v47 = vmul.f32 %v8355_v54, %v8211_v13  ;;  %v8380_v34 = vmul.f32 %v8349_v49, %v8315_v55  ;;  %v8364_v24 = vmul.f32 %v8363_v48, %v8211_v13  ;;  %v8370_v62 = vmul.f32 %v8369_v52, %v8315_v55 }
0x2f7d   :  { %v8378_v51 = vsub.f32 %v8372_v23, %v8377_v7  ;;  %v8357_v8 = vsub.f32 %v8350_v6, %v8356_v14 }
0x2f7e   :  { %v8381_v63 = vadd.f32 %v8380_v34, %v8379_v47  ;;  %v8371_v2 = vsub.f32 %v8364_v24, %v8370_v62 }
0x2f7f   :  { %8390 = vperm.xlu1 %10351, %v8378_v51   ;;  %8384 = vperm.xlu0 %10350, %v8357_v8  }
0x2f83   :  { %10352 = vset.pattern.permute.xlu1 %v12231_v57  ;;  %10353 = vset.pattern.permute.xlu0 %v12231_v57 }
0x2f84   :  { %8396 = vperm.xlu1 %10352, %v8357_v8   ;;  %8401 = vperm.xlu0 %10353, %v8378_v51  }
0x2f88   :  { %10354 = vset.pattern.permute.xlu1 %v12232_v5  ;;  %10355 = vset.pattern.permute.xlu0 %v12233_v15 }
0x2f89   :  { %8407 = vperm.xlu1 %10354, %v8357_v8   ;;  %8418 = vperm.xlu0 %10355, %v8357_v8  }
0x2f8d   :  { %8412 = vperm.xlu1 %10354, %v8378_v51   ;;  %10358 = vset.pattern.permute.xlu0 %v12221_v42 }
0x2f8e   :  { %8436 = vperm.xlu0 %10358, %v8381_v63  }
0x2f91   :  { %10356 = vset.pattern.permute.xlu1 %v12233_v15 }
0x2f92   :  { %8423 = vperm.xlu1 %10356, %v8378_v51   ;;  %10360 = vset.pattern.permute.xlu0 %v12232_v5 }
0x2f93   :  { %8453 = vperm.xlu0 %10360, %v8371_v2  }
0x2f96   :  { %10357 = vset.pattern.permute.xlu1 %v12221_v42 }
0x2f97   :  { %8430 = vperm.xlu1 %10357, %v8371_v2   ;;  %10363 = vset.pattern.permute.xlu0 %v12233_v15 }
0x2f98   :  { %8469 = vperm.xlu0 %10363, %v8381_v63  }
0x2f9b   :  { %10359 = vset.pattern.permute.xlu1 %v12231_v57 }
0x2f9c   :  { %8442 = vperm.xlu1 %10359, %v8371_v2  }
0x2fa0   :  { %8447 = vperm.xlu1 %10359, %v8381_v63  }
0x2fa4   :  { %10361 = vset.pattern.permute.xlu1 %v12232_v5 }
0x2fa5   :  { %8458 = vperm.xlu1 %10361, %v8381_v63  }
0x2fa9   :  { %10362 = vset.pattern.permute.xlu1 %v12233_v15 }
0x2faa   :  { %8464 = vperm.xlu1 %10362, %v8371_v2  }
0x2ffe   :  { %v8391_v29 = vpop.permute.xlu1 %8390  ;;  %v8385_v41 = vpop.permute.xlu0 %8384 }
0x2fff   :  { %v8393_v17 = vmul.f32 %v8391_v29, %v10876_v10  ;;  %v8387_v15 = vmul.f32 %v8385_v41, %v12242_v28 }
0x3001   :  { %v8394_v44 = vadd.f32 %v8393_v17, %v8387_v15 }
0x3003   :  { %v8397_v53 = vpop.permute.xlu1 %8396  ;;  %v8402_v42 = vpop.permute.xlu0 %8401 }
0x3004   :  { %v8399_v3 = vmul.f32 %v8397_v53, %v12253_v19  ;;  %v8404_v25 = vmul.f32 %v8402_v42, %v10873_v12 }
0x3008   :  { %v8408_v56 = vpop.permute.xlu1 %8407  ;;  %v8419_v33 = vpop.permute.xlu0 %8418 }
0x3009   :  { %v8421_v59 = vmul.f32 %v8419_v33, %v10878_v11  ;;  %v8410_v50 = vmul.f32 %v8408_v56, %v10889_v22 }
0x300c   :  { %v8413_v38 = vpop.permute.xlu1 %8412 }
0x300d   :  { %v8437_v9 = vpop.permute.xlu0 %8436  ;;  %v8415_v1 = vmul.f32 %v8413_v38, %v12254_v60 }
0x300e   :  { %v8439_v36 = vmul.f32 %v8437_v9, %v10876_v10 }
0x300f   :  { %v8416_v48 = vadd.f32 %v8415_v1, %v8410_v50 }
0x3011   :  { %v8424_v31 = vpop.permute.xlu1 %8423 }
0x3012   :  { %v8454_v39 = vpop.permute.xlu0 %8453  ;;  %v8426_v46 = vmul.f32 %v8424_v31, %v10880_v16 }
0x3013   :  { %v8456_v4 = vmul.f32 %v8454_v39, %v10889_v22 }
0x3014   :  { %v8427_v52 = vadd.f32 %v8426_v46, %v8421_v59 }
0x3016   :  { %v8431_v27 = vpop.permute.xlu1 %8430  ;;  %v8480_v6 = vmul.f32 %v8427_v52, %v8416_v48 }
0x3017   :  { %v8433_v37 = vmul.f32 %v8431_v27, %v12242_v28  ;;  %v8470_v21 = vpop.permute.xlu0 %8469 }
0x3019   :  { %v8440_v54 = vadd.f32 %v8439_v36, %v8433_v37  ;;  %v12255_v37 = vld [vmem:[#allocation13_spill] sm:$0xff] }
0x301b   :  { %v8443_v32 = vpop.permute.xlu1 %8442 }
0x301c   :  { %v8445_v45 = vmul.f32 %v8443_v32, %v12253_v19  ;;  %v8472_v19 = vmul.f32 %v8470_v21, %v10880_v16  ;;  %v12257_v21 = vld [vmem:[#allocation8_spill] sm:$0xff] }
0x301f   :  { %v8448_v57 = vpop.permute.xlu1 %8447 }
0x3020   :  { %v8450_v5 = vmul.f32 %v8448_v57, %v10873_v12  ;;  %v8405_v12 = vadd.f32 %v8404_v25, %v8399_v3 }
0x3022   :  { %v8451_v49 = vadd.f32 %v8450_v5, %v8445_v45  ;;  %v8474_v10 = vmul.f32 %v8405_v12, %v8394_v44  ;;  %v8478_v14 = vmul.f32 %v8440_v54, %v8405_v12 }
0x3024   :  { %v8459_v18 = vpop.permute.xlu1 %8458  ;;  %v8477_v23 = vmul.f32 %v8451_v49, %v8394_v44 }
0x3025   :  { %v8461_v35 = vmul.f32 %v8459_v18, %v12254_v60  ;;  %v8475_v60 = vmul.f32 %v8451_v49, %v8440_v54 }
0x3026   :  { %v8479_v22 = vadd.f32 %v8478_v14, %v8477_v23 }
0x3027   :  { %v8462_v13 = vadd.f32 %v8461_v35, %v8456_v4  ;;  %v8476_v62 = vsub.f32 %v8474_v10, %v8475_v60 }
0x3029   :  { %v8465_v28 = vpop.permute.xlu1 %8464  ;;  %v8484_v47 = vmul.f32 %v8462_v13, %v8427_v52 }
0x302a   :  { %v8467_v55 = vmul.f32 %v8465_v28, %v10878_v11 }
0x302c   :  { %v8473_v7 = vadd.f32 %v8472_v19, %v8467_v55 }
0x302e   :  { %v8481_v34 = vmul.f32 %v8473_v7, %v8462_v13  ;;  %v8483_v24 = vmul.f32 %v8473_v7, %v8416_v48 }
0x3030   :  { %v8482_v51 = vsub.f32 %v8480_v6, %v8481_v34  ;;  %v8485_v8 = vadd.f32 %v8484_v47, %v8483_v24 }
0x3032   :  { %v8489_v63 = vmul.f32 %v8485_v8, %v8476_v62  ;;  %v8490_v2 = vmul.f32 %v8482_v51, %v8479_v22  ;;  %v8487_v16 = vmul.f32 %v8485_v8, %v8479_v22  ;;  %v8486_v29 = vmul.f32 %v8482_v51, %v8476_v62 }
0x3034   :  { %v8491_v53 = vadd.f32 %v8490_v2, %v8489_v63  ;;  %v8488_v11 = vsub.f32 %v8486_v29, %v8487_v16 }
0x3036   :  { %8493 = vrot.lane.b32.xlu1 %v8491_v53, %s10581_s11  ;;  %s8671_s11 = sshll.u32 %s10585_s6, 4  ;;  %s8672_s11 = int_to_ptr.vmem [resolvable:$true] %s8671_s11 }
0x3037   :  { %s10519_s22 = scalar_lea.vmem %s8672_s11, 32  ;;  %p10524_p1 = scmp.lt.s32.totalorder %s8672_s11, %s8672_s11 }
0x3038   :  { %p10520_p0 = scmp.ne.s32.totalorder %s8672_s11, %s10519_s22  ;;  %p10525_p2 = scmp.lt.s32.totalorder %s10519_s22, %s10519_s22 }
0x303a   :  { %p10526_p3 = por %p10525_p2, %p10524_p1 }
0x303c   :  { %p10527_p4 = pnand %p10526_p3, %p10520_p0 }
0x30a8   :  { %v8494_v56 = vpop.permute.xlu1 %8493 }
0x30a9   :  { %v8496_v41 = vsel %vm1479_vm9, %v8488_v11, %v8494_v56 }
0x30aa   :  { %v8497_v38 = vpack.c.bf16 %v8496_v41, %v8496_v41 }
0x30ac   :  { %9799 = vmatmul.mubr.msk.bf16.vlgmr.msra.gmra.mrb[36].mxu1 %vm602_vm10, %v8497_v38 }
0x30ad   :  { %9803 = vmatpush3.bf16.msra.mxu1 %v11930_v26  ;;  %9810 = vmatprep.mubr.msk.bf16.mxu1 %vm10568_vm2, %v12222_v40  ;;  %vm8650_vm2 = vcmask 254976  }
0x30ae   :  { %9804 = vmatprep.subr.bf16.mxu1 %v12222_v40 }
0x30b1   :  { %9805 = vmatpush3.bf16.msra.mxu1 %v11939_v30 }
0x30b2   :  { %9806 = vmatprep.subr.bf16.mxu1 %v12222_v40 }
0x30b5   :  { %9807 = vmatpush3.bf16.msra.mxu1 %v11946_v20 }
0x30b6   :  { %9808 = vmatprep.subr.bf16.mxu1 %v12222_v40 }
0x30b9   :  { %9809 = vmatpush3.bf16.msra.mxu1 %v11953_v58 }
0x317f   :  { %v8535_v42 = vpop.f32.mrb[36].mxu1 }
0x3180   :  { %v8541_v31 = vmul.f32 %v8535_v42, %v8535_v42  ;;  %v9800_v33 = vpop.f32.mrb[37].mxu1 }
0x3181   :  { %v8538_v27 = vpop.f32.mrb[38].mxu1 }
0x3182   :  { %8543 = vrot.lane.b32.xlu1 %v8541_v31, %s10582_s20  ;;  %v9801_v26 = vpop.f32.mrb[39].mxu1 }
0x31f4   :  { %v8544_v9 = vpop.permute.xlu1 %8543 }
0x31f5   :  { %v8546_v32 = vadd.f32 %v8544_v9, %v8541_v31 }
0x31f7   :  { %v8547_v57 = vpack.c.bf16 %v8546_v32, %v8546_v32 }
0x31f9   :  { %9811 = vmatmul.mubr.msk.bf16.vlgmr.msra.gmra.mrb[40].mxu1 %vm1568_vm11, %v8547_v57 }
0x32cc   :  { %v8585_v30 = vpop.f32.mrb[40].mxu1 }
0x32cd   :  { %v8586_v39 = vadd.f32 %v11968_v0, %v8585_v30  ;;  %v9812_v20 = vpop.f32.mrb[41].mxu1  ;;  %v12256_v0 = vld [vmem:[#allocation14_spill] sm:$0xff] }
0x32ce   :  { %v8588_v17 = vpop.f32.mrb[42].mxu1 }
0x32cf   :  { %10492 = vtanh.f32 %v8586_v39  ;;  %v9813_v40 = vpop.f32.mrb[43].mxu1  ;;  %v8591_v5 = vmul.f32 0.5, %v8586_v39 }
0x32d1   :  { %10494 = vtanh.f32 %v8591_v5 }
0x32d9   :  { %v10493_v58 = vpop.eup %10492 }
0x32da   :  { %8598 = vrot.lane.b32.xlu0 %v10493_v58, %s10583_s23 }
0x32db   :  { %v10495_v18 = vpop.eup %10494 }
0x32dc   :  { %v8593_v15 = vadd.f32 1.0, %v10495_v18 }
0x32de   :  { %v8594_v3 = vmul.f32 0.5, %v8593_v15 }
0x32e0   :  { %v8596_v45 = vmul.f32 %v8594_v3, %v11974_v61 }
0x334c   :  { %v8599_v25 = vpop.permute.xlu0 %8598 }
0x334d   :  { %v8601_v46 = vmul.f32 %v8599_v25, %v8594_v3 }
0x334f   :  { %8603 = vrot.lane.b32.xlu1 %v8601_v46, %s10583_s23 }
0x3353   :  { %8614 = vrot.lane.b32.xlu1 %v12255_v37, %s10582_s20 }
0x3357   :  { %8617 = vrot.lane.b32.xlu1 %v12256_v0, %s10583_s23 }
0x33c1   :  { %v8604_v35 = vpop.permute.xlu1 %8603 }
0x33c2   :  { %v8606_v59 = vadd.f32 %v8604_v35, %v8596_v45 }
0x33c4   :  { %10496 = vtanh.f32 %v8606_v59  ;;  %8652 = vst.msk [vmem:[#allocation4] sm:$0x3] %vm8650_vm2, %v8606_v59 }
0x33ce   :  { %v10497_v1 = vpop.eup %10496 }
0x33cf   :  { %8609 = vrot.lane.b32.xlu0 %v10497_v1, %s10583_s23 }
0x33d3   :  { %8621 = vrot.lane.b32.xlu0 %v12257_v21, %s10582_s20 }
0x33d7   :  { %8624 = vrot.lane.b32.xlu0 %v11978_v43, %s10583_s23 }
0x33d8   :  { %10530 = shalt.err (!%p10527_p4)
}
0x33d9   :  { %s10531_s0 = scalar_lea.hbm %s12164_s10, 32 }
0x33da   :  { %p10532_p5 = scmp.ne.s32.totalorder %s12164_s10, %s10531_s0  ;;  %p10535_p6 = scmp.lt.u32.totalorder %s10531_s0, %s12164_s10 }
0x33dc   :  { %p10537_p7 = pnand %p10535_p6, %p10532_p5 }
0x33de   :  { %10540 = shalt.err (!%p10537_p7)
}
0x33df   :  { %8674 = dma.vmem_to_hbm [thread:$0]  %s8672_s11, 32, %s12164_s10, [#allocation5]   ;;  %v8615_v61 = vpop.permute.xlu1 %8614  ;;  %v12258_v44 = vld [vmem:[#allocation12_spill] sm:$0xff]  ;;  %vm8629_vm9 = vcmask 785408   ;;  %v12259_v52 = vld [vmem:[#allocation10_spill] sm:$0xff]  ;;  %v12260_v13 = vld [vmem:[#allocation15_spill] sm:$0xff] }
0x33e0   :  { %v8627_v12 = vsel %vm602_vm10, %v12258_v44, %v8615_v61  ;;  %s10586_s29 = smov [#allocation2]  }
0x33e1   :  { %s8661_s7 = sshll.u32 %s10586_s29, 4  ;;  %s8662_s7 = int_to_ptr.vmem [resolvable:$true] %s8661_s7 }
0x33e2   :  { %s10541_s30 = scalar_lea.vmem %s8662_s7, 32  ;;  %p10546_p9 = scmp.lt.s32.totalorder %s8662_s7, %s8662_s7 }
0x33e3   :  { %v8618_v4 = vpop.permute.xlu1 %8617  ;;  %p10542_p8 = scmp.ne.s32.totalorder %s8662_s7, %s10541_s30  ;;  %p10547_p10 = scmp.lt.s32.totalorder %s10541_s30, %s10541_s30 }
0x33e4   :  { %v8628_v50 = vsel %vm1568_vm11, %v8627_v12, %v8618_v4 }
0x33e5   :  { %v8630_v55 = vsel %vm8629_vm9, %v8628_v50, %v12260_v13  ;;  %p10548_p11 = por %p10547_p10, %p10546_p9 }
0x33e7   :  { %p10549_p12 = pnand %p10548_p11, %p10542_p8 }
0x3441   :  { %v8610_v43 = vpop.permute.xlu0 %8609 }
0x3442   :  { %v8612_v36 = vmul.f32 %v8610_v43, %v8594_v3 }
0x3444   :  { %8647 = vrot.lane.b32.xlu1 %v8612_v36, %s10584_s24 }
0x3445   :  { %v8622_v49 = vpop.permute.xlu0 %8621 }
0x3446   :  { %v8631_v28 = vsel %vm602_vm10, %v12259_v52, %v8622_v49 }
0x3449   :  { %v8625_v54 = vpop.permute.xlu0 %8624 }
0x344a   :  { %v8632_v19 = vsel %vm1568_vm11, %v8631_v28, %v8625_v54 }
0x344b   :  { %v8633_v48 = vsel %vm8629_vm9, %v8632_v19, %v8612_v36 }
0x344c   :  { %v8636_v60 = vcombine.low %v8630_v55, %v8633_v48 }
0x344e   :  { %8773 = vst.sshfl [vmem:[%s12162_s8] sm:$0x33 pattern:$0x76325410] %v8636_v60 }
0x34b6   :  { %v8648_v23 = vpop.permute.xlu1 %8647 }
0x34b7   :  { %8651 = vst.msk [vmem:[#allocation2] sm:$0x3] %vm8650_vm2, %v8648_v23 }
0x34b8   :  { %10552 = shalt.err (!%p10549_p12)
}
0x34b9   :  { %s10553_s4 = scalar_lea.hbm %s12163_s9, 32 }
0x34ba   :  { %p10554_p13 = scmp.ne.s32.totalorder %s12163_s9, %s10553_s4  ;;  %p10557_p0 = scmp.lt.u32.totalorder %s10553_s4, %s12163_s9 }
0x34bc   :  { %p10559_p1 = pnand %p10557_p0, %p10554_p13 }
0x34be   :  { %10562 = shalt.err (!%p10559_p1)
}
0x34bf   :  { %8664 = dma.vmem_to_hbm [thread:$0]  %s8662_s7, 32, %s12163_s9, [#allocation3]  }
0x34c0   :  { %10563 = dma.done.wait [#allocation3], 32  }
0x34c1   :  { %10564 = vsyncadd [#allocation3], 4294967264 }
0x34c2   :  { %10565 = dma.done.wait [#allocation5], 32  }
0x34c3   :  { %10566 = vsyncadd [#allocation5], 4294967264 }
0x34c4   :  { %8683 = vsyncpa [#allocation3], 1 }
0x34c5   :  { %8684 = vsyncpa [#allocation5], 1 }

</bundles_post_ra>
